<compile_context>
chip_gen: v6e
topology: v6e:2x2x1
jax: 0.10.0
libtpu: 0.0.40
codegen_flags: <defaults>
</compile_context>

<pallas_src>
import jax
import jax.numpy as jnp
from jax.experimental import pallas as pl
from jax.experimental.pallas import tpu as pltpu


# ----------------------------------------------------------------------------
# Kernel 1: 1x1 conv (pointwise) + bias + ReLU on the LOW-RES features.
# ----------------------------------------------------------------------------
def _conv1x1_relu_kernel(x_ref, w_ref, b_ref, o_ref):
    # x_ref: (TM, Cin)  w_ref: (Cin, Cmid)  b_ref: (1, Cmid)  o_ref: (TM, Cmid)
    y = jnp.dot(x_ref[...], w_ref[...], preferred_element_type=jnp.float32)
    o_ref[...] = jnp.maximum(y + b_ref[...], 0.0).astype(o_ref.dtype)


def conv1x1_relu(x_flat, w, b, *, tm=1024):
    M, Cin = x_flat.shape
    Cmid = w.shape[1]
    tm = M if M <= tm else tm              # big row tiles; whole array if small
    return pl.pallas_call(
        _conv1x1_relu_kernel,
        out_shape=jax.ShapeDtypeStruct((M, Cmid), jnp.float32),
        grid_spec=pltpu.PrefetchScalarGridSpec(
            num_scalar_prefetch=0,
            grid=(pl.cdiv(M, tm),),
            in_specs=[
                pl.BlockSpec((tm, Cin), lambda i: (i, 0)),
                pl.BlockSpec((Cin, Cmid), lambda i: (0, 0)),   # resident weights
                pl.BlockSpec((1, Cmid), lambda i: (0, 0)),
            ],
            out_specs=pl.BlockSpec((tm, Cmid), lambda i: (i, 0)),
        ),
        compiler_params=pltpu.CompilerParams(
            dimension_semantics=("parallel",)),
    )(x_flat, w, b)


# ----------------------------------------------------------------------------
# Kernel 2: fused [nearest x2 upsample -> conv3x3 (pad=1)], channel-first out.
# Grid: (batch, row tiles). Halo comes from a second 2-row block on the same
# zero-padded low-res array; no im2col and no hi-res intermediate in HBM.
# ----------------------------------------------------------------------------
def _up2_conv3x3_cf_kernel(a_ref, b_ref, w_ref, bias_ref, o_ref):
    # a_ref:    (1, TH, WP, C)   padded low-res rows r*TH .. r*TH+TH-1
    # b_ref:    (1, 2,  WP, C)   padded low-res rows (r+1)*TH .. (r+1)*TH+1
    # w_ref:    (9, C, Cout)     per-tap (dy*3+dx) weight matrices
    # bias_ref: (1, Cout)
    # o_ref:    (1, Cout, 4*TH*W)  channel-first, flattened 2x-res spatial
    TH, WP, C = a_ref.shape[1], a_ref.shape[2], a_ref.shape[3]
    W = WP - 2
    TH2, W2 = 2 * TH, 2 * W
    Cout = o_ref.shape[1]

    # low-res window with a 1-row / 1-col halo (zeros at the image border)
    lo = jnp.concatenate([a_ref[0], b_ref[0]], axis=0)        # (TH+2, WP, C)
    # fused nearest x2 upsample: rows = outer axis, cols = sublane axis;
    # channels stay on the lane axis (no lane-axis data movement).
    hi = jnp.repeat(jnp.repeat(lo, 2, axis=0), 2, axis=1)     # (2TH+4, 2WP, C)

    # 3x3 conv (padding=1 at hi-res) as 9 accumulated MXU matmuls over shifted
    # views; the padded hi-res window is hi[1:, 1:, :].
    acc = jnp.zeros((TH2 * W2, Cout), jnp.float32)
    for dy in range(3):
        for dx in range(3):
            tap = hi[1 + dy:1 + dy + TH2, 1 + dx:1 + dx + W2, :]
            acc = acc + jnp.dot(tap.reshape(TH2 * W2, C),
                                w_ref[dy * 3 + dx],
                                preferred_element_type=jnp.float32)
    acc = acc + bias_ref[...]
    # channel-first, lane-dense store (spatial on lanes, Cout rows)
    o_ref[0] = acc.T.astype(o_ref.dtype)


def _pick_row_tile(h):
    for th in (16, 8, 4, 2):
        if h % th == 0:
            return th
    return h


def up2_conv3x3_cf(mid_nhwc, w9, b3, *, th=None):
    """mid_nhwc (N, H, W, C) -> (N, Cout, 4*H*W) float32 (2x-res, NCHW order)."""
    N, H, W, C = mid_nhwc.shape
    Cout = w9.shape[-1]
    th = _pick_row_tile(H) if th is None else th
    assert H % th == 0 and th % 2 == 0, (H, th)
    assert (4 * th * W) % 128 == 0 or th == H, (th, W)

    # 1 low-res zero row/col on every side supplies both the conv halo and the
    # hi-res padding=1 (one low-res zero == two hi-res zeros after repeat).
    mp = jnp.pad(mid_nhwc, ((0, 0), (1, 1), (1, 1), (0, 0)))
    WP = W + 2
    half_th = th // 2

    return pl.pallas_call(
        _up2_conv3x3_cf_kernel,
        out_shape=jax.ShapeDtypeStruct((N, Cout, 4 * H * W), jnp.float32),
        grid_spec=pltpu.PrefetchScalarGridSpec(
            num_scalar_prefetch=0,
            grid=(N, H // th),
            in_specs=[
                # main row tile: padded rows r*th .. r*th+th-1
                pl.BlockSpec((1, th, WP, C), lambda n, r: (n, r, 0, 0)),
                # 2-row bottom halo: padded rows (r+1)*th .. (r+1)*th+1
                pl.BlockSpec((1, 2, WP, C),
                             lambda n, r: (n, (r + 1) * half_th, 0, 0)),
                pl.BlockSpec((9, C, Cout), lambda n, r: (0, 0, 0)),
                pl.BlockSpec((1, Cout), lambda n, r: (0, 0)),
            ],
            out_specs=pl.BlockSpec((1, Cout, 4 * th * W),
                                   lambda n, r: (n, 0, r)),
        ),
        compiler_params=pltpu.CompilerParams(
            dimension_semantics=("parallel", "parallel")),
    )(mp, mp, w9, b3)


# ----------------------------------------------------------------------------
# Head forward: up2 -> conv1x1+ReLU -> conv3x3(pad=1) -> up2
# ----------------------------------------------------------------------------
def hrnet_w48_up4_head_forward(feats_nchw, w1_oihw, b1, w3_oihw, b3):
    """feats (N, 360, H, W) f32 -> (N, num_classes, 4H, 4W) f32 (NCHW).

    w1_oihw: (180, 360, 1, 1), b1: (180,)          -- last_layer[0]
    w3_oihw: (num_classes, 180, 3, 3), b3: (nc,)   -- last_layer[2]
    """
    N, Cin, H, W = feats_nchw.shape
    Cmid = w1_oihw.shape[0]
    Cout = w3_oihw.shape[0]

    # pointwise conv commutes exactly with the nearest upsample -> run it on
    # the low-res features (4x less work; would NOT hold for bilinear).
    x = jnp.transpose(feats_nchw, (0, 2, 3, 1)).reshape(N * H * W, Cin)
    w1 = jnp.transpose(w1_oihw[:, :, 0, 0], (1, 0))            # (Cin, Cmid)
    mid = conv1x1_relu(x, w1, b1.reshape(1, Cmid))
    mid = mid.reshape(N, H, W, Cmid)

    # fused [up2 -> conv3x3], channel-first output at 2x resolution
    w9 = jnp.transpose(w3_oihw, (2, 3, 1, 0)).reshape(9, Cmid, Cout)
    y = up2_conv3x3_cf(mid, w9, b3.reshape(1, Cout))
    y = y.reshape(N, Cout, 2 * H, 2 * W)

    # final nearest x2 upsample; already NCHW -> no transpose needed
    return jnp.repeat(jnp.repeat(y, 2, axis=2), 2, axis=3)


# ----------------------------------------------------------------------------
# Pure-JAX reference (follows the module's literal op order, for checking)
# ----------------------------------------------------------------------------
def _ref_forward(feats_nchw, w1_oihw, b1, w3_oihw, b3):
    x = jnp.repeat(jnp.repeat(feats_nchw, 2, axis=2), 2, axis=3)        # up2
    y = jax.lax.conv_general_dilated(
        x, w1_oihw, (1, 1), 'VALID',
        dimension_numbers=('NCHW', 'OIHW', 'NCHW'))
    y = jnp.maximum(y + b1.reshape(1, -1, 1, 1), 0.0)
    z = jax.lax.conv_general_dilated(
        y, w3_oihw, (1, 1), ((1, 1), (1, 1)),
        dimension_numbers=('NCHW', 'OIHW', 'NCHW'))
    z = z + b3.reshape(1, -1, 1, 1)
    return jnp.repeat(jnp.repeat(z, 2, axis=2), 2, axis=3)              # up2


if __name__ == "__main__":
    NUM_CLASSES = 2
    C_FEAT, C_MID = 360, 180          # fixed by the module's last_layer
    N, Hf, Wf = 2, 8, 8               # small backbone-feature spatial size

    key = jax.random.PRNGKey(0)
    kx, k1, k2, k3, k4 = jax.random.split(key, 5)

    # stand-in for hrnet_w48(x) output (backbone: see TODO above)
    feats = jax.random.normal(kx, (N, C_FEAT, Hf, Wf), jnp.float32)

    # parameters in PyTorch layout (OIHW conv weights, 1-D biases)
    w1 = jax.random.normal(k1, (C_MID, C_FEAT, 1, 1), jnp.float32) * 0.05
    b1 = jax.random.normal(k2, (C_MID,), jnp.float32) * 0.05
    w3 = jax.random.normal(k3, (NUM_CLASSES, C_MID, 3, 3), jnp.float32) * 0.05
    b3 = jax.random.normal(k4, (NUM_CLASSES,), jnp.float32) * 0.05

    fwd = jax.jit(hrnet_w48_up4_head_forward)
    out = jax.block_until_ready(fwd(feats, w1, b1, w3, b3))
    assert out.shape == (N, NUM_CLASSES, 4 * Hf, 4 * Wf), out.shape

    ref = jax.block_until_ready(_ref_forward(feats, w1, b1, w3, b3))
    max_err = float(jnp.max(jnp.abs(out - ref)))
    # default (bf16 MXU, f32 accumulate) matmul precision -> loose-ish tolerance
    assert jnp.allclose(out, ref, rtol=5e-2, atol=5e-2), max_err

    print("KERNEL_OK")
</pallas_src>

<mosaic_0001>
module attributes {stable_mosaic.version = 11 : i64} {
  func.func @_conv1x1_relu_kernel(%arg0: i32, %arg1: memref<128x360xf32, #tpu.memory_space<vmem>>, %arg2: memref<360x180xf32, #tpu.memory_space<vmem>>, %arg3: memref<1x180xf32, #tpu.memory_space<vmem>>, %arg4: memref<128x180xf32, #tpu.memory_space<vmem>>) attributes {dimension_semantics = [#tpu.dimension_semantics<parallel>], iteration_bounds = array<i64: 1>, scalar_prefetch = 0 : i64, scratch_operands = 0 : i64, tpu.core_type = #tpu.core_type<tc>, window_params = [{transform_indices = @transform_0, window_bounds = array<i64: 128, 360>}, {pipeline_mode = #tpu.pipeline_mode<synchronous>, transform_indices = @transform_1, window_bounds = array<i64: 360, 180>}, {pipeline_mode = #tpu.pipeline_mode<synchronous>, transform_indices = @transform_2, window_bounds = array<i64: 1, 180>}, {transform_indices = @transform_3, window_bounds = array<i64: 128, 180>}]} {
    %c0 = arith.constant 0 : index
    %c0_0 = arith.constant 0 : index
    %0 = vector.load %arg1[%c0, %c0_0] : memref<128x360xf32, #tpu.memory_space<vmem>>, vector<128x360xf32>
    %c0_1 = arith.constant 0 : index
    %c0_2 = arith.constant 0 : index
    %1 = vector.load %arg2[%c0_1, %c0_2] : memref<360x180xf32, #tpu.memory_space<vmem>>, vector<360x180xf32>
    %cst = arith.constant dense<0.000000e+00> : vector<128x180xf32>
    %2 = tpu.matmul %0, %1, %cst {dimension_numbers = #tpu.dot_dimension_numbers<[1], [0], [0], [1], [0, 0, 1, 1], [], []>} : vector<128x360xf32>, vector<360x180xf32>, vector<128x180xf32> -> vector<128x180xf32>
    %c0_3 = arith.constant 0 : index
    %c0_4 = arith.constant 0 : index
    %3 = vector.load %arg3[%c0_3, %c0_4] : memref<1x180xf32, #tpu.memory_space<vmem>>, vector<1x180xf32>
    %4 = vector.broadcast %3 : vector<1x180xf32> to vector<128x180xf32>
    %5 = arith.addf %2, %4 : vector<128x180xf32>
    %cst_5 = arith.constant 0.000000e+00 : f32
    %6 = vector.broadcast %cst_5 : f32 to vector<128x180xf32>
    %7 = arith.maximumf %5, %6 : vector<128x180xf32>
    %c0_6 = arith.constant 0 : index
    %c0_7 = arith.constant 0 : index
    %8 = vector.load %arg4[%c0_6, %c0_7] : memref<128x180xf32, #tpu.memory_space<vmem>>, vector<128x180xf32>
    tpu.vector_store %arg4[%c0_6, %c0_7], %7 {strides = array<i32>} : memref<128x180xf32, #tpu.memory_space<vmem>>, vector<128x180xf32>,
    return
  }
  func.func @transform_0(%arg0: i32) -> (i32, i32) {
    %c0_i32 = arith.constant 0 : i32
    %c0_i32_0 = arith.constant 0 : i32
    return %arg0, %c0_i32 : i32, i32
  }
  func.func @transform_1(%arg0: i32) -> (i32, i32) {
    %c0_i32 = arith.constant 0 : i32
    %c0_i32_0 = arith.constant 0 : i32
    %c0_i32_1 = arith.constant 0 : i32
    return %c0_i32, %c0_i32_0 : i32, i32
  }
  func.func @transform_2(%arg0: i32) -> (i32, i32) {
    %c0_i32 = arith.constant 0 : i32
    %c0_i32_0 = arith.constant 0 : i32
    %c0_i32_1 = arith.constant 0 : i32
    return %c0_i32, %c0_i32_0 : i32, i32
  }
  func.func @transform_3(%arg0: i32) -> (i32, i32) {
    %c0_i32 = arith.constant 0 : i32
    %c0_i32_0 = arith.constant 0 : i32
    return %arg0, %c0_i32 : i32, i32
  }
}

module attributes {stable_mosaic.version = 11 : i64} {
  func.func @_up2_conv3x3_cf_kernel(%arg0: i32, %arg1: i32, %arg2: memref<1x8x10x180xf32, #tpu.memory_space<vmem>>, %arg3: memref<1x2x10x180xf32, #tpu.memory_space<vmem>>, %arg4: memref<9x180x2xf32, #tpu.memory_space<vmem>>, %arg5: memref<1x2xf32, #tpu.memory_space<vmem>>, %arg6: memref<1x2x256xf32, #tpu.memory_space<vmem>>) attributes {dimension_semantics = [#tpu.dimension_semantics<parallel>, #tpu.dimension_semantics<parallel>], iteration_bounds = array<i64: 2, 1>, scalar_prefetch = 0 : i64, scratch_operands = 0 : i64, tpu.core_type = #tpu.core_type<tc>, window_params = [{transform_indices = @transform_0, window_bounds = array<i64: 1, 8, 10, 180>}, {transform_indices = @transform_1, window_bounds = array<i64: 1, 2, 10, 180>}, {pipeline_mode = #tpu.pipeline_mode<synchronous>, transform_indices = @transform_2, window_bounds = array<i64: 9, 180, 2>}, {pipeline_mode = #tpu.pipeline_mode<synchronous>, transform_indices = @transform_3, window_bounds = array<i64: 1, 2>}, {transform_indices = @transform_4, window_bounds = array<i64: 1, 2, 256>}]} {
    %c0 = arith.constant 0 : index
    %c0_0 = arith.constant 0 : index
    %c0_1 = arith.constant 0 : index
    %c0_2 = arith.constant 0 : index
    %0 = vector.load %arg2[%c0, %c0_0, %c0_1, %c0_2] : memref<1x8x10x180xf32, #tpu.memory_space<vmem>>, vector<1x8x10x180xf32>
    %1 = vector.shape_cast %0 : vector<1x8x10x180xf32> to vector<8x10x180xf32>
    %c0_3 = arith.constant 0 : index
    %c0_4 = arith.constant 0 : index
    %c0_5 = arith.constant 0 : index
    %c0_6 = arith.constant 0 : index
    %2 = vector.load %arg3[%c0_3, %c0_4, %c0_5, %c0_6] : memref<1x2x10x180xf32, #tpu.memory_space<vmem>>, vector<1x2x10x180xf32>
    %3 = vector.shape_cast %2 : vector<1x2x10x180xf32> to vector<2x10x180xf32>
    %4 = tpu.concatenate %1, %3 in 0 : vector<8x10x180xf32>, vector<2x10x180xf32> -> vector<10x10x180xf32>
    %5 = vector.shape_cast %4 : vector<10x10x180xf32> to vector<10x1x10x180xf32>
    %6 = vector.broadcast %5 : vector<10x1x10x180xf32> to vector<10x2x10x180xf32>
    %7 = vector.shape_cast %6 : vector<10x2x10x180xf32> to vector<20x10x180xf32>
    %8 = vector.shape_cast %7 : vector<20x10x180xf32> to vector<20x10x1x180xf32>
    %9 = vector.broadcast %8 : vector<20x10x1x180xf32> to vector<20x10x2x180xf32>
    %10 = vector.shape_cast %9 : vector<20x10x2x180xf32> to vector<20x20x180xf32>
    %cst = arith.constant 0.000000e+00 : f32
    %11 = vector.broadcast %cst : f32 to vector<256x2xf32>
    %12 = vector.extract_strided_slice %10 {offsets = [1, 1, 0], sizes = [16, 16, 180], strides = [1, 1, 1]} : vector<20x20x180xf32> to vector<16x16x180xf32>
    %13 = vector.shape_cast %12 : vector<16x16x180xf32> to vector<256x180xf32>
    %c0_7 = arith.constant 0 : index
    %c0_8 = arith.constant 0 : index
    %c0_9 = arith.constant 0 : index
    %14 = vector.load %arg4[%c0_7, %c0_8, %c0_9] : memref<9x180x2xf32, #tpu.memory_space<vmem>>, vector<1x180x2xf32>
    %15 = vector.shape_cast %14 : vector<1x180x2xf32> to vector<180x2xf32>
    %cst_10 = arith.constant dense<0.000000e+00> : vector<256x2xf32>
    %16 = tpu.matmul %13, %15, %cst_10 {dimension_numbers = #tpu.dot_dimension_numbers<[1], [0], [0], [1], [0, 0, 1, 1], [], []>} : vector<256x180xf32>, vector<180x2xf32>, vector<256x2xf32> -> vector<256x2xf32>
    %17 = arith.addf %11, %16 : vector<256x2xf32>
    %18 = vector.extract_strided_slice %10 {offsets = [1, 2, 0], sizes = [16, 16, 180], strides = [1, 1, 1]} : vector<20x20x180xf32> to vector<16x16x180xf32>
    %19 = vector.shape_cast %18 : vector<16x16x180xf32> to vector<256x180xf32>
    %c1 = arith.constant 1 : index
    %c0_11 = arith.constant 0 : index
    %c0_12 = arith.constant 0 : index
    %20 = vector.load %arg4[%c1, %c0_11, %c0_12] : memref<9x180x2xf32, #tpu.memory_space<vmem>>, vector<1x180x2xf32>
    %21 = vector.shape_cast %20 : vector<1x180x2xf32> to vector<180x2xf32>
    %cst_13 = arith.constant dense<0.000000e+00> : vector<256x2xf32>
    %22 = tpu.matmul %19, %21, %cst_13 {dimension_numbers = #tpu.dot_dimension_numbers<[1], [0], [0], [1], [0, 0, 1, 1], [], []>} : vector<256x180xf32>, vector<180x2xf32>, vector<256x2xf32> -> vector<256x2xf32>
    %23 = arith.addf %17, %22 : vector<256x2xf32>
    %24 = vector.extract_strided_slice %10 {offsets = [1, 3, 0], sizes = [16, 16, 180], strides = [1, 1, 1]} : vector<20x20x180xf32> to vector<16x16x180xf32>
    %25 = vector.shape_cast %24 : vector<16x16x180xf32> to vector<256x180xf32>
    %c2 = arith.constant 2 : index
    %c0_14 = arith.constant 0 : index
    %c0_15 = arith.constant 0 : index
    %26 = vector.load %arg4[%c2, %c0_14, %c0_15] : memref<9x180x2xf32, #tpu.memory_space<vmem>>, vector<1x180x2xf32>
    %27 = vector.shape_cast %26 : vector<1x180x2xf32> to vector<180x2xf32>
    %cst_16 = arith.constant dense<0.000000e+00> : vector<256x2xf32>
    %28 = tpu.matmul %25, %27, %cst_16 {dimension_numbers = #tpu.dot_dimension_numbers<[1], [0], [0], [1], [0, 0, 1, 1], [], []>} : vector<256x180xf32>, vector<180x2xf32>, vector<256x2xf32> -> vector<256x2xf32>
    %29 = arith.addf %23, %28 : vector<256x2xf32>
    %30 = vector.extract_strided_slice %10 {offsets = [2, 1, 0], sizes = [16, 16, 180], strides = [1, 1, 1]} : vector<20x20x180xf32> to vector<16x16x180xf32>
    %31 = vector.shape_cast %30 : vector<16x16x180xf32> to vector<256x180xf32>
    %c3 = arith.constant 3 : index
    %c0_17 = arith.constant 0 : index
    %c0_18 = arith.constant 0 : index
    %32 = vector.load %arg4[%c3, %c0_17, %c0_18] : memref<9x180x2xf32, #tpu.memory_space<vmem>>, vector<1x180x2xf32>
    %33 = vector.shape_cast %32 : vector<1x180x2xf32> to vector<180x2xf32>
    %cst_19 = arith.constant dense<0.000000e+00> : vector<256x2xf32>
    %34 = tpu.matmul %31, %33, %cst_19 {dimension_numbers = #tpu.dot_dimension_numbers<[1], [0], [0], [1], [0, 0, 1, 1], [], []>} : vector<256x180xf32>, vector<180x2xf32>, vector<256x2xf32> -> vector<256x2xf32>
    %35 = arith.addf %29, %34 : vector<256x2xf32>
    %36 = vector.extract_strided_slice %10 {offsets = [2, 2, 0], sizes = [16, 16, 180], strides = [1, 1, 1]} : vector<20x20x180xf32> to vector<16x16x180xf32>
    %37 = vector.shape_cast %36 : vector<16x16x180xf32> to vector<256x180xf32>
    %c4 = arith.constant 4 : index
    %c0_20 = arith.constant 0 : index
    %c0_21 = arith.constant 0 : index
    %38 = vector.load %arg4[%c4, %c0_20, %c0_21] : memref<9x180x2xf32, #tpu.memory_space<vmem>>, vector<1x180x2xf32>
    %39 = vector.shape_cast %38 : vector<1x180x2xf32> to vector<180x2xf32>
    %cst_22 = arith.constant dense<0.000000e+00> : vector<256x2xf32>
    %40 = tpu.matmul %37, %39, %cst_22 {dimension_numbers = #tpu.dot_dimension_numbers<[1], [0], [0], [1], [0, 0, 1, 1], [], []>} : vector<256x180xf32>, vector<180x2xf32>, vector<256x2xf32> -> vector<256x2xf32>
    %41 = arith.addf %35, %40 : vector<256x2xf32>
    %42 = vector.extract_strided_slice %10 {offsets = [2, 3, 0], sizes = [16, 16, 180], strides = [1, 1, 1]} : vector<20x20x180xf32> to vector<16x16x180xf32>
    %43 = vector.shape_cast %42 : vector<16x16x180xf32> to vector<256x180xf32>
    %c5 = arith.constant 5 : index
    %c0_23 = arith.constant 0 : index
    %c0_24 = arith.constant 0 : index
    %44 = vector.load %arg4[%c5, %c0_23, %c0_24] : memref<9x180x2xf32, #tpu.memory_space<vmem>>, vector<1x180x2xf32>
    %45 = vector.shape_cast %44 : vector<1x180x2xf32> to vector<180x2xf32>
    %cst_25 = arith.constant dense<0.000000e+00> : vector<256x2xf32>
    %46 = tpu.matmul %43, %45, %cst_25 {dimension_numbers = #tpu.dot_dimension_numbers<[1], [0], [0], [1], [0, 0, 1, 1], [], []>} : vector<256x180xf32>, vector<180x2xf32>, vector<256x2xf32> -> vector<256x2xf32>
    %47 = arith.addf %41, %46 : vector<256x2xf32>
    %48 = vector.extract_strided_slice %10 {offsets = [3, 1, 0], sizes = [16, 16, 180], strides = [1, 1, 1]} : vector<20x20x180xf32> to vector<16x16x180xf32>
    %49 = vector.shape_cast %48 : vector<16x16x180xf32> to vector<256x180xf32>
    %c6 = arith.constant 6 : index
    %c0_26 = arith.constant 0 : index
    %c0_27 = arith.constant 0 : index
    %50 = vector.load %arg4[%c6, %c0_26, %c0_27] : memref<9x180x2xf32, #tpu.memory_space<vmem>>, vector<1x180x2xf32>
    %51 = vector.shape_cast %50 : vector<1x180x2xf32> to vector<180x2xf32>
    %cst_28 = arith.constant dense<0.000000e+00> : vector<256x2xf32>
    %52 = tpu.matmul %49, %51, %cst_28 {dimension_numbers = #tpu.dot_dimension_numbers<[1], [0], [0], [1], [0, 0, 1, 1], [], []>} : vector<256x180xf32>, vector<180x2xf32>, vector<256x2xf32> -> vector<256x2xf32>
    %53 = arith.addf %47, %52 : vector<256x2xf32>
    %54 = vector.extract_strided_slice %10 {offsets = [3, 2, 0], sizes = [16, 16, 180], strides = [1, 1, 1]} : vector<20x20x180xf32> to vector<16x16x180xf32>
    %55 = vector.shape_cast %54 : vector<16x16x180xf32> to vector<256x180xf32>
    %c7 = arith.constant 7 : index
    %c0_29 = arith.constant 0 : index
    %c0_30 = arith.constant 0 : index
    %56 = vector.load %arg4[%c7, %c0_29, %c0_30] : memref<9x180x2xf32, #tpu.memory_space<vmem>>, vector<1x180x2xf32>
    %57 = vector.shape_cast %56 : vector<1x180x2xf32> to vector<180x2xf32>
    %cst_31 = arith.constant dense<0.000000e+00> : vector<256x2xf32>
    %58 = tpu.matmul %55, %57, %cst_31 {dimension_numbers = #tpu.dot_dimension_numbers<[1], [0], [0], [1], [0, 0, 1, 1], [], []>} : vector<256x180xf32>, vector<180x2xf32>, vector<256x2xf32> -> vector<256x2xf32>
    %59 = arith.addf %53, %58 : vector<256x2xf32>
    %60 = vector.extract_strided_slice %10 {offsets = [3, 3, 0], sizes = [16, 16, 180], strides = [1, 1, 1]} : vector<20x20x180xf32> to vector<16x16x180xf32>
    %61 = vector.shape_cast %60 : vector<16x16x180xf32> to vector<256x180xf32>
    %c8 = arith.constant 8 : index
    %c0_32 = arith.constant 0 : index
    %c0_33 = arith.constant 0 : index
    %62 = vector.load %arg4[%c8, %c0_32, %c0_33] : memref<9x180x2xf32, #tpu.memory_space<vmem>>, vector<1x180x2xf32>
    %63 = vector.shape_cast %62 : vector<1x180x2xf32> to vector<180x2xf32>
    %cst_34 = arith.constant dense<0.000000e+00> : vector<256x2xf32>
    %64 = tpu.matmul %61, %63, %cst_34 {dimension_numbers = #tpu.dot_dimension_numbers<[1], [0], [0], [1], [0, 0, 1, 1], [], []>} : vector<256x180xf32>, vector<180x2xf32>, vector<256x2xf32> -> vector<256x2xf32>
    %65 = arith.addf %59, %64 : vector<256x2xf32>
    %c0_35 = arith.constant 0 : index
    %c0_36 = arith.constant 0 : index
    %66 = vector.load %arg5[%c0_35, %c0_36] : memref<1x2xf32, #tpu.memory_space<vmem>>, vector<1x2xf32>
    %67 = vector.broadcast %66 : vector<1x2xf32> to vector<256x2xf32>
    %68 = arith.addf %65, %67 : vector<256x2xf32>
    %69 = tpu.transpose %68, [1, 0] : vector<256x2xf32> -> vector<2x256xf32>
    %c0_37 = arith.constant 0 : index
    %c0_38 = arith.constant 0 : index
    %c0_39 = arith.constant 0 : index
    %70 = vector.load %arg6[%c0_37, %c0_38, %c0_39] : memref<1x2x256xf32, #tpu.memory_space<vmem>>, vector<1x2x256xf32>
    %71 = vector.shape_cast %70 : vector<1x2x256xf32> to vector<2x256xf32>
    %72 = vector.shape_cast %69 : vector<2x256xf32> to vector<1x2x256xf32>
    tpu.vector_store %arg6[%c0_37, %c0_38, %c0_39], %72 {strides = array<i32>} : memref<1x2x256xf32, #tpu.memory_space<vmem>>, vector<1x2x256xf32>,
    return
  }
  func.func @transform_0(%arg0: i32, %arg1: i32) -> (i32, i32, i32, i32) {
    %c0_i32 = arith.constant 0 : i32
    %c0_i32_0 = arith.constant 0 : i32
    %c0_i32_1 = arith.constant 0 : i32
    return %arg0, %arg1, %c0_i32, %c0_i32_0 : i32, i32, i32, i32
  }
  func.func @transform_1(%arg0: i32, %arg1: i32) -> (i32, i32, i32, i32) {
    %c1_i32 = arith.constant 1 : i32
    %0 = arith.addi %arg1, %c1_i32 : i32
    %c4_i32 = arith.constant 4 : i32
    %1 = arith.muli %0, %c4_i32 : i32
    %c0_i32 = arith.constant 0 : i32
    %c0_i32_0 = arith.constant 0 : i32
    %c0_i32_1 = arith.constant 0 : i32
    return %arg0, %1, %c0_i32, %c0_i32_0 : i32, i32, i32, i32
  }
  func.func @transform_2(%arg0: i32, %arg1: i32) -> (i32, i32, i32) {
    %c0_i32 = arith.constant 0 : i32
    %c0_i32_0 = arith.constant 0 : i32
    %c0_i32_1 = arith.constant 0 : i32
    %c0_i32_2 = arith.constant 0 : i32
    return %c0_i32, %c0_i32_0, %c0_i32_1 : i32, i32, i32
  }
  func.func @transform_3(%arg0: i32, %arg1: i32) -> (i32, i32) {
    %c0_i32 = arith.constant 0 : i32
    %c0_i32_0 = arith.constant 0 : i32
    %c0_i32_1 = arith.constant 0 : i32
    return %c0_i32, %c0_i32_0 : i32, i32
  }
  func.func @transform_4(%arg0: i32, %arg1: i32) -> (i32, i32, i32) {
    %c0_i32 = arith.constant 0 : i32
    %c0_i32_0 = arith.constant 0 : i32
    return %arg0, %c0_i32, %arg1 : i32, i32, i32
  }
}

</mosaic_0001>

<bundles_post_ra>
// kernel: hrnet_w48_up4_head_forward.2
= control target key start
LH: loop header
LB: loop body
LE: loop exit
PB: predicated region body
PF: predicated region fallthrough
CT: control target
= control target key end

     0   :  { %v621_v3 = vmov 0.0   ;;  %vm164_vm0 = vcmask 850944   ;;  %vm568_vm1 = vcmask 424960   ;;  %s1275_s1 = inlined_call_operand.vmem [shape: f32[360,180], index: 1, kind: input, shape index: {}]   ;;  %s1276_s0 = inlined_call_operand.vmem [shape: f32[128,360], index: 0, kind: input, shape index: {}]   ;;  %s1277_s2 = inlined_call_operand.vmem [shape: f32[1,180], index: 2, kind: input, shape index: {}]   ;;  %s1278_s3 = inlined_call_operand.vmem [shape: f32[128,180], index: 3, kind: output, shape index: {}]  }
   0x1   :  { %v93_v0 = vld [vmem:[%s1275_s1 + $0xf8] sm:$0xff]  ;;  %v92_v1 = vld [vmem:[%s1275_s1 + $0xf0] sm:$0xff]  ;;  %v91_v2 = vld [vmem:[%s1275_s1 + $0xe8] sm:$0xff]  ;;  %438 = vmatprep.mubr.f32.mxu1 %v621_v3 }
   0x2   :  { %213 = vmatprep.subr.mxu0 %v93_v0  ;;  %v90_v4 = vld [vmem:[%s1275_s1 + $0xe0] sm:$0xff]  ;;  %v89_v5 = vld [vmem:[%s1275_s1 + $0xd8] sm:$0xff]  ;;  %v88_v6 = vld [vmem:[%s1275_s1 + $0xd0] sm:$0xff] }
   0x3   :  { %214 = vmatpush1.msra.mxu0 %v92_v1  ;;  %v87_v7 = vld [vmem:[%s1275_s1 + $0xc8] sm:$0xff]  ;;  %v86_v8 = vld [vmem:[%s1275_s1 + $0xc0] sm:$0xff]  ;;  %v85_v9 = vld [vmem:[%s1275_s1 + $0xb8] sm:$0xff] }
   0x4   :  { %215 = vmatprep.subr.mxu0 %v91_v2  ;;  %v84_v10 = vld [vmem:[%s1275_s1 + $0xb0] sm:$0xff]  ;;  %v83_v11 = vld [vmem:[%s1275_s1 + $0xa8] sm:$0xff]  ;;  %v82_v12 = vld [vmem:[%s1275_s1 + $0xa0] sm:$0xff] }
   0x5   :  { %216 = vmatpush1.msra.mxu0 %v90_v4  ;;  %v81_v13 = vld [vmem:[%s1275_s1 + $0x98] sm:$0xff]  ;;  %v80_v14 = vld [vmem:[%s1275_s1 + $0x90] sm:$0xff]  ;;  %v79_v15 = vld [vmem:[%s1275_s1 + $0x88] sm:$0xff] }
   0x6   :  { %217 = vmatprep.subr.mxu0 %v89_v5  ;;  %v78_v16 = vld [vmem:[%s1275_s1 + $0x80] sm:$0xff]  ;;  %v151_v17 = vld [vmem:[%s1275_s1 + $0x2c8] sm:$0xff]  ;;  %v77_v19 = vld [vmem:[%s1275_s1 + $0x78] sm:$0xff] }
   0x7   :  { %218 = vmatpush1.msra.mxu0 %v88_v6  ;;  %v150_v18 = vld [vmem:[%s1275_s1 + $0x2c0] sm:$0xff]  ;;  %380 = vmatprep.subr.mxu1 %v151_v17  ;;  %v149_v20 = vld [vmem:[%s1275_s1 + $0x2b8] sm:$0xff]  ;;  %v76_v21 = vld [vmem:[%s1275_s1 + $0x70] sm:$0xff] }
   0x8   :  { %219 = vmatprep.subr.mxu0 %v87_v7  ;;  %381 = vmatpush1.msra.mxu1 %v150_v18  ;;  %v148_v22 = vld [vmem:[%s1275_s1 + $0x2b0] sm:$0xff]  ;;  %v147_v23 = vld [vmem:[%s1275_s1 + $0x2a8] sm:$0xff]  ;;  %v146_v25 = vld [vmem:[%s1275_s1 + $0x2a0] sm:$0xff] }
   0x9   :  { %220 = vmatpush1.msra.mxu0 %v86_v8  ;;  %v75_v24 = vld [vmem:[%s1275_s1 + $0x68] sm:$0xff]  ;;  %382 = vmatprep.subr.mxu1 %v149_v20  ;;  %v74_v26 = vld [vmem:[%s1275_s1 + $0x60] sm:$0xff]  ;;  %v145_v27 = vld [vmem:[%s1275_s1 + $0x298] sm:$0xff] }
   0xa   :  { %221 = vmatprep.subr.mxu0 %v85_v9  ;;  %383 = vmatpush1.msra.mxu1 %v148_v22  ;;  %v73_v28 = vld [vmem:[%s1275_s1 + $0x58] sm:$0xff]  ;;  %v144_v29 = vld [vmem:[%s1275_s1 + $0x290] sm:$0xff]  ;;  %v143_v31 = vld [vmem:[%s1275_s1 + $0x288] sm:$0xff] }
   0xb   :  { %222 = vmatpush1.msra.mxu0 %v84_v10  ;;  %384 = vmatprep.subr.mxu1 %v147_v23  ;;  %v72_v30 = vld [vmem:[%s1275_s1 + $0x50] sm:$0xff]  ;;  %v71_v32 = vld [vmem:[%s1275_s1 + $0x48] sm:$0xff]  ;;  %v142_v33 = vld [vmem:[%s1275_s1 + $0x280] sm:$0xff] }
   0xc   :  { %223 = vmatprep.subr.mxu0 %v83_v11  ;;  %385 = vmatpush1.msra.mxu1 %v146_v25  ;;  %v70_v34 = vld [vmem:[%s1275_s1 + $0x40] sm:$0xff]  ;;  %v141_v35 = vld [vmem:[%s1275_s1 + $0x278] sm:$0xff]  ;;  %v140_v37 = vld [vmem:[%s1275_s1 + $0x270] sm:$0xff] }
   0xd   :  { %224 = vmatpush1.msra.mxu0 %v82_v12  ;;  %386 = vmatprep.subr.mxu1 %v145_v27  ;;  %v69_v36 = vld [vmem:[%s1275_s1 + $0x38] sm:$0xff]  ;;  %v68_v38 = vld [vmem:[%s1275_s1 + $0x30] sm:$0xff]  ;;  %v139_v39 = vld [vmem:[%s1275_s1 + $0x268] sm:$0xff] }
   0xe   :  { %225 = vmatprep.subr.mxu0 %v81_v13  ;;  %387 = vmatpush1.msra.mxu1 %v144_v29  ;;  %v67_v40 = vld [vmem:[%s1275_s1 + $0x28] sm:$0xff]  ;;  %v138_v41 = vld [vmem:[%s1275_s1 + $0x260] sm:$0xff]  ;;  %v137_v43 = vld [vmem:[%s1275_s1 + $0x258] sm:$0xff] }
   0xf   :  { %226 = vmatpush1.msra.mxu0 %v80_v14  ;;  %388 = vmatprep.subr.mxu1 %v143_v31  ;;  %v66_v42 = vld [vmem:[%s1275_s1 + $0x20] sm:$0xff]  ;;  %v65_v44 = vld [vmem:[%s1275_s1 + $0x18] sm:$0xff]  ;;  %v136_v45 = vld [vmem:[%s1275_s1 + $0x250] sm:$0xff] }
  0x10   :  { %227 = vmatprep.subr.mxu0 %v79_v15  ;;  %389 = vmatpush1.msra.mxu1 %v142_v33  ;;  %v64_v46 = vld [vmem:[%s1275_s1 + $0x10] sm:$0xff]  ;;  %v135_v47 = vld [vmem:[%s1275_s1 + $0x248] sm:$0xff]  ;;  %v134_v49 = vld [vmem:[%s1275_s1 + $0x240] sm:$0xff] }
  0x11   :  { %228 = vmatpush1.msra.mxu0 %v78_v16  ;;  %390 = vmatprep.subr.mxu1 %v141_v35  ;;  %v63_v48 = vld [vmem:[%s1275_s1 + $0x8] sm:$0xff]  ;;  %v62_v50 = vld [vmem:[%s1275_s1] sm:$0xff]  ;;  %v133_v51 = vld [vmem:[%s1275_s1 + $0x238] sm:$0xff] }
  0x12   :  { %229 = vmatprep.subr.mxu0 %v77_v19  ;;  %391 = vmatpush1.msra.mxu1 %v140_v37  ;;  %v125_v52 = vld [vmem:[%s1275_s1 + $0x1f8] sm:$0xff]  ;;  %v132_v53 = vld [vmem:[%s1275_s1 + $0x230] sm:$0xff]  ;;  %v131_v55 = vld [vmem:[%s1275_s1 + $0x228] sm:$0xff] }
  0x13   :  { %230 = vmatpush1.msra.mxu0 %v76_v21  ;;  %392 = vmatprep.subr.mxu1 %v139_v39  ;;  %v124_v54 = vld [vmem:[%s1275_s1 + $0x1f0] sm:$0xff]  ;;  %v123_v56 = vld [vmem:[%s1275_s1 + $0x1e8] sm:$0xff]  ;;  %v130_v57 = vld [vmem:[%s1275_s1 + $0x220] sm:$0xff] }
  0x14   :  { %231 = vmatprep.subr.mxu0 %v75_v24  ;;  %393 = vmatpush1.msra.mxu1 %v138_v41  ;;  %v122_v58 = vld [vmem:[%s1275_s1 + $0x1e0] sm:$0xff]  ;;  %v129_v59 = vld [vmem:[%s1275_s1 + $0x218] sm:$0xff]  ;;  %v128_v61 = vld [vmem:[%s1275_s1 + $0x210] sm:$0xff] }
  0x15   :  { %232 = vmatpush1.msra.mxu0 %v74_v26  ;;  %394 = vmatprep.subr.mxu1 %v137_v43  ;;  %v121_v60 = vld [vmem:[%s1275_s1 + $0x1d8] sm:$0xff]  ;;  %v120_v62 = vld [vmem:[%s1275_s1 + $0x1d0] sm:$0xff]  ;;  %v127_v63 = vld [vmem:[%s1275_s1 + $0x208] sm:$0xff] }
  0x16   :  { %233 = vmatprep.subr.mxu0 %v73_v28  ;;  %395 = vmatpush1.msra.mxu1 %v136_v45  ;;  %v119_v0 = vld [vmem:[%s1275_s1 + $0x1c8] sm:$0xff]  ;;  %v118_v2 = vld [vmem:[%s1275_s1 + $0x1c0] sm:$0xff]  ;;  %v117_v5 = vld [vmem:[%s1275_s1 + $0x1b8] sm:$0xff] }
  0x17   :  { %234 = vmatpush1.msra.mxu0 %v72_v30  ;;  %396 = vmatprep.subr.mxu1 %v135_v47  ;;  %v15_v1 = vld [vmem:[%s1276_s0 + $0x8] sm:$0xff]  ;;  %v126_v4 = vld [vmem:[%s1275_s1 + $0x200] sm:$0xff]  ;;  %v16_v6 = vld [vmem:[%s1276_s0 + $0x10] sm:$0xff] }
  0x18   :  { %235 = vmatprep.subr.mxu0 %v71_v32  ;;  %397 = vmatpush1.msra.mxu1 %v134_v49  ;;  %v116_v7 = vld [vmem:[%s1275_s1 + $0x1b0] sm:$0xff]  ;;  %v115_v8 = vld [vmem:[%s1275_s1 + $0x1a8] sm:$0xff]  ;;  %v114_v9 = vld [vmem:[%s1275_s1 + $0x1a0] sm:$0xff] }
  0x19   :  { %236 = vmatpush1.msra.mxu0 %v70_v34  ;;  %398 = vmatprep.subr.mxu1 %v133_v51  ;;  %v113_v10 = vld [vmem:[%s1275_s1 + $0x198] sm:$0xff]  ;;  %v19_v11 = vld [vmem:[%s1276_s0 + $0x28] sm:$0xff]  ;;  %v112_v12 = vld [vmem:[%s1275_s1 + $0x190] sm:$0xff] }
  0x1a   :  { %237 = vmatprep.subr.mxu0 %v69_v36  ;;  %399 = vmatpush1.msra.mxu1 %v132_v53  ;;  %v111_v13 = vld [vmem:[%s1275_s1 + $0x188] sm:$0xff]  ;;  %v110_v14 = vld [vmem:[%s1275_s1 + $0x180] sm:$0xff]  ;;  %v109_v15 = vld [vmem:[%s1275_s1 + $0x178] sm:$0xff] }
  0x1b   :  { %238 = vmatpush1.msra.mxu0 %v68_v38  ;;  %400 = vmatprep.subr.mxu1 %v131_v55  ;;  %v22_v16 = vld [vmem:[%s1276_s0 + $0x40] sm:$0xff]  ;;  %v108_v17 = vld [vmem:[%s1275_s1 + $0x170] sm:$0xff]  ;;  %v107_v18 = vld [vmem:[%s1275_s1 + $0x168] sm:$0xff] }
  0x1c   :  { %239 = vmatprep.subr.mxu0 %v67_v40  ;;  %401 = vmatpush1.msra.mxu1 %v130_v57  ;;  %v106_v19 = vld [vmem:[%s1275_s1 + $0x160] sm:$0xff]  ;;  %v105_v20 = vld [vmem:[%s1275_s1 + $0x158] sm:$0xff]  ;;  %v104_v22 = vld [vmem:[%s1275_s1 + $0x150] sm:$0xff] }
  0x1d   :  { %240 = vmatpush1.msra.mxu0 %v66_v42  ;;  %402 = vmatprep.subr.mxu1 %v129_v59  ;;  %v25_v21 = vld [vmem:[%s1276_s0 + $0x58] sm:$0xff]  ;;  %v103_v23 = vld [vmem:[%s1275_s1 + $0x148] sm:$0xff]  ;;  %v102_v24 = vld [vmem:[%s1275_s1 + $0x140] sm:$0xff] }
  0x1e   :  { %241 = vmatprep.subr.mxu0 %v65_v44  ;;  %403 = vmatpush1.msra.mxu1 %v128_v61  ;;  %v101_v25 = vld [vmem:[%s1275_s1 + $0x138] sm:$0xff]  ;;  %v28_v26 = vld [vmem:[%s1276_s0 + $0x70] sm:$0xff]  ;;  %v99_v28 = vld [vmem:[%s1275_s1 + $0x128] sm:$0xff] }
  0x1f   :  { %242 = vmatpush1.msra.mxu0 %v64_v46  ;;  %404 = vmatprep.subr.mxu1 %v127_v63  ;;  %v100_v27 = vld [vmem:[%s1275_s1 + $0x130] sm:$0xff]  ;;  %v98_v29 = vld [vmem:[%s1275_s1 + $0x120] sm:$0xff]  ;;  %v97_v30 = vld [vmem:[%s1275_s1 + $0x118] sm:$0xff] }
  0x20   :  { %243 = vmatprep.subr.mxu0 %v63_v48  ;;  %277 = vmatprep.mubr.f32.mxu0 %v15_v1  ;;  %v31_v31 = vld [vmem:[%s1276_s0 + $0x88] sm:$0xff]  ;;  %v96_v32 = vld [vmem:[%s1275_s1 + $0x110] sm:$0xff]  ;;  %v94_v34 = vld [vmem:[%s1275_s1 + $0x100] sm:$0xff] }
  0x21   :  { %244 = vmatpush1.msra.mxu0 %v62_v50  ;;  %405 = vmatpush1.msra.mxu1 %v126_v4  ;;  %v95_v33 = vld [vmem:[%s1275_s1 + $0x108] sm:$0xff]  ;;  %v14_v35 = vld [vmem:[%s1276_s0] sm:$0xff]  ;;  %v17_v38 = vld [vmem:[%s1276_s0 + $0x18] sm:$0xff] }
  0x22   :  { %245 = vmatprep.subr.mxu0 %v125_v52  ;;  %604 = vmatmul.mubr.msk.f32.vlgmr.msra.gmra.mxu1 %vm164_vm0, %v16_v6  ;;  %v34_v36 = vld [vmem:[%s1276_s0 + $0xa0] sm:$0xff]  ;;  %v37_v39 = vld [vmem:[%s1276_s0 + $0xb8] sm:$0xff]  ;;  %v20_v41 = vld [vmem:[%s1276_s0 + $0x30] sm:$0xff] }
  0x23   :  { %246 = vmatpush2.msra.mxu0 %v124_v54  ;;  %444 = vmatprep.mubr.f32.mxu1 %v621_v3  ;;  %v18_v37 = vld [vmem:[%s1276_s0 + $0x20] sm:$0xff]  ;;  %v21_v40 = vld [vmem:[%s1276_s0 + $0x38] sm:$0xff]  ;;  %v40_v42 = vld [vmem:[%s1276_s0 + $0xd0] sm:$0xff] }
  0x24   :  { %247 = vmatprep.subr.mxu0 %v123_v56  ;;  %v24_v43 = vld [vmem:[%s1276_s0 + $0x50] sm:$0xff]  ;;  %v23_v44 = vld [vmem:[%s1276_s0 + $0x48] sm:$0xff]  ;;  %v26_v47 = vld [vmem:[%s1276_s0 + $0x60] sm:$0xff] }
  0x25   :  { %248 = vmatpush2.msra.mxu0 %v122_v58  ;;  %v43_v45 = vld [vmem:[%s1276_s0 + $0xe8] sm:$0xff]  ;;  %v46_v48 = vld [vmem:[%s1276_s0 + $0x100] sm:$0xff]  ;;  %v29_v50 = vld [vmem:[%s1276_s0 + $0x78] sm:$0xff] }
  0x26   :  { %249 = vmatprep.subr.mxu0 %v121_v60  ;;  %605 = vmatmul.mubr.msk.f32.gmra.mxu1 %vm164_vm0, %v19_v11  ;;  %v27_v46 = vld [vmem:[%s1276_s0 + $0x68] sm:$0xff]  ;;  %v30_v49 = vld [vmem:[%s1276_s0 + $0x80] sm:$0xff]  ;;  %v49_v51 = vld [vmem:[%s1276_s0 + $0x118] sm:$0xff] }
  0x27   :  { %250 = vmatpush2.msra.mxu0 %v120_v62  ;;  %450 = vmatprep.mubr.f32.mxu1 %v621_v3  ;;  %v33_v52 = vld [vmem:[%s1276_s0 + $0x98] sm:$0xff]  ;;  %v32_v53 = vld [vmem:[%s1276_s0 + $0x90] sm:$0xff]  ;;  %v35_v56 = vld [vmem:[%s1276_s0 + $0xa8] sm:$0xff] }
  0x28   :  { %251 = vmatprep.subr.mxu0 %v119_v0  ;;  %v52_v54 = vld [vmem:[%s1276_s0 + $0x130] sm:$0xff]  ;;  %v55_v57 = vld [vmem:[%s1276_s0 + $0x148] sm:$0xff]  ;;  %v38_v59 = vld [vmem:[%s1276_s0 + $0xc0] sm:$0xff] }
  0x29   :  { %252 = vmatpush2.msra.mxu0 %v118_v2  ;;  %v36_v55 = vld [vmem:[%s1276_s0 + $0xb0] sm:$0xff]  ;;  %v39_v58 = vld [vmem:[%s1276_s0 + $0xc8] sm:$0xff]  ;;  %v58_v60 = vld [vmem:[%s1276_s0 + $0x160] sm:$0xff] }
  0x2a   :  { %253 = vmatprep.subr.mxu0 %v117_v5  ;;  %606 = vmatmul.mubr.msk.f32.gmra.mxu1 %vm164_vm0, %v22_v16  ;;  %v42_v61 = vld [vmem:[%s1276_s0 + $0xe0] sm:$0xff]  ;;  %v41_v62 = vld [vmem:[%s1276_s0 + $0xd8] sm:$0xff]  ;;  %v44_v1 = vld [vmem:[%s1276_s0 + $0xf0] sm:$0xff] }
  0x2b   :  { %254 = vmatpush2.msra.mxu0 %v116_v7  ;;  %456 = vmatprep.mubr.f32.mxu1 %v621_v3  ;;  %v61_v63 = vld [vmem:[%s1276_s0 + $0x178] sm:$0xff]  ;;  %v47_v2 = vld [vmem:[%s1276_s0 + $0x108] sm:$0xff]  ;;  %v50_v5 = vld [vmem:[%s1276_s0 + $0x120] sm:$0xff] }
  0x2c   :  { %255 = vmatprep.subr.mxu0 %v115_v8  ;;  %v45_v0 = vld [vmem:[%s1276_s0 + $0xf8] sm:$0xff]  ;;  %v51_v4 = vld [vmem:[%s1276_s0 + $0x128] sm:$0xff]  ;;  %v54_v6 = vld [vmem:[%s1276_s0 + $0x140] sm:$0xff] }
  0x2d   :  { %256 = vmatpush2.msra.mxu0 %v114_v9  ;;  %v53_v7 = vld [vmem:[%s1276_s0 + $0x138] sm:$0xff]  ;;  %v56_v9 = vld [vmem:[%s1276_s0 + $0x150] sm:$0xff]  ;;  %v59_v11 = vld [vmem:[%s1276_s0 + $0x168] sm:$0xff] }
  0x2e   :  { %257 = vmatprep.subr.mxu0 %v113_v10  ;;  %607 = vmatmul.mubr.msk.f32.gmra.mxu1 %vm164_vm0, %v25_v21  ;;  %v57_v8 = vld [vmem:[%s1276_s0 + $0x158] sm:$0xff]  ;;  %v60_v10 = vld [vmem:[%s1276_s0 + $0x170] sm:$0xff] }
  0x2f   :  { %258 = vmatpush2.msra.mxu0 %v112_v12  ;;  %462 = vmatprep.mubr.f32.mxu1 %v621_v3 }
  0x30   :  { %259 = vmatprep.subr.mxu0 %v111_v13 }
  0x31   :  { %260 = vmatpush2.msra.mxu0 %v110_v14 }
  0x32   :  { %261 = vmatprep.subr.mxu0 %v109_v15  ;;  %608 = vmatmul.mubr.msk.f32.gmra.mxu1 %vm164_vm0, %v28_v26 }
  0x33   :  { %262 = vmatpush2.msra.mxu0 %v108_v17  ;;  %468 = vmatprep.mubr.f32.mxu1 %v621_v3  ;;  %v154_v17 = vlaneseq }
  0x34   :  { %263 = vmatprep.subr.mxu0 %v107_v18 }
  0x35   :  { %264 = vmatpush2.msra.mxu0 %v106_v19 }
  0x36   :  { %265 = vmatprep.subr.mxu0 %v105_v20  ;;  %609 = vmatmul.mubr.msk.f32.gmra.mxu1 %vm164_vm0, %v31_v31  ;;  %v155_v20 = vshrl.u32 %v154_v17, 7 }
  0x37   :  { %266 = vmatpush2.msra.mxu0 %v104_v22  ;;  %474 = vmatprep.mubr.f32.mxu1 %v621_v3 }
  0x38   :  { %267 = vmatprep.subr.mxu0 %v103_v23  ;;  %v156_v23 = vsub.s32 0, %v155_v20  ;;  %v160_v26 = vsub.s32 1, %v155_v20 }
  0x39   :  { %268 = vmatpush2.msra.mxu0 %v102_v24  ;;  %v152_v24 = vld [vmem:[%s1277_s2] sm:$0x3] }
  0x3a   :  { %269 = vmatprep.subr.mxu0 %v101_v25  ;;  %610 = vmatmul.mubr.msk.f32.gmra.mxu1 %vm164_vm0, %v34_v36 }
  0x3b   :  { %270 = vmatpush2.msra.mxu0 %v100_v27  ;;  %480 = vmatprep.mubr.f32.mxu1 %v621_v3 }
  0x3c   :  { %271 = vmatprep.subr.mxu0 %v99_v28  ;;  %v1095_v28 = vrot.slane %v152_v24, %v156_v23 }
  0x3d   :  { %272 = vmatpush2.msra.mxu0 %v98_v29 }
  0x3e   :  { %273 = vmatprep.subr.mxu0 %v97_v30  ;;  %611 = vmatmul.mubr.msk.f32.gmra.mxu1 %vm164_vm0, %v37_v39  ;;  %v1099_v30 = vrot.slane %v152_v24, %v160_v26 }
  0x3f   :  { %274 = vmatpush2.msra.mxu0 %v96_v32  ;;  %486 = vmatprep.mubr.f32.mxu1 %v621_v3 }
  0x40   :  { %275 = vmatprep.subr.mxu0 %v95_v33 }
  0x41   :  { %276 = vmatpush2.msra.mxu0 %v94_v34 }
  0x42   :  { %278 = vmatmul.mubr.f32.vlgmr.msra.gmra.mxu0 %v14_v35  ;;  %612 = vmatmul.mubr.msk.f32.gmra.mxu1 %vm164_vm0, %v40_v42 }
  0x43   :  { %283 = vmatprep.mubr.f32.mxu0 %v18_v37  ;;  %492 = vmatprep.mubr.f32.mxu1 %v621_v3 }
  0x46   :  { %284 = vmatmul.mubr.f32.gmra.mxu0 %v17_v38  ;;  %613 = vmatmul.mubr.msk.f32.gmra.mxu1 %vm164_vm0, %v43_v45 }
  0x47   :  { %289 = vmatprep.mubr.f32.mxu0 %v21_v40  ;;  %498 = vmatprep.mubr.f32.mxu1 %v621_v3 }
  0x4a   :  { %290 = vmatmul.mubr.f32.gmra.mxu0 %v20_v41  ;;  %614 = vmatmul.mubr.msk.f32.gmra.mxu1 %vm164_vm0, %v46_v48 }
  0x4b   :  { %295 = vmatprep.mubr.f32.mxu0 %v24_v43  ;;  %504 = vmatprep.mubr.f32.mxu1 %v621_v3 }
  0x4e   :  { %296 = vmatmul.mubr.f32.gmra.mxu0 %v23_v44  ;;  %615 = vmatmul.mubr.msk.f32.gmra.mxu1 %vm164_vm0, %v49_v51 }
  0x4f   :  { %301 = vmatprep.mubr.f32.mxu0 %v27_v46  ;;  %510 = vmatprep.mubr.f32.mxu1 %v621_v3 }
  0x52   :  { %302 = vmatmul.mubr.f32.gmra.mxu0 %v26_v47  ;;  %616 = vmatmul.mubr.msk.f32.gmra.mxu1 %vm164_vm0, %v52_v54 }
  0x53   :  { %307 = vmatprep.mubr.f32.mxu0 %v30_v49  ;;  %516 = vmatprep.mubr.f32.mxu1 %v621_v3 }
  0x56   :  { %308 = vmatmul.mubr.f32.gmra.mxu0 %v29_v50  ;;  %617 = vmatmul.mubr.msk.f32.gmra.mxu1 %vm164_vm0, %v55_v57 }
  0x57   :  { %313 = vmatprep.mubr.f32.mxu0 %v33_v52  ;;  %522 = vmatprep.mubr.f32.mxu1 %v621_v3 }
  0x5a   :  { %314 = vmatmul.mubr.f32.gmra.mxu0 %v32_v53  ;;  %618 = vmatmul.mubr.msk.f32.gmra.mxu1 %vm164_vm0, %v58_v60 }
  0x5b   :  { %319 = vmatprep.mubr.f32.mxu0 %v36_v55  ;;  %528 = vmatprep.mubr.f32.mxu1 %v621_v3  ;;  %v48_v3 = vld [vmem:[%s1276_s0 + $0x110] sm:$0xff] }
  0x5e   :  { %320 = vmatmul.mubr.f32.gmra.mxu0 %v35_v56  ;;  %619 = vmatmul.mubr.msk.f32.gmra.mxu1 %vm164_vm0, %v61_v63 }
  0x5f   :  { %325 = vmatprep.mubr.f32.mxu0 %v39_v58 }
  0x62   :  { %326 = vmatmul.mubr.f32.gmra.mxu0 %v38_v59 }
  0x63   :  { %331 = vmatprep.mubr.f32.mxu0 %v42_v61 }
  0x66   :  { %332 = vmatmul.mubr.f32.gmra.mxu0 %v41_v62 }
  0x67   :  { %337 = vmatprep.mubr.f32.mxu0 %v45_v0 }
  0x6a   :  { %338 = vmatmul.mubr.f32.gmra.mxu0 %v44_v1 }
  0x6b   :  { %343 = vmatprep.mubr.f32.mxu0 %v48_v3 }
  0x6e   :  { %344 = vmatmul.mubr.f32.gmra.mxu0 %v47_v2 }
  0x6f   :  { %349 = vmatprep.mubr.f32.mxu0 %v51_v4 }
  0x72   :  { %350 = vmatmul.mubr.f32.gmra.mxu0 %v50_v5 }
  0x73   :  { %355 = vmatprep.mubr.f32.mxu0 %v54_v6 }
  0x76   :  { %356 = vmatmul.mubr.f32.gmra.mxu0 %v53_v7 }
  0x77   :  { %361 = vmatprep.mubr.f32.mxu0 %v57_v8 }
  0x7a   :  { %362 = vmatmul.mubr.f32.gmra.mxu0 %v56_v9 }
  0x7b   :  { %367 = vmatprep.mubr.f32.mxu0 %v60_v10 }
  0x7e   :  { %368 = vmatmul.mubr.f32.gmra.mxu0 %v59_v11 }
  0xe2   :  { %v440_v12 = vpop.f32.mrf.mxu1 }
  0xe4   :  { %v442_v13 = vpop.f32.mrf.mxu1 }
  0xe6   :  { %v446_v14 = vpop.f32.mrf.mxu1 }
  0xe8   :  { %v448_v15 = vpop.f32.mrf.mxu1 }
  0xea   :  { %v452_v16 = vpop.f32.mrf.mxu1 }
  0xec   :  { %v454_v18 = vpop.f32.mrf.mxu1 }
  0xee   :  { %v458_v19 = vpop.f32.mrf.mxu1 }
  0xf0   :  { %v460_v21 = vpop.f32.mrf.mxu1 }
  0xf2   :  { %v464_v22 = vpop.f32.mrf.mxu1 }
  0xf4   :  { %v1091_v25 = vpop.f32.mrf.mxu1 }
  0xf6   :  { %v1093_v27 = vpop.f32.mrf.mxu1 }
  0xf8   :  { %v1097_v29 = vpop.f32.mrf.mxu1 }
  0xfa   :  { %v1101_v32 = vpop.f32.mrf.mxu1 }
  0xfc   :  { %v1104_v35 = vpop.f32.mrf.mxu1 }
  0xfe   :  { %v1107_v39 = vpop.f32.mrf.mxu1 }
 0x100   :  { %v1110_v44 = vpop.f32.mrf.mxu1 }
 0x102   :  { %v279_v31 = vpop.f32.mrf.mxu0  ;;  %v1116_v49 = vpop.f32.mrf.mxu1 }
 0x103   :  { %v280_v33 = vadd.f32 %v279_v31, %v1095_v28 }
 0x104   :  { %v281_v34 = vpop.f32.mrf.mxu0  ;;  %v1123_v54 = vpop.f32.mrf.mxu1 }
 0x105   :  { %v441_v36 = vadd.f32 %v440_v12, %v280_v33  ;;  %v282_v37 = vadd.f32 %v281_v34, %v1099_v30 }
 0x106   :  { %v285_v38 = vpop.f32.mrf.mxu0  ;;  %v1129_v59 = vpop.f32.mrf.mxu1 }
 0x107   :  { %v535_v40 = vmax.f32 %v441_v36, 0.0  ;;  %v443_v41 = vadd.f32 %v442_v13, %v282_v37  ;;  %v286_v42 = vadd.f32 %v285_v38, %v1095_v28 }
 0x108   :  { %v287_v43 = vpop.f32.mrf.mxu0  ;;  %v1140_v4 = vpop.f32.mrf.mxu1 }
 0x109   :  { %567 = vst [vmem:[%s1278_s3] sm:$0xff] %v535_v40  ;;  %v536_v45 = vmax.f32 %v443_v41, 0.0  ;;  %v447_v46 = vadd.f32 %v446_v14, %v286_v42  ;;  %v288_v47 = vadd.f32 %v287_v43, %v1099_v30 }
 0x10a   :  { %v291_v48 = vpop.f32.mrf.mxu0  ;;  %v1151_v13 = vpop.f32.mrf.mxu1 }
 0x10b   :  { %569 = vst.msk [vmem:[%s1278_s3 + $0x8] sm:$0xff] %vm568_vm1, %v536_v45  ;;  %v537_v50 = vmax.f32 %v447_v46, 0.0  ;;  %v449_v51 = vadd.f32 %v448_v15, %v288_v47  ;;  %v292_v52 = vadd.f32 %v291_v48, %v1095_v28 }
 0x10c   :  { %v293_v53 = vpop.f32.mrf.mxu0 }
 0x10d   :  { %570 = vst [vmem:[%s1278_s3 + $0x10] sm:$0xff] %v537_v50  ;;  %v538_v55 = vmax.f32 %v449_v51, 0.0  ;;  %v453_v56 = vadd.f32 %v452_v16, %v292_v52  ;;  %v294_v57 = vadd.f32 %v293_v53, %v1099_v30 }
 0x10e   :  { %v297_v58 = vpop.f32.mrf.mxu0 }
 0x10f   :  { %571 = vst.msk [vmem:[%s1278_s3 + $0x18] sm:$0xff] %vm568_vm1, %v538_v55  ;;  %v539_v60 = vmax.f32 %v453_v56, 0.0  ;;  %v455_v61 = vadd.f32 %v454_v18, %v294_v57  ;;  %v298_v62 = vadd.f32 %v297_v58, %v1095_v28 }
 0x110   :  { %v299_v63 = vpop.f32.mrf.mxu0 }
 0x111   :  { %572 = vst [vmem:[%s1278_s3 + $0x20] sm:$0xff] %v539_v60  ;;  %v540_v0 = vmax.f32 %v455_v61, 0.0  ;;  %v459_v1 = vadd.f32 %v458_v19, %v298_v62  ;;  %v300_v3 = vadd.f32 %v299_v63, %v1099_v30 }
 0x112   :  { %v303_v2 = vpop.f32.mrf.mxu0 }
 0x113   :  { %573 = vst.msk [vmem:[%s1278_s3 + $0x28] sm:$0xff] %vm568_vm1, %v540_v0  ;;  %v541_v5 = vmax.f32 %v459_v1, 0.0  ;;  %v461_v6 = vadd.f32 %v460_v21, %v300_v3  ;;  %v304_v7 = vadd.f32 %v303_v2, %v1095_v28 }
 0x114   :  { %v305_v8 = vpop.f32.mrf.mxu0 }
 0x115   :  { %574 = vst [vmem:[%s1278_s3 + $0x30] sm:$0xff] %v541_v5  ;;  %v542_v9 = vmax.f32 %v461_v6, 0.0  ;;  %v465_v10 = vadd.f32 %v464_v22, %v304_v7  ;;  %v306_v11 = vadd.f32 %v305_v8, %v1099_v30  ;;  %v502_v22 = vpop.f32.mrf.mxu1 }
 0x116   :  { %v309_v12 = vpop.f32.mrf.mxu0 }
 0x117   :  { %575 = vst.msk [vmem:[%s1278_s3 + $0x38] sm:$0xff] %vm568_vm1, %v542_v9  ;;  %v543_v14 = vmax.f32 %v465_v10, 0.0  ;;  %v467_v15 = vadd.f32 %v1091_v25, %v306_v11  ;;  %v310_v16 = vadd.f32 %v309_v12, %v1095_v28  ;;  %v506_v36 = vpop.f32.mrf.mxu1 }
 0x118   :  { %v311_v17 = vpop.f32.mrf.mxu0 }
 0x119   :  { %576 = vst [vmem:[%s1278_s3 + $0x40] sm:$0xff] %v543_v14  ;;  %v544_v18 = vmax.f32 %v467_v15, 0.0  ;;  %v471_v19 = vadd.f32 %v1093_v27, %v310_v16  ;;  %v312_v20 = vadd.f32 %v311_v17, %v1099_v30  ;;  %v508_v45 = vpop.f32.mrf.mxu1 }
 0x11a   :  { %v315_v21 = vpop.f32.mrf.mxu0 }
 0x11b   :  { %577 = vst.msk [vmem:[%s1278_s3 + $0x48] sm:$0xff] %vm568_vm1, %v544_v18  ;;  %v545_v23 = vmax.f32 %v471_v19, 0.0  ;;  %v473_v24 = vadd.f32 %v1097_v29, %v312_v20  ;;  %v316_v25 = vadd.f32 %v315_v21, %v1095_v28  ;;  %v512_v53 = vpop.f32.mrf.mxu1 }
 0x11c   :  { %v317_v26 = vpop.f32.mrf.mxu0 }
 0x11d   :  { %578 = vst [vmem:[%s1278_s3 + $0x50] sm:$0xff] %v545_v23  ;;  %v546_v27 = vmax.f32 %v473_v24, 0.0  ;;  %v477_v31 = vadd.f32 %v1101_v32, %v316_v25  ;;  %v318_v33 = vadd.f32 %v317_v26, %v1099_v30  ;;  %v514_v62 = vpop.f32.mrf.mxu1 }
 0x11e   :  { %v321_v34 = vpop.f32.mrf.mxu0 }
 0x11f   :  { %579 = vst.msk [vmem:[%s1278_s3 + $0x58] sm:$0xff] %vm568_vm1, %v546_v27  ;;  %v547_v29 = vmax.f32 %v477_v31, 0.0  ;;  %v479_v37 = vadd.f32 %v1104_v35, %v318_v33  ;;  %v322_v38 = vadd.f32 %v321_v34, %v1095_v28  ;;  %v518_v6 = vpop.f32.mrf.mxu1 }
 0x120   :  { %v323_v40 = vpop.f32.mrf.mxu0 }
 0x121   :  { %580 = vst [vmem:[%s1278_s3 + $0x60] sm:$0xff] %v547_v29  ;;  %v548_v32 = vmax.f32 %v479_v37, 0.0  ;;  %v483_v41 = vadd.f32 %v1107_v39, %v322_v38  ;;  %v324_v42 = vadd.f32 %v323_v40, %v1099_v30  ;;  %v520_v14 = vpop.f32.mrf.mxu1 }
 0x122   :  { %v327_v43 = vpop.f32.mrf.mxu0 }
 0x123   :  { %581 = vst.msk [vmem:[%s1278_s3 + $0x68] sm:$0xff] %vm568_vm1, %v548_v32  ;;  %v549_v35 = vmax.f32 %v483_v41, 0.0  ;;  %v485_v46 = vadd.f32 %v1110_v44, %v324_v42  ;;  %v328_v47 = vadd.f32 %v327_v43, %v1095_v28  ;;  %v524_v23 = vpop.f32.mrf.mxu1 }
 0x124   :  { %v329_v48 = vpop.f32.mrf.mxu0 }
 0x125   :  { %582 = vst [vmem:[%s1278_s3 + $0x70] sm:$0xff] %v549_v35  ;;  %v550_v39 = vmax.f32 %v485_v46, 0.0  ;;  %v489_v50 = vadd.f32 %v1116_v49, %v328_v47  ;;  %v330_v51 = vadd.f32 %v329_v48, %v1099_v30  ;;  %v526_v29 = vpop.f32.mrf.mxu1 }
 0x126   :  { %v333_v52 = vpop.f32.mrf.mxu0 }
 0x127   :  { %583 = vst.msk [vmem:[%s1278_s3 + $0x78] sm:$0xff] %vm568_vm1, %v550_v39  ;;  %v551_v44 = vmax.f32 %v489_v50, 0.0  ;;  %v491_v55 = vadd.f32 %v1123_v54, %v330_v51  ;;  %v334_v56 = vadd.f32 %v333_v52, %v1095_v28  ;;  %v530_v35 = vpop.f32.mrf.mxu1 }
 0x128   :  { %v335_v57 = vpop.f32.mrf.mxu0 }
 0x129   :  { %584 = vst [vmem:[%s1278_s3 + $0x80] sm:$0xff] %v551_v44  ;;  %v552_v49 = vmax.f32 %v491_v55, 0.0  ;;  %v495_v58 = vadd.f32 %v1129_v59, %v334_v56  ;;  %v336_v60 = vadd.f32 %v335_v57, %v1099_v30 }
 0x12a   :  { %v339_v61 = vpop.f32.mrf.mxu0 }
 0x12b   :  { %585 = vst.msk [vmem:[%s1278_s3 + $0x88] sm:$0xff] %vm568_vm1, %v552_v49  ;;  %v553_v54 = vmax.f32 %v495_v58, 0.0  ;;  %v497_v63 = vadd.f32 %v1140_v4, %v336_v60  ;;  %v340_v0 = vadd.f32 %v339_v61, %v1095_v28 }
 0x12c   :  { %v341_v1 = vpop.f32.mrf.mxu0 }
 0x12d   :  { %586 = vst [vmem:[%s1278_s3 + $0x90] sm:$0xff] %v553_v54  ;;  %v554_v59 = vmax.f32 %v497_v63, 0.0  ;;  %v501_v3 = vadd.f32 %v1151_v13, %v340_v0  ;;  %v342_v2 = vadd.f32 %v341_v1, %v1099_v30 }
 0x12e   :  { %v345_v5 = vpop.f32.mrf.mxu0 }
 0x12f   :  { %587 = vst.msk [vmem:[%s1278_s3 + $0x98] sm:$0xff] %vm568_vm1, %v554_v59  ;;  %v555_v4 = vmax.f32 %v501_v3, 0.0  ;;  %v503_v7 = vadd.f32 %v502_v22, %v342_v2  ;;  %v346_v8 = vadd.f32 %v345_v5, %v1095_v28 }
 0x130   :  { %v347_v9 = vpop.f32.mrf.mxu0 }
 0x131   :  { %588 = vst [vmem:[%s1278_s3 + $0xa0] sm:$0xff] %v555_v4  ;;  %v556_v10 = vmax.f32 %v503_v7, 0.0  ;;  %v507_v11 = vadd.f32 %v506_v36, %v346_v8  ;;  %v348_v12 = vadd.f32 %v347_v9, %v1099_v30 }
 0x132   :  { %v351_v13 = vpop.f32.mrf.mxu0 }
 0x133   :  { %589 = vst.msk [vmem:[%s1278_s3 + $0xa8] sm:$0xff] %vm568_vm1, %v556_v10  ;;  %v557_v15 = vmax.f32 %v507_v11, 0.0  ;;  %v509_v16 = vadd.f32 %v508_v45, %v348_v12  ;;  %v352_v17 = vadd.f32 %v351_v13, %v1095_v28 }
 0x134   :  { %v353_v18 = vpop.f32.mrf.mxu0 }
 0x135   :  { %590 = vst [vmem:[%s1278_s3 + $0xb0] sm:$0xff] %v557_v15  ;;  %v558_v19 = vmax.f32 %v509_v16, 0.0  ;;  %v513_v20 = vadd.f32 %v512_v53, %v352_v17  ;;  %v354_v21 = vadd.f32 %v353_v18, %v1099_v30  ;;  %v532_v53 = vpop.f32.mrf.mxu1 }
 0x136   :  { %v357_v22 = vpop.f32.mrf.mxu0 }
 0x137   :  { %591 = vst.msk [vmem:[%s1278_s3 + $0xb8] sm:$0xff] %vm568_vm1, %v558_v19  ;;  %v559_v24 = vmax.f32 %v513_v20, 0.0  ;;  %v515_v25 = vadd.f32 %v514_v62, %v354_v21  ;;  %v358_v26 = vadd.f32 %v357_v22, %v1095_v28 }
 0x138   :  { %v359_v27 = vpop.f32.mrf.mxu0 }
 0x139   :  { %592 = vst [vmem:[%s1278_s3 + $0xc0] sm:$0xff] %v559_v24  ;;  %v560_v31 = vmax.f32 %v515_v25, 0.0  ;;  %v519_v33 = vadd.f32 %v518_v6, %v358_v26  ;;  %v360_v34 = vadd.f32 %v359_v27, %v1099_v30 }
 0x13a   :  { %v363_v36 = vpop.f32.mrf.mxu0 }
 0x13b   :  { %593 = vst.msk [vmem:[%s1278_s3 + $0xc8] sm:$0xff] %vm568_vm1, %v560_v31  ;;  %v561_v37 = vmax.f32 %v519_v33, 0.0  ;;  %v521_v38 = vadd.f32 %v520_v14, %v360_v34  ;;  %v364_v40 = vadd.f32 %v363_v36, %v1095_v28 }
 0x13c   :  { %v365_v32 = vpop.f32.mrf.mxu0 }
 0x13d   :  { %594 = vst [vmem:[%s1278_s3 + $0xd0] sm:$0xff] %v561_v37  ;;  %v562_v41 = vmax.f32 %v521_v38, 0.0  ;;  %v525_v42 = vadd.f32 %v524_v23, %v364_v40  ;;  %v366_v43 = vadd.f32 %v365_v32, %v1099_v30 }
 0x13e   :  { %v369_v45 = vpop.f32.mrf.mxu0 }
 0x13f   :  { %595 = vst.msk [vmem:[%s1278_s3 + $0xd8] sm:$0xff] %vm568_vm1, %v562_v41  ;;  %v563_v46 = vmax.f32 %v525_v42, 0.0  ;;  %v527_v47 = vadd.f32 %v526_v29, %v366_v43  ;;  %v370_v48 = vadd.f32 %v369_v45, %v1095_v28 }
 0x140   :  { %v371_v39 = vpop.f32.mrf.mxu0 }
 0x141   :  { %596 = vst [vmem:[%s1278_s3 + $0xe0] sm:$0xff] %v563_v46  ;;  %v564_v50 = vmax.f32 %v527_v47, 0.0  ;;  %v531_v51 = vadd.f32 %v530_v35, %v370_v48  ;;  %v372_v52 = vadd.f32 %v371_v39, %v1099_v30 }
 0x143   :  { %597 = vst.msk [vmem:[%s1278_s3 + $0xe8] sm:$0xff] %vm568_vm1, %v564_v50  ;;  %v565_v44 = vmax.f32 %v531_v51, 0.0  ;;  %v533_v55 = vadd.f32 %v532_v53, %v372_v52 }
 0x145   :  { %598 = vst [vmem:[%s1278_s3 + $0xf0] sm:$0xff] %v565_v44  ;;  %v566_v28 = vmax.f32 %v533_v55, 0.0 }
 0x147   :  { %599 = vst.msk [vmem:[%s1278_s3 + $0xf8] sm:$0xff] %vm568_vm1, %v566_v28 }

// kernel: hrnet_w48_up4_head_forward.3
= control target key start
LH: loop header
LB: loop body
LE: loop exit
PB: predicated region body
PF: predicated region fallthrough
CT: control target
= control target key end

     0   :  { %s7674_s15 = smov 0   ;;  %s7676_s16 = smov 0   ;;  %s11799_s0 = inlined_call_operand.vmem [shape: f32[2,10,10,180], index: 0, kind: input, shape index: {}, may-alias: {0,1}]   ;;  %s11800_s1 = inlined_call_operand.vmem [shape: f32[2,10,10,180], index: 1, kind: input, shape index: {}, may-alias: {0,1}]   ;;  %s11801_s2 = inlined_call_operand.vmem [shape: f32[9,180,2], index: 2, kind: input, shape index: {}]   ;;  %s11802_s3 = inlined_call_operand.vmem [shape: f32[1,2], index: 3, kind: input, shape index: {}]   ;;  %s11803_s4 = inlined_call_operand.vmem [shape: f32[2,2,256], index: 4, kind: output, shape index: {}]  }
   0x1   :  { %s7678_s17 = smov 0  }
   0x2 LB: > { %s26_s18 = sadd.s32 1, %s7640_s16  ;;  %p7003_p0 = scmp.ge.s32.totalorder %s7644_s17, 1  ;;  %s7644_s17 = sphi %s7678_s17, %s14_s17   ;;  %s7640_s16 = sphi %s7676_s16, %s12748_s16   ;;  %s7636_s15 = sphi %s7674_s15, %s12747_s15  }
   0x3   : > { %p28_p1 = scmp.ge.s32.totalorder %s26_s18, 2  ;;  %p222_p2 = scmp.lt.s32.totalorder %s7644_s17, 3 }
   0x5   : > { %s12750_s18 = smov (%p28_p1, %s26_s18), 0  ;;  %p223_p3 = pnand %p7003_p0, %p222_p2 }
   0x7   : > { %226 = sbr.rel (%p223_p3) target bundleno = 1008 (0x3f0), region = 36 }
   0xc   : > { %v7032_v0 = vld [vmem:[%s11801_s2 + $0x130] sm:$0xff]  ;;  %p282_p4 = scmp.lt.s32.totalorder %s7636_s15, 1  ;;  %v408_v1 = vlaneseq  ;;  %v11809_v2 = vmov 0.0   ;;  %v7031_v3 = vld [vmem:[%s11801_s2 + $0x128] sm:$0xff]  ;;  %v7647_v4 = vmov 1966171168  }
   0xd   : > { %7506 = vmatprep.subr.mxu1 %v11809_v2  ;;  %3395 = vmatprep.subr.mxu0 %v11809_v2  ;;  %v406_v5 = vunpack.c.l.s4 %v7647_v4  ;;  %v7030_v7 = vld [vmem:[%s11801_s2 + $0x120] sm:$0xff]  ;;  %v7029_v9 = vld [vmem:[%s11801_s2 + $0x118] sm:$0xff]  ;;  %v7648_v10 = vmov 1983009808   ;;  %v7028_v13 = vld [vmem:[%s11801_s2 + $0x110] sm:$0xff]  ;;  %vm3391_vm0 = vcmask 1043456  }
   0xe   : > { %7529 = vmatpush1.msra.mxu1 %v7032_v0  ;;  %3396 = vmatpush1.msra.mxu0 %v7032_v0  ;;  %s12752_s15 = smov (!%p282_p4, %s7636_s15), 1  ;;  %v409_v6 = vshrl.u32 %v408_v1, 7  ;;  %v1935_v11 = vunpack.c.l.s4 %v7648_v10  ;;  %v7027_v14 = vld [vmem:[%s11801_s2 + $0x108] sm:$0xff]  ;;  %v7026_v23 = vld [vmem:[%s11801_s2 + $0x100] sm:$0xff]  ;;  %v7025_v29 = vld [vmem:[%s11801_s2 + $0xf8] sm:$0xff]  ;;  %vm3354_vm1 = vcmask 424960  }
   0xf   : > { %7507 = vmatprep.subr.mxu1 %v11809_v2  ;;  %3397 = vmatprep.subr.mxu0 %v11809_v2  ;;  %s7552_s25 = smul.u32 320, %s12752_s15  ;;  %v407_v8 = vunpack.c.0.s8 %v406_v5  ;;  %v7024_v36 = vld [vmem:[%s11801_s2 + $0xf0] sm:$0xff]  ;;  %v7023_v43 = vld [vmem:[%s11801_s2 + $0xe8] sm:$0xff]  ;;  %v7022_v50 = vld [vmem:[%s11801_s2 + $0xe0] sm:$0xff]  ;;  %vm2733_vm2 = vcmask 1040384   ;;  %vm2734_vm3 = vcmask 1042434  }
  0x10   : > { %7530 = vmatpush1.msra.mxu1 %v7031_v3  ;;  %3398 = vmatpush1.msra.mxu0 %v7031_v3  ;;  %v1936_v17 = vunpack.c.0.s8 %v1935_v11  ;;  %v7739_v21 = vsub.s32 0, %v409_v6  ;;  %v7747_v24 = vsub.s32 1, %v409_v6  ;;  %v7021_v57 = vld [vmem:[%s11801_s2 + $0xd8] sm:$0xff]  ;;  %v7020_v0 = vld [vmem:[%s11801_s2 + $0xd0] sm:$0xff]  ;;  %vm2736_vm4 = vcmask 1044484   ;;  %vm8937_vm6 = vmor %vm2733_vm2, %vm2734_vm3  ;;  %s7505_s26 = sshll.u32 %s12752_s15, 2 }
  0x11   : > { %7508 = vmatprep.subr.mxu1 %v11809_v2  ;;  %3399 = vmatprep.subr.mxu0 %v11809_v2  ;;  %s7718_s30 = scalar_lea.vmem %s11799_s0, %s7552_s25  ;;  %v7720_v12 = vsub.s32 %v407_v8, %v409_v6  ;;  %v7019_v8 = vld [vmem:[%s11801_s2 + $0xc8] sm:$0xff]  ;;  %s7504_s13 = sadd.s32 256, %s7552_s25  ;;  %vm2738_vm5 = vcmask 1046534   ;;  %vm2737_vm7 = vmor %vm8937_vm6, %vm2736_vm4 }
  0x12   : > { %7531 = vmatpush1.msra.mxu1 %v7030_v7  ;;  %3400 = vmatpush1.msra.mxu0 %v7030_v7  ;;  %v7582_v15 = vld [vmem:[%s7718_s30 + $0x80] ss:$8 sps:$4 sm:$0xff]   ;;  %v7584_v16 = vld [vmem:[%s7718_s30 + $0x84] ss:$8 sps:$4 sm:$0xff]   ;;  %12176 = vst [vmem:[#allocation3_spill] sm:$0xff] %v7739_v21  ;;  %12177 = vst [vmem:[#allocation4_spill] sm:$0xff] %v7747_v24  ;;  %v7762_v30 = vsub.s32 %v1936_v17, %v409_v6  ;;  %s7935_s23 = scalar_lea.vmem %s11800_s1, %s7504_s13  ;;  %s321_s29 = scalar_lea.vmem %s11803_s4, %s7505_s26 }
  0x13   : > { %12175 = vst [vmem:[#allocation2_spill] sm:$0xff] %v7720_v12  ;;  %7509 = vmatprep.subr.mxu1 %v11809_v2  ;;  %3401 = vmatprep.subr.mxu0 %v11809_v2  ;;  %v7585_v18 = vld [vmem:[%s7718_s30] ss:$8 sps:$4 sm:$0xff]   ;;  %v703_v19 = vrot.slane %v7582_v15, %v7720_v12  ;;  %v7737_v20 = vrot.slane %v7584_v16, %v7720_v12  ;;  %v7587_v22 = vld [vmem:[%s7718_s30 + $0x4] ss:$8 sps:$4 sm:$0xff]   ;;  %vm8984_vm8 = vmor %vm2737_vm7, %vm2738_vm5 }
  0x14   : > { %7532 = vmatpush1.msra.mxu1 %v7029_v9  ;;  %3402 = vmatpush1.msra.mxu0 %v7029_v9  ;;  %v411_v25 = vrot.slane %v7585_v18, %v7720_v12  ;;  %12179 = vst [vmem:[#allocation6_spill] sm:$0xff] %v7762_v30  ;;  %v7765_v31 = vrot.slane %v7587_v22, %v7720_v12  ;;  %v7018_v15 = vld [vmem:[%s11801_s2 + $0xc0] sm:$0xff] }
  0x15   : > { %7510 = vmatprep.subr.mxu1 %v11809_v2  ;;  %3403 = vmatprep.subr.mxu0 %v11809_v2  ;;  %v711_v26 = vcombine.high %v703_v19, %v703_v19  ;;  %v7751_v27 = vrot.slane %v703_v19, %v7720_v12  ;;  %v7755_v28 = vrot.slane %v7737_v20, %v7720_v12 }
  0x16   : > { %7533 = vmatpush1.msra.mxu1 %v7028_v13  ;;  %3404 = vmatpush1.msra.mxu0 %v7028_v13  ;;  %v419_v32 = vcombine.high %v411_v25, %v411_v25  ;;  %v7780_v38 = vrot.slane %v411_v25, %v7720_v12  ;;  %v7784_v39 = vrot.slane %v7765_v31, %v7720_v12  ;;  %v7588_v25 = vld [vmem:[%s7718_s30 + $0x90] ss:$8 sps:$4 sm:$0x33]  }
  0x17   : > { %7511 = vmatprep.subr.mxu1 %v11809_v2  ;;  %3405 = vmatprep.subr.mxu0 %v11809_v2  ;;  %12178 = vst [vmem:[#allocation5_spill] sm:$0xff] %v7751_v27  ;;  %v733_v33 = vrot.slane %v711_v26, %v7720_v12  ;;  %v741_v34 = vcombine.high %v7751_v27, %v7751_v27  ;;  %v7017_v26 = vld [vmem:[%s11801_s2 + $0xb8] sm:$0xff] }
  0x18   : > { %7534 = vmatpush1.msra.mxu1 %v7027_v14  ;;  %3406 = vmatpush1.msra.mxu0 %v7027_v14  ;;  %v1488_v35 = vrot.slane %v7755_v28, %v7739_v21  ;;  %v1492_v37 = vrot.slane %v7755_v28, %v7747_v24  ;;  %v441_v53 = vrot.slane %v419_v32, %v7720_v12 }
  0x19   : > { %7512 = vmatprep.subr.mxu1 %v11809_v2  ;;  %3407 = vmatprep.subr.mxu0 %v11809_v2  ;;  %v743_v40 = vcombine.high %v733_v33, %v733_v33  ;;  %v1464_v41 = vrot.slane %v733_v33, %v7739_v21  ;;  %v1468_v42 = vrot.slane %v733_v33, %v7747_v24 }
  0x1a   : > { %7535 = vmatpush1.msra.mxu1 %v7026_v23  ;;  %3408 = vmatpush1.msra.mxu0 %v7026_v23  ;;  %v1472_v44 = vrot.slane %v741_v34, %v7739_v21  ;;  %v1476_v45 = vrot.slane %v741_v34, %v7747_v24  ;;  %v2285_v46 = vcombine.low %v1488_v35, %v1492_v37  ;;  %v7039_v34 = vld [vmem:[%s11801_s2 + $0x168] sm:$0xf] }
  0x1b   : > { %7513 = vmatprep.subr.mxu1 %v11809_v2  ;;  %3409 = vmatprep.subr.mxu0 %v11809_v2  ;;  %v1480_v47 = vrot.slane %v743_v40, %v7739_v21  ;;  %v1484_v48 = vrot.slane %v743_v40, %v7747_v24  ;;  %v2261_v49 = vcombine.low %v1464_v41, %v1468_v42 }
  0x1c   : > { %7536 = vmatpush1.msra.mxu1 %v7025_v29  ;;  %3410 = vmatpush1.msra.mxu0 %v7025_v29  ;;  %v2269_v51 = vcombine.low %v1472_v44, %v1476_v45  ;;  %v7803_v52 = vrot.slane %v2285_v46, %v7762_v30  ;;  %v449_v56 = vcombine.high %v7780_v38, %v7780_v38 }
  0x1d   : > { %7514 = vmatprep.subr.mxu1 %v11809_v2  ;;  %3411 = vmatprep.subr.mxu0 %v11809_v2  ;;  %v7807_v54 = vrot.slane %v2261_v49, %v7762_v30  ;;  %v2277_v55 = vcombine.low %v1480_v47, %v1484_v48  ;;  %v451_v59 = vcombine.high %v441_v53, %v441_v53  ;;  %v7037_v47 = vld [vmem:[%s11801_s2 + $0x158] sm:$0xff] }
  0x1e   : > { %7537 = vmatpush1.msra.mxu1 %v7024_v36  ;;  %3412 = vmatpush1.msra.mxu0 %v7024_v36  ;;  %12180 = vst [vmem:[#allocation7_spill] sm:$0xff] %v7803_v52  ;;  %v7817_v58 = vrot.slane %v2269_v51, %v7762_v30  ;;  %v1144_v60 = vrot.slane %v441_v53, %v7739_v21 }
  0x1f   : > { %7515 = vmatprep.subr.mxu1 %v11809_v2  ;;  %3413 = vmatprep.subr.mxu0 %v11809_v2  ;;  %12181 = vst [vmem:[#allocation8_spill] sm:$0xff] %v7807_v54  ;;  %v7821_v61 = vrot.slane %v2277_v55, %v7762_v30  ;;  %v1148_v62 = vrot.slane %v441_v53, %v7747_v24 }
  0x20   : > { %7538 = vmatpush1.msra.mxu1 %v7023_v43  ;;  %3414 = vmatpush1.msra.mxu0 %v7023_v43  ;;  %12182 = vst [vmem:[#allocation9_spill] sm:$0xff] %v7817_v58  ;;  %v1152_v63 = vrot.slane %v449_v56, %v7739_v21  ;;  %v3156_v1 = vcombine.low %v7807_v54, %v7817_v58 }
  0x21   : > { %7516 = vmatprep.subr.mxu1 %v11809_v2  ;;  %3415 = vmatprep.subr.mxu0 %v11809_v2  ;;  %12183 = vst [vmem:[#allocation10_spill] sm:$0xff] %v7821_v61  ;;  %v1156_v3 = vrot.slane %v449_v56, %v7747_v24  ;;  %v1160_v4 = vrot.slane %v451_v59, %v7739_v21  ;;  %v7589_v56 = vld [vmem:[%s7718_s30 + $0x10] ss:$8 sps:$4 sm:$0x33]  }
  0x22   : > { %7539 = vmatpush1.msra.mxu1 %v7022_v50  ;;  %3416 = vmatpush1.msra.mxu0 %v7022_v50  ;;  %v3157_v5 = vcombine.low %v7821_v61, %v7803_v52  ;;  %v1164_v6 = vrot.slane %v451_v59, %v7747_v24  ;;  %v1168_v7 = vrot.slane %v7784_v39, %v7739_v21  ;;  %v7603_v61 = vld [vmem:[%s7718_s30 + $0x44] ss:$8 sps:$4 sm:$0xff]  }
  0x23   : > { %7517 = vmatprep.subr.mxu1 %v11809_v2  ;;  %3417 = vmatprep.subr.mxu0 %v11809_v2  ;;  %v1172_v9 = vrot.slane %v7784_v39, %v7747_v24  ;;  %v1941_v10 = vcombine.low %v1144_v60, %v1148_v62  ;;  %v3164_v11 = vrot.slane %v3156_v1, %v7762_v30 }
  0x24   : > { %7540 = vmatpush1.msra.mxu1 %v7021_v57  ;;  %3418 = vmatpush1.msra.mxu0 %v7021_v57  ;;  %v1949_v13 = vcombine.low %v1152_v63, %v1156_v3  ;;  %v1957_v14 = vcombine.low %v1160_v4, %v1164_v6  ;;  %v712_v18 = vcombine.high %v7737_v20, %v7737_v20  ;;  %v7036_v57 = vld [vmem:[%s11801_s2 + $0x150] sm:$0xff]  ;;  %v7035_v3 = vld [vmem:[%s11801_s2 + $0x148] sm:$0xff] }
  0x25   : > { %7518 = vmatprep.subr.mxu1 %v11809_v2  ;;  %3419 = vmatprep.subr.mxu0 %v11809_v2  ;;  %v7853_v16 = vrot.slane %v1941_v10, %v7762_v30  ;;  %v1965_v17 = vcombine.low %v1168_v7, %v1172_v9  ;;  %v3171_v19 = vrot.slane %v3157_v5, %v7762_v30 }
  0x26   : > { %7541 = vmatpush1.msra.mxu1 %v7020_v0  ;;  %3420 = vmatpush1.msra.mxu0 %v7020_v0  ;;  %v7859_v22 = vrot.slane %v1949_v13, %v7762_v30  ;;  %v7862_v23 = vrot.slane %v1957_v14, %v7762_v30  ;;  %v740_v29 = vrot.slane %v712_v18, %v7720_v12 }
  0x27   : > { %7519 = vmatprep.subr.mxu1 %v11809_v2  ;;  %3421 = vmatprep.subr.mxu0 %v11809_v2  ;;  %v7871_v20 = vrot.slane %v1965_v17, %v7762_v30  ;;  %v742_v33 = vcombine.high %v7755_v28, %v7755_v28  ;;  %v420_v35 = vcombine.high %v7765_v31, %v7765_v31  ;;  %v7038_v31 = vld [vmem:[%s11801_s2 + $0x160] sm:$0xff] }
  0x28   : > { %7542 = vmatpush1.msra.mxu1 %v7019_v8  ;;  %3422 = vmatpush1.msra.mxu0 %v7019_v8  ;;  %v3012_v32 = vcombine.low %v7853_v16, %v7859_v22  ;;  %v7887_v37 = vcombine.high %v3164_v11, %v3171_v19  ;;  %v744_v28 = vcombine.high %v740_v29, %v740_v29 }
  0x29   : > { %7520 = vmatprep.subr.mxu1 %v11809_v2  ;;  %3423 = vmatprep.subr.mxu0 %v11809_v2  ;;  %v3013_v36 = vcombine.low %v7862_v23, %v7871_v20  ;;  %v7890_v40 = vrot.slane %v7588_v25, %v7720_v12  ;;  %v7897_v41 = vcombine.low %v3164_v11, %v3171_v19  ;;  %v7034_v11 = vld [vmem:[%s11801_s2 + $0x140] sm:$0xff] }
  0x2a   : > { %7543 = vmatpush1.msra.mxu1 %v7018_v15  ;;  %3424 = vmatpush1.msra.mxu0 %v7018_v15  ;;  %12184 = vst [vmem:[#allocation11_spill] sm:$0xff] %v7887_v37  ;;  %v1496_v42 = vrot.slane %v740_v29, %v7739_v21  ;;  %v1500_v43 = vrot.slane %v740_v29, %v7747_v24  ;;  %v7033_v29 = vld [vmem:[%s11801_s2 + $0x138] sm:$0xff] }
  0x2b   : > { %7521 = vmatprep.subr.mxu1 %v11809_v2  ;;  %3425 = vmatprep.subr.mxu0 %v11809_v2  ;;  %12185 = vst [vmem:[#allocation12_spill] sm:$0xff] %v7890_v40  ;;  %12186 = vst [vmem:[#allocation13_spill] sm:$0xff] %v7897_v41  ;;  %v7904_v44 = vrot.slane %v3012_v32, %v7762_v30  ;;  %v760_v45 = vrot.slane %v7890_v40, %v7720_v12  ;;  %v11804_v32 = vrot.slane %v7853_v16, 7 }
  0x2c   : > { %7544 = vmatpush1.msra.mxu1 %v7017_v26  ;;  %3426 = vmatpush1.msra.mxu0 %v7017_v26  ;;  %v1504_v46 = vrot.slane %v742_v33, %v7739_v21  ;;  %v7917_v48 = vrot.slane %v3013_v36, %v7762_v30  ;;  %v1508_v50 = vrot.slane %v742_v33, %v7747_v24  ;;  %v11807_v36 = vrot.slane %v7859_v22, 7 }
  0x2d   : > { %7522 = vmatprep.subr.mxu1 %v11809_v2  ;;  %3445 = vmatprep.subr.mxu0 %v11809_v2  ;;  %v1512_v51 = vrot.slane %v744_v28, %v7739_v21  ;;  %v1516_v53 = vrot.slane %v744_v28, %v7747_v24  ;;  %v1520_v55 = vrot.slane %v760_v45, %v7739_v21 }
  0x2e   : > { %7545 = vmatpush2.msk.msra.mxu1 %vm3391_vm0, %v7039_v34  ;;  %7040 = vmatpush2.msk.msra.mxu0 %vm3391_vm0, %v7039_v34  ;;  %v1524_v59 = vrot.slane %v760_v45, %v7747_v24  ;;  %v2293_v60 = vcombine.low %v1496_v42, %v1500_v43  ;;  %v2301_v62 = vcombine.low %v1504_v46, %v1508_v50  ;;  %v11806_v43 = vrot.slane %v7862_v23, 7 }
  0x2f   : > { %7523 = vmatprep.subr.mxu1 %v11809_v2  ;;  %3447 = vmatprep.subr.mxu0 %v11809_v2  ;;  %v2309_v63 = vcombine.low %v1512_v51, %v1516_v53  ;;  %v448_v0 = vrot.slane %v420_v35, %v7720_v12  ;;  %v450_v1 = vcombine.high %v7784_v39, %v7784_v39  ;;  %v11805_v50 = vrot.slane %v7871_v20, 7  ;;  %v2980_v51 = vld [vmem:[%s11801_s2 + $0x78] sm:$0xff] }
  0x30   : > { %7546 = vmatpush2.msra.mxu1 %v7038_v31  ;;  %3448 = vmatpush2.msra.mxu0 %v7038_v31  ;;  %v7947_v5 = vrot.slane %v2293_v60, %v7762_v30  ;;  %v7950_v6 = vrot.slane %v2301_v62, %v7762_v30  ;;  %v2317_v7 = vcombine.low %v1520_v55, %v1524_v59 }
  0x31   : > { %7524 = vmatprep.subr.mxu1 %v11809_v2  ;;  %3449 = vmatprep.subr.mxu0 %v11809_v2  ;;  %v7954_v8 = vrot.slane %v2309_v63, %v7762_v30  ;;  %v452_v9 = vcombine.high %v448_v0, %v448_v0  ;;  %v7957_v10 = vrot.slane %v7589_v56, %v7720_v12  ;;  %v8018_v63 = vrot.slane %v11807_v36, 2 }
  0x32   : > { %7547 = vmatpush2.msra.mxu1 %v7037_v47  ;;  %3450 = vmatpush2.msra.mxu0 %v7037_v47  ;;  %12187 = vst [vmem:[#allocation14_spill] sm:$0xff] %v7947_v5  ;;  %12188 = vst [vmem:[#allocation15_spill] sm:$0xff] %v7950_v6  ;;  %v3029_v14 = vcombine.high %v7904_v44, %v7917_v48  ;;  %v7968_v15 = vrot.slane %v2317_v7, %v7762_v30  ;;  %v7590_v47 = vld [vmem:[%s7718_s30 + $0xa0] ss:$8 sps:$4 sm:$0xff]  }
  0x33   : > { %7525 = vmatprep.subr.mxu1 %v11809_v2  ;;  %3451 = vmatprep.subr.mxu0 %v11809_v2  ;;  %12189 = vst [vmem:[#allocation16_spill] sm:$0xff] %v7954_v8  ;;  %v3174_v17 = vcombine.low %v7947_v5, %v7950_v6  ;;  %v3028_v19 = vcombine.low %v7904_v44, %v7917_v48  ;;  %v7592_v48 = vld [vmem:[%s7718_s30 + $0xa4] ss:$8 sps:$4 sm:$0xff]  }
  0x34   : > { %7548 = vmatpush2.msra.mxu1 %v7036_v57  ;;  %3452 = vmatpush2.msra.mxu0 %v7036_v57  ;;  %12190 = vst [vmem:[#allocation17_spill] sm:$0xff] %v7968_v15  ;;  %v468_v25 = vrot.slane %v7957_v10, %v7720_v12  ;;  %v1176_v26 = vrot.slane %v448_v0, %v7739_v21  ;;  %v8009_v57 = vrot.slane %v11804_v32, 2 }
  0x35   : > { %7526 = vmatprep.subr.mxu1 %v11809_v2  ;;  %3453 = vmatprep.subr.mxu0 %v11809_v2  ;;  %v3175_v33 = vcombine.low %v7954_v8, %v7968_v15  ;;  %v3182_v34 = vrot.slane %v3174_v17, %v7762_v30  ;;  %v1180_v35 = vrot.slane %v448_v0, %v7747_v24  ;;  %v7121_v0 = vld [vmem:[%s11801_s2 + $0x1e8] sm:$0xff] }
  0x36   : > { %7549 = vmatpush2.msra.mxu1 %v7035_v3  ;;  %3454 = vmatpush2.msra.mxu0 %v7035_v3  ;;  %v1184_v28 = vrot.slane %v450_v1, %v7739_v21  ;;  %v1188_v31 = vrot.slane %v450_v1, %v7747_v24  ;;  %v1192_v42 = vrot.slane %v452_v9, %v7739_v21 }
  0x37   : > { %7527 = vmatprep.subr.mxu1 %v11809_v2  ;;  %3455 = vmatprep.subr.mxu0 %v11809_v2  ;;  %v3189_v44 = vrot.slane %v3175_v33, %v7762_v30  ;;  %v1196_v45 = vrot.slane %v452_v9, %v7747_v24  ;;  %v1200_v46 = vrot.slane %v468_v25, %v7739_v21  ;;  %v7593_v9 = vld [vmem:[%s7718_s30 + $0x20] ss:$8 sps:$4 sm:$0xff]  }
  0x38   : > { %7550 = vmatpush2.msra.mxu1 %v7034_v11  ;;  %3456 = vmatpush2.msra.mxu0 %v7034_v11  ;;  %v1204_v53 = vrot.slane %v468_v25, %v7747_v24  ;;  %v1973_v55 = vcombine.low %v1176_v26, %v1180_v35  ;;  %v1981_v56 = vcombine.low %v1184_v28, %v1188_v31  ;;  %v8034_v11 = vrot.slane %v11806_v43, 2  ;;  %v7120_v35 = vld [vmem:[%s11801_s2 + $0x1e0] sm:$0xff] }
  0x39   : > { %7528 = vmatprep.subr.mxu1 %v11809_v2  ;;  %3457 = vmatprep.subr.mxu0 %v11809_v2  ;;  %v8012_v59 = vcombine.high %v3182_v34, %v3189_v44  ;;  %v1989_v60 = vcombine.low %v1192_v42, %v1196_v45  ;;  %v8014_v62 = vcombine.low %v3182_v34, %v3189_v44  ;;  %v8045_v26 = vrot.slane %v11805_v50, 2  ;;  %v2979_v34 = vld [vmem:[%s11801_s2 + $0x70] sm:$0xff]  ;;  %v7595_v28 = vld [vmem:[%s7718_s30 + $0x24] ss:$8 sps:$4 sm:$0xff]  }
  0x3a   : > { %7551 = vmatpush2.msra.mxu1 %v7033_v29  ;;  %7057 = vmatprep.mubr.msk.f32.mxu1 %vm3354_vm1, %v7887_v37  ;;  %v8026_v1 = vrot.slane %v1973_v55, %v7762_v30  ;;  %v8029_v3 = vrot.slane %v1981_v56, %v7762_v30  ;;  %v1997_v7 = vcombine.low %v1200_v46, %v1204_v53 }
  0x3b   : > { %3458 = vmatpush2.msra.mxu0 %v7033_v29  ;;  %7041 = vmatprep.mubr.msk.f32.mxu0 %vm3354_vm1, %v3029_v14  ;;  %12191 = vst [vmem:[#allocation18_spill] sm:$0xff] %v8012_v59  ;;  %12192 = vst [vmem:[#allocation19_spill] sm:$0xff] %v8014_v62  ;;  %v8037_v14 = vrot.slane %v1989_v60, %v7762_v30  ;;  %v776_v17 = vrot.slane %v7590_v47, %v7720_v12 }
  0x3c   : > { %3540 = vmatmul.mubr.f32.vlgmr.msra.gmra.mxu1 %v7897_v41  ;;  %4001 = vmatprep.subr.mxu1 %v11809_v2  ;;  %v8041_v25 = vrot.slane %v7592_v48, %v7720_v12  ;;  %v8053_v29 = vrot.slane %v1997_v7, %v7762_v30  ;;  %v3030_v33 = vcombine.low %v8026_v1, %v8029_v3 }
  0x3d   : > { %3460 = vmatmul.mubr.f32.vlgmr.msra.gmra.mxu0 %v3028_v19  ;;  %4002 = vmatpush1.msra.mxu1 %v2980_v51  ;;  %v784_v42 = vcombine.high %v776_v17, %v776_v17  ;;  %v8067_v44 = vrot.slane %v776_v17, %v7720_v12  ;;  %v2978_v51 = vld [vmem:[%s11801_s2 + $0x68] sm:$0xff]  ;;  %v484_v53 = vrot.slane %v7593_v9, %v7720_v12  ;;  %v7596_v19 = vld [vmem:[%s7718_s30 + $0xb0] ss:$8 sps:$4 sm:$0x33]  }
  0x3e   : > { %4658 = vmatprep.subr.mxu0 %v11809_v2  ;;  %7058 = vmatprep.mubr.msk.f32.mxu1 %vm3354_vm1, %v8012_v59  ;;  %v8071_v45 = vrot.slane %v8041_v25, %v7720_v12  ;;  %v3031_v47 = vcombine.low %v8037_v14, %v8053_v29  ;;  %v3038_v48 = vrot.slane %v3030_v33, %v7762_v30 }
  0x3f   : > { %4003 = vmatprep.subr.mxu1 %v11809_v2  ;;  %4659 = vmatpush1.msra.mxu0 %v7121_v0  ;;  %12193 = vst [vmem:[#allocation20_spill] sm:$0xff] %v8067_v44  ;;  %v806_v56 = vrot.slane %v784_v42, %v7720_v12  ;;  %v814_v60 = vcombine.high %v8067_v44, %v8067_v44 }
  0x40   : > { %3545 = vmatmul.mubr.f32.gmra.mxu1 %v8014_v62  ;;  %4660 = vmatprep.subr.mxu0 %v11809_v2  ;;  %v1568_v0 = vrot.slane %v8071_v45, %v7739_v21  ;;  %v3045_v7 = vrot.slane %v3031_v47, %v7762_v30  ;;  %v1572_v17 = vrot.slane %v8071_v45, %v7747_v24 }
  0x41   : > { %4004 = vmatpush1.msra.mxu1 %v2979_v34  ;;  %4661 = vmatpush1.msra.mxu0 %v7120_v35  ;;  %v8094_v9 = vrot.slane %v7595_v28, %v7720_v12  ;;  %v492_v33 = vcombine.high %v484_v53, %v484_v53  ;;  %v816_v34 = vcombine.high %v806_v56, %v806_v56  ;;  %v2977_v28 = vld [vmem:[%s11801_s2 + $0x60] sm:$0xff] }
  0x42   : > { %4005 = vmatprep.subr.mxu1 %v11809_v2  ;;  %v1544_v35 = vrot.slane %v806_v56, %v7739_v21  ;;  %v1548_v42 = vrot.slane %v806_v56, %v7747_v24  ;;  %v1552_v49 = vrot.slane %v814_v60, %v7739_v21  ;;  %v3047_v55 = vcombine.high %v3038_v48, %v3045_v7 }
  0x43   : > { %4006 = vmatpush1.msra.mxu1 %v2978_v51  ;;  %v3046_v46 = vcombine.low %v3038_v48, %v3045_v7  ;;  %v1556_v47 = vrot.slane %v814_v60, %v7747_v24  ;;  %v2365_v31 = vcombine.low %v1568_v0, %v1572_v17  ;;  %4662 = vmatprep.subr.mxu0 %v11809_v2  ;;  %v7119_v48 = vld [vmem:[%s11801_s2 + $0x1d8] sm:$0xff] }
  0x44   : > { %v1560_v4 = vrot.slane %v816_v34, %v7739_v21  ;;  %v1564_v18 = vrot.slane %v816_v34, %v7747_v24  ;;  %v2341_v13 = vcombine.low %v1544_v35, %v1548_v42  ;;  %v8107_v56 = vrot.slane %v484_v53, %v7720_v12  ;;  %4007 = vmatprep.subr.mxu1 %v11809_v2  ;;  %v2976_v53 = vld [vmem:[%s11801_s2 + $0x58] sm:$0xff] }
  0x45   : > { %7042 = vmatprep.mubr.msk.f32.mxu0 %vm3354_vm1, %v3047_v55  ;;  %v2349_v51 = vcombine.low %v1552_v49, %v1556_v47  ;;  %v8115_v60 = vrot.slane %v2365_v31, %v7762_v30  ;;  %v8119_v0 = vrot.slane %v8094_v9, %v7720_v12  ;;  %v514_v7 = vrot.slane %v492_v33, %v7720_v12  ;;  %v7118_v55 = vld [vmem:[%s11801_s2 + $0x1d0] sm:$0xff] }
  0x46   : > { %3465 = vmatmul.mubr.f32.gmra.mxu0 %v3046_v46  ;;  %v8127_v34 = vrot.slane %v2341_v13, %v7762_v30  ;;  %v2357_v49 = vcombine.low %v1560_v4, %v1564_v18  ;;  %v522_v31 = vcombine.high %v8107_v56, %v8107_v56  ;;  %4008 = vmatpush1.msra.mxu1 %v2977_v28  ;;  %v11808_v33 = vrot.slane %v8026_v1, 7  ;;  %v2975_v4 = vld [vmem:[%s11801_s2 + $0x50] sm:$0xff] }
  0x47   : > { %12194 = vst [vmem:[#allocation21_spill] sm:$0xff] %v8115_v60  ;;  %v8136_v35 = vrot.slane %v2349_v51, %v7762_v30  ;;  %v524_v42 = vcombine.high %v514_v7, %v514_v7  ;;  %v1224_v46 = vrot.slane %v514_v7, %v7739_v21  ;;  %4663 = vmatpush1.msra.mxu0 %v7119_v48  ;;  %v7117_v48 = vld [vmem:[%s11801_s2 + $0x1c8] sm:$0xff] }
  0x48   : > { %12195 = vst [vmem:[#allocation22_spill] sm:$0xff] %v8127_v34  ;;  %4009 = vmatprep.subr.mxu1 %v11809_v2  ;;  %v8145_v18 = vrot.slane %v2357_v49, %v7762_v30  ;;  %v1228_v47 = vrot.slane %v514_v7, %v7747_v24  ;;  %v1232_v28 = vrot.slane %v522_v31, %v7739_v21  ;;  %v7116_v7 = vld [vmem:[%s11801_s2 + $0x1c0] sm:$0xff] }
  0x49   : > { %12196 = vst [vmem:[#allocation23_spill] sm:$0xff] %v8136_v35  ;;  %4664 = vmatprep.subr.mxu0 %v11809_v2  ;;  %4010 = vmatpush1.msra.mxu1 %v2976_v53  ;;  %v3192_v17 = vcombine.low %v8127_v34, %v8136_v35  ;;  %v1236_v39 = vrot.slane %v522_v31, %v7747_v24  ;;  %v12204_v35 = vmov 0.0  }
  0x4a   : > { %12197 = vst [vmem:[#allocation24_spill] sm:$0xff] %v8145_v18  ;;  %v1240_v49 = vrot.slane %v524_v42, %v7739_v21  ;;  %4665 = vmatpush1.msra.mxu0 %v7118_v55  ;;  %4011 = vmatprep.subr.mxu1 %v11809_v2  ;;  %v3193_v53 = vcombine.low %v8145_v18, %v8115_v60  ;;  %v7597_v60 = vld [vmem:[%s7718_s30 + $0x30] ss:$8 sps:$4 sm:$0x33]  }
  0x4b   : > { %v1244_v32 = vrot.slane %v524_v42, %v7747_v24  ;;  %v1248_v50 = vrot.slane %v8119_v0, %v7739_v21  ;;  %4666 = vmatprep.subr.mxu0 %v11809_v2  ;;  %4012 = vmatpush1.msra.mxu1 %v2975_v4  ;;  %v3200_v31 = vrot.slane %v3192_v17, %v7762_v30 }
  0x4c   : > { %v1252_v55 = vrot.slane %v8119_v0, %v7747_v24  ;;  %v2021_v43 = vcombine.low %v1224_v46, %v1228_v47  ;;  %v2029_v36 = vcombine.low %v1232_v28, %v1236_v39  ;;  %4667 = vmatpush1.msra.mxu0 %v7117_v48  ;;  %v3207_v42 = vrot.slane %v3193_v53, %v7762_v30  ;;  %v2974_v39 = vld [vmem:[%s11801_s2 + $0x48] sm:$0xff] }
  0x4d   : > { %v2037_v51 = vcombine.low %v1240_v49, %v1244_v32  ;;  %v785_v13 = vcombine.high %v8041_v25, %v8041_v25  ;;  %v815_v4 = vcombine.high %v8071_v45, %v8071_v45  ;;  %4668 = vmatprep.subr.mxu0 %v11809_v2  ;;  %v8189_v32 = vrot.slane %v7596_v19, %v7720_v12  ;;  %v2973_v19 = vld [vmem:[%s11801_s2 + $0x40] sm:$0xff] }
  0x4e   : > { %v8183_v17 = vrot.slane %v2021_v43, %v7762_v30  ;;  %v8186_v46 = vrot.slane %v2029_v36, %v7762_v30  ;;  %v2045_v47 = vcombine.low %v1248_v50, %v1252_v55  ;;  %4013 = vmatprep.subr.mxu1 %v11809_v2  ;;  %v8192_v25 = vcombine.high %v3200_v31, %v3207_v42  ;;  %v7115_v36 = vld [vmem:[%s11801_s2 + $0x1b8] sm:$0xff] }
  0x4f   : > { %12198 = vst [vmem:[#allocation25_spill] sm:$0xff] %v8189_v32  ;;  %v8195_v45 = vrot.slane %v2037_v51, %v7762_v30  ;;  %v8197_v28 = vcombine.low %v3200_v31, %v3207_v42  ;;  %v813_v48 = vrot.slane %v785_v13, %v7720_v12  ;;  %4669 = vmatpush1.msra.mxu0 %v7116_v7  ;;  %v8214_v13 = vrot.slane %v11808_v33, 2  ;;  %v7114_v42 = vld [vmem:[%s11801_s2 + $0x1b0] sm:$0xff] }
  0x50   : > { %12199 = vst [vmem:[#allocation26_spill] sm:$0xff] %v8192_v25  ;;  %v8204_v43 = vrot.slane %v2045_v47, %v7762_v30  ;;  %v3048_v50 = vcombine.low %v8183_v17, %v8186_v46  ;;  %4014 = vmatpush1.msra.mxu1 %v2974_v39  ;;  %4670 = vmatprep.subr.mxu0 %v11809_v2  ;;  %v12203_v51 = vrot.slane %v8029_v3, 7 }
  0x51   : > { %12200 = vst [vmem:[#allocation27_spill] sm:$0xff] %v8195_v45  ;;  %12201 = vst [vmem:[#allocation28_spill] sm:$0xff] %v8197_v28  ;;  %7059 = vmatprep.mubr.msk.f32.mxu1 %vm3354_vm1, %v8192_v25  ;;  %v817_v31 = vcombine.high %v813_v48, %v813_v48  ;;  %v833_v55 = vrot.slane %v8189_v32, %v7720_v12  ;;  %4015 = vmatprep.subr.mxu1 %v11809_v2  ;;  %v7601_v32 = vld [vmem:[%s7718_s30 + $0x40] ss:$8 sps:$4 sm:$0xff]  }
  0x52   : > { %12202 = vst [vmem:[#allocation29_spill] sm:$0xff] %v8204_v43  ;;  %v8218_v49 = vrot.slane %v12203_v51, 2  ;;  %v3049_v39 = vcombine.low %v8195_v45, %v8204_v43  ;;  %v3056_v47 = vrot.slane %v3048_v50, %v7762_v30  ;;  %3550 = vmatmul.mubr.f32.gmra.mxu1 %v8197_v28  ;;  %v1576_v51 = vrot.slane %v813_v48, %v7739_v21 }
  0x53   : > { %4671 = vmatpush1.msra.mxu0 %v7115_v36  ;;  %v1580_v53 = vrot.slane %v813_v48, %v7747_v24  ;;  %v1584_v7 = vrot.slane %v815_v4, %v7739_v21  ;;  %v1588_v33 = vrot.slane %v815_v4, %v7747_v24  ;;  %v1592_v2 = vrot.slane %v817_v31, %v7739_v21  ;;  %v2972_v4 = vld [vmem:[%s11801_s2 + $0x38] sm:$0xff] }
  0x54   : > { %4016 = vmatpush1.msra.mxu1 %v2973_v19  ;;  %v3063_v50 = vrot.slane %v3049_v39, %v7762_v30  ;;  %v1596_v44 = vrot.slane %v817_v31, %v7747_v24  ;;  %v1600_v36 = vrot.slane %v833_v55, %v7739_v21  ;;  %v1604_v48 = vrot.slane %v833_v55, %v7747_v24 }
  0x55   : > { %4672 = vmatprep.subr.mxu0 %v12204_v35  ;;  %v2373_v34 = vcombine.low %v1576_v51, %v1580_v53  ;;  %v2381_v19 = vcombine.low %v1584_v7, %v1588_v33  ;;  %v493_v40 = vcombine.high %v8094_v9, %v8094_v9  ;;  %v523_v39 = vcombine.high %v8119_v0, %v8119_v0  ;;  %v7113_v7 = vld [vmem:[%s11801_s2 + $0x1a8] sm:$0xff] }
  0x56   : > { %4017 = vmatprep.subr.mxu1 %v12204_v35  ;;  %v8254_v31 = vcombine.high %v3056_v47, %v3063_v50  ;;  %v8256_v15 = vcombine.low %v3056_v47, %v3063_v50  ;;  %v2389_v55 = vcombine.low %v1592_v2, %v1596_v44  ;;  %v2397_v8 = vcombine.low %v1600_v36, %v1604_v48  ;;  %v7598_v51 = vld [vmem:[%s7718_s30 + $0xc0] ss:$8 sps:$4 sm:$0xff]   ;;  %v7600_v36 = vld [vmem:[%s7718_s30 + $0xc4] ss:$8 sps:$4 sm:$0xff]  }
  0x57   : > { %4673 = vmatpush1.msra.mxu0 %v7114_v42  ;;  %v8259_v6 = vrot.slane %v2373_v34, %v7762_v30  ;;  %v8262_v33 = vrot.slane %v2381_v19, %v7762_v30  ;;  %v521_v9 = vrot.slane %v493_v40, %v7720_v12  ;;  %v8266_v0 = vrot.slane %v7597_v60, %v7720_v12  ;;  %v2971_v60 = vld [vmem:[%s11801_s2 + $0x30] sm:$0xff]  ;;  %v2970_v50 = vld [vmem:[%s11801_s2 + $0x28] sm:$0xff] }
  0x58   : > { %12205 = vst [vmem:[#allocation30_spill] sm:$0xff] %v8254_v31  ;;  %12206 = vst [vmem:[#allocation31_spill] sm:$0xff] %v8256_v15  ;;  %4018 = vmatpush1.msra.mxu1 %v2972_v4  ;;  %7043 = vmatprep.mubr.msk.f32.mxu0 %vm3354_vm1, %v8254_v31  ;;  %v8274_v2 = vrot.slane %v2389_v55, %v7762_v30  ;;  %v8277_v44 = vrot.slane %v2397_v8, %v7762_v30 }
  0x59   : > { %12207 = vst [vmem:[#allocation32_spill] sm:$0xff] %v8259_v6  ;;  %12208 = vst [vmem:[#allocation33_spill] sm:$0xff] %v8262_v33  ;;  %v1264_v34 = vrot.slane %v523_v39, %v7739_v21  ;;  %v1268_v40 = vrot.slane %v523_v39, %v7747_v24  ;;  %3470 = vmatmul.mubr.f32.gmra.mxu0 %v8256_v15  ;;  %v3210_v47 = vcombine.low %v8259_v6, %v8262_v33 }
  0x5a   : > { %12209 = vst [vmem:[#allocation34_spill] sm:$0xff] %v8266_v0  ;;  %12210 = vst [vmem:[#allocation35_spill] sm:$0xff] %v8274_v2  ;;  %v525_v8 = vcombine.high %v521_v9, %v521_v9  ;;  %4674 = vmatprep.subr.mxu0 %v12204_v35  ;;  %v3211_v48 = vcombine.low %v8274_v2, %v8277_v44  ;;  %4019 = vmatprep.subr.mxu1 %v12204_v35 }
  0x5b   : > { %12211 = vst [vmem:[#allocation36_spill] sm:$0xff] %v8277_v44  ;;  %4675 = vmatpush1.msra.mxu0 %v7113_v7  ;;  %v3218_v19 = vrot.slane %v3210_v47, %v7762_v30  ;;  %v541_v39 = vrot.slane %v8266_v0, %v7720_v12  ;;  %v1256_v55 = vrot.slane %v521_v9, %v7739_v21  ;;  %v7106_v44 = vld [vmem:[%s11801_s2 + $0x170] sm:$0xff] }
  0x5c   : > { %v1260_v53 = vrot.slane %v521_v9, %v7747_v24  ;;  %4020 = vmatpush1.msra.mxu1 %v2971_v60  ;;  %v3225_v4 = vrot.slane %v3211_v48, %v7762_v30  ;;  %v1272_v7 = vrot.slane %v525_v8, %v7739_v21  ;;  %v1276_v47 = vrot.slane %v525_v8, %v7747_v24  ;;  %v7112_v9 = vld [vmem:[%s11801_s2 + $0x1a0] sm:$0xff] }
  0x5d   : > { %v2061_v42 = vcombine.low %v1264_v34, %v1268_v40  ;;  %4021 = vmatprep.subr.mxu1 %v12204_v35  ;;  %v1280_v60 = vrot.slane %v541_v39, %v7739_v21  ;;  %v1284_v18 = vrot.slane %v541_v39, %v7747_v24  ;;  %v849_v48 = vrot.slane %v7598_v51, %v7720_v12  ;;  %v7111_v39 = vld [vmem:[%s11801_s2 + $0x198] sm:$0xff] }
  0x5e   : > { %v2053_v5 = vcombine.low %v1256_v55, %v1260_v53  ;;  %4676 = vmatprep.subr.mxu0 %v12204_v35  ;;  %v8320_v52 = vcombine.high %v3218_v19, %v3225_v4  ;;  %v2069_v40 = vcombine.low %v1272_v7, %v1276_v47  ;;  %v8325_v8 = vcombine.low %v3218_v19, %v3225_v4 }
  0x5f   : > { %v8323_v34 = vrot.slane %v2061_v42, %v7762_v30  ;;  %4022 = vmatpush1.msra.mxu1 %v2970_v50  ;;  %v2077_v58 = vcombine.low %v1280_v60, %v1284_v18  ;;  %v8332_v53 = vrot.slane %v7600_v36, %v7720_v12  ;;  %v857_v51 = vcombine.high %v849_v48, %v849_v48  ;;  %v2969_v36 = vld [vmem:[%s11801_s2 + $0x20] sm:$0xff]  ;;  %v7110_v60 = vld [vmem:[%s11801_s2 + $0x190] sm:$0xff] }
  0x60   : > { %12212 = vst [vmem:[#allocation37_spill] sm:$0xff] %v8320_v52  ;;  %12214 = vst [vmem:[#allocation39_spill] sm:$0xff] %v8325_v8  ;;  %v8329_v27 = vrot.slane %v2053_v5, %v7762_v30  ;;  %4677 = vmatpush1.msra.mxu0 %v7112_v9  ;;  %7060 = vmatprep.mubr.msk.f32.mxu1 %vm3354_vm1, %v8320_v52  ;;  %v8341_v50 = vrot.slane %v2069_v40, %v7762_v30 }
  0x61   : > { %12213 = vst [vmem:[#allocation38_spill] sm:$0xff] %v8323_v34  ;;  %v8344_v5 = vrot.slane %v849_v48, %v7720_v12  ;;  %v557_v18 = vrot.slane %v7601_v32, %v7720_v12  ;;  %4678 = vmatprep.subr.mxu0 %v12204_v35  ;;  %v8353_v19 = vrot.slane %v2077_v58, %v7762_v30 }
  0x62   : > { %12215 = vst [vmem:[#allocation40_spill] sm:$0xff] %v8341_v50  ;;  %v3066_v55 = vcombine.low %v8329_v27, %v8323_v34  ;;  %3555 = vmatmul.mubr.f32.gmra.mxu1 %v8325_v8  ;;  %v8360_v7 = vrot.slane %v8332_v53, %v7720_v12  ;;  %4023 = vmatprep.subr.mxu1 %v12204_v35 }
  0x63   : > { %12216 = vst [vmem:[#allocation41_spill] sm:$0xff] %v8344_v5  ;;  %12217 = vst [vmem:[#allocation42_spill] sm:$0xff] %v8353_v19  ;;  %7061 = vmatprep.mubr.msk.f32.mxu1 %vm3354_vm1, %v8192_v25  ;;  %v879_v47 = vrot.slane %v857_v51, %v7720_v12  ;;  %v887_v58 = vcombine.high %v8344_v5, %v8344_v5  ;;  %v8370_v9 = vrot.slane %v7603_v61, %v7720_v12 }
  0x64   : > { %4679 = vmatpush1.msra.mxu0 %v7111_v39  ;;  %v3067_v48 = vcombine.low %v8341_v50, %v8353_v19  ;;  %v3074_v40 = vrot.slane %v3066_v55, %v7762_v30  ;;  %v1648_v32 = vrot.slane %v8360_v7, %v7739_v21  ;;  %4024 = vmatpush1.msra.mxu1 %v2969_v36  ;;  %v7609_v50 = vld [vmem:[%s7718_s30 + $0x60] ss:$8 sps:$4 sm:$0xff]  }
  0x65   : > { %4680 = vmatprep.subr.mxu0 %v12204_v35  ;;  %v889_v51 = vcombine.high %v879_v47, %v879_v47  ;;  %v1624_v4 = vrot.slane %v879_v47, %v7739_v21  ;;  %v1628_v61 = vrot.slane %v879_v47, %v7747_v24  ;;  %v1632_v39 = vrot.slane %v887_v58, %v7739_v21  ;;  %v2968_v47 = vld [vmem:[%s11801_s2 + $0x18] sm:$0xff] }
  0x66   : > { %4025 = vmatprep.subr.mxu1 %v12204_v35  ;;  %v3081_v55 = vrot.slane %v3067_v48, %v7762_v30  ;;  %3560 = vmatmul.mubr.f32.gmra.mxu1 %v8197_v28  ;;  %v1636_v36 = vrot.slane %v887_v58, %v7747_v24  ;;  %v1652_v42 = vrot.slane %v8360_v7, %v7747_v24 }
  0x67   : > { %v565_v25 = vcombine.high %v557_v18, %v557_v18  ;;  %7062 = vmatprep.mubr.msk.f32.mxu1 %vm3354_vm1, %v8320_v52  ;;  %v1640_v5 = vrot.slane %v889_v51, %v7739_v21  ;;  %v1644_v33 = vrot.slane %v889_v51, %v7747_v24  ;;  %v2421_v48 = vcombine.low %v1624_v4, %v1628_v61 }
  0x68   : > { %v8399_v28 = vrot.slane %v557_v18, %v7720_v12  ;;  %v8401_v58 = vcombine.high %v3074_v40, %v3081_v55  ;;  %v8403_v6 = vcombine.low %v3074_v40, %v3081_v55  ;;  %v2429_v54 = vcombine.low %v1632_v39, %v1636_v36  ;;  %4681 = vmatpush1.msra.mxu0 %v7110_v60  ;;  %v7604_v36 = vld [vmem:[%s7718_s30 + $0xd0] ss:$8 sps:$4 sm:$0x33]  }
  0x69   : > { %v2445_v0 = vcombine.low %v1648_v32, %v1652_v42  ;;  %v8406_v43 = vrot.slane %v2421_v48, %v7762_v30  ;;  %v2437_v45 = vcombine.low %v1640_v5, %v1644_v33  ;;  %v8410_v52 = vrot.slane %v8370_v9, %v7720_v12  ;;  %4026 = vmatpush1.msra.mxu1 %v2968_v47  ;;  %v2967_v32 = vld [vmem:[%s11801_s2 + $0x10] sm:$0xff] }
  0x6a   : > { %12218 = vst [vmem:[#allocation43_spill] sm:$0xff] %v8399_v28  ;;  %12219 = vst [vmem:[#allocation44_spill] sm:$0xff] %v8401_v58  ;;  %v587_v4 = vrot.slane %v565_v25, %v7720_v12  ;;  %7044 = vmatprep.mubr.msk.f32.mxu0 %vm3354_vm1, %v8401_v58  ;;  %3565 = vmatmul.mubr.f32.gmra.mxu1 %v8325_v8  ;;  %v8418_v42 = vrot.slane %v2429_v54, %v7762_v30  ;;  %v7109_v25 = vld [vmem:[%s11801_s2 + $0x188] sm:$0xff] }
  0x6b   : > { %12220 = vst [vmem:[#allocation45_spill] sm:$0xff] %v8403_v6  ;;  %12221 = vst [vmem:[#allocation46_spill] sm:$0xff] %v8406_v43  ;;  %v8421_v33 = vrot.slane %v2445_v0, %v7762_v30  ;;  %v595_v5 = vcombine.high %v8399_v28, %v8399_v28  ;;  %3475 = vmatmul.mubr.f32.gmra.mxu0 %v8403_v6  ;;  %v8434_v54 = vrot.slane %v2437_v45, %v7762_v30 }
  0x6c   : > { %12222 = vst [vmem:[#allocation47_spill] sm:$0xff] %v8418_v42  ;;  %v597_v0 = vcombine.high %v587_v4, %v587_v4  ;;  %v1304_v40 = vrot.slane %v587_v4, %v7739_v21  ;;  %4682 = vmatprep.subr.mxu0 %v12204_v35  ;;  %7045 = vmatprep.mubr.msk.f32.mxu0 %vm3354_vm1, %v8254_v31 }
  0x6d   : > { %12223 = vst [vmem:[#allocation48_spill] sm:$0xff] %v8421_v33  ;;  %12224 = vst [vmem:[#allocation49_spill] sm:$0xff] %v8434_v54  ;;  %v3228_v39 = vcombine.low %v8406_v43, %v8418_v42  ;;  %v1308_v55 = vrot.slane %v587_v4, %v7747_v24  ;;  %4027 = vmatprep.subr.mxu1 %v12204_v35  ;;  %v3229_v47 = vcombine.low %v8434_v54, %v8421_v33 }
  0x6e   : > { %v1312_v48 = vrot.slane %v595_v5, %v7739_v21  ;;  %v1316_v60 = vrot.slane %v595_v5, %v7747_v24  ;;  %4683 = vmatpush1.msra.mxu0 %v7109_v25  ;;  %4028 = vmatpush1.msra.mxu1 %v2967_v32  ;;  %v1320_v61 = vrot.slane %v597_v0, %v7739_v21 }
  0x6f   : > { %v3236_v18 = vrot.slane %v3228_v39, %v7762_v30  ;;  %v1324_v4 = vrot.slane %v597_v0, %v7747_v24  ;;  %v1328_v51 = vrot.slane %v8410_v52, %v7739_v21  ;;  %4029 = vmatprep.subr.mxu1 %v12204_v35  ;;  %3480 = vmatmul.mubr.f32.gmra.mxu0 %v8256_v15  ;;  %v2966_v39 = vld [vmem:[%s11801_s2 + $0x8] sm:$0xff] }
  0x70   : > { %v3243_v45 = vrot.slane %v3229_v47, %v7762_v30  ;;  %v1332_v5 = vrot.slane %v8410_v52, %v7747_v24  ;;  %v2101_v25 = vcombine.low %v1304_v40, %v1308_v55  ;;  %v2109_v32 = vcombine.low %v1312_v48, %v1316_v60  ;;  %7046 = vmatprep.mubr.msk.f32.mxu0 %vm3354_vm1, %v8401_v58 }
  0x71   : > { %v2117_v8 = vcombine.low %v1320_v61, %v1324_v4  ;;  %v858_v15 = vcombine.high %v8332_v53, %v8332_v53  ;;  %v8471_v47 = vrot.slane %v7604_v36, %v7720_v12  ;;  %4684 = vmatprep.subr.mxu0 %v12204_v35  ;;  %v7108_v61 = vld [vmem:[%s11801_s2 + $0x180] sm:$0xff]  ;;  %v888_v4 = vcombine.high %v8360_v7, %v8360_v7 }
  0x72   : > { %v8473_v31 = vcombine.high %v3236_v18, %v3243_v45  ;;  %v8476_v60 = vrot.slane %v2101_v25, %v7762_v30  ;;  %v8479_v40 = vrot.slane %v2109_v32, %v7762_v30  ;;  %v2125_v55 = vcombine.low %v1328_v51, %v1332_v5  ;;  %4030 = vmatpush1.msra.mxu1 %v2966_v39  ;;  %v7605_v51 = vld [vmem:[%s7718_s30 + $0x50] ss:$8 sps:$4 sm:$0x33]  }
  0x73   : > { %12225 = vst [vmem:[#allocation50_spill] sm:$0xff] %v8471_v47  ;;  %v8486_v53 = vrot.slane %v2117_v8, %v7762_v30  ;;  %v8488_v36 = vcombine.low %v3236_v18, %v3243_v45  ;;  %v886_v48 = vrot.slane %v858_v15, %v7720_v12  ;;  %3485 = vmatmul.mubr.f32.gmra.mxu0 %v8403_v6  ;;  %v7107_v15 = vld [vmem:[%s11801_s2 + $0x178] sm:$0xff]  ;;  %v12232_v7 = vrot.slane %v8037_v14, 7 }
  0x74   : > { %12226 = vst [vmem:[#allocation51_spill] sm:$0xff] %v8473_v31  ;;  %12227 = vst [vmem:[#allocation52_spill] sm:$0xff] %v8476_v60  ;;  %7063 = vmatprep.mubr.msk.f32.mxu1 %vm3354_vm1, %v8473_v31  ;;  %v8498_v5 = vrot.slane %v2125_v55, %v7762_v30  ;;  %v3084_v8 = vcombine.low %v8476_v60, %v8479_v40  ;;  %v906_v32 = vrot.slane %v8471_v47, %v7720_v12  ;;  %v2965_v55 = vld [vmem:[%s11801_s2] sm:$0xff] }
  0x75   : > { %12228 = vst [vmem:[#allocation53_spill] sm:$0xff] %v8479_v40  ;;  %12229 = vst [vmem:[#allocation54_spill] sm:$0xff] %v8486_v53  ;;  %v8507_v18 = vrot.slane %v12232_v7, 2  ;;  %3570 = vmatmul.mubr.f32.gmra.mxu1 %v8488_v36  ;;  %v890_v25 = vcombine.high %v886_v48, %v886_v48  ;;  %v1656_v39 = vrot.slane %v886_v48, %v7739_v21  ;;  %4685 = vmatpush1.msra.mxu0 %v7108_v61 }
  0x76   : > { %12230 = vst [vmem:[#allocation55_spill] sm:$0xff] %v8488_v36  ;;  %12231 = vst [vmem:[#allocation56_spill] sm:$0xff] %v8498_v5  ;;  %v3085_v7 = vcombine.low %v8486_v53, %v8498_v5  ;;  %v3092_v45 = vrot.slane %v3084_v8, %v7762_v30  ;;  %v1660_v0 = vrot.slane %v886_v48, %v7747_v24  ;;  %4686 = vmatprep.subr.mxu0 %v12204_v35 }
  0x77   : > { %4031 = vmatprep.subr.mxu1 %v12204_v35  ;;  %v1664_v6 = vrot.slane %v888_v4, %v7739_v21  ;;  %v1668_v61 = vrot.slane %v888_v4, %v7747_v24  ;;  %v1672_v58 = vrot.slane %v890_v25, %v7739_v21  ;;  %v1676_v42 = vrot.slane %v890_v25, %v7747_v24  ;;  %v2987_v25 = vld [vmem:[%s11801_s2 + $0xb0] sm:$0xf] }
  0x78   : > { %4687 = vmatpush1.msra.mxu0 %v7107_v15  ;;  %v3099_v33 = vrot.slane %v3085_v7, %v7762_v30  ;;  %v1680_v8 = vrot.slane %v906_v32, %v7739_v21  ;;  %v1684_v48 = vrot.slane %v906_v32, %v7747_v24  ;;  %v2453_v43 = vcombine.low %v1656_v39, %v1660_v0 }
  0x79   : > { %4032 = vmatpush1.msra.mxu1 %v2965_v55  ;;  %v2461_v2 = vcombine.low %v1664_v6, %v1668_v61  ;;  %v2469_v4 = vcombine.low %v1672_v58, %v1676_v42  ;;  %v566_v28 = vcombine.high %v8370_v9, %v8370_v9  ;;  %v596_v15 = vcombine.high %v8410_v52, %v8410_v52 }
  0x7a   : > { %4688 = vmatprep.subr.mxu0 %v12204_v35  ;;  %v8543_v0 = vcombine.high %v3092_v45, %v3099_v33  ;;  %v8545_v32 = vcombine.low %v3092_v45, %v3099_v33  ;;  %v8548_v39 = vrot.slane %v2453_v43, %v7762_v30  ;;  %v2477_v6 = vcombine.low %v1680_v8, %v1684_v48  ;;  %v7128_v43 = vld [vmem:[%s11801_s2 + $0x220] sm:$0xf]  ;;  %v7608_v48 = vld [vmem:[%s7718_s30 + $0xe4] ss:$8 sps:$4 sm:$0xff]  }
  0x7b   : > { %4051 = vmatprep.subr.mxu1 %v12204_v35  ;;  %v8552_v9 = vrot.slane %v2461_v2, %v7762_v30  ;;  %v8555_v52 = vrot.slane %v2469_v4, %v7762_v30  ;;  %v594_v58 = vrot.slane %v566_v28, %v7720_v12  ;;  %v8559_v42 = vrot.slane %v7605_v51, %v7720_v12  ;;  %v7606_v8 = vld [vmem:[%s7718_s30 + $0xe0] ss:$8 sps:$4 sm:$0xff]  }
  0x7c   : > { %12233 = vst [vmem:[#allocation57_spill] sm:$0xff] %v8543_v0  ;;  %12234 = vst [vmem:[#allocation58_spill] sm:$0xff] %v8545_v32  ;;  %4689 = vmatpush1.msra.mxu0 %v7106_v44  ;;  %7047 = vmatprep.mubr.msk.f32.mxu0 %vm3354_vm1, %v8543_v0  ;;  %v8570_v28 = vrot.slane %v2477_v6, %v7762_v30  ;;  %v1344_v51 = vrot.slane %v596_v15, %v7739_v21  ;;  %v2986_v44 = vld [vmem:[%s11801_s2 + $0xa8] sm:$0xff] }
  0x7d   : > { %12235 = vst [vmem:[#allocation59_spill] sm:$0xff] %v8548_v39  ;;  %12236 = vst [vmem:[#allocation60_spill] sm:$0xff] %v8552_v9  ;;  %7073 = vmatpush2.msk.msra.mxu1 %vm3391_vm0, %v2987_v25  ;;  %3490 = vmatmul.mubr.f32.gmra.mxu0 %v8545_v32  ;;  %v3246_v55 = vcombine.low %v8548_v39, %v8552_v9  ;;  %v598_v7 = vcombine.high %v594_v58, %v594_v58  ;;  %v7127_v25 = vld [vmem:[%s11801_s2 + $0x218] sm:$0xff] }
  0x7e   : > { %12237 = vst [vmem:[#allocation61_spill] sm:$0xff] %v8555_v52  ;;  %12238 = vst [vmem:[#allocation62_spill] sm:$0xff] %v8559_v42  ;;  %v1348_v61 = vrot.slane %v596_v15, %v7747_v24  ;;  %4708 = vmatprep.subr.mxu0 %v12204_v35  ;;  %v3247_v6 = vcombine.low %v8555_v52, %v8570_v28  ;;  %v614_v2 = vrot.slane %v8559_v42, %v7720_v12 }
  0x7f   : > { %12239 = vst [vmem:[#allocation63_spill] sm:$0xff] %v8570_v28  ;;  %4053 = vmatprep.subr.mxu1 %v12204_v35  ;;  %7129 = vmatpush2.msk.msra.mxu0 %vm3391_vm0, %v7128_v43  ;;  %v3254_v15 = vrot.slane %v3246_v55, %v7762_v30  ;;  %v1336_v33 = vrot.slane %v594_v58, %v7739_v21 }
  0x80   : > { %v1340_v45 = vrot.slane %v594_v58, %v7747_v24  ;;  %v1352_v4 = vrot.slane %v598_v7, %v7739_v21  ;;  %4054 = vmatpush2.msra.mxu1 %v2986_v44  ;;  %v3261_v47 = vrot.slane %v3247_v6, %v7762_v30  ;;  %v1356_v54 = vrot.slane %v598_v7, %v7747_v24  ;;  %v2985_v58 = vld [vmem:[%s11801_s2 + $0xa0] sm:$0xff] }
  0x81   : > { %v1360_v43 = vrot.slane %v614_v2, %v7739_v21  ;;  %v1364_v55 = vrot.slane %v614_v2, %v7747_v24  ;;  %4710 = vmatprep.subr.mxu0 %v12204_v35  ;;  %v2141_v53 = vcombine.low %v1344_v51, %v1348_v61  ;;  %v922_v40 = vrot.slane %v7606_v8, %v7720_v12 }
  0x82   : > { %v2133_v44 = vcombine.low %v1336_v33, %v1340_v45  ;;  %v8610_v60 = vrot.slane %v7608_v48, %v7720_v12  ;;  %4055 = vmatprep.subr.mxu1 %v12204_v35  ;;  %v8613_v7 = vcombine.high %v3254_v15, %v3261_v47  ;;  %v2149_v6 = vcombine.low %v1352_v4, %v1356_v54 }
  0x83   : > { %v2157_v19 = vcombine.low %v1360_v43, %v1364_v55  ;;  %v8615_v2 = vcombine.low %v3254_v15, %v3261_v47  ;;  %4711 = vmatpush2.msra.mxu0 %v7127_v25  ;;  %v8622_v33 = vrot.slane %v2141_v53, %v7762_v30  ;;  %v930_v51 = vcombine.high %v922_v40, %v922_v40  ;;  %v7126_v25 = vld [vmem:[%s11801_s2 + $0x210] sm:$0xff] }
  0x84   : > { %12240 = vst [vmem:[#allocation64_spill] sm:$0xff] %v8613_v7  ;;  %v8619_v34 = vrot.slane %v2133_v44, %v7762_v30  ;;  %v8625_v45 = vrot.slane %v922_v40, %v7720_v12  ;;  %4056 = vmatpush2.msra.mxu1 %v2985_v58  ;;  %7064 = vmatprep.mubr.msk.f32.mxu1 %vm3354_vm1, %v8613_v7  ;;  %v2984_v40 = vld [vmem:[%s11801_s2 + $0x98] sm:$0xff]  ;;  %v7611_v58 = vld [vmem:[%s7718_s30 + $0x64] ss:$8 sps:$4 sm:$0xff]  }
  0x85   : > { %12241 = vst [vmem:[#allocation65_spill] sm:$0xff] %v8615_v2  ;;  %12243 = vst [vmem:[#allocation67_spill] sm:$0xff] %v8622_v33  ;;  %v8631_v54 = vrot.slane %v2149_v6, %v7762_v30  ;;  %v8634_v47 = vrot.slane %v2157_v19, %v7762_v30  ;;  %v8638_v53 = vrot.slane %v8610_v60, %v7720_v12  ;;  %3575 = vmatmul.mubr.f32.gmra.mxu1 %v8615_v2 }
  0x86   : > { %12242 = vst [vmem:[#allocation66_spill] sm:$0xff] %v8619_v34  ;;  %12244 = vst [vmem:[#allocation68_spill] sm:$0xff] %v8625_v45  ;;  %v3102_v4 = vcombine.low %v8619_v34, %v8622_v33  ;;  %v952_v19 = vrot.slane %v930_v51, %v7720_v12  ;;  %4057 = vmatprep.subr.mxu1 %v12204_v35  ;;  %7065 = vmatprep.mubr.msk.f32.mxu1 %vm3354_vm1, %v8473_v31 }
  0x87   : > { %12245 = vst [vmem:[#allocation69_spill] sm:$0xff] %v8631_v54  ;;  %12246 = vst [vmem:[#allocation70_spill] sm:$0xff] %v8634_v47  ;;  %v3103_v43 = vcombine.low %v8631_v54, %v8634_v47  ;;  %v960_v55 = vcombine.high %v8625_v45, %v8625_v45  ;;  %v630_v44 = vrot.slane %v7609_v50, %v7720_v12  ;;  %4712 = vmatprep.subr.mxu0 %v12204_v35 }
  0x88   : > { %v3110_v6 = vrot.slane %v3102_v4, %v7762_v30  ;;  %v962_v51 = vcombine.high %v952_v19, %v952_v19  ;;  %v1704_v48 = vrot.slane %v952_v19, %v7739_v21  ;;  %v1708_v15 = vrot.slane %v952_v19, %v7747_v24  ;;  %4058 = vmatpush2.msra.mxu1 %v2984_v40 }
  0x89   : > { %v3117_v8 = vrot.slane %v3103_v43, %v7762_v30  ;;  %v1712_v61 = vrot.slane %v960_v55, %v7739_v21  ;;  %v1716_v31 = vrot.slane %v960_v55, %v7747_v24  ;;  %v1728_v45 = vrot.slane %v8638_v53, %v7739_v21  ;;  %4713 = vmatpush2.msra.mxu0 %v7126_v25 }
  0x8a   : > { %3580 = vmatmul.mubr.f32.gmra.mxu1 %v8488_v36  ;;  %v1720_v50 = vrot.slane %v962_v51, %v7739_v21  ;;  %v1724_v4 = vrot.slane %v962_v51, %v7747_v24  ;;  %v1732_v19 = vrot.slane %v8638_v53, %v7747_v24  ;;  %v2501_v40 = vcombine.low %v1704_v48, %v1708_v15  ;;  %v2983_v15 = vld [vmem:[%s11801_s2 + $0x90] sm:$0xff] }
  0x8b   : > { %v8676_v52 = vcombine.high %v3110_v6, %v3117_v8  ;;  %v8678_v43 = vcombine.low %v3110_v6, %v3117_v8  ;;  %7066 = vmatprep.mubr.msk.f32.mxu1 %vm3354_vm1, %v8613_v7  ;;  %v2509_v55 = vcombine.low %v1712_v61, %v1716_v31  ;;  %v8683_v25 = vrot.slane %v7611_v58, %v7720_v12  ;;  %v7612_v7 = vld [vmem:[%s7718_s30 + $0xf0] ss:$8 sps:$4 sm:$0x33]  }
  0x8c   : > { %v8686_v36 = vrot.slane %v2501_v40, %v7762_v30  ;;  %v2517_v9 = vcombine.low %v1720_v50, %v1724_v4  ;;  %v2525_v51 = vcombine.low %v1728_v45, %v1732_v19  ;;  %v638_v39 = vcombine.high %v630_v44, %v630_v44  ;;  %4714 = vmatprep.subr.mxu0 %v12204_v35  ;;  %v7125_v45 = vld [vmem:[%s11801_s2 + $0x208] sm:$0xff] }
  0x8d   : > { %12247 = vst [vmem:[#allocation71_spill] sm:$0xff] %v8676_v52  ;;  %12248 = vst [vmem:[#allocation72_spill] sm:$0xff] %v8678_v43  ;;  %7048 = vmatprep.mubr.msk.f32.mxu0 %vm3354_vm1, %v8676_v52  ;;  %v8694_v8 = vrot.slane %v2509_v55, %v7762_v30  ;;  %v8697_v31 = vrot.slane %v630_v44, %v7720_v12  ;;  %v8701_v61 = vrot.slane %v8683_v25, %v7720_v12 }
  0x8e   : > { %12249 = vst [vmem:[#allocation73_spill] sm:$0xff] %v8686_v36  ;;  %3495 = vmatmul.mubr.f32.gmra.mxu0 %v8678_v43  ;;  %3585 = vmatmul.mubr.f32.gmra.mxu1 %v8615_v2  ;;  %v8713_v44 = vrot.slane %v2517_v9, %v7762_v30  ;;  %v8716_v6 = vrot.slane %v2525_v51, %v7762_v30 }
  0x8f   : > { %12250 = vst [vmem:[#allocation74_spill] sm:$0xff] %v8694_v8  ;;  %12251 = vst [vmem:[#allocation75_spill] sm:$0xff] %v8697_v31  ;;  %v660_v50 = vrot.slane %v638_v39, %v7720_v12  ;;  %7049 = vmatprep.mubr.msk.f32.mxu0 %vm3354_vm1, %v8543_v0  ;;  %v3264_v19 = vcombine.low %v8686_v36, %v8694_v8  ;;  %v668_v40 = vcombine.high %v8697_v31, %v8697_v31 }
  0x90   : > { %12252 = vst [vmem:[#allocation76_spill] sm:$0xff] %v8713_v44  ;;  %12253 = vst [vmem:[#allocation77_spill] sm:$0xff] %v8716_v6  ;;  %v931_v9 = vcombine.high %v8610_v60, %v8610_v60  ;;  %4059 = vmatprep.subr.mxu1 %v12204_v35  ;;  %v3265_v39 = vcombine.low %v8713_v44, %v8716_v6  ;;  %v1408_v58 = vrot.slane %v8701_v61, %v7739_v21 }
  0x91   : > { %v670_v51 = vcombine.high %v660_v50, %v660_v50  ;;  %4715 = vmatpush2.msra.mxu0 %v7125_v45  ;;  %4060 = vmatpush2.msra.mxu1 %v2983_v15  ;;  %v3272_v48 = vrot.slane %v3264_v19, %v7762_v30  ;;  %v1384_v4 = vrot.slane %v660_v50, %v7739_v21  ;;  %v7124_v19 = vld [vmem:[%s11801_s2 + $0x200] sm:$0xff] }
  0x92   : > { %v1388_v2 = vrot.slane %v660_v50, %v7747_v24  ;;  %v1392_v60 = vrot.slane %v668_v40, %v7739_v21  ;;  %4716 = vmatprep.subr.mxu0 %v12204_v35  ;;  %3500 = vmatmul.mubr.f32.gmra.mxu0 %v8545_v32  ;;  %v3279_v55 = vrot.slane %v3265_v39, %v7762_v30 }
  0x93   : > { %v1396_v0 = vrot.slane %v668_v40, %v7747_v24  ;;  %v1400_v45 = vrot.slane %v670_v51, %v7739_v21  ;;  %v1404_v15 = vrot.slane %v670_v51, %v7747_v24  ;;  %7050 = vmatprep.mubr.msk.f32.mxu0 %vm3354_vm1, %v8676_v52  ;;  %v1412_v32 = vrot.slane %v8701_v61, %v7747_v24 }
  0x94   : > { %v2181_v28 = vcombine.low %v1384_v4, %v1388_v2  ;;  %v959_v39 = vrot.slane %v931_v9, %v7720_v12  ;;  %v8754_v40 = vcombine.high %v3272_v48, %v3279_v55  ;;  %v8756_v51 = vcombine.low %v3272_v48, %v3279_v55  ;;  %4061 = vmatprep.subr.mxu1 %v12204_v35  ;;  %v7123_v2 = vld [vmem:[%s11801_s2 + $0x1f8] sm:$0xff] }
  0x95   : > { %v2189_v31 = vcombine.low %v1392_v60, %v1396_v0  ;;  %v2197_v42 = vcombine.low %v1400_v45, %v1404_v15  ;;  %v2205_v50 = vcombine.low %v1408_v58, %v1412_v32  ;;  %v961_v52 = vcombine.high %v8638_v53, %v8638_v53  ;;  %4717 = vmatpush2.msra.mxu0 %v7124_v19  ;;  %v2982_v0 = vld [vmem:[%s11801_s2 + $0x88] sm:$0xff]  ;;  %v7613_v15 = vld [vmem:[%s7718_s30 + $0x70] ss:$8 sps:$4 sm:$0x33]  }
  0x96   : > { %12254 = vst [vmem:[#allocation78_spill] sm:$0xff] %v8754_v40  ;;  %12255 = vst [vmem:[#allocation79_spill] sm:$0xff] %v8756_v51  ;;  %v8760_v33 = vrot.slane %v2181_v28, %v7762_v30  ;;  %v8765_v54 = vrot.slane %v7612_v7, %v7720_v12  ;;  %3505 = vmatmul.mubr.f32.gmra.mxu0 %v8678_v43  ;;  %7067 = vmatprep.mubr.msk.f32.mxu1 %vm3354_vm1, %v8754_v40  ;;  %v7122_v19 = vld [vmem:[%s11801_s2 + $0x1f0] sm:$0xff] }
  0x97   : > { %v8778_v32 = vrot.slane %v2189_v31, %v7762_v30  ;;  %v8781_v28 = vrot.slane %v2197_v42, %v7762_v30  ;;  %v963_v7 = vcombine.high %v959_v39, %v959_v39  ;;  %v8785_v58 = vrot.slane %v2205_v50, %v7762_v30  ;;  %3590 = vmatmul.mubr.f32.gmra.mxu1 %v8756_v51  ;;  %v2981_v42 = vld [vmem:[%s11801_s2 + $0x80] sm:$0xff] }
  0x98   : > { %12256 = vst [vmem:[#allocation80_spill] sm:$0xff] %v8760_v33  ;;  %12257 = vst [vmem:[#allocation81_spill] sm:$0xff] %v8765_v54  ;;  %v979_v4 = vrot.slane %v8765_v54, %v7720_v12  ;;  %v1736_v9 = vrot.slane %v959_v39, %v7739_v21  ;;  %4718 = vmatprep.subr.mxu0 %v12204_v35  ;;  %v1740_v45 = vrot.slane %v959_v39, %v7747_v24 }
  0x99   : > { %12258 = vst [vmem:[#allocation82_spill] sm:$0xff] %v8778_v32  ;;  %12259 = vst [vmem:[#allocation83_spill] sm:$0xff] %v8781_v28  ;;  %v3120_v60 = vcombine.low %v8760_v33, %v8778_v32  ;;  %4062 = vmatpush2.msra.mxu1 %v2982_v0  ;;  %4719 = vmatpush2.msra.mxu0 %v7123_v2  ;;  %v3121_v53 = vcombine.low %v8781_v28, %v8785_v58 }
  0x9a   : > { %12260 = vst [vmem:[#allocation84_spill] sm:$0xff] %v8785_v58  ;;  %v1744_v31 = vrot.slane %v961_v52, %v7739_v21  ;;  %v1748_v55 = vrot.slane %v961_v52, %v7747_v24  ;;  %4063 = vmatprep.subr.mxu1 %v12204_v35  ;;  %4720 = vmatprep.subr.mxu0 %v12204_v35 }
  0x9b   : > { %v3128_v39 = vrot.slane %v3120_v60, %v7762_v30  ;;  %v1752_v0 = vrot.slane %v963_v7, %v7739_v21  ;;  %v1756_v2 = vrot.slane %v963_v7, %v7747_v24  ;;  %v1760_v48 = vrot.slane %v979_v4, %v7739_v21  ;;  %4064 = vmatpush2.msra.mxu1 %v2981_v42 }
  0x9c   : > { %v3135_v50 = vrot.slane %v3121_v53, %v7762_v30  ;;  %v1764_v43 = vrot.slane %v979_v4, %v7747_v24  ;;  %v2533_v6 = vcombine.low %v1736_v9, %v1740_v45  ;;  %v2541_v44 = vcombine.low %v1744_v31, %v1748_v55  ;;  %4721 = vmatpush2.msra.mxu0 %v7122_v19 }
  0x9d   : > { %v2549_v52 = vcombine.low %v1752_v0, %v1756_v2  ;;  %v639_v8 = vcombine.high %v8683_v25, %v8683_v25  ;;  %v669_v60 = vcombine.high %v8701_v61, %v8701_v61  ;;  %v8822_v36 = vrot.slane %v7613_v15, %v7720_v12  ;;  %4942 = vmatprep.subr.mxu1 %v12204_v35 }
  0x9e   : > { %v8825_v7 = vcombine.high %v3128_v39, %v3135_v50  ;;  %v8827_v53 = vcombine.low %v3128_v39, %v3135_v50  ;;  %v8830_v4 = vrot.slane %v2533_v6, %v7762_v30  ;;  %v8833_v9 = vrot.slane %v2541_v44, %v7762_v30  ;;  %5226 = vmatprep.subr.mxu0 %v12204_v35  ;;  %v7614_v50 = vld [vmem:[%s7935_s23] ss:$8 sps:$4 sm:$0xff]   ;;  %v7616_v39 = vld [vmem:[%s7935_s23 + $0x4] ss:$8 sps:$4 sm:$0xff]  }
  0x9f   : > { %12261 = vst [vmem:[#allocation85_spill] sm:$0xff] %v8822_v36  ;;  %v8837_v25 = vrot.slane %v2549_v52, %v7762_v30  ;;  %v2557_v61 = vcombine.low %v1760_v48, %v1764_v43  ;;  %v667_v42 = vrot.slane %v639_v8, %v7720_v12  ;;  %v12266_v31 = vrot.slane %v8053_v29, 7 }
  0xa0   : > { %12262 = vst [vmem:[#allocation86_spill] sm:$0xff] %v8825_v7  ;;  %12263 = vst [vmem:[#allocation87_spill] sm:$0xff] %v8827_v53  ;;  %7051 = vmatprep.mubr.msk.f32.mxu0 %vm3354_vm1, %v8825_v7  ;;  %v3282_v45 = vcombine.low %v8830_v4, %v8833_v9  ;;  %v687_v43 = vrot.slane %v8822_v36, %v7720_v12  ;;  %v1424_v52 = vrot.slane %v669_v60, %v7739_v21 }
  0xa1   : > { %12264 = vst [vmem:[#allocation88_spill] sm:$0xff] %v8830_v4  ;;  %12265 = vst [vmem:[#allocation89_spill] sm:$0xff] %v8833_v9  ;;  %v8842_v55 = vrot.slane %v12266_v31, 2  ;;  %3510 = vmatmul.mubr.f32.gmra.mxu0 %v8827_v53  ;;  %v8856_v48 = vrot.slane %v2557_v61, %v7762_v30  ;;  %v671_v15 = vcombine.high %v667_v42, %v667_v42 }
  0xa2   : > { %v1416_v19 = vrot.slane %v667_v42, %v7739_v21  ;;  %v1420_v2 = vrot.slane %v667_v42, %v7747_v24  ;;  %v1428_v31 = vrot.slane %v669_v60, %v7747_v24  ;;  %v3290_v8 = vrot.slane %v3282_v45, %v7762_v30 }
  0xa3   : > { %v3283_v44 = vcombine.low %v8837_v25, %v8856_v48  ;;  %v1432_v61 = vrot.slane %v671_v15, %v7739_v21  ;;  %v1436_v6 = vrot.slane %v671_v15, %v7747_v24  ;;  %v1440_v54 = vrot.slane %v687_v43, %v7739_v21 }
  0xa4   : > { %v1444_v0 = vrot.slane %v687_v43, %v7747_v24  ;;  %v2213_v28 = vcombine.low %v1416_v19, %v1420_v2  ;;  %v2221_v42 = vcombine.low %v1424_v52, %v1428_v31  ;;  %v995_v33 = vrot.slane %v7614_v50, %v7720_v12  ;;  %v7617_v19 = vld [vmem:[%s7935_s23 + $0x10] ss:$8 sps:$4 sm:$0x33]  }
  0xa5   : > { %v3297_v60 = vrot.slane %v3283_v44, %v7762_v30  ;;  %v2229_v32 = vcombine.low %v1432_v61, %v1436_v6  ;;  %v1002_v45 = vrot.slane %v7616_v39, %v7720_v12 }
  0xa6   : > { %v8877_v34 = vrot.slane %v2213_v28, %v7762_v30  ;;  %v8880_v15 = vrot.slane %v2221_v42, %v7762_v30  ;;  %v2237_v43 = vcombine.low %v1440_v54, %v1444_v0  ;;  %v1003_v44 = vcombine.high %v995_v33, %v995_v33 }
  0xa7   : > { %v8883_v2 = vcombine.high %v3290_v8, %v3297_v60  ;;  %v8886_v52 = vrot.slane %v2229_v32, %v7762_v30  ;;  %v8888_v6 = vcombine.low %v3290_v8, %v3297_v60  ;;  %v8902_v32 = vrot.slane %v995_v33, %v7720_v12 }
  0xa8   : > { %v8894_v39 = vrot.slane %v2237_v43, %v7762_v30  ;;  %v3138_v54 = vcombine.low %v8877_v34, %v8880_v15  ;;  %v1018_v8 = vrot.slane %v1002_v45, %v7720_v12  ;;  %v1025_v31 = vrot.slane %v1003_v44, %v7720_v12 }
  0xa9   : > { %12267 = vst [vmem:[#allocation90_spill] sm:$0xff] %v8883_v2  ;;  %12268 = vst [vmem:[#allocation91_spill] sm:$0xff] %v8888_v6  ;;  %7068 = vmatprep.mubr.msk.f32.mxu1 %vm3354_vm1, %v8883_v2  ;;  %v1004_v60 = vcombine.high %v1002_v45, %v1002_v45  ;;  %v8911_v43 = vrot.slane %v7617_v19, %v7720_v12  ;;  %v1033_v33 = vcombine.high %v8902_v32, %v8902_v32 }
  0xaa   : > { %12269 = vst [vmem:[#allocation92_spill] sm:$0xff] %v8902_v32  ;;  %v3139_v61 = vcombine.low %v8886_v52, %v8894_v39  ;;  %v3146_v42 = vrot.slane %v3138_v54, %v7762_v30  ;;  %3595 = vmatmul.mubr.f32.gmra.mxu1 %v8888_v6  ;;  %v1035_v0 = vcombine.high %v1025_v31, %v1025_v31 }
  0xab   : > { %7069 = vmatprep.mubr.msk.f32.mxu1 %vm3354_vm1, %v8754_v40  ;;  %v1784_v44 = vrot.slane %v1025_v31, %v7739_v21  ;;  %v1788_v50 = vrot.slane %v1025_v31, %v7747_v24  ;;  %v1808_v28 = vrot.slane %v1018_v8, %v7739_v21  ;;  %v1812_v45 = vrot.slane %v1018_v8, %v7747_v24 }
  0xac   : > { %v3153_v54 = vrot.slane %v3139_v61, %v7762_v30  ;;  %v1032_v19 = vrot.slane %v1004_v60, %v7720_v12  ;;  %v1792_v47 = vrot.slane %v1033_v33, %v7739_v21  ;;  %v1796_v40 = vrot.slane %v1033_v33, %v7747_v24 }
  0xad   : > { %v1800_v9 = vrot.slane %v1035_v0, %v7739_v21  ;;  %v1804_v32 = vrot.slane %v1035_v0, %v7747_v24  ;;  %v2581_v31 = vcombine.low %v1784_v44, %v1788_v50  ;;  %v2605_v61 = vcombine.low %v1808_v28, %v1812_v45 }
  0xae   : > { %v8927_v4 = vcombine.high %v3146_v42, %v3153_v54  ;;  %v8929_v36 = vcombine.low %v3146_v42, %v3153_v54  ;;  %3600 = vmatmul.mubr.f32.gmra.mxu1 %v8756_v51  ;;  %v2589_v60 = vcombine.low %v1792_v47, %v1796_v40  ;;  %v1034_v33 = vcombine.high %v1018_v8, %v1018_v8 }
  0xaf   : > { %7070 = vmatprep.mubr.msk.f32.mxu1 %vm3354_vm1, %v8883_v2  ;;  %v2597_v5 = vcombine.low %v1800_v9, %v1804_v32  ;;  %v8944_v50 = vrot.slane %v2581_v31, %v7762_v30  ;;  %v8947_v28 = vrot.slane %v2605_v61, %v7762_v30  ;;  %v1036_v42 = vcombine.high %v1032_v19, %v1032_v19 }
  0xb0   : > { %12270 = vst [vmem:[#allocation93_spill] sm:$0xff] %v8927_v4  ;;  %12271 = vst [vmem:[#allocation94_spill] sm:$0xff] %v8929_v36  ;;  %7052 = vmatprep.mubr.msk.f32.mxu0 %vm3354_vm1, %v8927_v4  ;;  %v1052_v47 = vrot.slane %v8911_v43, %v7720_v12  ;;  %v8953_v40 = vrot.slane %v2589_v60, %v7762_v30  ;;  %v1816_v32 = vrot.slane %v1032_v19, %v7739_v21  ;;  %v12274_v2 = vmov 0 }
  0xb1   : > { %3515 = vmatmul.mubr.f32.gmra.mxu0 %v8929_v36  ;;  %v8956_v9 = vrot.slane %v2597_v5, %v7762_v30  ;;  %v1820_v8 = vrot.slane %v1032_v19, %v7747_v24  ;;  %v1824_v45 = vrot.slane %v1034_v33, %v7739_v21  ;;  %v1828_v31 = vrot.slane %v1034_v33, %v7747_v24 }
  0xb2   : > { %7053 = vmatprep.mubr.msk.f32.mxu0 %vm3354_vm1, %v8825_v7  ;;  %3605 = vmatmul.mubr.f32.gmra.mxu1 %v8888_v6  ;;  %v3300_v61 = vcombine.low %v8944_v50, %v8953_v40  ;;  %v1832_v44 = vrot.slane %v1036_v42, %v7739_v21  ;;  %v1836_v58 = vrot.slane %v1036_v42, %v7747_v24  ;;  %v12275_v2 = vsel %vm8984_vm8, 4294967295, %v12274_v2 }
  0xb3   : > { %v3301_v60 = vcombine.low %v8956_v9, %v8947_v28  ;;  %v1840_v33 = vrot.slane %v1052_v47, %v7739_v21  ;;  %v1844_v54 = vrot.slane %v1052_v47, %v7747_v24  ;;  %v2613_v5 = vcombine.low %v1816_v32, %v1820_v8  ;;  %12276 = vst [vmem:[#allocation95_spill] sm:$0xff] %v12275_v2  ;;  %v12543_v2 = vld [vmem:[#allocation44_spill] sm:$0xff] }
  0xb4   : > { %v3308_v0 = vrot.slane %v3300_v61, %v7762_v30  ;;  %v2621_v6 = vcombine.low %v1824_v45, %v1828_v31  ;;  %v2629_v42 = vcombine.low %v1832_v44, %v1836_v58  ;;  %v1136_v47 = vrot.slane %v7780_v38, %v7739_v21 }
  0xb5   : > { %3520 = vmatmul.mubr.f32.gmra.mxu0 %v8827_v53  ;;  %v3315_v19 = vrot.slane %v3301_v60, %v7762_v30  ;;  %v2637_v51 = vcombine.low %v1840_v33, %v1844_v54  ;;  %v1140_v61 = vrot.slane %v7780_v38, %v7747_v24  ;;  %v8999_v8 = vrot.slane %v2613_v5, %v7762_v30 }
  0xb6   : > { %7054 = vmatprep.mubr.msk.f32.mxu0 %vm3354_vm1, %v8927_v4  ;;  %v9002_v45 = vrot.slane %v2621_v6, %v7762_v30  ;;  %v9005_v31 = vrot.slane %v2629_v42, %v7762_v30  ;;  %v12279_v54 = vrot.slane %v7859_v22, 7  ;;  %v12280_v5 = vrot.slane %v7862_v23, 7 }
  0xb7   : > { %v8994_v53 = vcombine.high %v3308_v0, %v3315_v19  ;;  %v8996_v32 = vcombine.low %v3308_v0, %v3315_v19  ;;  %v9008_v58 = vrot.slane %v2637_v51, %v7762_v30  ;;  %v1933_v44 = vcombine.low %v1136_v47, %v1140_v61 }
  0xb8   : > { %v2746_v38 = vsel %vm8984_vm8, %v8009_v57, %v12279_v54  ;;  %v3318_v51 = vcombine.low %v8999_v8, %v9002_v45  ;;  %v2749_v22 = vsel %vm8984_vm8, %v8018_v63, %v12280_v5  ;;  %v12281_v42 = vrot.slane %v7871_v20, 7 }
  0xb9   : > { %12277 = vst [vmem:[#allocation96_spill] sm:$0xff] %v8994_v53  ;;  %12278 = vst [vmem:[#allocation97_spill] sm:$0xff] %v8996_v32  ;;  %3525 = vmatmul.mubr.f32.gmra.mxu0 %v8929_v36  ;;  %7071 = vmatprep.mubr.msk.f32.mxu1 %vm3354_vm1, %v8994_v53  ;;  %v3319_v33 = vcombine.low %v9005_v31, %v9008_v58  ;;  %v1940_v0 = vrot.slane %v1933_v44, %v7762_v30  ;;  %v12282_v47 = vrot.slane %v8026_v1, 7 }
  0xba   : > { %7055 = vmatprep.mubr.msk.f32.mxu0 %vm3354_vm1, %v7887_v37  ;;  %3610 = vmatmul.mubr.f32.gmra.mxu1 %v8996_v32  ;;  %v3326_v23 = vrot.slane %v3318_v51, %v7762_v30  ;;  %v2752_v63 = vsel %vm8984_vm8, %v8034_v11, %v12281_v42  ;;  %v4277_v54 = vcombine.low %v2746_v38, %v2749_v22  ;;  %v12283_v51 = vrot.slane %v8029_v3, 7 }
  0xbb   : > { %v2755_v61 = vsel %vm8984_vm8, %v8045_v26, %v12282_v47  ;;  %v3333_v5 = vrot.slane %v3319_v33, %v7762_v30  ;;  %v7008_v6 = vrot.slane %v1940_v0, 9  ;;  %v3621_v60 = vcombine.low %v2749_v22, %v2752_v63 }
  0xbc   : > { %v4278_v44 = vcombine.low %v2752_v63, %v2755_v61  ;;  %v4285_v20 = vrot.slane %v4277_v54, %v7762_v30  ;;  %v2758_v1 = vsel %vm8984_vm8, %v8214_v13, %v12283_v51  ;;  %v12284_v11 = vrot.slane %v8037_v14, 7 }
  0xbd   : > { %3530 = vmatmul.mubr.f32.gmra.mxu0 %v7897_v41  ;;  %v12285_v33 = vrot.slane %v8053_v29, 7  ;;  %v9067_v0 = vcombine.high %v3326_v23, %v3333_v5  ;;  %v9071_v3 = vcombine.low %v3326_v23, %v3333_v5  ;;  %v12288_v14 = vrot.slane %v7853_v16, 7 }
  0xbe   : > { %v2761_v26 = vsel %vm8984_vm8, %v8218_v49, %v12284_v11  ;;  %7056 = vmatprep.mubr.msk.f32.mxu0 %vm3354_vm1, %v8012_v59  ;;  %v3635_v49 = vrot.slane %v3621_v60, %v7762_v30  ;;  %v4292_v42 = vrot.slane %v4278_v44, %v7762_v30  ;;  %v3638_v63 = vcombine.low %v2755_v61, %v2758_v1 }
  0xbf   : > { %v9065_v22 = vsel %vm8984_vm8, %v8507_v18, %v12285_v33  ;;  %12286 = vst [vmem:[#allocation98_spill] sm:$0xff] %v9067_v0  ;;  %12287 = vst [vmem:[#allocation99_spill] sm:$0xff] %v9071_v3  ;;  %v2743_v13 = vsel %vm8984_vm8, %v7008_v6, %v12288_v14  ;;  %7072 = vmatprep.mubr.msk.f32.mxu1 %vm3354_vm1, %v9067_v0  ;;  %v12289_v23 = vcombine.high %v7957_v10, %v7957_v10  ;;  %v7233_v33 = vld [vmem:[%s11801_s2 + $0x358] sm:$0xff] }
  0xc0   : > { %v3620_v29 = vcombine.low %v2743_v13, %v2746_v38  ;;  %v3639_v18 = vcombine.low %v2761_v26, %v9065_v22  ;;  %v4295_v16 = vcombine.low %v2758_v1, %v2761_v26  ;;  %v1216_v6 = vrot.slane %v8107_v56, %v7739_v21  ;;  %3615 = vmatmul.mubr.f32.gmra.mxu1 %v9071_v3  ;;  %v7177_v13 = vld [vmem:[%s11801_s2 + $0x2a0] sm:$0xff] }
  0xc1   : > { %v475_v47 = vrot.slane %v12289_v23, %v7720_v12  ;;  %v1220_v38 = vrot.slane %v8107_v56, %v7747_v24  ;;  %3535 = vmatmul.mubr.f32.gmra.mxu0 %v8014_v62  ;;  %v4293_v61 = vcombine.low %v4285_v20, %v4292_v42  ;;  %v4294_v54 = vcombine.high %v4285_v20, %v4292_v42 }
  0xc2   : > { %v3628_v60 = vrot.slane %v3620_v29, %v7762_v30  ;;  %v12290_v5 = vrot.slane %v8183_v17, 7  ;;  %v3646_v10 = vrot.slane %v3638_v63, %v7762_v30  ;;  %v3653_v51 = vrot.slane %v3639_v18, %v7762_v30 }
  0xc3   : > { %v1208_v1 = vrot.slane %v475_v47, %v7739_v21  ;;  %v1212_v11 = vrot.slane %v475_v47, %v7747_v24  ;;  %7130 = vmatprep.mubr.msk.f32.mxu0 %vm3354_vm1, %v4294_v54  ;;  %v9104_v20 = vrot.slane %v4295_v16, %v7762_v30  ;;  %v2013_v14 = vcombine.low %v1216_v6, %v1220_v38  ;;  %v12293_v6 = vld [vmem:[#allocation27_spill] sm:$0xff]  ;;  %v12295_v54 = vld [vmem:[#allocation29_spill] sm:$0xff] }
  0xc4   : > { %v2769_v44 = vrot.slane %v12290_v5, 2  ;;  %v3636_v56 = vcombine.low %v3628_v60, %v3635_v49  ;;  %v3637_v26 = vcombine.high %v3628_v60, %v3635_v49  ;;  %v3655_v29 = vcombine.high %v3646_v10, %v3653_v51 }
  0xc5   : > { %v3654_v42 = vcombine.low %v3646_v10, %v3653_v51  ;;  %v2005_v63 = vcombine.low %v1208_v1, %v1212_v11  ;;  %v12291_v18 = vrot.slane %v8186_v46, 7  ;;  %4723 = vmatmul.mubr.f32.vlgmr.msra.gmra.mxu0 %v4293_v61  ;;  %v2020_v23 = vrot.slane %v2013_v14, %v7762_v30  ;;  %v7232_v61 = vld [vmem:[%s11801_s2 + $0x350] sm:$0xff]  ;;  %v12298_v11 = vld [vmem:[#allocation38_spill] sm:$0xff] }
  0xc6   : > { %7074 = vmatprep.mubr.msk.f32.mxu1 %vm3354_vm1, %v3637_v26  ;;  %v12294_v38 = vrot.slane %v12293_v6, 7  ;;  %v12296_v5 = vrot.slane %v12295_v54, 7  ;;  %5227 = vmatpush1.msra.mxu0 %v7233_v33  ;;  %v12297_v46 = vrot.slane %v8329_v27, 7  ;;  %v12299_v26 = vrot.slane %v12298_v11, 7 }
  0xc7   : > { %v2771_v49 = vsel %vm8984_vm8, %v2769_v44, %v12291_v18  ;;  %v12292_v47 = vmov %v12291_v18  ;;  %4066 = vmatmul.mubr.f32.vlgmr.msra.gmra.mxu1 %v3636_v56  ;;  %v2012_v51 = vrot.slane %v2005_v63, %v7762_v30  ;;  %v7176_v44 = vld [vmem:[%s11801_s2 + $0x298] sm:$0xff]  ;;  %v12300_v18 = vld [vmem:[#allocation40_spill] sm:$0xff]  ;;  %v7009_v33 = vrot.slane %v2020_v23, 9  ;;  %5228 = vmatprep.subr.mxu0 %v12204_v35 }
  0xc8   : > { %v2772_v16 = vrot.slane %v12292_v47, 2  ;;  %v2775_v60 = vrot.slane %v12294_v38, 2  ;;  %v2778_v10 = vrot.slane %v12296_v5, 2  ;;  %v2781_v1 = vrot.slane %v12297_v46, 2  ;;  %4943 = vmatpush1.msra.mxu1 %v7177_v13  ;;  %7075 = vmatprep.mubr.msk.f32.mxu1 %vm3354_vm1, %v3655_v29 }
  0xc9   : > { %v2784_v14 = vrot.slane %v12299_v26, 2  ;;  %v12301_v47 = vrot.slane %v12300_v18, 7  ;;  %v12302_v63 = vmov %v12294_v38  ;;  %v12303_v57 = vrot.slane %v8329_v27, 7  ;;  %4944 = vmatprep.subr.mxu1 %v12204_v35  ;;  %5229 = vmatpush1.msra.mxu0 %v7232_v61 }
  0xca   : > { %v2774_v38 = vsel %vm8984_vm8, %v2772_v16, %v12302_v63  ;;  %v2777_v46 = vsel %vm8984_vm8, %v2775_v60, %v12296_v5  ;;  %v12304_v16 = vrot.slane %v8183_v17, 7  ;;  %4945 = vmatpush1.msra.mxu1 %v7176_v44  ;;  %v12305_v27 = vrot.slane %v12298_v11, 7  ;;  %v7175_v17 = vld [vmem:[%s11801_s2 + $0x290] sm:$0xff]  ;;  %5230 = vmatprep.subr.mxu0 %v12204_v35 }
  0xcb   : > { %v2787_v56 = vrot.slane %v12301_v47, 2  ;;  %v2780_v26 = vsel %vm8984_vm8, %v2778_v10, %v12303_v57  ;;  %v4227_v47 = vrot.slane %v2012_v51, 7  ;;  %v3657_v13 = vcombine.low %v2774_v38, %v2777_v46  ;;  %v12307_v10 = vld [vmem:[#allocation42_spill] sm:$0xff]  ;;  %4071 = vmatmul.mubr.f32.gmra.mxu1 %v3654_v42  ;;  %4946 = vmatprep.subr.mxu1 %v12204_v35 }
  0xcc   : > { %v4313_v29 = vcombine.low %v2771_v49, %v2774_v38  ;;  %v4314_v23 = vcombine.low %v2777_v46, %v2780_v26  ;;  %v2768_v6 = vsel %vm8984_vm8, %v7009_v33, %v12304_v16  ;;  %v2783_v57 = vsel %vm8984_vm8, %v2781_v1, %v12305_v27  ;;  %4947 = vmatpush1.msra.mxu1 %v7175_v17  ;;  %v7174_v16 = vld [vmem:[%s11801_s2 + $0x288] sm:$0xff] }
  0xcd   : > { %v12306_v60 = vrot.slane %v12300_v18, 7  ;;  %v12308_v51 = vrot.slane %v12307_v10, 7  ;;  %v4228_v44 = vsel %vm8984_vm8, %v8842_v55, %v4227_v47  ;;  %v3656_v61 = vcombine.low %v2768_v6, %v2771_v49  ;;  %v7231_v55 = vld [vmem:[%s11801_s2 + $0x348] sm:$0xff]  ;;  %4948 = vmatprep.subr.mxu1 %v12204_v35 }
  0xce   : > { %v3671_v1 = vrot.slane %v3657_v13, %v7762_v30  ;;  %v4321_v11 = vrot.slane %v4313_v29, %v7762_v30  ;;  %v4328_v18 = vrot.slane %v4314_v23, %v7762_v30  ;;  %v3674_v42 = vcombine.low %v2780_v26, %v2783_v57  ;;  %5231 = vmatpush1.msra.mxu0 %v7231_v55 }
  0xcf   : > { %v2786_v54 = vsel %vm8984_vm8, %v2784_v14, %v12306_v60  ;;  %v9163_v63 = vrot.slane %v12308_v51, 2  ;;  %v4296_v14 = vcombine.low %v9065_v22, %v4228_v44  ;;  %v12309_v33 = vmov %v12308_v51  ;;  %v12310_v22 = vld [vmem:[#allocation34_spill] sm:$0xff]  ;;  %4949 = vmatpush1.msra.mxu1 %v7174_v16  ;;  %v12325_v16 = vld [vmem:[#allocation56_spill] sm:$0xff]  ;;  %5232 = vmatprep.subr.mxu0 %v12204_v35 }
  0xd0   : > { %v9179_v38 = vsel %vm8984_vm8, %v2787_v56, %v12309_v33  ;;  %v3664_v49 = vrot.slane %v3656_v61, %v7762_v30  ;;  %v12311_v46 = vcombine.high %v12310_v22, %v12310_v22  ;;  %v4331_v13 = vcombine.low %v2783_v57, %v2786_v54  ;;  %4950 = vmatprep.subr.mxu1 %v12204_v35 }
  0xd1   : > { %v3675_v5 = vcombine.low %v2786_v54, %v9179_v38  ;;  %v4310_v56 = vrot.slane %v4296_v14, %v7762_v30  ;;  %v9192_v26 = vcombine.high %v4321_v11, %v4328_v18  ;;  %v9194_v29 = vcombine.low %v4321_v11, %v4328_v18  ;;  %v12318_v14 = vld [vmem:[#allocation52_spill] sm:$0xff] }
  0xd2   : > { %v548_v47 = vrot.slane %v12311_v46, %v7720_v12  ;;  %v3682_v23 = vrot.slane %v3674_v42, %v7762_v30  ;;  %v9201_v6 = vcombine.high %v3664_v49, %v3671_v1  ;;  %v9203_v27 = vcombine.low %v3664_v49, %v3671_v1  ;;  %v12317_v1 = vld [vmem:[#allocation43_spill] sm:$0xff]  ;;  %v7230_v42 = vld [vmem:[%s11801_s2 + $0x340] sm:$0xff]  ;;  %v12320_v49 = vld [vmem:[#allocation53_spill] sm:$0xff] }
  0xd3   : > { %12312 = vst [vmem:[#allocation27_spill] sm:$0xff] %v9192_v26  ;;  %12313 = vst [vmem:[#allocation29_spill] sm:$0xff] %v9194_v29  ;;  %v3689_v57 = vrot.slane %v3675_v5, %v7762_v30  ;;  %v4312_v54 = vcombine.high %v9104_v20, %v4310_v56  ;;  %v4311_v10 = vcombine.low %v9104_v20, %v4310_v56  ;;  %v12319_v20 = vrot.slane %v12318_v14, 7  ;;  %v12322_v46 = vld [vmem:[#allocation54_spill] sm:$0xff] }
  0xd4   : > { %12314 = vst [vmem:[#allocation38_spill] sm:$0xff] %v9203_v27  ;;  %v1288_v60 = vrot.slane %v548_v47, %v7739_v21  ;;  %v1292_v51 = vrot.slane %v548_v47, %v7747_v24  ;;  %v9211_v17 = vrot.slane %v4331_v13, %v7762_v30  ;;  %7076 = vmatprep.mubr.msk.f32.mxu1 %vm3354_vm1, %v9201_v6  ;;  %v12321_v5 = vrot.slane %v12320_v49, 7 }
  0xd5   : > { %v9216_v44 = vcombine.high %v3682_v23, %v3689_v57  ;;  %v9218_v61 = vcombine.low %v3682_v23, %v3689_v57  ;;  %v1296_v11 = vrot.slane %v12317_v1, %v7739_v21  ;;  %v2794_v18 = vrot.slane %v12319_v20, 2  ;;  %7131 = vmatprep.mubr.msk.f32.mxu0 %vm3354_vm1, %v4312_v54  ;;  %4076 = vmatmul.mubr.f32.gmra.mxu1 %v9203_v27  ;;  %v12327_v54 = vld [vmem:[#allocation66_spill] sm:$0xff]  ;;  %v12329_v20 = vld [vmem:[#allocation67_spill] sm:$0xff] }
  0xd6   : > { %v2085_v33 = vcombine.low %v1288_v60, %v1292_v51  ;;  %v1300_v55 = vrot.slane %v12317_v1, %v7747_v24  ;;  %v2797_v22 = vrot.slane %v12321_v5, 2  ;;  %v12323_v47 = vrot.slane %v12322_v46, 7  ;;  %4728 = vmatmul.mubr.f32.gmra.mxu0 %v4311_v10  ;;  %v12336_v46 = vld [vmem:[#allocation70_spill] sm:$0xff] }
  0xd7   : > { %12315 = vst [vmem:[#allocation40_spill] sm:$0xff] %v9216_v44  ;;  %12316 = vst [vmem:[#allocation42_spill] sm:$0xff] %v9218_v61  ;;  %7077 = vmatprep.mubr.msk.f32.mxu1 %vm3354_vm1, %v9216_v44  ;;  %v12324_v56 = vmov %v12321_v5  ;;  %v12326_v57 = vrot.slane %v12325_v16, 7  ;;  %v12328_v51 = vrot.slane %v12327_v54, 7  ;;  %v12330_v5 = vrot.slane %v12329_v20, 7  ;;  %7132 = vmatprep.mubr.msk.f32.mxu0 %vm3354_vm1, %v9192_v26 }
  0xd8   : > { %v2800_v13 = vrot.slane %v12323_v47, 2  ;;  %v9241_v23 = vsel %vm8984_vm8, %v2794_v18, %v12324_v56  ;;  %v2092_v10 = vrot.slane %v2085_v33, %v7762_v30  ;;  %v2093_v49 = vcombine.low %v1296_v11, %v1300_v55  ;;  %v12332_v56 = vld [vmem:[#allocation69_spill] sm:$0xff]  ;;  %5233 = vmatpush1.msra.mxu0 %v7230_v42 }
  0xd9   : > { %v2803_v60 = vrot.slane %v12326_v57, 2  ;;  %v2806_v1 = vrot.slane %v12328_v51, 2  ;;  %v2809_v19 = vrot.slane %v12330_v5, 2  ;;  %v12331_v18 = vmov %v12323_v47  ;;  %v7229_v42 = vld [vmem:[%s11801_s2 + $0x338] sm:$0xff]  ;;  %4081 = vmatmul.mubr.f32.gmra.mxu1 %v9218_v61  ;;  %5234 = vmatprep.subr.mxu0 %v12204_v35 }
  0xda   : > { %v2799_v47 = vsel %vm8984_vm8, %v2797_v22, %v12331_v18  ;;  %v12333_v57 = vrot.slane %v12332_v56, 7  ;;  %v12334_v51 = vrot.slane %v12325_v16, 7  ;;  %v12335_v33 = vrot.slane %v12327_v54, 7  ;;  %v7173_v22 = vld [vmem:[%s11801_s2 + $0x280] sm:$0xff]  ;;  %4733 = vmatmul.mubr.f32.gmra.mxu0 %v9194_v29  ;;  %7078 = vmatprep.mubr.msk.f32.mxu1 %vm3354_vm1, %v9201_v6 }
  0xdb   : > { %v4349_v55 = vcombine.low %v9241_v23, %v2799_v47  ;;  %v12337_v16 = vrot.slane %v12336_v46, 7  ;;  %v4230_v54 = vrot.slane %v2092_v10, 7  ;;  %v2100_v18 = vrot.slane %v2093_v49, %v7762_v30  ;;  %4951 = vmatpush1.msra.mxu1 %v7173_v22  ;;  %5235 = vmatpush1.msra.mxu0 %v7229_v42  ;;  %v7172_v22 = vld [vmem:[%s11801_s2 + $0x278] sm:$0xff] }
  0xdc   : > { %v2812_v3 = vrot.slane %v12333_v57, 2  ;;  %v2802_v5 = vsel %vm8984_vm8, %v2800_v13, %v12334_v51  ;;  %v2805_v11 = vsel %vm8984_vm8, %v2803_v60, %v12335_v33  ;;  %v12338_v33 = vrot.slane %v12329_v20, 7  ;;  %4952 = vmatprep.subr.mxu1 %v12204_v35  ;;  %5236 = vmatprep.subr.mxu0 %v12204_v35 }
  0xdd   : > { %v9277_v13 = vrot.slane %v12337_v16, 2  ;;  %v3693_v60 = vcombine.low %v2799_v47, %v2802_v5  ;;  %v4350_v57 = vcombine.low %v2802_v5, %v2805_v11  ;;  %v4357_v51 = vrot.slane %v4349_v55, %v7762_v30  ;;  %v12340_v47 = vld [vmem:[#allocation80_spill] sm:$0xff]  ;;  %4086 = vmatmul.mubr.f32.gmra.mxu1 %v9203_v27 }
  0xde   : > { %v2808_v16 = vsel %vm8984_vm8, %v2806_v1, %v12338_v33  ;;  %v12339_v10 = vrot.slane %v12332_v56, 7  ;;  %v12341_v5 = vrot.slane %v12340_v47, 7  ;;  %v4231_v32 = vsel %vm8984_vm8, %v9163_v63, %v4230_v54  ;;  %7079 = vmatprep.mubr.msk.f32.mxu1 %vm3354_vm1, %v9216_v44  ;;  %4953 = vmatpush1.msra.mxu1 %v7172_v22  ;;  %v7183_v27 = vld [vmem:[%s11801_s2 + $0x2d0] sm:$0xff] }
  0xdf   : > { %v7010_v53 = vrot.slane %v2100_v18, 9  ;;  %v3707_v55 = vrot.slane %v3693_v60, %v7762_v30  ;;  %v4364_v20 = vrot.slane %v4350_v57, %v7762_v30  ;;  %v4332_v1 = vcombine.low %v9179_v38, %v4231_v32  ;;  %4954 = vmatprep.subr.mxu1 %v12204_v35 }
  0xe0   : > { %v2811_v49 = vsel %vm8984_vm8, %v2809_v19, %v12339_v10  ;;  %v2819_v0 = vrot.slane %v12341_v5, 2  ;;  %v12342_v56 = vrot.slane %v12336_v46, 7  ;;  %v3710_v33 = vcombine.low %v2805_v11, %v2808_v16  ;;  %v12343_v10 = vld [vmem:[#allocation62_spill] sm:$0xff]  ;;  %v7228_v46 = vld [vmem:[%s11801_s2 + $0x330] sm:$0xff] }
  0xe1   : > { %v12344_v63 = vcombine.high %v12343_v10, %v12343_v10  ;;  %v12345_v32 = vrot.slane %v12318_v14, 7  ;;  %v9321_v38 = vcombine.high %v4357_v51, %v4364_v20  ;;  %v9323_v11 = vcombine.low %v4357_v51, %v4364_v20  ;;  %v7171_v20 = vld [vmem:[%s11801_s2 + $0x270] sm:$0xff]  ;;  %5237 = vmatpush1.msra.mxu0 %v7228_v46  ;;  %4091 = vmatmul.mubr.f32.gmra.mxu1 %v9218_v61 }
  0xe2   : > { %v9306_v19 = vsel %vm8984_vm8, %v2812_v3, %v12342_v56  ;;  %v4346_v18 = vrot.slane %v4332_v1, %v7762_v30  ;;  %v3718_v60 = vrot.slane %v3710_v33, %v7762_v30  ;;  %v4367_v5 = vcombine.low %v2808_v16, %v2811_v49  ;;  %v12348_v1 = vld [vmem:[#allocation82_spill] sm:$0xff]  ;;  %v12352_v16 = vld [vmem:[#allocation83_spill] sm:$0xff]  ;;  %4955 = vmatpush1.msra.mxu1 %v7171_v20 }
  0xe3   : > { %v621_v54 = vrot.slane %v12344_v63, %v7720_v12  ;;  %v2793_v3 = vsel %vm8984_vm8, %v7010_v53, %v12345_v32  ;;  %12346 = vst [vmem:[#allocation34_spill] sm:$0xff] %v9321_v38  ;;  %12347 = vst [vmem:[#allocation43_spill] sm:$0xff] %v9323_v11  ;;  %v3711_v42 = vcombine.low %v2811_v49, %v9306_v19  ;;  %v12349_v56 = vrot.slane %v12348_v1, 7 }
  0xe4   : > { %v3692_v14 = vcombine.low %v2793_v3, %v9241_v23  ;;  %v9344_v23 = vcombine.high %v9211_v17, %v4346_v18  ;;  %v9347_v33 = vcombine.low %v9211_v17, %v4346_v18  ;;  %v12353_v49 = vrot.slane %v12352_v16, 7  ;;  %v7227_v18 = vld [vmem:[%s11801_s2 + $0x328] sm:$0xff]  ;;  %5238 = vmatprep.subr.mxu0 %v12204_v35  ;;  %4956 = vmatprep.subr.mxu1 %v12204_v35 }
  0xe5   : > { %v1368_v53 = vrot.slane %v621_v54, %v7739_v21  ;;  %v3725_v57 = vrot.slane %v3711_v42, %v7762_v30  ;;  %v1372_v51 = vrot.slane %v621_v54, %v7747_v24  ;;  %v2822_v10 = vrot.slane %v12349_v56, 2  ;;  %5239 = vmatpush1.msra.mxu0 %v7227_v18 }
  0xe6   : > { %12350 = vst [vmem:[#allocation52_spill] sm:$0xff] %v9344_v23  ;;  %12351 = vst [vmem:[#allocation53_spill] sm:$0xff] %v9347_v33  ;;  %v3700_v63 = vrot.slane %v3692_v14, %v7762_v30  ;;  %v2825_v54 = vrot.slane %v12353_v49, 2  ;;  %v9359_v42 = vrot.slane %v4367_v5, %v7762_v30  ;;  %7133 = vmatprep.mubr.msk.f32.mxu0 %vm3354_vm1, %v9344_v23  ;;  %v12358_v14 = vld [vmem:[#allocation75_spill] sm:$0xff]  ;;  %v12361_v20 = vmov %v12349_v56 }
  0xe7   : > { %v9354_v22 = vcombine.high %v3718_v60, %v3725_v57  ;;  %v9356_v32 = vcombine.low %v3718_v60, %v3725_v57  ;;  %v2165_v3 = vcombine.low %v1368_v53, %v1372_v51  ;;  %v1376_v60 = vrot.slane %v12358_v14, %v7739_v21  ;;  %v12359_v57 = vld [vmem:[#allocation84_spill] sm:$0xff]  ;;  %4738 = vmatmul.mubr.f32.gmra.mxu0 %v9347_v33 }
  0xe8   : > { %v9363_v17 = vcombine.high %v3700_v63, %v3707_v55  ;;  %v9365_v46 = vcombine.low %v3700_v63, %v3707_v55  ;;  %v12360_v53 = vrot.slane %v12359_v57, 7  ;;  %v1380_v55 = vrot.slane %v12358_v14, %v7747_v24  ;;  %7134 = vmatprep.mubr.msk.f32.mxu0 %vm3354_vm1, %v9192_v26  ;;  %5240 = vmatprep.subr.mxu0 %v12204_v35 }
  0xe9   : > { %12354 = vst [vmem:[#allocation54_spill] sm:$0xff] %v9354_v22  ;;  %12355 = vst [vmem:[#allocation56_spill] sm:$0xff] %v9356_v32  ;;  %v2172_v5 = vrot.slane %v2165_v3, %v7762_v30  ;;  %v9383_v56 = vsel %vm8984_vm8, %v2819_v0, %v12361_v20  ;;  %v12362_v63 = vrot.slane %v8877_v34, 7  ;;  %v12363_v3 = vrot.slane %v12352_v16, 7 }
  0xea   : > { %12356 = vst [vmem:[#allocation66_spill] sm:$0xff] %v9363_v17  ;;  %12357 = vst [vmem:[#allocation67_spill] sm:$0xff] %v9365_v46  ;;  %v2828_v51 = vrot.slane %v12360_v53, 2  ;;  %7080 = vmatprep.mubr.msk.f32.mxu1 %vm3354_vm1, %v9363_v17  ;;  %v12364_v1 = vmov %v12360_v53  ;;  %v2173_v16 = vcombine.low %v1376_v60, %v1380_v55  ;;  %v12368_v18 = vrot.slane %v8886_v52, 7 }
  0xeb   : > { %v2831_v49 = vrot.slane %v12362_v63, 2  ;;  %v2824_v14 = vsel %vm8984_vm8, %v2822_v10, %v12363_v3  ;;  %v2827_v0 = vsel %vm8984_vm8, %v2825_v54, %v12364_v1  ;;  %v12365_v53 = vmov %v12362_v63  ;;  %4096 = vmatmul.mubr.f32.gmra.mxu1 %v9365_v46  ;;  %v7170_v54 = vld [vmem:[%s11801_s2 + $0x268] sm:$0xff]  ;;  %4743 = vmatmul.mubr.f32.gmra.mxu0 %v9194_v29  ;;  %v7226_v1 = vld [vmem:[%s11801_s2 + $0x320] sm:$0xff] }
  0xec   : > { %v2830_v20 = vsel %vm8984_vm8, %v2828_v51, %v12365_v53  ;;  %v12366_v63 = vrot.slane %v8880_v15, 7  ;;  %v4233_v62 = vrot.slane %v2172_v5, 7  ;;  %v3729_v59 = vcombine.low %v2824_v14, %v2827_v0  ;;  %7081 = vmatprep.mubr.msk.f32.mxu1 %vm3354_vm1, %v9354_v22  ;;  %7135 = vmatprep.mubr.msk.f32.mxu0 %vm3354_vm1, %v9344_v23 }
  0xed   : > { %v4385_v10 = vcombine.low %v9383_v56, %v2824_v14  ;;  %v4386_v34 = vcombine.low %v2827_v0, %v2830_v20  ;;  %v12369_v5 = vmov %v12368_v18  ;;  %v2180_v14 = vrot.slane %v2173_v16, %v7762_v30  ;;  %4957 = vmatpush1.msra.mxu1 %v7170_v54  ;;  %v12372_v16 = vld [vmem:[#allocation85_spill] sm:$0xff]  ;;  %5241 = vmatpush1.msra.mxu0 %v7226_v1 }
  0xee   : > { %v2834_v26 = vrot.slane %v12366_v63, 2  ;;  %v12367_v57 = vmov %v12366_v63  ;;  %v2837_v55 = vrot.slane %v12369_v5, 2  ;;  %v4234_v3 = vsel %vm8984_vm8, %v9277_v13, %v4233_v62  ;;  %4958 = vmatprep.subr.mxu1 %v12204_v35  ;;  %5242 = vmatprep.subr.mxu0 %v12204_v35 }
  0xef   : > { %v2833_v51 = vsel %vm8984_vm8, %v2831_v49, %v12367_v57  ;;  %v3743_v15 = vrot.slane %v3729_v59, %v7762_v30  ;;  %v4393_v49 = vrot.slane %v4385_v10, %v7762_v30  ;;  %v4368_v52 = vcombine.low %v9306_v19, %v4234_v3  ;;  %4101 = vmatmul.mubr.f32.gmra.mxu1 %v9356_v32 }
  0xf0   : > { %v2836_v60 = vsel %vm8984_vm8, %v2834_v26, %v12368_v18  ;;  %v4400_v26 = vrot.slane %v4386_v34, %v7762_v30  ;;  %v12370_v62 = vrot.slane %v8894_v39, 7  ;;  %v7011_v53 = vrot.slane %v2180_v14, 9  ;;  %7082 = vmatprep.mubr.msk.f32.mxu1 %vm3354_vm1, %v9363_v17  ;;  %v12376_v18 = vld [vmem:[#allocation8_spill] sm:$0xff]  ;;  %4748 = vmatmul.mubr.f32.gmra.mxu0 %v9347_v33 }
  0xf1   : > { %v3746_v63 = vcombine.low %v2830_v20, %v2833_v51  ;;  %v12373_v10 = vcombine.high %v12372_v16, %v12372_v16  ;;  %v4382_v34 = vrot.slane %v4368_v52, %v7762_v30  ;;  %v12377_v5 = vrot.slane %v12376_v18, 7  ;;  %7136 = vmatprep.mubr.msk.f32.mxu0 %vm3354_vm1, %v9321_v38  ;;  %v7225_v16 = vld [vmem:[%s11801_s2 + $0x318] sm:$0xff] }
  0xf2   : > { %v9441_v13 = vsel %vm8984_vm8, %v2837_v55, %v12370_v62  ;;  %v12371_v59 = vmov %v12370_v62  ;;  %v9457_v39 = vcombine.high %v4393_v49, %v4400_v26  ;;  %v9459_v57 = vcombine.low %v4393_v49, %v4400_v26  ;;  %v7169_v49 = vld [vmem:[%s11801_s2 + $0x260] sm:$0xff]  ;;  %5243 = vmatpush1.msra.mxu0 %v7225_v16 }
  0xf3   : > { %v9445_v0 = vrot.slane %v12371_v59, 2  ;;  %v3747_v19 = vcombine.low %v2836_v60, %v9441_v13  ;;  %v694_v54 = vrot.slane %v12373_v10, %v7720_v12  ;;  %v2844_v20 = vrot.slane %v12377_v5, 2  ;;  %4106 = vmatmul.mubr.f32.gmra.mxu1 %v9365_v46  ;;  %v12383_v10 = vld [vmem:[#allocation9_spill] sm:$0xff]  ;;  %5244 = vmatprep.subr.mxu0 %v12204_v35 }
  0xf4   : > { %12374 = vst [vmem:[#allocation69_spill] sm:$0xff] %v9457_v39  ;;  %12375 = vst [vmem:[#allocation70_spill] sm:$0xff] %v9459_v57  ;;  %v12378_v55 = vrot.slane %v12340_v47, 7  ;;  %v3754_v14 = vrot.slane %v3746_v63, %v7762_v30  ;;  %v9477_v1 = vcombine.high %v9359_v42, %v4382_v34  ;;  %v9480_v47 = vcombine.low %v9359_v42, %v4382_v34  ;;  %v12385_v5 = vld [vmem:[#allocation5_spill] sm:$0xff] }
  0xf5   : > { %v3761_v52 = vrot.slane %v3747_v19, %v7762_v30  ;;  %v1448_v62 = vrot.slane %v694_v54, %v7739_v21  ;;  %v1452_v59 = vrot.slane %v694_v54, %v7747_v24  ;;  %v4403_v19 = vcombine.low %v2833_v51, %v2836_v60  ;;  %7083 = vmatprep.mubr.msk.f32.mxu1 %vm3354_vm1, %v9354_v22  ;;  %v12386_v51 = vld [vmem:[#allocation10_spill] sm:$0xff] }
  0xf6   : > { %v2818_v3 = vsel %vm8984_vm8, %v7011_v53, %v12378_v55  ;;  %12379 = vst [vmem:[#allocation80_spill] sm:$0xff] %v9477_v1  ;;  %12380 = vst [vmem:[#allocation62_spill] sm:$0xff] %v9480_v47  ;;  %v12384_v42 = vrot.slane %v12383_v10, 7  ;;  %4959 = vmatpush1.msra.mxu1 %v7169_v49  ;;  %v1456_v55 = vrot.slane %v12385_v5, %v7739_v21  ;;  %v12387_v60 = vrot.slane %v12386_v51, 7 }
  0xf7   : > { %v3728_v26 = vcombine.low %v2818_v3, %v9383_v56  ;;  %v9485_v53 = vcombine.high %v3754_v14, %v3761_v52  ;;  %v9487_v63 = vcombine.low %v3754_v14, %v3761_v52  ;;  %v2245_v54 = vcombine.low %v1448_v62, %v1452_v59  ;;  %4753 = vmatmul.mubr.f32.gmra.mxu0 %v9323_v11  ;;  %v7168_v52 = vld [vmem:[%s11801_s2 + $0x258] sm:$0xff]  ;;  %v12389_v59 = vld [vmem:[#allocation7_spill] sm:$0xff] }
  0xf8   : > { %v2847_v34 = vrot.slane %v12384_v42, 2  ;;  %v2850_v3 = vrot.slane %v12387_v60, 2  ;;  %v9504_v14 = vrot.slane %v4403_v19, %v7762_v30  ;;  %v1460_v62 = vrot.slane %v12385_v5, %v7747_v24  ;;  %7137 = vmatprep.mubr.msk.f32.mxu0 %vm3354_vm1, %v9477_v1  ;;  %v12393_v5 = vld [vmem:[#allocation14_spill] sm:$0xff]  ;;  %4111 = vmatmul.mubr.f32.gmra.mxu1 %v9356_v32 }
  0xf9   : > { %12381 = vst [vmem:[#allocation82_spill] sm:$0xff] %v9485_v53  ;;  %12382 = vst [vmem:[#allocation83_spill] sm:$0xff] %v9487_v63  ;;  %v3736_v56 = vrot.slane %v3728_v26, %v7762_v30  ;;  %v12388_v49 = vmov %v12384_v42  ;;  %v12390_v42 = vrot.slane %v12389_v59, 7  ;;  %v2252_v23 = vrot.slane %v2245_v54, %v7762_v30  ;;  %4960 = vmatprep.subr.mxu1 %v12204_v35 }
  0xfa   : > { %v9516_v26 = vsel %vm8984_vm8, %v2844_v20, %v12388_v49  ;;  %v12394_v29 = vrot.slane %v12393_v5, 7  ;;  %v7224_v20 = vld [vmem:[%s11801_s2 + $0x310] sm:$0xff]  ;;  %v2253_v49 = vcombine.low %v1456_v55, %v1460_v62  ;;  %4961 = vmatpush1.msra.mxu1 %v7168_v52  ;;  %v12399_v55 = vrot.slane %v12393_v5, 7 }
  0xfb   : > { %v2853_v60 = vrot.slane %v12390_v42, 2  ;;  %v9522_v19 = vcombine.high %v3736_v56, %v3743_v15  ;;  %v9524_v33 = vcombine.low %v3736_v56, %v3743_v15  ;;  %v12395_v42 = vrot.slane %v12386_v51, 7  ;;  %4758 = vmatmul.mubr.f32.gmra.mxu0 %v9480_v47  ;;  %v12401_v5 = vld [vmem:[#allocation16_spill] sm:$0xff]  ;;  %4962 = vmatprep.subr.mxu1 %v12204_v35 }
  0xfc   : > { %v2856_v10 = vrot.slane %v12394_v29, 2  ;;  %v12396_v56 = vrot.slane %v12389_v59, 7  ;;  %v12397_v29 = vld [vmem:[#allocation15_spill] sm:$0xff]  ;;  %v4236_v37 = vrot.slane %v2252_v23, 7  ;;  %v7167_v23 = vld [vmem:[%s11801_s2 + $0x250] sm:$0xff]  ;;  %7138 = vmatprep.mubr.msk.f32.mxu0 %vm3354_vm1, %v9321_v38  ;;  %5245 = vmatpush1.msra.mxu0 %v7224_v20 }
  0xfd   : > { %12391 = vst [vmem:[#allocation75_spill] sm:$0xff] %v9522_v19  ;;  %12392 = vst [vmem:[#allocation84_spill] sm:$0xff] %v9524_v33  ;;  %v2849_v15 = vsel %vm8984_vm8, %v2847_v34, %v12395_v42  ;;  %v12398_v54 = vrot.slane %v12397_v29, 7  ;;  %7084 = vmatprep.mubr.msk.f32.mxu1 %vm3354_vm1, %v9522_v19  ;;  %v2855_v51 = vsel %vm8984_vm8, %v2853_v60, %v12399_v55  ;;  %v12402_v60 = vrot.slane %v12401_v5, 7  ;;  %v12409_v5 = vld [vmem:[#allocation22_spill] sm:$0xff] }
  0xfe   : > { %v2852_v16 = vsel %vm8984_vm8, %v2850_v3, %v12396_v56  ;;  %v4421_v34 = vcombine.low %v9516_v26, %v2849_v15  ;;  %v2260_v3 = vrot.slane %v2253_v49, %v7762_v30  ;;  %v4237_v49 = vsel %vm8984_vm8, %v9445_v0, %v4236_v37  ;;  %4116 = vmatmul.mubr.f32.gmra.mxu1 %v9524_v33 }
  0xff   : > { %v2859_v41 = vrot.slane %v12398_v54, 2  ;;  %v3765_v36 = vcombine.low %v2849_v15, %v2852_v16  ;;  %v4422_v62 = vcombine.low %v2852_v16, %v2855_v51  ;;  %v12400_v52 = vmov %v12398_v54  ;;  %v12403_v16 = vld [vmem:[#allocation17_spill] sm:$0xff]  ;;  %7085 = vmatprep.mubr.msk.f32.mxu1 %vm3354_vm1, %v9485_v53  ;;  %4963 = vmatpush1.msra.mxu1 %v7167_v23 }
 0x100   : > { %v2858_v59 = vsel %vm8984_vm8, %v2856_v10, %v12400_v52  ;;  %v2862_v42 = vrot.slane %v12402_v60, 2  ;;  %v4429_v56 = vrot.slane %v4421_v34, %v7762_v30  ;;  %v12404_v29 = vrot.slane %v12403_v16, 7  ;;  %v7223_v34 = vld [vmem:[%s11801_s2 + $0x308] sm:$0xff]  ;;  %4763 = vmatmul.mubr.f32.gmra.mxu0 %v9323_v11  ;;  %5246 = vmatprep.subr.mxu0 %v12204_v35 }
 0x101   : > { %v3779_v15 = vrot.slane %v3765_v36, %v7762_v30  ;;  %v4404_v10 = vcombine.low %v9441_v13, %v4237_v49  ;;  %v7012_v55 = vrot.slane %v2260_v3, 9  ;;  %v4436_v52 = vrot.slane %v4422_v62, %v7762_v30  ;;  %v12407_v3 = vld [vmem:[#allocation12_spill] sm:$0xff]  ;;  %7139 = vmatprep.mubr.msk.f32.mxu0 %vm3354_vm1, %v9477_v1  ;;  %5247 = vmatpush1.msra.mxu0 %v7223_v34 }
 0x102   : > { %v9572_v54 = vrot.slane %v12404_v29, 2  ;;  %v12405_v37 = vmov %v12402_v60  ;;  %v12406_v0 = vmov %v12404_v29  ;;  %v3782_v13 = vcombine.low %v2855_v51, %v2858_v59  ;;  %4121 = vmatmul.mubr.f32.gmra.mxu1 %v9487_v63  ;;  %4964 = vmatprep.subr.mxu1 %v12204_v35  ;;  %v12420_v34 = vld [vmem:[#allocation20_spill] sm:$0xff] }
 0x103   : > { %v2861_v36 = vsel %vm8984_vm8, %v2859_v41, %v12405_v37  ;;  %v9588_v20 = vsel %vm8984_vm8, %v2862_v42, %v12406_v0  ;;  %v12408_v62 = vcombine.high %v12407_v3, %v12407_v3  ;;  %v12410_v60 = vrot.slane %v12409_v5, 7  ;;  %v12414_v3 = vld [vmem:[#allocation23_spill] sm:$0xff]  ;;  %7086 = vmatprep.mubr.msk.f32.mxu1 %vm3354_vm1, %v9522_v19  ;;  %5248 = vmatprep.subr.mxu0 %v12204_v35 }
 0x104   : > { %v4418_v23 = vrot.slane %v4404_v10, %v7762_v30  ;;  %v12411_v42 = vrot.slane %v12376_v18, 7  ;;  %v9605_v16 = vcombine.high %v4429_v56, %v4436_v52  ;;  %v9607_v29 = vcombine.low %v4429_v56, %v4436_v52  ;;  %v12418_v52 = vld [vmem:[#allocation24_spill] sm:$0xff]  ;;  %4768 = vmatmul.mubr.f32.gmra.mxu0 %v9480_v47 }
 0x105   : > { %v767_v41 = vrot.slane %v12408_v62, %v7720_v12  ;;  %v2869_v49 = vrot.slane %v12410_v60, 2  ;;  %v3783_v0 = vcombine.low %v2861_v36, %v9588_v20  ;;  %v3790_v10 = vrot.slane %v3782_v13, %v7762_v30  ;;  %7140 = vmatprep.mubr.msk.f32.mxu0 %vm3354_vm1, %v9457_v39 }
 0x106   : > { %v2843_v51 = vsel %vm8984_vm8, %v7012_v55, %v12411_v42  ;;  %12412 = vst [vmem:[#allocation85_spill] sm:$0xff] %v9605_v16  ;;  %12413 = vst [vmem:[#allocation8_spill] sm:$0xff] %v9607_v29  ;;  %v12415_v18 = vrot.slane %v12414_v3, 7  ;;  %v9619_v55 = vcombine.high %v9504_v14, %v4418_v23  ;;  %v9622_v56 = vcombine.low %v9504_v14, %v4418_v23  ;;  %v7166_v14 = vld [vmem:[%s11801_s2 + $0x248] sm:$0xff] }
 0x107   : > { %v3764_v37 = vcombine.low %v2843_v51, %v9516_v26  ;;  %v1528_v26 = vrot.slane %v767_v41, %v7739_v21  ;;  %v12419_v60 = vrot.slane %v12418_v52, 7  ;;  %v3797_v51 = vrot.slane %v3783_v0, %v7762_v30  ;;  %4126 = vmatmul.mubr.f32.gmra.mxu1 %v9524_v33 }
 0x108   : > { %v2872_v62 = vrot.slane %v12415_v18, 2  ;;  %12416 = vst [vmem:[#allocation9_spill] sm:$0xff] %v9619_v55  ;;  %12417 = vst [vmem:[#allocation5_spill] sm:$0xff] %v9622_v56  ;;  %v1532_v18 = vrot.slane %v767_v41, %v7747_v24  ;;  %v4439_v1 = vcombine.low %v2858_v59, %v2861_v36  ;;  %v1536_v23 = vrot.slane %v12420_v34, %v7739_v21  ;;  %v12422_v59 = vld [vmem:[#allocation21_spill] sm:$0xff] }
 0x109   : > { %v2875_v42 = vrot.slane %v12419_v60, 2  ;;  %v3772_v13 = vrot.slane %v3764_v37, %v7762_v30  ;;  %v1540_v60 = vrot.slane %v12420_v34, %v7747_v24  ;;  %v12421_v37 = vrot.slane %v12414_v3, 7  ;;  %v7222_v34 = vld [vmem:[%s11801_s2 + $0x300] sm:$0xff]  ;;  %7087 = vmatprep.mubr.msk.f32.mxu1 %vm3354_vm1, %v9485_v53  ;;  %4965 = vmatpush1.msra.mxu1 %v7166_v14 }
 0x10a   : > { %v12423_v36 = vrot.slane %v12422_v59, 7  ;;  %v9655_v38 = vcombine.high %v3790_v10, %v3797_v51  ;;  %v9657_v4 = vcombine.low %v3790_v10, %v3797_v51  ;;  %v2325_v3 = vcombine.low %v1528_v26, %v1532_v18  ;;  %4773 = vmatmul.mubr.f32.gmra.mxu0 %v9459_v57  ;;  %4966 = vmatprep.subr.mxu1 %v12204_v35 }
 0x10b   : > { %v9645_v41 = vsel %vm8984_vm8, %v2869_v49, %v12421_v37  ;;  %v9651_v47 = vcombine.high %v3772_v13, %v3779_v15  ;;  %v9653_v11 = vcombine.low %v3772_v13, %v3779_v15  ;;  %v9661_v49 = vrot.slane %v4439_v1, %v7762_v30  ;;  %7141 = vmatprep.mubr.msk.f32.mxu0 %vm3354_vm1, %v9619_v55 }
 0x10c   : > { %v2878_v0 = vrot.slane %v12423_v36, 2  ;;  %12426 = vst [vmem:[#allocation14_spill] sm:$0xff] %v9655_v38  ;;  %12427 = vst [vmem:[#allocation15_spill] sm:$0xff] %v9657_v4  ;;  %v2333_v37 = vcombine.low %v1536_v23, %v1540_v60  ;;  %v12428_v36 = vld [vmem:[#allocation32_spill] sm:$0xff]  ;;  %v12430_v10 = vrot.slane %v12418_v52, 7  ;;  %v12431_v26 = vrot.slane %v12422_v59, 7  ;;  %5249 = vmatpush1.msra.mxu0 %v7222_v34  ;;  %4131 = vmatmul.mubr.f32.gmra.mxu1 %v9487_v63 }
 0x10d   : > { %12424 = vst [vmem:[#allocation10_spill] sm:$0xff] %v9651_v47  ;;  %12425 = vst [vmem:[#allocation7_spill] sm:$0xff] %v9653_v11  ;;  %v12429_v15 = vrot.slane %v12428_v36, 7  ;;  %v12433_v60 = vld [vmem:[#allocation33_spill] sm:$0xff]  ;;  %v2332_v52 = vrot.slane %v2325_v3, %v7762_v30  ;;  %v12435_v59 = vld [vmem:[#allocation35_spill] sm:$0xff]  ;;  %5250 = vmatprep.subr.mxu0 %v12204_v35  ;;  %7088 = vmatprep.mubr.msk.f32.mxu1 %vm3354_vm1, %v9651_v47 }
 0x10e   : > { %v2874_v1 = vsel %vm8984_vm8, %v2872_v62, %v12430_v10  ;;  %v2877_v51 = vsel %vm8984_vm8, %v2875_v42, %v12431_v26  ;;  %v7165_v62 = vld [vmem:[%s11801_s2 + $0x240] sm:$0xff]  ;;  %v2340_v42 = vrot.slane %v2333_v37, %v7762_v30  ;;  %v12436_v36 = vrot.slane %v12435_v59, 7  ;;  %4778 = vmatmul.mubr.f32.gmra.mxu0 %v9622_v56 }
 0x10f   : > { %v2881_v13 = vrot.slane %v12429_v15, 2  ;;  %v12432_v18 = vmov %v12429_v15  ;;  %v12434_v15 = vrot.slane %v12433_v60, 7  ;;  %v3801_v14 = vcombine.low %v2874_v1, %v2877_v51  ;;  %4967 = vmatpush1.msra.mxu1 %v7165_v62  ;;  %7142 = vmatprep.mubr.msk.f32.mxu0 %vm3354_vm1, %v9457_v39 }
 0x110   : > { %v2880_v23 = vsel %vm8984_vm8, %v2878_v0, %v12432_v18  ;;  %v2887_v10 = vrot.slane %v12436_v36, 2  ;;  %v4457_v3 = vcombine.low %v9645_v41, %v2874_v1  ;;  %v4239_v37 = vrot.slane %v2332_v52, 7  ;;  %v7221_v36 = vld [vmem:[%s11801_s2 + $0x2f8] sm:$0xff]  ;;  %4968 = vmatprep.subr.mxu1 %v12204_v35  ;;  %4136 = vmatmul.mubr.f32.gmra.mxu1 %v9653_v11 }
 0x111   : > { %v2884_v7 = vrot.slane %v12434_v15, 2  ;;  %v4458_v26 = vcombine.low %v2877_v51, %v2880_v23  ;;  %v12437_v18 = vmov %v12434_v15  ;;  %v7013_v0 = vrot.slane %v2340_v42, 9  ;;  %5251 = vmatpush1.msra.mxu0 %v7221_v36  ;;  %7089 = vmatprep.mubr.msk.f32.mxu1 %vm3354_vm1, %v9655_v38 }
 0x112   : > { %v9702_v15 = vsel %vm8984_vm8, %v2881_v13, %v12437_v18  ;;  %v3815_v34 = vrot.slane %v3801_v14, %v7762_v30  ;;  %v12438_v1 = vrot.slane %v12435_v59, 7  ;;  %v4465_v60 = vrot.slane %v4457_v3, %v7762_v30  ;;  %v12439_v18 = vld [vmem:[#allocation36_spill] sm:$0xff]  ;;  %v7164_v59 = vld [vmem:[%s11801_s2 + $0x238] sm:$0xff]  ;;  %5252 = vmatprep.subr.mxu0 %v12204_v35  ;;  %4783 = vmatmul.mubr.f32.gmra.mxu0 %v9459_v57 }
 0x113   : > { %v4472_v52 = vrot.slane %v4458_v26, %v7762_v30  ;;  %v12440_v63 = vrot.slane %v12439_v18, 7  ;;  %v12441_v14 = vrot.slane %v12409_v5, 7  ;;  %v12444_v26 = vld [vmem:[#allocation46_spill] sm:$0xff]  ;;  %4969 = vmatpush1.msra.mxu1 %v7164_v59  ;;  %v12453_v13 = vld [vmem:[#allocation49_spill] sm:$0xff]  ;;  %7143 = vmatprep.mubr.msk.f32.mxu0 %vm3354_vm1, %v9619_v55  ;;  %v7163_v57 = vld [vmem:[%s11801_s2 + $0x230] sm:$0xff] }
 0x114   : > { %v2886_v51 = vsel %vm8984_vm8, %v2884_v7, %v12438_v1  ;;  %v4240_v7 = vsel %vm8984_vm8, %v9572_v54, %v4239_v37  ;;  %v12445_v37 = vrot.slane %v12444_v26, 7  ;;  %v12454_v39 = vrot.slane %v12453_v13, 7  ;;  %4970 = vmatprep.subr.mxu1 %v12204_v35  ;;  %v12455_v59 = vld [vmem:[#allocation41_spill] sm:$0xff]  ;;  %4141 = vmatmul.mubr.f32.gmra.mxu1 %v9657_v4 }
 0x115   : > { %v9723_v42 = vsel %vm8984_vm8, %v2887_v10, %v12440_v63  ;;  %v2868_v62 = vsel %vm8984_vm8, %v7013_v0, %v12441_v14  ;;  %v3818_v63 = vcombine.low %v2880_v23, %v9702_v15  ;;  %v12442_v10 = vrot.slane %v12439_v18, 7  ;;  %v9750_v14 = vpop.f32.mrf.mxu1  ;;  %7090 = vmatprep.mubr.msk.f32.mxu1 %vm3354_vm1, %v9651_v47  ;;  %4971 = vmatpush1.msra.mxu1 %v7163_v57 }
 0x116   : > { %v4440_v54 = vcombine.low %v9588_v20, %v4240_v7  ;;  %v3800_v5 = vcombine.low %v2868_v62, %v9645_v41  ;;  %v9746_v0 = vcombine.high %v4465_v60, %v4472_v52  ;;  %v2894_v1 = vrot.slane %v12445_v37, 2  ;;  %12446 = vst [vmem:[#allocation17_spill] sm:$0xff] %v9750_v14  ;;  %v12448_v20 = vld [vmem:[#allocation47_spill] sm:$0xff]  ;;  %v9760_v7 = vpop.f32.mrf.mxu0  ;;  %4788 = vmatmul.mubr.f32.gmra.mxu0 %v9622_v56 }
 0x117   : > { %v9740_v3 = vrot.slane %v12442_v10, 2  ;;  %v9753_v23 = vcombine.low %v4465_v60, %v4472_v52  ;;  %v3819_v18 = vcombine.low %v2886_v51, %v9723_v42  ;;  %v3826_v10 = vrot.slane %v3818_v63, %v7762_v30  ;;  %12450 = vst [vmem:[#allocation22_spill] sm:$0xff] %v9760_v7  ;;  %v12451_v60 = vld [vmem:[#allocation25_spill] sm:$0xff]  ;;  %v3543_v53 = vpop.f32.mrf.mxu1  ;;  %7144 = vmatprep.mubr.msk.f32.mxu0 %vm3354_vm1, %v9605_v16 }
 0x118   : > { %12443 = vst [vmem:[#allocation16_spill] sm:$0xff] %v9746_v0  ;;  %v12449_v36 = vrot.slane %v12448_v20, 7  ;;  %v4454_v62 = vrot.slane %v4440_v54, %v7762_v30  ;;  %v3808_v37 = vrot.slane %v3800_v5, %v7762_v30  ;;  %v12452_v52 = vcombine.high %v12451_v60, %v12451_v60  ;;  %v7220_v54 = vld [vmem:[%s11801_s2 + $0x2f0] sm:$0xff]  ;;  %4146 = vmatmul.mubr.f32.gmra.mxu1 %v9653_v11 }
 0x119   : > { %12447 = vst [vmem:[#allocation12_spill] sm:$0xff] %v9753_v23  ;;  %v2900_v14 = vrot.slane %v12454_v39, 2  ;;  %v4475_v7 = vcombine.low %v9702_v15, %v2886_v51  ;;  %v1616_v5 = vrot.slane %v12455_v59, %v7739_v21  ;;  %v12456_v60 = vld [vmem:[#allocation48_spill] sm:$0xff]  ;;  %v3463_v39 = vpop.f32.mrf.mxu0  ;;  %v9798_v19 = vpop.f32.mrf.mxu1  ;;  %5253 = vmatpush1.msra.mxu0 %v7220_v54  ;;  %v12465_v54 = vrot.slane %v12453_v13, 7  ;;  %7091 = vmatprep.mubr.msk.f32.mxu1 %vm3354_vm1, %v9655_v38 }
 0x11a   : > { %v2897_v41 = vrot.slane %v12449_v36, 2  ;;  %v840_v63 = vrot.slane %v12452_v52, %v7720_v12  ;;  %v3833_v36 = vrot.slane %v3819_v18, %v7762_v30  ;;  %v12457_v52 = vrot.slane %v12456_v60, 7  ;;  %12460 = vst [vmem:[#allocation20_spill] sm:$0xff] %v9798_v19  ;;  %5254 = vmatprep.subr.mxu0 %v12204_v35  ;;  %4972 = vmatprep.subr.mxu1 %v12204_v35 }
 0x11b   : > { %v9786_v53 = vcombine.high %v9661_v49, %v4454_v62  ;;  %v9789_v15 = vcombine.low %v9661_v49, %v4454_v62  ;;  %v9791_v51 = vcombine.high %v3808_v37, %v3815_v34  ;;  %v9793_v18 = vcombine.low %v3808_v37, %v3815_v34  ;;  %v7219_v62 = vld [vmem:[%s11801_s2 + $0x2e8] sm:$0xff]  ;;  %v3548_v32 = vpop.f32.mrf.mxu1  ;;  %4793 = vmatmul.mubr.f32.gmra.mxu0 %v9607_v29 }
 0x11c   : > { %v2903_v33 = vrot.slane %v12457_v52, 2  ;;  %v9801_v52 = vcombine.high %v3826_v10, %v3833_v36  ;;  %v9803_v39 = vcombine.low %v3826_v10, %v3833_v36  ;;  %v1608_v55 = vrot.slane %v840_v63, %v7739_v21  ;;  %v7162_v32 = vld [vmem:[%s11801_s2 + $0x228] sm:$0xff]  ;;  %5255 = vmatpush1.msra.mxu0 %v7219_v62  ;;  %v7218_v62 = vld [vmem:[%s11801_s2 + $0x2e0] sm:$0xff]  ;;  %4151 = vmatmul.mubr.f32.gmra.mxu1 %v9657_v4 }
 0x11d   : > { %12458 = vst [vmem:[#allocation23_spill] sm:$0xff] %v9786_v53  ;;  %12459 = vst [vmem:[#allocation24_spill] sm:$0xff] %v9789_v15  ;;  %v1612_v49 = vrot.slane %v840_v63, %v7747_v24  ;;  %v9810_v34 = vrot.slane %v4475_v7, %v7762_v30  ;;  %v1620_v37 = vrot.slane %v12455_v59, %v7747_v24  ;;  %v12462_v10 = vrot.slane %v12448_v20, 7  ;;  %v12463_v63 = vld [vmem:[#allocation59_spill] sm:$0xff] }
 0x11e   : > { %12461 = vst [vmem:[#allocation21_spill] sm:$0xff] %v9801_v52  ;;  %v12464_v19 = vrot.slane %v12463_v63, 7  ;;  %v2899_v22 = vsel %vm8984_vm8, %v2897_v41, %v12465_v54  ;;  %v12466_v59 = vrot.slane %v12456_v60, 7  ;;  %4973 = vmatpush1.msra.mxu1 %v7162_v32  ;;  %7145 = vmatprep.mubr.msk.f32.mxu0 %vm3354_vm1, %v9786_v53 }
 0x11f   : > { %v9821_v36 = vsel %vm8984_vm8, %v2894_v1, %v12462_v10  ;;  %v2405_v7 = vcombine.low %v1608_v55, %v1612_v49  ;;  %v12467_v1 = vld [vmem:[#allocation60_spill] sm:$0xff]  ;;  %v2413_v57 = vcombine.low %v1616_v5, %v1620_v37  ;;  %v12469_v55 = vrot.slane %v12463_v63, 7  ;;  %5256 = vmatprep.subr.mxu0 %v12204_v35  ;;  %7092 = vmatprep.mubr.msk.f32.mxu1 %vm3354_vm1, %v9791_v51 }
 0x120   : > { %v2906_v47 = vrot.slane %v12464_v19, 2  ;;  %v2902_v20 = vsel %vm8984_vm8, %v2900_v14, %v12466_v59  ;;  %v12468_v10 = vrot.slane %v12467_v1, 7  ;;  %v12470_v14 = vld [vmem:[#allocation61_spill] sm:$0xff]  ;;  %v4493_v54 = vcombine.low %v9821_v36, %v2899_v22  ;;  %5257 = vmatpush1.msra.mxu0 %v7218_v62  ;;  %4992 = vmatprep.subr.mxu1 %v12204_v35 }
 0x121   : > { %v3837_v19 = vcombine.low %v2899_v22, %v2902_v20  ;;  %v2905_v13 = vsel %vm8984_vm8, %v2903_v33, %v12469_v55  ;;  %v12471_v41 = vrot.slane %v12470_v14, 7  ;;  %v2412_v49 = vrot.slane %v2405_v7, %v7762_v30  ;;  %v7184_v14 = vld [vmem:[%s11801_s2 + $0x2d8] sm:$0xf]  ;;  %4798 = vmatmul.mubr.f32.gmra.mxu0 %v9789_v15  ;;  %4156 = vmatmul.mubr.f32.gmra.mxu1 %v9793_v18 }
 0x122   : > { %v2909_v46 = vrot.slane %v12468_v10, 2  ;;  %v4494_v59 = vcombine.low %v2902_v20, %v2905_v13  ;;  %v12472_v10 = vld [vmem:[#allocation73_spill] sm:$0xff]  ;;  %v2420_v33 = vrot.slane %v2413_v57, %v7762_v30  ;;  %v12474_v22 = vrot.slane %v12467_v1, 7  ;;  %v9876_v1 = vpop.f32.mrf.mxu0  ;;  %7185 = vmatpush2.msk.msra.mxu1 %vm3391_vm0, %v7184_v14  ;;  %7146 = vmatprep.mubr.msk.f32.mxu0 %vm3354_vm1, %v9605_v16 }
 0x123   : > { %v2912_v60 = vrot.slane %v12471_v41, 2  ;;  %v12473_v56 = vrot.slane %v12472_v10, 7  ;;  %v3851_v37 = vrot.slane %v3837_v19, %v7762_v30  ;;  %v4242_v55 = vrot.slane %v2412_v49, 7  ;;  %12477 = vst [vmem:[#allocation32_spill] sm:$0xff] %v9876_v1  ;;  %v12487_v62 = vld [vmem:[#allocation77_spill] sm:$0xff]  ;;  %5276 = vmatprep.subr.mxu0 %v12204_v35  ;;  %7093 = vmatprep.mubr.msk.f32.mxu1 %vm3354_vm1, %v9801_v52 }
 0x124   : > { %v2908_v63 = vsel %vm8984_vm8, %v2906_v47, %v12474_v22  ;;  %v4501_v57 = vrot.slane %v4493_v54, %v7762_v30  ;;  %v4508_v19 = vrot.slane %v4494_v59, %v7762_v30  ;;  %v2911_v38 = vsel %vm8984_vm8, %v2909_v46, %v12471_v41  ;;  %v12478_v22 = vld [vmem:[#allocation63_spill] sm:$0xff]  ;;  %v12480_v46 = vld [vmem:[#allocation50_spill] sm:$0xff]  ;;  %v3468_v11 = vpop.f32.mrf.mxu0  ;;  %4994 = vmatprep.subr.mxu1 %v12204_v35 }
 0x125   : > { %v9853_v5 = vrot.slane %v12473_v56, 2  ;;  %v12475_v56 = vld [vmem:[#allocation74_spill] sm:$0xff]  ;;  %v7014_v47 = vrot.slane %v2420_v33, 9  ;;  %v12479_v49 = vrot.slane %v12478_v22, 7  ;;  %v3854_v54 = vcombine.low %v2905_v13, %v2908_v63  ;;  %v12484_v13 = vld [vmem:[#allocation76_spill] sm:$0xff]  ;;  %4803 = vmatmul.mubr.f32.gmra.mxu0 %v9607_v29  ;;  %4161 = vmatmul.mubr.f32.gmra.mxu1 %v9803_v39 }
 0x126   : > { %v12476_v7 = vrot.slane %v12475_v56, 7  ;;  %v12481_v59 = vcombine.high %v12480_v46, %v12480_v46  ;;  %v4243_v33 = vsel %vm8984_vm8, %v9740_v3, %v4242_v55  ;;  %v9898_v41 = vcombine.high %v4501_v57, %v4508_v19  ;;  %7147 = vmatprep.mubr.msk.f32.mxu0 %vm3354_vm1, %v9786_v53  ;;  %7094 = vmatprep.mubr.msk.f32.mxu1 %vm3354_vm1, %v9791_v51  ;;  %v12569_v53 = vld [vmem:[#allocation15_spill] sm:$0xff] }
 0x127   : > { %v9885_v32 = vsel %vm8984_vm8, %v2912_v60, %v12479_v49  ;;  %v9900_v60 = vcombine.low %v4501_v57, %v4508_v19  ;;  %v12485_v49 = vrot.slane %v12484_v13, 7  ;;  %v4476_v46 = vcombine.low %v9723_v42, %v4243_v33  ;;  %4995 = vmatpush2.msra.mxu1 %v7183_v27 }
 0x128   : > { %v2922_v20 = vrot.slane %v12476_v7, 2  ;;  %v913_v7 = vrot.slane %v12481_v59, %v7720_v12  ;;  %12482 = vst [vmem:[#allocation33_spill] sm:$0xff] %v9898_v41  ;;  %v12486_v59 = vrot.slane %v12444_v26, 7  ;;  %v3855_v3 = vcombine.low %v2911_v38, %v9885_v32  ;;  %v12489_v26 = vld [vmem:[#allocation88_spill] sm:$0xff]  ;;  %4996 = vmatprep.subr.mxu1 %v12204_v35 }
 0x129   : > { %12483 = vst [vmem:[#allocation35_spill] sm:$0xff] %v9900_v60  ;;  %v2925_v1 = vrot.slane %v12485_v49, 2  ;;  %v12488_v55 = vrot.slane %v12487_v62, 7  ;;  %v3862_v19 = vrot.slane %v3854_v54, %v7762_v30  ;;  %v12490_v33 = vrot.slane %v12489_v26, 7  ;;  %v12491_v54 = vld [vmem:[#allocation68_spill] sm:$0xff]  ;;  %4808 = vmatmul.mubr.f32.gmra.mxu0 %v9789_v15  ;;  %4166 = vmatmul.mubr.f32.gmra.mxu1 %v9793_v18 }
 0x12a   : > { %v2893_v4 = vsel %vm8984_vm8, %v7014_v47, %v12486_v59  ;;  %v1688_v42 = vrot.slane %v913_v7, %v7739_v21  ;;  %v4490_v49 = vrot.slane %v4476_v46, %v7762_v30  ;;  %v3869_v59 = vrot.slane %v3855_v3, %v7762_v30  ;;  %v12492_v3 = vld [vmem:[#allocation89_spill] sm:$0xff]  ;;  %7148 = vmatprep.mubr.msk.f32.mxu0 %vm3354_vm1, %v9746_v0 }
 0x12b   : > { %v2928_v57 = vrot.slane %v12488_v55, 2  ;;  %v3836_v11 = vcombine.low %v2893_v4, %v9821_v36  ;;  %v2931_v47 = vrot.slane %v12490_v33, 2  ;;  %v1692_v55 = vrot.slane %v913_v7, %v7747_v24  ;;  %v7240_v36 = vld [vmem:[%s11801_s2 + $0x390] sm:$0xf]  ;;  %7095 = vmatprep.mubr.msk.f32.mxu1 %vm3354_vm1, %v9801_v52 }
 0x12c   : > { %v4511_v17 = vcombine.low %v2908_v63, %v2911_v38  ;;  %v1696_v14 = vrot.slane %v12491_v54, %v7739_v21  ;;  %v1700_v46 = vrot.slane %v12491_v54, %v7747_v24  ;;  %v12493_v33 = vrot.slane %v12492_v3, 7  ;;  %7241 = vmatpush2.msk.msra.mxu0 %vm3391_vm0, %v7240_v36 }
 0x12d   : > { %v3844_v4 = vrot.slane %v3836_v11, %v7762_v30  ;;  %v9942_v38 = vcombine.high %v9810_v34, %v4490_v49  ;;  %v9945_v63 = vcombine.low %v9810_v34, %v4490_v49  ;;  %v9947_v11 = vcombine.high %v3862_v19, %v3869_v59  ;;  %5278 = vmatprep.subr.mxu0 %v12204_v35 }
 0x12e   : > { %v2934_v7 = vrot.slane %v12493_v33, 2  ;;  %v9949_v16 = vcombine.low %v3862_v19, %v3869_v59  ;;  %v2485_v33 = vcombine.low %v1688_v42, %v1692_v55  ;;  %v9957_v44 = vrot.slane %v4511_v17, %v7762_v30  ;;  %4813 = vmatmul.mubr.f32.gmra.mxu0 %v9753_v23  ;;  %4171 = vmatmul.mubr.f32.gmra.mxu1 %v9803_v39 }
 0x12f   : > { %12494 = vst [vmem:[#allocation36_spill] sm:$0xff] %v9942_v38  ;;  %12495 = vst [vmem:[#allocation46_spill] sm:$0xff] %v9945_v63  ;;  %v9952_v61 = vcombine.high %v3844_v4, %v3851_v37  ;;  %v9954_v54 = vcombine.low %v3844_v4, %v3851_v37  ;;  %v2493_v34 = vcombine.low %v1696_v14, %v1700_v46  ;;  %v12498_v19 = vrot.slane %v12475_v56, 7 }
 0x130   : > { %12496 = vst [vmem:[#allocation47_spill] sm:$0xff] %v9947_v11  ;;  %12497 = vst [vmem:[#allocation25_spill] sm:$0xff] %v9949_v16  ;;  %v12499_v42 = vrot.slane %v12484_v13, 7  ;;  %v12500_v49 = vrot.slane %v8837_v25, 7  ;;  %v2492_v55 = vrot.slane %v2485_v33, %v7762_v30  ;;  %v12501_v4 = vrot.slane %v12478_v22, 7  ;;  %7149 = vmatprep.mubr.msk.f32.mxu0 %vm3354_vm1, %v9942_v38 }
 0x131   : > { %v2921_v37 = vsel %vm8984_vm8, %v9853_v5, %v12498_v19  ;;  %v7239_v5 = vld [vmem:[%s11801_s2 + $0x388] sm:$0xff]  ;;  %v12502_v56 = vrot.slane %v12487_v62, 7  ;;  %v12503_v13 = vrot.slane %v12489_v26, 7  ;;  %v12053_v46 = vrot.slane %v8999_v8, 7  ;;  %7096 = vmatprep.mubr.msk.f32.mxu1 %vm3354_vm1, %v9952_v61 }
 0x132   : > { %v2924_v17 = vsel %vm8984_vm8, %v2922_v20, %v12499_v42  ;;  %v2937_v59 = vrot.slane %v12500_v49, 2  ;;  %v4244_v36 = vrot.slane %v12501_v4, 2  ;;  %v2500_v22 = vrot.slane %v2493_v34, %v7762_v30  ;;  %v9996_v42 = vpop.f32.mrf.mxu1  ;;  %v7182_v62 = vld [vmem:[%s11801_s2 + $0x2c8] sm:$0xff]  ;;  %5279 = vmatpush2.msra.mxu0 %v7239_v5  ;;  %4176 = vmatmul.mubr.f32.gmra.mxu1 %v9954_v54 }
 0x133   : > { %v2927_v20 = vsel %vm8984_vm8, %v2925_v1, %v12502_v56  ;;  %v2930_v14 = vsel %vm8984_vm8, %v2928_v57, %v12503_v13  ;;  %v4529_v19 = vcombine.low %v2921_v37, %v2924_v17  ;;  %v4245_v1 = vrot.slane %v2492_v55, 7  ;;  %4997 = vmatpush2.msra.mxu1 %v7182_v62  ;;  %5280 = vmatprep.subr.mxu0 %v12204_v35 }
 0x134   : > { %v3873_v33 = vcombine.low %v2924_v17, %v2927_v20  ;;  %v4530_v57 = vcombine.low %v2927_v20, %v2930_v14  ;;  %v12504_v26 = vrot.slane %v12492_v3, 7  ;;  %v12505_v34 = vmov %v12500_v49  ;;  %v7238_v20 = vld [vmem:[%s11801_s2 + $0x380] sm:$0xff]  ;;  %4998 = vmatprep.subr.mxu1 %v12204_v35  ;;  %4818 = vmatmul.mubr.f32.gmra.mxu0 %v9945_v63 }
 0x135   : > { %v2936_v17 = vsel %vm8984_vm8, %v2934_v7, %v12505_v34  ;;  %v7015_v49 = vrot.slane %v2500_v22, 9  ;;  %v4537_v4 = vrot.slane %v4529_v19, %v7762_v30  ;;  %v12506_v56 = vrot.slane %v8856_v48, 7  ;;  %5281 = vmatpush2.msra.mxu0 %v7238_v20  ;;  %7150 = vmatprep.mubr.msk.f32.mxu0 %vm3354_vm1, %v9746_v0  ;;  %v12565_v0 = vld [vmem:[#allocation94_spill] sm:$0xff] }
 0x136   : > { %v2933_v27 = vsel %vm8984_vm8, %v2931_v47, %v12504_v26  ;;  %v3887_v55 = vrot.slane %v3873_v33, %v7762_v30  ;;  %v3553_v47 = vpop.f32.mrf.mxu1  ;;  %v12054_v25 = vrot.slane %v9002_v45, 7  ;;  %v4246_v7 = vsel %vm8984_vm8, %v4244_v36, %v4245_v1  ;;  %5282 = vmatprep.subr.mxu0 %v12204_v35  ;;  %7097 = vmatprep.mubr.msk.f32.mxu1 %vm3354_vm1, %v9947_v11 }
 0x137   : > { %v10019_v3 = vsel %vm8984_vm8, %v2937_v59, %v12506_v56  ;;  %v4544_v5 = vrot.slane %v4530_v57, %v7762_v30  ;;  %v3890_v13 = vcombine.low %v2930_v14, %v2933_v27  ;;  %v4512_v22 = vcombine.low %v9885_v32, %v4246_v7  ;;  %v7181_v32 = vld [vmem:[%s11801_s2 + $0x2c0] sm:$0xff]  ;;  %v12512_v47 = vld [vmem:[#allocation81_spill] sm:$0xff]  ;;  %4181 = vmatmul.mubr.f32.gmra.mxu1 %v9949_v16 }
 0x138   : > { %v12507_v33 = vrot.slane %v12472_v10, 7  ;;  %v3891_v19 = vcombine.low %v2936_v17, %v10019_v3  ;;  %v12510_v10 = vrot.slane %v8944_v50, 7  ;;  %v12513_v7 = vcombine.high %v12512_v47, %v12512_v47  ;;  %4999 = vmatpush2.msra.mxu1 %v7181_v32  ;;  %4823 = vmatmul.mubr.f32.gmra.mxu0 %v9753_v23 }
 0x139   : > { %v10041_v14 = vcombine.high %v4537_v4, %v4544_v5  ;;  %v10043_v57 = vcombine.low %v4537_v4, %v4544_v5  ;;  %v4526_v26 = vrot.slane %v4512_v22, %v7762_v30  ;;  %v4547_v22 = vcombine.low %v2933_v27, %v2936_v17  ;;  %v7237_v27 = vld [vmem:[%s11801_s2 + $0x378] sm:$0xff]  ;;  %5000 = vmatprep.subr.mxu1 %v12204_v35 }
 0x13a   : > { %v2918_v36 = vsel %vm8984_vm8, %v7015_v49, %v12507_v33  ;;  %v2944_v62 = vrot.slane %v12510_v10, 2  ;;  %v3905_v34 = vrot.slane %v3891_v19, %v7762_v30  ;;  %v12511_v49 = vrot.slane %v8953_v40, 7  ;;  %v10066_v33 = vpop.f32.mrf.mxu0  ;;  %5283 = vmatpush2.msra.mxu0 %v7237_v27  ;;  %7151 = vmatprep.mubr.msk.f32.mxu0 %vm3354_vm1, %v9942_v38 }
 0x13b   : > { %v3872_v1 = vcombine.low %v2918_v36, %v2921_v37  ;;  %12508 = vst [vmem:[#allocation49_spill] sm:$0xff] %v10041_v14  ;;  %12509 = vst [vmem:[#allocation41_spill] sm:$0xff] %v10043_v57  ;;  %v3898_v37 = vrot.slane %v3890_v13, %v7762_v30  ;;  %v986_v5 = vrot.slane %v12513_v7, %v7720_v12  ;;  %v12514_v20 = vrot.slane %v8956_v9, 7 }
 0x13c   : > { %v2947_v4 = vrot.slane %v12511_v49, 2  ;;  %v10071_v36 = vcombine.high %v9957_v44, %v4526_v26  ;;  %v10074_v19 = vcombine.low %v9957_v44, %v4526_v26  ;;  %v12517_v17 = vrot.slane %v8947_v28, 7  ;;  %v3473_v26 = vpop.f32.mrf.mxu0  ;;  %5284 = vmatprep.subr.mxu0 %v12204_v35  ;;  %7098 = vmatprep.mubr.msk.f32.mxu1 %vm3354_vm1, %v9952_v61 }
 0x13d   : > { %v3880_v56 = vrot.slane %v3872_v1, %v7762_v30  ;;  %v2950_v13 = vrot.slane %v12514_v20, 2  ;;  %v10076_v1 = vcombine.high %v3898_v37, %v3905_v34  ;;  %v10088_v7 = vcombine.low %v3898_v37, %v3905_v34  ;;  %v12518_v37 = vld [vmem:[#allocation92_spill] sm:$0xff]  ;;  %4828 = vmatmul.mubr.f32.gmra.mxu0 %v9945_v63  ;;  %4186 = vmatmul.mubr.f32.gmra.mxu1 %v9954_v54  ;;  %v12563_v63 = vld [vmem:[#allocation93_spill] sm:$0xff] }
 0x13e   : > { %12515 = vst [vmem:[#allocation48_spill] sm:$0xff] %v10071_v36  ;;  %12516 = vst [vmem:[#allocation59_spill] sm:$0xff] %v10074_v19  ;;  %v2953_v10 = vrot.slane %v12517_v17, 2  ;;  %v1768_v44 = vrot.slane %v986_v5, %v7739_v21  ;;  %v1772_v32 = vrot.slane %v986_v5, %v7747_v24  ;;  %v10095_v20 = vrot.slane %v4547_v22, %v7762_v30 }
 0x13f   : > { %v10084_v49 = vcombine.high %v3880_v56, %v3887_v55  ;;  %v10086_v47 = vcombine.low %v3880_v56, %v3887_v55  ;;  %v7180_v55 = vld [vmem:[%s11801_s2 + $0x2b8] sm:$0xff]  ;;  %v1776_v34 = vrot.slane %v12518_v37, %v7739_v21  ;;  %v2956_v56 = vrot.slane %v12053_v46, 2  ;;  %7152 = vmatprep.mubr.msk.f32.mxu0 %vm3354_vm1, %v9898_v41  ;;  %7099 = vmatprep.mubr.msk.f32.mxu1 %vm3354_vm1, %v9947_v11 }
 0x140   : > { %v1780_v5 = vrot.slane %v12518_v37, %v7747_v24  ;;  %v12519_v22 = vrot.slane %v8953_v40, 7  ;;  %v12520_v26 = vrot.slane %v8956_v9, 7  ;;  %v2959_v46 = vrot.slane %v12054_v25, 2  ;;  %v7236_v40 = vld [vmem:[%s11801_s2 + $0x370] sm:$0xff]  ;;  %5001 = vmatpush2.msra.mxu1 %v7180_v55 }
 0x141   : > { %v2565_v27 = vcombine.low %v1768_v44, %v1772_v32  ;;  %v2963_v44 = vrot.slane %v9008_v58, 7  ;;  %v12525_v55 = vrot.slane %v9002_v45, 7  ;;  %5285 = vmatpush2.msra.mxu0 %v7236_v40  ;;  %5002 = vmatprep.subr.mxu1 %v12204_v35 }
 0x142   : > { %v10112_v17 = vsel %vm8984_vm8, %v2944_v62, %v12519_v22  ;;  %v2949_v59 = vsel %vm8984_vm8, %v2947_v4, %v12520_v26  ;;  %v12521_v62 = vrot.slane %v8947_v28, 7  ;;  %v12522_v4 = vrot.slane %v8999_v8, 7  ;;  %5286 = vmatprep.subr.mxu0 %v12204_v35  ;;  %4833 = vmatmul.mubr.f32.gmra.mxu0 %v9900_v60 }
 0x143   : > { %v12523_v22 = vrot.slane %v9005_v31, 7  ;;  %v2573_v32 = vcombine.low %v1776_v34, %v1780_v5  ;;  %v4565_v28 = vcombine.low %v10112_v17, %v2949_v59  ;;  %v2572_v8 = vrot.slane %v2565_v27, %v7762_v30  ;;  %v10158_v27 = vpop.f32.mrf.mxu1  ;;  %7153 = vmatprep.mubr.msk.f32.mxu0 %vm3354_vm1, %v10071_v36  ;;  %4191 = vmatmul.mubr.f32.gmra.mxu1 %v9949_v16 }
 0x144   : > { %v2952_v9 = vsel %vm8984_vm8, %v2950_v13, %v12521_v62  ;;  %v2955_v37 = vsel %vm8984_vm8, %v2953_v10, %v12522_v4  ;;  %v12524_v13 = vrot.slane %v8856_v48, 7  ;;  %v7179_v62 = vld [vmem:[%s11801_s2 + $0x2b0] sm:$0xff]  ;;  %v12527_v31 = vcombine.high %v8911_v43, %v8911_v43  ;;  %7100 = vmatprep.mubr.msk.f32.mxu1 %vm3354_vm1, %v10084_v49 }
 0x145   : > { %v2962_v26 = vrot.slane %v12523_v22, 2  ;;  %v3909_v25 = vcombine.low %v2949_v59, %v2952_v9  ;;  %v4566_v4 = vcombine.low %v2952_v9, %v2955_v37  ;;  %v10152_v59 = vsel %vm8984_vm8, %v2956_v56, %v12525_v55  ;;  %v7235_v56 = vld [vmem:[%s11801_s2 + $0x368] sm:$0xff]  ;;  %5003 = vmatpush2.msra.mxu1 %v7179_v62 }
 0x146   : > { %v4247_v10 = vrot.slane %v12524_v13, 2  ;;  %v2580_v34 = vrot.slane %v2573_v32, %v7762_v30  ;;  %v4573_v5 = vrot.slane %v4565_v28, %v7762_v30  ;;  %v4248_v9 = vrot.slane %v2572_v8, 7  ;;  %5287 = vmatpush2.msra.mxu0 %v7235_v56  ;;  %5004 = vmatprep.subr.mxu1 %v12204_v35 }
 0x147   : > { %v3923_v48 = vrot.slane %v3909_v25, %v7762_v30  ;;  %v4580_v45 = vrot.slane %v4566_v4, %v7762_v30  ;;  %v12526_v40 = vmov %v12523_v22  ;;  %v2964_v22 = vsel %vm8984_vm8, %v2962_v26, %v2963_v44  ;;  %5288 = vmatprep.subr.mxu0 %v12204_v35  ;;  %4838 = vmatmul.mubr.f32.gmra.mxu0 %v10074_v19 }
 0x148   : > { %v10171_v25 = vsel %vm8984_vm8, %v2959_v46, %v12526_v40  ;;  %v7016_v32 = vrot.slane %v2580_v34, 9  ;;  %v3926_v28 = vcombine.low %v2955_v37, %v10152_v59  ;;  %v1059_v13 = vrot.slane %v12527_v31, %v7720_v12  ;;  %v3558_v46 = vpop.f32.mrf.mxu1  ;;  %v7178_v37 = vld [vmem:[%s11801_s2 + $0x2a8] sm:$0xff]  ;;  %7154 = vmatprep.mubr.msk.f32.mxu0 %vm3354_vm1, %v9898_v41  ;;  %4196 = vmatmul.mubr.f32.gmra.mxu1 %v10086_v47 }
 0x149   : > { %v3927_v8 = vcombine.low %v10171_v25, %v2964_v22  ;;  %v4249_v26 = vsel %vm8984_vm8, %v4247_v10, %v4248_v9  ;;  %v10189_v62 = vcombine.high %v4573_v5, %v4580_v45  ;;  %v10191_v4 = vcombine.low %v4573_v5, %v4580_v45  ;;  %5005 = vmatpush2.msra.mxu1 %v7178_v37  ;;  %v12562_v12 = vld [vmem:[#allocation87_spill] sm:$0xff] }
 0x14a   : > { %v4548_v43 = vcombine.low %v10019_v3, %v4249_v26  ;;  %v12530_v55 = vrot.slane %v8944_v50, 7  ;;  %v3934_v10 = vrot.slane %v3926_v28, %v7762_v30  ;;  %v10203_v9 = vpop.f32.mrf.mxu1  ;;  %v1848_v3 = vrot.slane %v1059_v13, %v7739_v21  ;;  %5510 = vmatprep.subr.mxu1 %v12204_v35  ;;  %7101 = vmatprep.mubr.msk.f32.mxu1 %vm3354_vm1, %v10076_v1  ;;  %v12554_v21 = vld [vmem:[#allocation72_spill] sm:$0xff] }
 0x14b   : > { %12528 = vst [vmem:[#allocation60_spill] sm:$0xff] %v10189_v62  ;;  %12529 = vst [vmem:[#allocation61_spill] sm:$0xff] %v10191_v4  ;;  %v3941_v45 = vrot.slane %v3927_v8, %v7762_v30  ;;  %v1852_v56 = vrot.slane %v1059_v13, %v7747_v24  ;;  %v4583_v40 = vcombine.low %v10152_v59, %v10171_v25  ;;  %4843 = vmatmul.mubr.f32.gmra.mxu0 %v9900_v60  ;;  %v12553_v24 = vld [vmem:[#allocation75_spill] sm:$0xff] }
 0x14c   : > { %v2943_v34 = vsel %vm8984_vm8, %v7016_v32, %v12530_v55  ;;  %v4562_v50 = vrot.slane %v4548_v43, %v7762_v30  ;;  %v3563_v32 = vpop.f32.mrf.mxu1  ;;  %v10242_v43 = vpop.f32.mrf.mxu0  ;;  %7155 = vmatprep.mubr.msk.f32.mxu0 %vm3354_vm1, %v10071_v36  ;;  %4201 = vmatmul.mubr.f32.gmra.mxu1 %v10088_v7  ;;  %v12558_v60 = vld [vmem:[#allocation83_spill] sm:$0xff] }
 0x14d   : > { %v3908_v5 = vcombine.low %v2943_v34, %v10112_v17  ;;  %v7234_v17 = vld [vmem:[%s11801_s2 + $0x360] sm:$0xff]  ;;  %v10222_v8 = vcombine.high %v3934_v10, %v3941_v45  ;;  %v10224_v31 = vcombine.low %v3934_v10, %v3941_v45  ;;  %v2645_v13 = vcombine.low %v1848_v3, %v1852_v56  ;;  %7102 = vmatprep.mubr.msk.f32.mxu1 %vm3354_vm1, %v10084_v49 }
 0x14e   : > { %v10229_v59 = vcombine.high %v10095_v20, %v4562_v50  ;;  %v10232_v25 = vcombine.low %v10095_v20, %v4562_v50  ;;  %v10234_v46 = vpop.f32.mrf.mxu1  ;;  %5289 = vmatpush2.msra.mxu0 %v7234_v17  ;;  %v4250_v20 = vrot.slane %v2963_v44, 2  ;;  %v4591_v45 = vrot.slane %v4583_v40, %v7762_v30 }
 0x14f   : > { %v3916_v28 = vrot.slane %v3908_v5, %v7762_v30  ;;  %12531 = vst [vmem:[#allocation73_spill] sm:$0xff] %v10222_v8  ;;  %12532 = vst [vmem:[#allocation74_spill] sm:$0xff] %v10224_v31  ;;  %v2652_v55 = vrot.slane %v2645_v13, %v7762_v30  ;;  %5861 = vmatprep.subr.mxu0 %v12204_v35  ;;  %4848 = vmatmul.mubr.f32.gmra.mxu0 %v10074_v19  ;;  %v12556_v19 = vld [vmem:[#allocation82_spill] sm:$0xff] }
 0x150   : > { %12533 = vst [vmem:[#allocation63_spill] sm:$0xff] %v10229_v59  ;;  %12534 = vst [vmem:[#allocation50_spill] sm:$0xff] %v10232_v25  ;;  %v3568_v34 = vpop.f32.mrf.mxu1  ;;  %7156 = vmatprep.mubr.msk.f32.mxu0 %vm3354_vm1, %v10041_v14  ;;  %4206 = vmatmul.mubr.f32.gmra.mxu1 %v10086_v47 }
 0x151   : > { %v10238_v26 = vcombine.high %v3916_v28, %v3923_v48  ;;  %v10240_v37 = vcombine.low %v3916_v28, %v3923_v48  ;;  %v3478_v48 = vpop.f32.mrf.mxu0  ;;  %v4251_v10 = vrot.slane %v2652_v55, 7  ;;  %7103 = vmatprep.mubr.msk.f32.mxu1 %vm3354_vm1, %v10076_v1 }
 0x152   : > { %v10270_v17 = vpop.f32.mrf.mxu1  ;;  %v12537_v48 = vld [vmem:[#allocation38_spill] sm:$0xff] }
 0x153   : > { %v10255_v5 = vpop.f32.mrf.mxu0  ;;  %v4252_v58 = vsel %vm8984_vm8, %v4250_v20, %v4251_v10  ;;  %4853 = vmatmul.mubr.f32.gmra.mxu0 %v10043_v57  ;;  %v7289_v20 = vld [vmem:[%s11801_s2 + $0x410] sm:$0xff]  ;;  %v7288_v10 = vld [vmem:[%s11801_s2 + $0x408] sm:$0xff] }
 0x154   : > { %v4584_v44 = vcombine.low %v2964_v22, %v4252_v58  ;;  %v3573_v28 = vpop.f32.mrf.mxu1  ;;  %7157 = vmatprep.mubr.msk.f32.mxu0 %vm3354_vm1, %v10229_v59  ;;  %4211 = vmatmul.mubr.f32.gmra.mxu1 %v10088_v7 }
 0x155   : > { %v3483_v3 = vpop.f32.mrf.mxu0  ;;  %7104 = vmatprep.mubr.msk.f32.mxu1 %vm3354_vm1, %v10238_v26 }
 0x156   : > { %v4598_v50 = vrot.slane %v4584_v44, %v7762_v30  ;;  %v10305_v34 = vpop.f32.mrf.mxu1  ;;  %v12538_v44 = vld [vmem:[#allocation40_spill] sm:$0xff] }
 0x157   : > { %v10267_v56 = vpop.f32.mrf.mxu0  ;;  %4858 = vmatmul.mubr.f32.gmra.mxu0 %v10232_v25 }
 0x158   : > { %v10274_v22 = vcombine.high %v4591_v45, %v4598_v50  ;;  %v10276_v40 = vcombine.low %v4591_v45, %v4598_v50  ;;  %7158 = vmatprep.mubr.msk.f32.mxu0 %vm3354_vm1, %v10041_v14  ;;  %4216 = vmatmul.mubr.f32.gmra.mxu1 %v10240_v37  ;;  %v3578_v58 = vpop.f32.mrf.mxu1  ;;  %v7287_v45 = vld [vmem:[%s11801_s2 + $0x400] sm:$0xff] }
 0x159   : > { %v3488_v32 = vpop.f32.mrf.mxu0  ;;  %7105 = vmatprep.mubr.msk.f32.mxu1 %vm3354_vm1, %v10222_v8  ;;  %v12539_v50 = vld [vmem:[#allocation42_spill] sm:$0xff] }
 0x15a   : > { %12535 = vst [vmem:[#allocation76_spill] sm:$0xff] %v10274_v22  ;;  %12536 = vst [vmem:[#allocation77_spill] sm:$0xff] %v10276_v40  ;;  %v10320_v3 = vpop.f32.mrf.mxu1  ;;  %v7286_v32 = vld [vmem:[%s11801_s2 + $0x3f8] sm:$0xff]  ;;  %v12541_v58 = vld [vmem:[#allocation30_spill] sm:$0xff] }
 0x15b   : > { %v10288_v13 = vpop.f32.mrf.mxu0  ;;  %4863 = vmatmul.mubr.f32.gmra.mxu0 %v10043_v57  ;;  %v12548_v57 = vld [vmem:[#allocation54_spill] sm:$0xff] }
 0x15c   : > { %7159 = vmatprep.mubr.msk.f32.mxu0 %vm3354_vm1, %v10229_v59  ;;  %4221 = vmatmul.mubr.f32.gmra.mxu1 %v10224_v31  ;;  %v3583_v28 = vpop.f32.mrf.mxu1 }
 0x15d   : > { %v3493_v55 = vpop.f32.mrf.mxu0  ;;  %7186 = vmatprep.mubr.msk.f32.mxu1 %vm3354_vm1, %v9201_v6 }
 0x15e   : > { %v7285_v55 = vld [vmem:[%s11801_s2 + $0x3f0] sm:$0xff] }
 0x15f   : > { %4868 = vmatmul.mubr.f32.gmra.mxu0 %v10232_v25 }
 0x160   : > { %7160 = vmatprep.mubr.msk.f32.mxu0 %vm3354_vm1, %v10189_v62  ;;  %5007 = vmatmul.mubr.f32.vlgmr.msra.gmra.mxu1 %v12537_v48  ;;  %v12545_v62 = vld [vmem:[#allocation45_spill] sm:$0xff] }
 0x161   : > { %5511 = vmatpush1.msra.mxu1 %v7289_v20  ;;  %7187 = vmatprep.mubr.msk.f32.mxu1 %vm3354_vm1, %v12538_v44  ;;  %v10336_v20 = vpop.f32.mrf.mxu0 }
 0x162   : > { %5512 = vmatprep.subr.mxu1 %v12204_v35 }
 0x163   : > { %4873 = vmatmul.mubr.f32.gmra.mxu0 %v10191_v4  ;;  %5513 = vmatpush1.msra.mxu1 %v7288_v10  ;;  %v10338_v10 = vpop.f32.mrf.mxu1  ;;  %v3498_v28 = vpop.f32.mrf.mxu0 }
 0x164   : > { %7161 = vmatprep.mubr.msk.f32.mxu0 %vm3354_vm1, %v10274_v22  ;;  %5012 = vmatmul.mubr.f32.gmra.mxu1 %v12539_v50  ;;  %12540 = vst [vmem:[#allocation88_spill] sm:$0xff] %v10338_v10  ;;  %v12542_v22 = vld [vmem:[#allocation31_spill] sm:$0xff]  ;;  %v12544_v28 = vld [vmem:[#allocation66_spill] sm:$0xff] }
 0x165   : > { %5514 = vmatprep.subr.mxu1 %v12204_v35  ;;  %7188 = vmatprep.mubr.msk.f32.mxu1 %vm3354_vm1, %v9201_v6  ;;  %v10354_v4 = vpop.f32.mrf.mxu0 }
 0x166   : > { %5515 = vmatpush1.msra.mxu1 %v7287_v45  ;;  %v7346_v45 = vld [vmem:[%s11801_s2 + $0x4c8] sm:$0xff] }
 0x167   : > { %4878 = vmatmul.mubr.f32.gmra.mxu0 %v10276_v40  ;;  %5516 = vmatprep.subr.mxu1 %v12204_v35  ;;  %v3588_v40 = vpop.f32.mrf.mxu1 }
 0x168   : > { %7242 = vmatprep.mubr.msk.f32.mxu0 %vm3354_vm1, %v12541_v58  ;;  %5517 = vmatpush1.msra.mxu1 %v7286_v32  ;;  %v7345_v32 = vld [vmem:[%s11801_s2 + $0x4c0] sm:$0xff]  ;;  %v7344_v40 = vld [vmem:[%s11801_s2 + $0x4b8] sm:$0xff] }
 0x169   : > { %5017 = vmatmul.mubr.f32.gmra.mxu1 %v12537_v48  ;;  %5518 = vmatprep.subr.mxu1 %v12204_v35  ;;  %v10374_v30 = vpop.f32.mrf.mxu1 }
 0x16a   : > { %7189 = vmatprep.mubr.msk.f32.mxu1 %vm3354_vm1, %v12538_v44  ;;  %5519 = vmatpush1.msra.mxu1 %v7285_v55  ;;  %v3503_v55 = vpop.f32.mrf.mxu0  ;;  %12546 = vst [vmem:[#allocation68_spill] sm:$0xff] %v10374_v30 }
 0x16b   : > { %5291 = vmatmul.mubr.f32.vlgmr.msra.gmra.mxu0 %v12542_v22  ;;  %5520 = vmatprep.subr.mxu1 %v12204_v35  ;;  %v7342_v55 = vld [vmem:[%s11801_s2 + $0x4a8] sm:$0xff]  ;;  %v3593_v14 = vpop.f32.mrf.mxu1 }
 0x16c   : > { %5862 = vmatpush1.msra.mxu0 %v7346_v45  ;;  %7243 = vmatprep.mubr.msk.f32.mxu0 %vm3354_vm1, %v12543_v2  ;;  %v7343_v45 = vld [vmem:[%s11801_s2 + $0x4b0] sm:$0xff]  ;;  %v10370_v25 = vpop.f32.mrf.mxu0  ;;  %v7341_v14 = vld [vmem:[%s11801_s2 + $0x4a0] sm:$0xff] }
 0x16d   : > { %5863 = vmatprep.subr.mxu0 %v12204_v35  ;;  %5022 = vmatmul.mubr.f32.gmra.mxu1 %v12539_v50  ;;  %v10441_v36 = vpop.f32.mrf.mxu1 }
 0x16e   : > { %5864 = vmatpush1.msra.mxu0 %v7345_v32  ;;  %7190 = vmatprep.mubr.msk.f32.mxu1 %vm3354_vm1, %v12544_v28  ;;  %v12547_v32 = vld [vmem:[#allocation67_spill] sm:$0xff]  ;;  %v3508_v59 = vpop.f32.mrf.mxu0  ;;  %12557 = vst [vmem:[#allocation89_spill] sm:$0xff] %v10441_v36 }
 0x16f   : > { %5296 = vmatmul.mubr.f32.gmra.mxu0 %v12545_v62  ;;  %5865 = vmatprep.subr.mxu0 %v12204_v35  ;;  %v7283_v59 = vld [vmem:[%s11801_s2 + $0x3e0] sm:$0xff] }
 0x170   : > { %7244 = vmatprep.mubr.msk.f32.mxu0 %vm3354_vm1, %v12541_v58  ;;  %5866 = vmatpush1.msra.mxu0 %v7344_v40  ;;  %v7284_v40 = vld [vmem:[%s11801_s2 + $0x3e8] sm:$0xff]  ;;  %v12549_v58 = vld [vmem:[#allocation56_spill] sm:$0xff] }
 0x171   : > { %5027 = vmatmul.mubr.f32.gmra.mxu1 %v12547_v32  ;;  %5867 = vmatprep.subr.mxu0 %v12204_v35 }
 0x172   : > { %7191 = vmatprep.mubr.msk.f32.mxu1 %vm3354_vm1, %v12548_v57  ;;  %5868 = vmatpush1.msra.mxu0 %v7343_v45  ;;  %v12550_v45 = vld [vmem:[#allocation57_spill] sm:$0xff] }
 0x173   : > { %5301 = vmatmul.mubr.f32.gmra.mxu0 %v12542_v22  ;;  %5869 = vmatprep.subr.mxu0 %v12204_v35  ;;  %v12552_v22 = vld [vmem:[#allocation71_spill] sm:$0xff] }
 0x174   : > { %7245 = vmatprep.mubr.msk.f32.mxu0 %vm3354_vm1, %v12543_v2  ;;  %5870 = vmatpush1.msra.mxu0 %v7342_v55  ;;  %v7340_v55 = vld [vmem:[%s11801_s2 + $0x498] sm:$0xff] }
 0x175   : > { %5032 = vmatmul.mubr.f32.gmra.mxu1 %v12549_v58  ;;  %5871 = vmatprep.subr.mxu0 %v12204_v35 }
 0x176   : > { %7192 = vmatprep.mubr.msk.f32.mxu1 %vm3354_vm1, %v12544_v28  ;;  %5521 = vmatpush1.msra.mxu1 %v7284_v40  ;;  %v10409_v40 = vpop.f32.mrf.mxu0 }
 0x177   : > { %5306 = vmatmul.mubr.f32.gmra.mxu0 %v12545_v62  ;;  %5522 = vmatprep.subr.mxu1 %v12204_v35  ;;  %v12551_v62 = vld [vmem:[#allocation58_spill] sm:$0xff] }
 0x178   : > { %7246 = vmatprep.mubr.msk.f32.mxu0 %vm3354_vm1, %v12550_v45  ;;  %5872 = vmatpush1.msra.mxu0 %v7341_v14  ;;  %v7282_v14 = vld [vmem:[%s11801_s2 + $0x3d8] sm:$0xff]  ;;  %v3513_v2 = vpop.f32.mrf.mxu0 }
 0x179   : > { %5037 = vmatmul.mubr.f32.gmra.mxu1 %v12547_v32  ;;  %5873 = vmatprep.subr.mxu0 %v12204_v35  ;;  %v7281_v2 = vld [vmem:[%s11801_s2 + $0x3d0] sm:$0xff] }
 0x17a   : > { %7193 = vmatprep.mubr.msk.f32.mxu1 %vm3354_vm1, %v12548_v57  ;;  %5523 = vmatpush1.msra.mxu1 %v7283_v59  ;;  %v7339_v59 = vld [vmem:[%s11801_s2 + $0x490] sm:$0xff]  ;;  %v10467_v41 = vpop.f32.mrf.mxu0 }
 0x17b   : > { %5311 = vmatmul.mubr.f32.gmra.mxu0 %v12551_v62  ;;  %5524 = vmatprep.subr.mxu1 %v12204_v35 }
 0x17c   : > { %7247 = vmatprep.mubr.msk.f32.mxu0 %vm3354_vm1, %v12552_v22  ;;  %5874 = vmatpush1.msra.mxu0 %v7340_v55  ;;  %v12555_v55 = vld [vmem:[#allocation84_spill] sm:$0xff] }
 0x17d   : > { %5042 = vmatmul.mubr.f32.gmra.mxu1 %v12549_v58  ;;  %5875 = vmatprep.subr.mxu0 %v12204_v35 }
 0x17e   : > { %7194 = vmatprep.mubr.msk.f32.mxu1 %vm3354_vm1, %v12553_v24  ;;  %5525 = vmatpush1.msra.mxu1 %v7282_v14  ;;  %v7338_v14 = vld [vmem:[%s11801_s2 + $0x488] sm:$0xff] }
 0x17f   : > { %5316 = vmatmul.mubr.f32.gmra.mxu0 %v12554_v21  ;;  %5526 = vmatprep.subr.mxu1 %v12204_v35 }
 0x180   : > { %7248 = vmatprep.mubr.msk.f32.mxu0 %vm3354_vm1, %v12550_v45  ;;  %5876 = vmatpush1.msra.mxu0 %v7339_v59  ;;  %v7280_v59 = vld [vmem:[%s11801_s2 + $0x3c8] sm:$0xff]  ;;  %v3598_v45 = vpop.f32.mrf.mxu1 }
 0x181   : > { %5047 = vmatmul.mubr.f32.gmra.mxu1 %v12555_v55  ;;  %5877 = vmatprep.subr.mxu0 %v12204_v35  ;;  %v7279_v45 = vld [vmem:[%s11801_s2 + $0x3c0] sm:$0xff] }
 0x182   : > { %7195 = vmatprep.mubr.msk.f32.mxu1 %vm3354_vm1, %v12556_v19  ;;  %5527 = vmatpush1.msra.mxu1 %v7281_v2  ;;  %v7337_v2 = vld [vmem:[%s11801_s2 + $0x480] sm:$0xff] }
 0x183   : > { %5321 = vmatmul.mubr.f32.gmra.mxu0 %v12551_v62  ;;  %5528 = vmatprep.subr.mxu1 %v12204_v35  ;;  %v10457_v62 = vpop.f32.mrf.mxu1 }
 0x184   : > { %7249 = vmatprep.mubr.msk.f32.mxu0 %vm3354_vm1, %v12552_v22  ;;  %5878 = vmatpush1.msra.mxu0 %v7338_v14  ;;  %12559 = vst [vmem:[#allocation81_spill] sm:$0xff] %v10457_v62  ;;  %v12560_v14 = vld [vmem:[#allocation86_spill] sm:$0xff] }
 0x185   : > { %5052 = vmatmul.mubr.f32.gmra.mxu1 %v12558_v60  ;;  %5879 = vmatprep.subr.mxu0 %v12204_v35  ;;  %v3603_v22 = vpop.f32.mrf.mxu1 }
 0x186   : > { %7196 = vmatprep.mubr.msk.f32.mxu1 %vm3354_vm1, %v12553_v24  ;;  %5529 = vmatpush1.msra.mxu1 %v7280_v59  ;;  %v7336_v59 = vld [vmem:[%s11801_s2 + $0x478] sm:$0xff]  ;;  %v3518_v22 = vpop.f32.mrf.mxu0 }
 0x187   : > { %5326 = vmatmul.mubr.f32.gmra.mxu0 %v12554_v21  ;;  %5530 = vmatprep.subr.mxu1 %v12204_v35  ;;  %v10475_v21 = vpop.f32.mrf.mxu1  ;;  %v12564_v22 = vld [vmem:[#allocation10_spill] sm:$0xff] }
 0x188   : > { %7250 = vmatprep.mubr.msk.f32.mxu0 %vm3354_vm1, %v12560_v14  ;;  %5880 = vmatpush1.msra.mxu0 %v7337_v2  ;;  %12561 = vst [vmem:[#allocation92_spill] sm:$0xff] %v10475_v21  ;;  %v7278_v2 = vld [vmem:[%s11801_s2 + $0x3b8] sm:$0xff]  ;;  %v10485_v23 = vpop.f32.mrf.mxu0 }
 0x189   : > { %5057 = vmatmul.mubr.f32.gmra.mxu1 %v12555_v55  ;;  %5881 = vmatprep.subr.mxu0 %v12204_v35  ;;  %v3608_v38 = vpop.f32.mrf.mxu1 }
 0x18a   : > { %7197 = vmatprep.mubr.msk.f32.mxu1 %vm3354_vm1, %v12556_v19  ;;  %5531 = vmatpush1.msra.mxu1 %v7279_v45  ;;  %v7335_v45 = vld [vmem:[%s11801_s2 + $0x470] sm:$0xff]  ;;  %v3523_v21 = vpop.f32.mrf.mxu0 }
 0x18b   : > { %5331 = vmatmul.mubr.f32.gmra.mxu0 %v12562_v12  ;;  %5532 = vmatprep.subr.mxu1 %v12204_v35  ;;  %v7277_v38 = vld [vmem:[%s11801_s2 + $0x3b0] sm:$0xff]  ;;  %v7334_v21 = vld [vmem:[%s11801_s2 + $0x468] sm:$0xff]  ;;  %v10509_v15 = vpop.f32.mrf.mxu1 }
 0x18c   : > { %7251 = vmatprep.mubr.msk.f32.mxu0 %vm3354_vm1, %v12563_v63  ;;  %5882 = vmatpush1.msra.mxu0 %v7336_v59  ;;  %v12566_v59 = vld [vmem:[#allocation7_spill] sm:$0xff]  ;;  %v10501_v62 = vpop.f32.mrf.mxu0  ;;  %12568 = vst [vmem:[#allocation38_spill] sm:$0xff] %v10509_v15  ;;  %v12573_v15 = vld [vmem:[#allocation18_spill] sm:$0xff] }
 0x18d   : > { %5062 = vmatmul.mubr.f32.gmra.mxu1 %v12558_v60  ;;  %5883 = vmatprep.subr.mxu0 %v12204_v35  ;;  %v3613_v36 = vpop.f32.mrf.mxu1 }
 0x18e   : > { %7198 = vmatprep.mubr.msk.f32.mxu1 %vm3354_vm1, %v12564_v22  ;;  %5533 = vmatpush1.msra.mxu1 %v7278_v2  ;;  %v12567_v2 = vld [vmem:[#allocation14_spill] sm:$0xff] }
 0x18f   : > { %5336 = vmatmul.mubr.f32.gmra.mxu0 %v12565_v0  ;;  %5534 = vmatprep.subr.mxu1 %v12204_v35  ;;  %v7275_v36 = vld [vmem:[%s11801_s2 + $0x3a0] sm:$0xff] }
 0x190   : > { %7252 = vmatprep.mubr.msk.f32.mxu0 %vm3354_vm1, %v12560_v14  ;;  %5884 = vmatpush1.msra.mxu0 %v7335_v45  ;;  %v3528_v14 = vpop.f32.mrf.mxu0  ;;  %v7276_v45 = vld [vmem:[%s11801_s2 + $0x3a8] sm:$0xff] }
 0x191   : > { %5067 = vmatmul.mubr.f32.gmra.mxu1 %v12566_v59  ;;  %5885 = vmatprep.subr.mxu0 %v12204_v35  ;;  %v7333_v14 = vld [vmem:[%s11801_s2 + $0x460] sm:$0xff] }
 0x192   : > { %7199 = vmatprep.mubr.msk.f32.mxu1 %vm3354_vm1, %v12567_v2  ;;  %5535 = vmatpush1.msra.mxu1 %v7277_v38  ;;  %v10519_v29 = vpop.f32.mrf.mxu0 }
 0x193   : > { %5341 = vmatmul.mubr.f32.gmra.mxu0 %v12562_v12  ;;  %5536 = vmatprep.subr.mxu1 %v12204_v35 }
 0x194   : > { %7253 = vmatprep.mubr.msk.f32.mxu0 %vm3354_vm1, %v12563_v63  ;;  %5886 = vmatpush1.msra.mxu0 %v7334_v21  ;;  %v3533_v38 = vpop.f32.mrf.mxu0  ;;  %v12570_v21 = vld [vmem:[#allocation11_spill] sm:$0xff]  ;;  %v10535_v63 = vpop.f32.mrf.mxu1 }
 0x195   : > { %5072 = vmatmul.mubr.f32.gmra.mxu1 %v12569_v53  ;;  %5887 = vmatprep.subr.mxu0 %v12204_v35  ;;  %12571 = vst [vmem:[#allocation40_spill] sm:$0xff] %v10535_v63  ;;  %v12572_v38 = vld [vmem:[#allocation13_spill] sm:$0xff] }
 0x196   : > { %7200 = vmatprep.mubr.msk.f32.mxu1 %vm3354_vm1, %v12564_v22  ;;  %5537 = vmatpush1.msra.mxu1 %v7276_v45  ;;  %v10537_v12 = vpop.f32.mrf.mxu0  ;;  %v7332_v45 = vld [vmem:[%s11801_s2 + $0x458] sm:$0xff] }
 0x197   : > { %5346 = vmatmul.mubr.f32.gmra.mxu0 %v12565_v0  ;;  %5538 = vmatprep.subr.mxu1 %v12204_v35  ;;  %v3618_v0 = vpop.f32.mrf.mxu1  ;;  %v7274_v63 = vld [vmem:[%s11801_s2 + $0x398] sm:$0xff] }
 0x198   : > { %7254 = vmatprep.mubr.msk.f32.mxu0 %vm3354_vm1, %v12570_v21  ;;  %5888 = vmatpush1.msra.mxu0 %v7333_v14  ;;  %v3538_v14 = vpop.f32.mrf.mxu0  ;;  %v7331_v0 = vld [vmem:[%s11801_s2 + $0x450] sm:$0xff] }
 0x199   : > { %5077 = vmatmul.mubr.f32.gmra.mxu1 %v12566_v59  ;;  %5889 = vmatprep.subr.mxu0 %v12204_v35  ;;  %v12574_v14 = vld [vmem:[#allocation19_spill] sm:$0xff] }
 0x19a   : > { %7201 = vmatprep.mubr.msk.f32.mxu1 %vm3354_vm1, %v12567_v2  ;;  %5539 = vmatpush1.msra.mxu1 %v7275_v36  ;;  %v4724_v59 = vpop.f32.mrf.mxu0  ;;  %v4067_v36 = vpop.f32.mrf.mxu1  ;;  %v12575_v2 = vld [vmem:[#allocation22_spill] sm:$0xff] }
 0x19b   : > { %5351 = vmatmul.mubr.f32.gmra.mxu0 %v12572_v38  ;;  %5540 = vmatprep.subr.mxu1 %v12204_v35  ;;  %v4068_v22 = vadd.f32 %v4067_v36, %v12575_v2  ;;  %v12576_v2 = vld [vmem:[#allocation32_spill] sm:$0xff]  ;;  %v7294_v36 = vld [vmem:[%s11801_s2 + $0x438] sm:$0xff] }
 0x19c   : > { %7255 = vmatprep.mubr.msk.f32.mxu0 %vm3354_vm1, %v12573_v15  ;;  %5890 = vmatpush1.msra.mxu0 %v7332_v45  ;;  %v4726_v30 = vpop.f32.mrf.mxu0  ;;  %v7296_v45 = vld [vmem:[%s11801_s2 + $0x448] sm:$0xf] }
 0x19d   : > { %5082 = vmatmul.mubr.f32.gmra.mxu1 %v12569_v53  ;;  %5891 = vmatprep.subr.mxu0 %v12204_v35  ;;  %v4069_v53 = vpop.f32.mrf.mxu1  ;;  %v10568_v10 = vadd.f32 %v4724_v59, %v4068_v22  ;;  %v7353_v30 = vld [vmem:[%s11801_s2 + $0x500] sm:$0xf]  ;;  %v7352_v59 = vld [vmem:[%s11801_s2 + $0x4f8] sm:$0xff] }
 0x19e   : > { %7202 = vmatprep.mubr.msk.f32.mxu1 %vm3354_vm1, %v9791_v51  ;;  %5541 = vmatpush1.msra.mxu1 %v7274_v63  ;;  %v7295_v53 = vld [vmem:[%s11801_s2 + $0x440] sm:$0xff] }
 0x19f   : > { %5356 = vmatmul.mubr.f32.gmra.mxu0 %v12574_v14  ;;  %5560 = vmatprep.subr.mxu1 %v12204_v35  ;;  %v4072_v63 = vpop.f32.mrf.mxu1 }
 0x1a0   : > { %7256 = vmatprep.mubr.msk.f32.mxu0 %vm3354_vm1, %v12570_v21  ;;  %5892 = vmatpush1.msra.mxu0 %v7331_v0  ;;  %v4073_v0 = vadd.f32 %v4072_v63, %v12576_v2  ;;  %v4729_v63 = vpop.f32.mrf.mxu0 }
 0x1a1   : > { %5087 = vmatmul.mubr.f32.gmra.mxu1 %v9793_v18  ;;  %5911 = vmatprep.subr.mxu0 %v12204_v35  ;;  %v4074_v22 = vpop.f32.mrf.mxu1 }
 0x1a2   : > { %7203 = vmatprep.mubr.msk.f32.mxu1 %vm3354_vm1, %v9801_v52  ;;  %7297 = vmatpush2.msk.msra.mxu1 %vm3391_vm0, %v7296_v45  ;;  %v12577_v45 = vld [vmem:[#allocation26_spill] sm:$0xff]  ;;  %v12578_v22 = vld [vmem:[#allocation28_spill] sm:$0xff]  ;;  %v10608_v2 = vadd.f32 %v4729_v63, %v4073_v0  ;;  %v4731_v21 = vpop.f32.mrf.mxu0  ;;  %v12580_v0 = vld [vmem:[#allocation39_spill] sm:$0xff] }
 0x1a3   : > { %5361 = vmatmul.mubr.f32.gmra.mxu0 %v12572_v38  ;;  %5562 = vmatprep.subr.mxu1 %v12204_v35  ;;  %v12579_v38 = vld [vmem:[#allocation37_spill] sm:$0xff] }
 0x1a4   : > { %7257 = vmatprep.mubr.msk.f32.mxu0 %vm3354_vm1, %v12573_v15  ;;  %7354 = vmatpush2.msk.msra.mxu0 %vm3391_vm0, %v7353_v30  ;;  %v4077_v30 = vpop.f32.mrf.mxu1  ;;  %v7293_v15 = vld [vmem:[%s11801_s2 + $0x430] sm:$0xff] }
 0x1a5   : > { %5092 = vmatmul.mubr.f32.gmra.mxu1 %v9803_v39  ;;  %5913 = vmatprep.subr.mxu0 %v12204_v35 }
 0x1a6   : > { %7204 = vmatprep.mubr.msk.f32.mxu1 %vm3354_vm1, %v9791_v51  ;;  %5563 = vmatpush2.msra.mxu1 %v7295_v53  ;;  %v7351_v53 = vld [vmem:[%s11801_s2 + $0x4f0] sm:$0xff] }
 0x1a7   : > { %5366 = vmatmul.mubr.f32.gmra.mxu0 %v12574_v14  ;;  %5564 = vmatprep.subr.mxu1 %v12204_v35  ;;  %v4079_v14 = vpop.f32.mrf.mxu1 }
 0x1a8   : > { %7258 = vmatprep.mubr.msk.f32.mxu0 %vm3354_vm1, %v12577_v45  ;;  %5914 = vmatpush2.msra.mxu0 %v7352_v59  ;;  %v4078_v59 = vadd.f32 %v4077_v30, %v10066_v33  ;;  %v7350_v33 = vld [vmem:[%s11801_s2 + $0x4e8] sm:$0xff]  ;;  %v4734_v14 = vpop.f32.mrf.mxu0 }
 0x1a9   : > { %5097 = vmatmul.mubr.f32.gmra.mxu1 %v9793_v18  ;;  %5915 = vmatprep.subr.mxu0 %v12204_v35  ;;  %v7292_v30 = vld [vmem:[%s11801_s2 + $0x428] sm:$0xff] }
 0x1aa   : > { %7205 = vmatprep.mubr.msk.f32.mxu1 %vm3354_vm1, %v9801_v52  ;;  %5565 = vmatpush2.msra.mxu1 %v7294_v36  ;;  %v4082_v52 = vpop.f32.mrf.mxu1  ;;  %v10625_v36 = vadd.f32 %v4734_v14, %v4078_v59 }
 0x1ab   : > { %5371 = vmatmul.mubr.f32.gmra.mxu0 %v12578_v22  ;;  %5566 = vmatprep.subr.mxu1 %v12204_v35  ;;  %v4083_v14 = vadd.f32 %v4082_v52, %v10242_v43  ;;  %v7290_v43 = vld [vmem:[%s11801_s2 + $0x418] sm:$0xff] }
 0x1ac   : > { %7259 = vmatprep.mubr.msk.f32.mxu0 %vm3354_vm1, %v12579_v38  ;;  %5916 = vmatpush2.msra.mxu0 %v7351_v53  ;;  %v4084_v21 = vpop.f32.mrf.mxu1  ;;  %v4736_v53 = vpop.f32.mrf.mxu0 }
 0x1ad   : > { %5102 = vmatmul.mubr.f32.gmra.mxu1 %v9803_v39  ;;  %5917 = vmatprep.subr.mxu0 %v12204_v35 }
 0x1ae   : > { %7206 = vmatprep.mubr.msk.f32.mxu1 %vm3354_vm1, %v9952_v61  ;;  %5567 = vmatpush2.msra.mxu1 %v7293_v15  ;;  %v4087_v63 = vpop.f32.mrf.mxu1  ;;  %v7349_v15 = vld [vmem:[%s11801_s2 + $0x4e0] sm:$0xff]  ;;  %v4739_v53 = vpop.f32.mrf.mxu0 }
 0x1af   : > { %5376 = vmatmul.mubr.f32.gmra.mxu0 %v12580_v0  ;;  %5568 = vmatprep.subr.mxu1 %v12204_v35 }
 0x1b0   : > { %7260 = vmatprep.mubr.msk.f32.mxu0 %vm3354_vm1, %v12577_v45  ;;  %5918 = vmatpush2.msra.mxu0 %v7350_v33  ;;  %v4089_v59 = vpop.f32.mrf.mxu1  ;;  %v7291_v33 = vld [vmem:[%s11801_s2 + $0x420] sm:$0xff] }
 0x1b1   : > { %5107 = vmatmul.mubr.f32.gmra.mxu1 %v9954_v54  ;;  %5919 = vmatprep.subr.mxu0 %v12204_v35  ;;  %v4088_v59 = vadd.f32 %v4087_v63, %v10255_v5  ;;  %v12582_v5 = vld [vmem:[#allocation55_spill] sm:$0xff] }
 0x1b2   : > { %7207 = vmatprep.mubr.msk.f32.mxu1 %vm3354_vm1, %v9947_v11  ;;  %5569 = vmatpush2.msra.mxu1 %v7292_v30  ;;  %v4092_v21 = vpop.f32.mrf.mxu1  ;;  %v7348_v30 = vld [vmem:[%s11801_s2 + $0x4d8] sm:$0xff] }
 0x1b3   : > { %5381 = vmatmul.mubr.f32.gmra.mxu0 %v12578_v22  ;;  %5570 = vmatprep.subr.mxu1 %v12204_v35  ;;  %v4741_v22 = vpop.f32.mrf.mxu0 }
 0x1b4   : > { %7261 = vmatprep.mubr.msk.f32.mxu0 %vm3354_vm1, %v12579_v38  ;;  %5920 = vmatpush2.msra.mxu0 %v7349_v15  ;;  %v4094_v52 = vpop.f32.mrf.mxu1  ;;  %v10660_v15 = vadd.f32 %v4739_v53, %v4083_v14  ;;  %v12581_v38 = vld [vmem:[#allocation51_spill] sm:$0xff]  ;;  %v12583_v53 = vld [vmem:[#allocation64_spill] sm:$0xff] }
 0x1b5   : > { %5112 = vmatmul.mubr.f32.gmra.mxu1 %v9949_v16  ;;  %5921 = vmatprep.subr.mxu0 %v12204_v35  ;;  %v7347_v52 = vld [vmem:[%s11801_s2 + $0x4d0] sm:$0xff]  ;;  %v4744_v14 = vpop.f32.mrf.mxu0 }
 0x1b6   : > { %7208 = vmatprep.mubr.msk.f32.mxu1 %vm3354_vm1, %v9952_v61  ;;  %5571 = vmatpush2.msra.mxu1 %v7291_v33  ;;  %v4097_v33 = vpop.f32.mrf.mxu1  ;;  %v10674_v22 = vadd.f32 %v4744_v14, %v4088_v59 }
 0x1b7   : > { %5386 = vmatmul.mubr.f32.gmra.mxu0 %v12580_v0  ;;  %5572 = vmatprep.subr.mxu1 %v12204_v35  ;;  %v4746_v0 = vpop.f32.mrf.mxu0 }
 0x1b8   : > { %7262 = vmatprep.mubr.msk.f32.mxu0 %vm3354_vm1, %v12581_v38  ;;  %5922 = vmatpush2.msra.mxu0 %v7348_v30  ;;  %v4099_v63 = vpop.f32.mrf.mxu1  ;;  %v4093_v30 = vadd.f32 %v4092_v21, %v10267_v56  ;;  %v4098_v56 = vadd.f32 %v4097_v33, %v10288_v13 }
 0x1b9   : > { %5117 = vmatmul.mubr.f32.gmra.mxu1 %v9954_v54  ;;  %5923 = vmatprep.subr.mxu0 %v12204_v35  ;;  %v12584_v63 = vld [vmem:[#allocation65_spill] sm:$0xff] }
 0x1ba   : > { %7209 = vmatprep.mubr.msk.f32.mxu1 %vm3354_vm1, %v9947_v11  ;;  %5573 = vmatpush2.msra.mxu1 %v7290_v43  ;;  %v4102_v45 = vpop.f32.mrf.mxu1  ;;  %v4749_v43 = vpop.f32.mrf.mxu0 }
 0x1bb   : > { %5391 = vmatmul.mubr.f32.gmra.mxu0 %v12582_v5  ;;  %6187 = vmatprep.subr.mxu1 %v12204_v35  ;;  %v10684_v14 = vadd.f32 %v4749_v43, %v4093_v30  ;;  %v4103_v30 = vadd.f32 %v4102_v45, %v10336_v20 }
 0x1bc   : > { %7263 = vmatprep.mubr.msk.f32.mxu0 %vm3354_vm1, %v12583_v53  ;;  %5924 = vmatpush2.msra.mxu0 %v7347_v52  ;;  %v4104_v59 = vpop.f32.mrf.mxu1  ;;  %v4751_v0 = vpop.f32.mrf.mxu0 }
 0x1bd   : > { %5122 = vmatmul.mubr.f32.gmra.mxu1 %v9949_v16  ;;  %6516 = vmatprep.subr.mxu0 %v12204_v35 }
 0x1be   : > { %7210 = vmatprep.mubr.msk.f32.mxu1 %vm3354_vm1, %v10084_v49  ;;  %v4107_v21 = vpop.f32.mrf.mxu1  ;;  %v4754_v52 = vpop.f32.mrf.mxu0 }
 0x1bf   : > { %5396 = vmatmul.mubr.f32.gmra.mxu0 %v12584_v63  ;;  %v10693_v11 = vadd.f32 %v4754_v52, %v4098_v56  ;;  %v12585_v56 = vld [vmem:[#allocation78_spill] sm:$0xff] }
 0x1c0   : > { %7264 = vmatprep.mubr.msk.f32.mxu0 %vm3354_vm1, %v12581_v38  ;;  %v4109_v16 = vpop.f32.mrf.mxu1  ;;  %v4756_v13 = vpop.f32.mrf.mxu0 }
 0x1c1   : > { %5127 = vmatmul.mubr.f32.gmra.mxu1 %v10086_v47  ;;  %v4108_v16 = vadd.f32 %v4107_v21, %v10354_v4  ;;  %v12586_v13 = vld [vmem:[#allocation79_spill] sm:$0xff] }
 0x1c2   : > { %7211 = vmatprep.mubr.msk.f32.mxu1 %vm3354_vm1, %v10076_v1  ;;  %v4112_v33 = vpop.f32.mrf.mxu1  ;;  %v4759_v43 = vpop.f32.mrf.mxu0 }
 0x1c3   : > { %5401 = vmatmul.mubr.f32.gmra.mxu0 %v12582_v5  ;;  %v10702_v0 = vadd.f32 %v4759_v43, %v4103_v30  ;;  %v4113_v30 = vadd.f32 %v4112_v33, %v10370_v25  ;;  %v12587_v43 = vld [vmem:[#allocation90_spill] sm:$0xff] }
 0x1c4   : > { %7265 = vmatprep.mubr.msk.f32.mxu0 %vm3354_vm1, %v12583_v53  ;;  %v4114_v59 = vpop.f32.mrf.mxu1  ;;  %v4761_v20 = vpop.f32.mrf.mxu0 }
 0x1c5   : > { %5132 = vmatmul.mubr.f32.gmra.mxu1 %v10088_v7  ;;  %v12588_v20 = vld [vmem:[#allocation91_spill] sm:$0xff] }
 0x1c6   : > { %7212 = vmatprep.mubr.msk.f32.mxu1 %vm3354_vm1, %v10084_v49  ;;  %v4117_v45 = vpop.f32.mrf.mxu1  ;;  %v4764_v52 = vpop.f32.mrf.mxu0 }
 0x1c7   : > { %5406 = vmatmul.mubr.f32.gmra.mxu0 %v12584_v63  ;;  %v10711_v63 = vadd.f32 %v4764_v52, %v4108_v16 }
 0x1c8   : > { %7266 = vmatprep.mubr.msk.f32.mxu0 %vm3354_vm1, %v12585_v56  ;;  %v4119_v53 = vpop.f32.mrf.mxu1  ;;  %v4766_v4 = vpop.f32.mrf.mxu0 }
 0x1c9   : > { %5137 = vmatmul.mubr.f32.gmra.mxu1 %v10086_v47  ;;  %v4118_v53 = vadd.f32 %v4117_v45, %v10409_v40 }
 0x1ca   : > { %7213 = vmatprep.mubr.msk.f32.mxu1 %vm3354_vm1, %v10076_v1  ;;  %v4122_v21 = vpop.f32.mrf.mxu1  ;;  %v4769_v59 = vpop.f32.mrf.mxu0 }
 0x1cb   : > { %5411 = vmatmul.mubr.f32.gmra.mxu0 %v12586_v13  ;;  %v10720_v38 = vadd.f32 %v4769_v59, %v4113_v30 }
 0x1cc   : > { %7267 = vmatprep.mubr.msk.f32.mxu0 %vm3354_vm1, %v12587_v43  ;;  %v4124_v5 = vpop.f32.mrf.mxu1  ;;  %v4771_v25 = vpop.f32.mrf.mxu0 }
 0x1cd   : > { %5142 = vmatmul.mubr.f32.gmra.mxu1 %v10088_v7  ;;  %v4123_v5 = vadd.f32 %v4122_v21, %v10467_v41 }
 0x1ce   : > { %7214 = vmatprep.mubr.msk.f32.mxu1 %vm3354_vm1, %v10238_v26  ;;  %v4127_v33 = vpop.f32.mrf.mxu1  ;;  %v4774_v16 = vpop.f32.mrf.mxu0 }
 0x1cf   : > { %5416 = vmatmul.mubr.f32.gmra.mxu0 %v12588_v20  ;;  %v10729_v4 = vadd.f32 %v4774_v16, %v4118_v53  ;;  %v4128_v53 = vadd.f32 %v4127_v33, %v10485_v23  ;;  %v12589_v16 = vld [vmem:[#allocation96_spill] sm:$0xff] }
 0x1d0   : > { %7268 = vmatprep.mubr.msk.f32.mxu0 %vm3354_vm1, %v12585_v56  ;;  %v4129_v52 = vpop.f32.mrf.mxu1  ;;  %v4776_v40 = vpop.f32.mrf.mxu0 }
 0x1d1   : > { %5147 = vmatmul.mubr.f32.gmra.mxu1 %v10240_v37  ;;  %v12590_v40 = vld [vmem:[#allocation97_spill] sm:$0xff] }
 0x1d2   : > { %7215 = vmatprep.mubr.msk.f32.mxu1 %vm3354_vm1, %v10222_v8  ;;  %v4132_v45 = vpop.f32.mrf.mxu1  ;;  %v4779_v30 = vpop.f32.mrf.mxu0 }
 0x1d3   : > { %5421 = vmatmul.mubr.f32.gmra.mxu0 %v12586_v13  ;;  %v10738_v25 = vadd.f32 %v4779_v30, %v4123_v5  ;;  %v4133_v5 = vadd.f32 %v4132_v45, %v10501_v62  ;;  %v12591_v30 = vld [vmem:[#allocation98_spill] sm:$0xff]  ;;  %v12593_v13 = vld [vmem:[#allocation99_spill] sm:$0xff] }
 0x1d4   : > { %7269 = vmatprep.mubr.msk.f32.mxu0 %vm3354_vm1, %v12587_v43  ;;  %v4134_v59 = vpop.f32.mrf.mxu1  ;;  %v4781_v41 = vpop.f32.mrf.mxu0 }
 0x1d5   : > { %5152 = vmatmul.mubr.f32.gmra.mxu1 %v10224_v31  ;;  %v12592_v59 = vld [vmem:[#allocation27_spill] sm:$0xff] }
 0x1d6   : > { %7216 = vmatprep.mubr.msk.f32.mxu1 %vm3354_vm1, %v10238_v26  ;;  %v4137_v21 = vpop.f32.mrf.mxu1  ;;  %v4784_v52 = vpop.f32.mrf.mxu0 }
 0x1d7   : > { %5426 = vmatmul.mubr.f32.gmra.mxu0 %v12588_v20  ;;  %v10747_v20 = vadd.f32 %v4784_v52, %v4128_v53  ;;  %v4138_v62 = vadd.f32 %v4137_v21, %v10519_v29  ;;  %v7400_v29 = vld [vmem:[%s11801_s2 + $0x570] sm:$0xff] }
 0x1d8   : > { %7270 = vmatprep.mubr.msk.f32.mxu0 %vm3354_vm1, %v12589_v16  ;;  %v4139_v43 = vpop.f32.mrf.mxu1  ;;  %v4786_v23 = vpop.f32.mrf.mxu0 }
 0x1d9   : > { %5157 = vmatmul.mubr.f32.gmra.mxu1 %v10240_v37  ;;  %v7402_v43 = vld [vmem:[%s11801_s2 + $0x580] sm:$0xff]  ;;  %v12594_v23 = vld [vmem:[#allocation29_spill] sm:$0xff] }
 0x1da   : > { %7217 = vmatprep.mubr.msk.f32.mxu1 %vm3354_vm1, %v10222_v8  ;;  %v4142_v33 = vpop.f32.mrf.mxu1  ;;  %v4789_v41 = vpop.f32.mrf.mxu0 }
 0x1db   : > { %5431 = vmatmul.mubr.f32.gmra.mxu0 %v12590_v40  ;;  %v10759_v53 = vadd.f32 %v4789_v41, %v4133_v5  ;;  %v4143_v41 = vadd.f32 %v4142_v33, %v10537_v12 }
 0x1dc   : > { %7271 = vmatprep.mubr.msk.f32.mxu0 %vm3354_vm1, %v12591_v30  ;;  %v4144_v56 = vpop.f32.mrf.mxu1  ;;  %v4791_v45 = vpop.f32.mrf.mxu0 }
 0x1dd   : > { %5162 = vmatmul.mubr.f32.gmra.mxu1 %v10224_v31  ;;  %v7401_v31 = vld [vmem:[%s11801_s2 + $0x578] sm:$0xff]  ;;  %v12595_v56 = vld [vmem:[#allocation52_spill] sm:$0xff] }
 0x1de   : > { %7298 = vmatprep.mubr.msk.f32.mxu1 %vm3354_vm1, %v12592_v59  ;;  %v4147_v52 = vpop.f32.mrf.mxu1  ;;  %v4794_v8 = vpop.f32.mrf.mxu0 }
 0x1df   : > { %5436 = vmatmul.mubr.f32.gmra.mxu0 %v12593_v13  ;;  %v10775_v21 = vadd.f32 %v4794_v8, %v4138_v62  ;;  %v12597_v62 = vld [vmem:[#allocation17_spill] sm:$0xff] }
 0x1e0   : > { %7272 = vmatprep.mubr.msk.f32.mxu0 %vm3354_vm1, %v12589_v16  ;;  %v4149_v5 = vpop.f32.mrf.mxu1  ;;  %v12596_v16 = vld [vmem:[#allocation53_spill] sm:$0xff] }
 0x1e1   : > { %5575 = vmatmul.mubr.f32.vlgmr.msra.gmra.mxu1 %v12594_v23  ;;  %v7399_v5 = vld [vmem:[%s11801_s2 + $0x568] sm:$0xff] }
 0x1e2   : > { %6188 = vmatpush1.msra.mxu1 %v7402_v43  ;;  %7299 = vmatprep.mubr.msk.f32.mxu1 %vm3354_vm1, %v12595_v56  ;;  %v4796_v43 = vpop.f32.mrf.mxu0  ;;  %v4152_v45 = vpop.f32.mrf.mxu1 }
 0x1e3   : > { %5441 = vmatmul.mubr.f32.gmra.mxu0 %v12590_v40  ;;  %6189 = vmatprep.subr.mxu1 %v12204_v35  ;;  %v4148_v43 = vadd.f32 %v4147_v52, %v12597_v62 }
 0x1e4   : > { %7273 = vmatprep.mubr.msk.f32.mxu0 %vm3354_vm1, %v12591_v30  ;;  %6190 = vmatpush1.msra.mxu1 %v7401_v31  ;;  %v4799_v8 = vpop.f32.mrf.mxu0  ;;  %v4154_v12 = vpop.f32.mrf.mxu1  ;;  %v7398_v31 = vld [vmem:[%s11801_s2 + $0x560] sm:$0xff] }
 0x1e5   : > { %5580 = vmatmul.mubr.f32.gmra.mxu1 %v12596_v16  ;;  %6191 = vmatprep.subr.mxu1 %v12204_v35  ;;  %v10792_v33 = vadd.f32 %v4799_v8, %v4143_v41 }
 0x1e6   : > { %7300 = vmatprep.mubr.msk.f32.mxu1 %vm3354_vm1, %v12592_v59  ;;  %6192 = vmatpush1.msra.mxu1 %v7400_v29  ;;  %v4801_v30 = vpop.f32.mrf.mxu0  ;;  %v7458_v29 = vld [vmem:[%s11801_s2 + $0x638] sm:$0xff]  ;;  %v4157_v12 = vpop.f32.mrf.mxu1 }
 0x1e7   : > { %5446 = vmatmul.mubr.f32.gmra.mxu0 %v12593_v13  ;;  %6193 = vmatprep.subr.mxu1 %v12204_v35  ;;  %v12602_v13 = vld [vmem:[#allocation62_spill] sm:$0xff] }
 0x1e8   : > { %7355 = vmatprep.mubr.msk.f32.mxu0 %vm3354_vm1, %v9201_v6  ;;  %6194 = vmatpush1.msra.mxu1 %v7399_v5  ;;  %v4804_v41 = vpop.f32.mrf.mxu0  ;;  %v7457_v6 = vld [vmem:[%s11801_s2 + $0x630] sm:$0xff]  ;;  %v4159_v30 = vpop.f32.mrf.mxu1 }
 0x1e9   : > { %5585 = vmatmul.mubr.f32.gmra.mxu1 %v12594_v23  ;;  %6195 = vmatprep.subr.mxu1 %v12204_v35  ;;  %v10809_v52 = vadd.f32 %v4804_v41, %v4148_v43  ;;  %v12598_v5 = vld [vmem:[#allocation20_spill] sm:$0xff]  ;;  %v12599_v30 = vld [vmem:[#allocation34_spill] sm:$0xff]  ;;  %v4158_v41 = vadd.f32 %v4157_v12, %v9996_v42  ;;  %v7397_v12 = vld [vmem:[%s11801_s2 + $0x558] sm:$0xff] }
 0x1ea   : > { %7301 = vmatprep.mubr.msk.f32.mxu1 %vm3354_vm1, %v12595_v56  ;;  %6196 = vmatpush1.msra.mxu1 %v7398_v31  ;;  %v4153_v8 = vadd.f32 %v4152_v45, %v12598_v5  ;;  %v4806_v62 = vpop.f32.mrf.mxu0  ;;  %v4162_v31 = vpop.f32.mrf.mxu1 }
 0x1eb   : > { %5926 = vmatmul.mubr.f32.vlgmr.msra.gmra.mxu0 %v12537_v48  ;;  %6197 = vmatprep.subr.mxu1 %v12204_v35  ;;  %v7456_v48 = vld [vmem:[%s11801_s2 + $0x628] sm:$0xff] }
 0x1ec   : > { %6517 = vmatpush1.msra.mxu0 %v7458_v29  ;;  %7356 = vmatprep.mubr.msk.f32.mxu0 %vm3354_vm1, %v12538_v44  ;;  %v4809_v43 = vpop.f32.mrf.mxu0  ;;  %v4164_v45 = vpop.f32.mrf.mxu1  ;;  %v7455_v44 = vld [vmem:[%s11801_s2 + $0x620] sm:$0xff]  ;;  %v12600_v62 = vld [vmem:[#allocation43_spill] sm:$0xff] }
 0x1ed   : > { %6518 = vmatprep.subr.mxu0 %v12204_v35  ;;  %5590 = vmatmul.mubr.f32.gmra.mxu1 %v12596_v16  ;;  %v10826_v29 = vadd.f32 %v4809_v43, %v4153_v8  ;;  %v12601_v45 = vld [vmem:[#allocation80_spill] sm:$0xff]  ;;  %v4163_v43 = vadd.f32 %v4162_v31, %v10158_v27 }
 0x1ee   : > { %6519 = vmatpush1.msra.mxu0 %v7457_v6  ;;  %7302 = vmatprep.mubr.msk.f32.mxu1 %vm3354_vm1, %v12599_v30  ;;  %v4811_v6 = vpop.f32.mrf.mxu0  ;;  %v4167_v5 = vpop.f32.mrf.mxu1  ;;  %v7396_v31 = vld [vmem:[%s11801_s2 + $0x550] sm:$0xff] }
 0x1ef   : > { %5931 = vmatmul.mubr.f32.gmra.mxu0 %v12539_v50  ;;  %6520 = vmatprep.subr.mxu0 %v12204_v35  ;;  %v7454_v50 = vld [vmem:[%s11801_s2 + $0x618] sm:$0xff] }
 0x1f0   : > { %7357 = vmatprep.mubr.msk.f32.mxu0 %vm3354_vm1, %v12544_v28  ;;  %6521 = vmatpush1.msra.mxu0 %v7456_v48  ;;  %v4814_v8 = vpop.f32.mrf.mxu0  ;;  %v4169_v42 = vpop.f32.mrf.mxu1 }
 0x1f1   : > { %5595 = vmatmul.mubr.f32.gmra.mxu1 %v12600_v62  ;;  %6522 = vmatprep.subr.mxu0 %v12204_v35  ;;  %v10843_v48 = vadd.f32 %v4814_v8, %v4158_v41  ;;  %v7453_v42 = vld [vmem:[%s11801_s2 + $0x610] sm:$0xff]  ;;  %v4168_v8 = vadd.f32 %v4167_v5, %v10203_v9 }
 0x1f2   : > { %7303 = vmatprep.mubr.msk.f32.mxu1 %vm3354_vm1, %v12601_v45  ;;  %6523 = vmatpush1.msra.mxu0 %v7455_v44  ;;  %v4816_v6 = vpop.f32.mrf.mxu0  ;;  %v4172_v44 = vpop.f32.mrf.mxu1 }
 0x1f3   : > { %5936 = vmatmul.mubr.f32.gmra.mxu0 %v12547_v32  ;;  %6524 = vmatprep.subr.mxu0 %v12204_v35 }
 0x1f4   : > { %7358 = vmatprep.mubr.msk.f32.mxu0 %vm3354_vm1, %v12548_v57  ;;  %6525 = vmatpush1.msra.mxu0 %v7454_v50  ;;  %v4819_v41 = vpop.f32.mrf.mxu0  ;;  %v4174_v27 = vpop.f32.mrf.mxu1 }
 0x1f5   : > { %5600 = vmatmul.mubr.f32.gmra.mxu1 %v12602_v13  ;;  %6526 = vmatprep.subr.mxu0 %v12204_v35  ;;  %v10860_v50 = vadd.f32 %v4819_v41, %v4163_v43  ;;  %v7452_v27 = vld [vmem:[%s11801_s2 + $0x608] sm:$0xff] }
 0x1f6   : > { %7304 = vmatprep.mubr.msk.f32.mxu1 %vm3354_vm1, %v12599_v30  ;;  %6198 = vmatpush1.msra.mxu1 %v7397_v12  ;;  %v4821_v6 = vpop.f32.mrf.mxu0  ;;  %v4177_v12 = vpop.f32.mrf.mxu1 }
 0x1f7   : > { %5941 = vmatmul.mubr.f32.gmra.mxu0 %v12549_v58  ;;  %6199 = vmatprep.subr.mxu1 %v12204_v35  ;;  %v12603_v6 = vld [vmem:[#allocation69_spill] sm:$0xff] }
 0x1f8   : > { %7359 = vmatprep.mubr.msk.f32.mxu0 %vm3354_vm1, %v12544_v28  ;;  %6527 = vmatpush1.msra.mxu0 %v7453_v42  ;;  %v4824_v43 = vpop.f32.mrf.mxu0  ;;  %v4179_v9 = vpop.f32.mrf.mxu1  ;;  %v7395_v28 = vld [vmem:[%s11801_s2 + $0x548] sm:$0xff]  ;;  %v4173_v42 = vadd.f32 %v4172_v44, %v10234_v46 }
 0x1f9   : > { %5605 = vmatmul.mubr.f32.gmra.mxu1 %v12600_v62  ;;  %6528 = vmatprep.subr.mxu0 %v12204_v35  ;;  %v10877_v5 = vadd.f32 %v4824_v43, %v4168_v8 }
 0x1fa   : > { %7305 = vmatprep.mubr.msk.f32.mxu1 %vm3354_vm1, %v12601_v45  ;;  %6200 = vmatpush1.msra.mxu1 %v7396_v31  ;;  %v4826_v41 = vpop.f32.mrf.mxu0  ;;  %v4182_v31 = vpop.f32.mrf.mxu1 }
 0x1fb   : > { %5946 = vmatmul.mubr.f32.gmra.mxu0 %v12547_v32  ;;  %6201 = vmatprep.subr.mxu1 %v12204_v35  ;;  %v7451_v32 = vld [vmem:[%s11801_s2 + $0x600] sm:$0xff]  ;;  %v12605_v41 = vld [vmem:[#allocation9_spill] sm:$0xff] }
 0x1fc   : > { %7360 = vmatprep.mubr.msk.f32.mxu0 %vm3354_vm1, %v12548_v57  ;;  %6529 = vmatpush1.msra.mxu0 %v7452_v27  ;;  %v4184_v46 = vpop.f32.mrf.mxu1  ;;  %v7394_v57 = vld [vmem:[%s11801_s2 + $0x540] sm:$0xff]  ;;  %v4178_v27 = vadd.f32 %v4177_v12, %v10270_v17  ;;  %v7393_v12 = vld [vmem:[%s11801_s2 + $0x538] sm:$0xff] }
 0x1fd   : > { %5610 = vmatmul.mubr.f32.gmra.mxu1 %v12602_v13  ;;  %6530 = vmatprep.subr.mxu0 %v12204_v35  ;;  %v4829_v8 = vpop.f32.mrf.mxu0 }
 0x1fe   : > { %7306 = vmatprep.mubr.msk.f32.mxu1 %vm3354_vm1, %v12603_v6  ;;  %6202 = vmatpush1.msra.mxu1 %v7395_v28  ;;  %v10894_v44 = vadd.f32 %v4829_v8, %v4173_v42  ;;  %v4187_v9 = vpop.f32.mrf.mxu1  ;;  %v12604_v28 = vld [vmem:[#allocation70_spill] sm:$0xff]  ;;  %v4183_v8 = vadd.f32 %v4182_v31, %v10305_v34  ;;  %v7392_v31 = vld [vmem:[%s11801_s2 + $0x530] sm:$0xff] }
 0x1ff   : > { %5951 = vmatmul.mubr.f32.gmra.mxu0 %v12549_v58  ;;  %6203 = vmatprep.subr.mxu1 %v12204_v35  ;;  %v4831_v43 = vpop.f32.mrf.mxu0  ;;  %v7450_v58 = vld [vmem:[%s11801_s2 + $0x5f8] sm:$0xff] }
 0x200   : > { %7361 = vmatprep.mubr.msk.f32.mxu0 %vm3354_vm1, %v12553_v24  ;;  %6531 = vmatpush1.msra.mxu0 %v7451_v32  ;;  %v4189_v17 = vpop.f32.mrf.mxu1  ;;  %v12606_v43 = vld [vmem:[#allocation5_spill] sm:$0xff] }
 0x201   : > { %5615 = vmatmul.mubr.f32.gmra.mxu1 %v12604_v28  ;;  %6532 = vmatprep.subr.mxu0 %v12204_v35  ;;  %v7449_v17 = vld [vmem:[%s11801_s2 + $0x5f0] sm:$0xff] }
 0x202   : > { %7307 = vmatprep.mubr.msk.f32.mxu1 %vm3354_vm1, %v12605_v41  ;;  %6204 = vmatpush1.msra.mxu1 %v7394_v57  ;;  %v4834_v42 = vpop.f32.mrf.mxu0 }
 0x203   : > { %5956 = vmatmul.mubr.f32.gmra.mxu0 %v12555_v55  ;;  %6205 = vmatprep.subr.mxu1 %v12204_v35  ;;  %v10911_v32 = vadd.f32 %v4834_v42, %v4178_v27  ;;  %v4192_v57 = vpop.f32.mrf.mxu1  ;;  %v4188_v42 = vadd.f32 %v4187_v9, %v10320_v3 }
 0x204   : > { %7362 = vmatprep.mubr.msk.f32.mxu0 %vm3354_vm1, %v12556_v19  ;;  %6533 = vmatpush1.msra.mxu0 %v7450_v58  ;;  %v4836_v46 = vpop.f32.mrf.mxu0 }
 0x205   : > { %5620 = vmatmul.mubr.f32.gmra.mxu1 %v12606_v43  ;;  %6534 = vmatprep.subr.mxu0 %v12204_v35  ;;  %v4194_v34 = vpop.f32.mrf.mxu1 }
 0x206   : > { %7308 = vmatprep.mubr.msk.f32.mxu1 %vm3354_vm1, %v12603_v6  ;;  %6206 = vmatpush1.msra.mxu1 %v7393_v12  ;;  %v7448_v34 = vld [vmem:[%s11801_s2 + $0x5e8] sm:$0xff] }
 0x207   : > { %v4839_v27 = vpop.f32.mrf.mxu0  ;;  %5961 = vmatmul.mubr.f32.gmra.mxu0 %v12558_v60  ;;  %6207 = vmatprep.subr.mxu1 %v12204_v35 }
 0x208   : > { %v10928_v58 = vadd.f32 %v4839_v27, %v4183_v8  ;;  %7363 = vmatprep.mubr.msk.f32.mxu0 %vm3354_vm1, %v12553_v24  ;;  %6535 = vmatpush1.msra.mxu0 %v7449_v17  ;;  %v4197_v12 = vpop.f32.mrf.mxu1  ;;  %v7391_v24 = vld [vmem:[%s11801_s2 + $0x528] sm:$0xff]  ;;  %v12608_v17 = vld [vmem:[#allocation88_spill] sm:$0xff] }
 0x209   : > { %v4841_v46 = vpop.f32.mrf.mxu0  ;;  %5625 = vmatmul.mubr.f32.gmra.mxu1 %v12604_v28  ;;  %6536 = vmatprep.subr.mxu0 %v12204_v35  ;;  %v4193_v27 = vadd.f32 %v4192_v57, %v12608_v17 }
 0x20a   : > { %7309 = vmatprep.mubr.msk.f32.mxu1 %vm3354_vm1, %v12605_v41  ;;  %6208 = vmatpush1.msra.mxu1 %v7392_v31  ;;  %v4199_v3 = vpop.f32.mrf.mxu1  ;;  %v12618_v41 = vld [vmem:[#allocation14_spill] sm:$0xff] }
 0x20b   : > { %v4844_v8 = vpop.f32.mrf.mxu0  ;;  %5966 = vmatmul.mubr.f32.gmra.mxu0 %v12555_v55  ;;  %6209 = vmatprep.subr.mxu1 %v12204_v35  ;;  %v7447_v55 = vld [vmem:[%s11801_s2 + $0x5e0] sm:$0xff]  ;;  %v12609_v3 = vld [vmem:[#allocation85_spill] sm:$0xff] }
 0x20c   : > { %v10945_v9 = vadd.f32 %v4844_v8, %v4188_v42  ;;  %7364 = vmatprep.mubr.msk.f32.mxu0 %vm3354_vm1, %v12556_v19  ;;  %6537 = vmatpush1.msra.mxu0 %v7448_v34  ;;  %v4202_v31 = vpop.f32.mrf.mxu1  ;;  %v7390_v19 = vld [vmem:[%s11801_s2 + $0x520] sm:$0xff]  ;;  %v12611_v8 = vld [vmem:[#allocation68_spill] sm:$0xff] }
 0x20d   : > { %v4846_v46 = vpop.f32.mrf.mxu0  ;;  %5630 = vmatmul.mubr.f32.gmra.mxu1 %v12606_v43  ;;  %6538 = vmatprep.subr.mxu0 %v12204_v35  ;;  %v4198_v17 = vadd.f32 %v4197_v12, %v12611_v8  ;;  %v12613_v43 = vld [vmem:[#allocation8_spill] sm:$0xff]  ;;  %v12615_v12 = vld [vmem:[#allocation7_spill] sm:$0xff]  ;;  %v12617_v8 = vld [vmem:[#allocation89_spill] sm:$0xff] }
 0x20e   : > { %12607 = vst [vmem:[#allocation42_spill] sm:$0xff] %v10945_v9  ;;  %7310 = vmatprep.mubr.msk.f32.mxu1 %vm3354_vm1, %v12609_v3  ;;  %6210 = vmatpush1.msra.mxu1 %v7391_v24  ;;  %v4204_v57 = vpop.f32.mrf.mxu1  ;;  %v12612_v46 = vld [vmem:[#allocation10_spill] sm:$0xff]  ;;  %v12619_v9 = vld [vmem:[#allocation24_spill] sm:$0xff] }
 0x20f   : > { %v4849_v42 = vpop.f32.mrf.mxu0  ;;  %5971 = vmatmul.mubr.f32.gmra.mxu0 %v12558_v60  ;;  %6211 = vmatprep.subr.mxu1 %v12204_v35  ;;  %v7446_v60 = vld [vmem:[%s11801_s2 + $0x5d8] sm:$0xff]  ;;  %v12614_v57 = vld [vmem:[#allocation23_spill] sm:$0xff] }
 0x210   : > { %v10962_v34 = vadd.f32 %v4849_v42, %v4193_v27  ;;  %7365 = vmatprep.mubr.msk.f32.mxu0 %vm3354_vm1, %v12612_v46  ;;  %6539 = vmatpush1.msra.mxu0 %v7447_v55  ;;  %v4207_v24 = vpop.f32.mrf.mxu1 }
 0x211   : > { %v4851_v40 = vpop.f32.mrf.mxu0  ;;  %5635 = vmatmul.mubr.f32.gmra.mxu1 %v12613_v43  ;;  %6540 = vmatprep.subr.mxu0 %v12204_v35 }
 0x212   : > { %12610 = vst [vmem:[#allocation66_spill] sm:$0xff] %v10962_v34  ;;  %7311 = vmatprep.mubr.msk.f32.mxu1 %vm3354_vm1, %v12614_v57  ;;  %6212 = vmatpush1.msra.mxu1 %v7390_v19  ;;  %v4209_v42 = vpop.f32.mrf.mxu1  ;;  %v7389_v40 = vld [vmem:[%s11801_s2 + $0x518] sm:$0xff]  ;;  %v4203_v34 = vadd.f32 %v4202_v31, %v12617_v8  ;;  %v12620_v31 = vld [vmem:[#allocation15_spill] sm:$0xff] }
 0x213   : > { %v4854_v27 = vpop.f32.mrf.mxu0  ;;  %5976 = vmatmul.mubr.f32.gmra.mxu0 %v12615_v12  ;;  %6213 = vmatprep.subr.mxu1 %v12204_v35  ;;  %v7445_v42 = vld [vmem:[%s11801_s2 + $0x5d0] sm:$0xff]  ;;  %v12621_v8 = vld [vmem:[#allocation81_spill] sm:$0xff] }
 0x214   : > { %v10979_v55 = vadd.f32 %v4854_v27, %v4198_v17  ;;  %7366 = vmatprep.mubr.msk.f32.mxu0 %vm3354_vm1, %v12618_v41  ;;  %6541 = vmatpush1.msra.mxu0 %v7446_v60  ;;  %v4212_v19 = vpop.f32.mrf.mxu1 }
 0x215   : > { %v4856_v28 = vpop.f32.mrf.mxu0  ;;  %5640 = vmatmul.mubr.f32.gmra.mxu1 %v12619_v9  ;;  %6542 = vmatprep.subr.mxu0 %v12204_v35 }
 0x216   : > { %12616 = vst [vmem:[#allocation67_spill] sm:$0xff] %v10979_v55  ;;  %7312 = vmatprep.mubr.msk.f32.mxu1 %vm3354_vm1, %v12609_v3  ;;  %6214 = vmatpush1.msra.mxu1 %v7389_v40  ;;  %v4214_v27 = vpop.f32.mrf.mxu1  ;;  %v7388_v28 = vld [vmem:[%s11801_s2 + $0x510] sm:$0xff]  ;;  %v4208_v55 = vadd.f32 %v4207_v24, %v12621_v8 }
 0x217   : > { %v4859_v17 = vpop.f32.mrf.mxu0  ;;  %5981 = vmatmul.mubr.f32.gmra.mxu0 %v12620_v31  ;;  %6215 = vmatprep.subr.mxu1 %v12204_v35  ;;  %v7444_v27 = vld [vmem:[%s11801_s2 + $0x5c8] sm:$0xff] }
 0x218   : > { %v10996_v60 = vadd.f32 %v4859_v17, %v4203_v34  ;;  %7367 = vmatprep.mubr.msk.f32.mxu0 %vm3354_vm1, %v12612_v46  ;;  %6543 = vmatpush1.msra.mxu0 %v7445_v42  ;;  %v4217_v40 = vpop.f32.mrf.mxu1  ;;  %v12623_v42 = vld [vmem:[#allocation92_spill] sm:$0xff] }
 0x219   : > { %v4861_v3 = vpop.f32.mrf.mxu0  ;;  %5645 = vmatmul.mubr.f32.gmra.mxu1 %v12613_v43  ;;  %6544 = vmatprep.subr.mxu0 %v12204_v35  ;;  %v4213_v17 = vadd.f32 %v4212_v19, %v12623_v42 }
 0x21a   : > { %7313 = vmatprep.mubr.msk.f32.mxu1 %vm3354_vm1, %v12614_v57  ;;  %6216 = vmatpush1.msra.mxu1 %v7388_v28  ;;  %v4219_v24 = vpop.f32.mrf.mxu1  ;;  %v7387_v3 = vld [vmem:[%s11801_s2 + $0x508] sm:$0xff]  ;;  %v12632_v57 = vld [vmem:[#allocation46_spill] sm:$0xff] }
 0x21b   : > { %v4864_v34 = vpop.f32.mrf.mxu0  ;;  %5986 = vmatmul.mubr.f32.gmra.mxu0 %v12615_v12  ;;  %6217 = vmatprep.subr.mxu1 %v12204_v35  ;;  %v7443_v12 = vld [vmem:[%s11801_s2 + $0x5c0] sm:$0xff]  ;;  %v12624_v24 = vld [vmem:[#allocation16_spill] sm:$0xff] }
 0x21c   : > { %v11013_v46 = vadd.f32 %v4864_v34, %v4208_v55  ;;  %7368 = vmatprep.mubr.msk.f32.mxu0 %vm3354_vm1, %v12618_v41  ;;  %6545 = vmatpush1.msra.mxu0 %v7444_v27  ;;  %v4222_v28 = vpop.f32.mrf.mxu1  ;;  %v7409_v41 = vld [vmem:[%s11801_s2 + $0x5b8] sm:$0xf]  ;;  %v12626_v34 = vld [vmem:[#allocation38_spill] sm:$0xff] }
 0x21d   : > { %v4866_v8 = vpop.f32.mrf.mxu0  ;;  %5650 = vmatmul.mubr.f32.gmra.mxu1 %v12619_v9  ;;  %6546 = vmatprep.subr.mxu0 %v12204_v35  ;;  %v4218_v42 = vadd.f32 %v4217_v40, %v12626_v34  ;;  %v12627_v9 = vld [vmem:[#allocation12_spill] sm:$0xff] }
 0x21e   : > { %12622 = vst [vmem:[#allocation54_spill] sm:$0xff] %v11013_v46  ;;  %7314 = vmatprep.mubr.msk.f32.mxu1 %vm3354_vm1, %v12624_v24  ;;  %6218 = vmatpush1.msra.mxu1 %v7387_v3  ;;  %v4224_v19 = vpop.f32.mrf.mxu1 }
 0x21f   : > { %v4869_v55 = vpop.f32.mrf.mxu0  ;;  %5991 = vmatmul.mubr.f32.gmra.mxu0 %v12620_v31  ;;  %6237 = vmatprep.subr.mxu1 %v12204_v35  ;;  %v7465_v31 = vld [vmem:[%s11801_s2 + $0x670] sm:$0xf] }
 0x220   : > { %v11030_v27 = vadd.f32 %v4869_v55, %v4213_v17  ;;  %7369 = vmatprep.mubr.msk.f32.mxu0 %vm3354_vm1, %v9791_v51  ;;  %6547 = vmatpush1.msra.mxu0 %v7443_v12  ;;  %v5008_v3 = vpop.f32.mrf.mxu1  ;;  %v12628_v17 = vld [vmem:[#allocation36_spill] sm:$0xff] }
 0x221   : > { %v4871_v8 = vpop.f32.mrf.mxu0  ;;  %5655 = vmatmul.mubr.f32.gmra.mxu1 %v12627_v9  ;;  %6566 = vmatprep.subr.mxu0 %v12204_v35  ;;  %v5167_v19 = vadd.f32 %v5008_v3, %v10568_v10  ;;  %v7408_v55 = vld [vmem:[%s11801_s2 + $0x5b0] sm:$0xff]  ;;  %v12631_v10 = vld [vmem:[#allocation21_spill] sm:$0xff] }
 0x222   : > { %12625 = vst [vmem:[#allocation56_spill] sm:$0xff] %v11030_v27  ;;  %7315 = vmatprep.mubr.msk.f32.mxu1 %vm3354_vm1, %v12628_v17  ;;  %7410 = vmatpush2.msk.msra.mxu1 %vm3391_vm0, %v7409_v41  ;;  %v5010_v12 = vpop.f32.mrf.mxu1  ;;  %v12630_v8 = vld [vmem:[#allocation40_spill] sm:$0xff] }
 0x223   : > { %v4874_v40 = vpop.f32.mrf.mxu0  ;;  %5996 = vmatmul.mubr.f32.gmra.mxu0 %v9793_v18  ;;  %6239 = vmatprep.subr.mxu1 %v12204_v35  ;;  %v4223_v27 = vadd.f32 %v4222_v28, %v12630_v8  ;;  %v7464_v12 = vld [vmem:[%s11801_s2 + $0x668] sm:$0xff] }
 0x224   : > { %v11049_v34 = vadd.f32 %v4874_v40, %v4218_v42  ;;  %7370 = vmatprep.mubr.msk.f32.mxu0 %vm3354_vm1, %v12631_v10  ;;  %7466 = vmatpush2.msk.msra.mxu0 %vm3391_vm0, %v7465_v31  ;;  %v5013_v3 = vpop.f32.mrf.mxu1  ;;  %v7407_v40 = vld [vmem:[%s11801_s2 + $0x5a8] sm:$0xff] }
 0x225   : > { %v4876_v41 = vpop.f32.mrf.mxu0  ;;  %5660 = vmatmul.mubr.f32.gmra.mxu1 %v12632_v57  ;;  %6568 = vmatprep.subr.mxu0 %v12204_v35  ;;  %v5168_v42 = vadd.f32 %v5013_v3, %v10608_v2  ;;  %v7618_v8 = vld [vmem:[%s7935_s23 + $0x20] ss:$8 sps:$4 sm:$0xff]  }
 0x226   : > { %12629 = vst [vmem:[#allocation75_spill] sm:$0xff] %v11049_v34  ;;  %7316 = vmatprep.mubr.msk.f32.mxu1 %vm3354_vm1, %v12624_v24  ;;  %6240 = vmatpush2.msra.mxu1 %v7408_v55  ;;  %v5015_v31 = vpop.f32.mrf.mxu1  ;;  %v7463_v55 = vld [vmem:[%s11801_s2 + $0x660] sm:$0xff]  ;;  %v7403_v24 = vld [vmem:[%s11801_s2 + $0x588] sm:$0xff] }
 0x227   : > { %v4879_v28 = vpop.f32.mrf.mxu0  ;;  %6001 = vmatmul.mubr.f32.gmra.mxu0 %v9803_v39  ;;  %6241 = vmatprep.subr.mxu1 %v12204_v35 }
 0x228   : > { %v11069_v41 = vadd.f32 %v4879_v28, %v4223_v27  ;;  %7371 = vmatprep.mubr.msk.f32.mxu0 %vm3354_vm1, %v9791_v51  ;;  %6569 = vmatpush2.msra.mxu0 %v7464_v12  ;;  %v7406_v12 = vld [vmem:[%s11801_s2 + $0x5a0] sm:$0xff] }
 0x229   : > { %v4881_v2 = vpop.f32.mrf.mxu0  ;;  %v5018_v3 = vpop.f32.mrf.mxu1  ;;  %5665 = vmatmul.mubr.f32.gmra.mxu1 %v12627_v9  ;;  %6570 = vmatprep.subr.mxu0 %v12204_v35  ;;  %v12634_v28 = vld [vmem:[#allocation2_spill] sm:$0xff] }
 0x22a   : > { %12633 = vst [vmem:[#allocation84_spill] sm:$0xff] %v11069_v41  ;;  %v5169_v31 = vadd.f32 %v5018_v3, %v10625_v36  ;;  %7317 = vmatprep.mubr.msk.f32.mxu1 %vm3354_vm1, %v12628_v17  ;;  %6242 = vmatpush2.msra.mxu1 %v7407_v40  ;;  %v1068_v2 = vrot.slane %v7618_v8, %v12634_v28  ;;  %v7620_v3 = vld [vmem:[%s7935_s23 + $0x24] ss:$8 sps:$4 sm:$0xff]   ;;  %v12636_v8 = vld [vmem:[#allocation33_spill] sm:$0xff] }
 0x22b   : > { %v5292_v27 = vpop.f32.mrf.mxu0  ;;  %6006 = vmatmul.mubr.f32.gmra.mxu0 %v9793_v18  ;;  %v5020_v51 = vpop.f32.mrf.mxu1  ;;  %6243 = vmatprep.subr.mxu1 %v12204_v35  ;;  %v7462_v18 = vld [vmem:[%s11801_s2 + $0x658] sm:$0xff] }
 0x22c   : > { %v11087_v9 = vadd.f32 %v5292_v27, %v5167_v19  ;;  %7372 = vmatprep.mubr.msk.f32.mxu0 %vm3354_vm1, %v12631_v10  ;;  %6571 = vmatpush2.msra.mxu0 %v7463_v55  ;;  %v7405_v55 = vld [vmem:[%s11801_s2 + $0x598] sm:$0xff]  ;;  %v1076_v27 = vcombine.high %v1068_v2, %v1068_v2 }
 0x22d   : > { %v5294_v36 = vpop.f32.mrf.mxu0  ;;  %v5023_v40 = vpop.f32.mrf.mxu1  ;;  %5670 = vmatmul.mubr.f32.gmra.mxu1 %v12632_v57  ;;  %6572 = vmatprep.subr.mxu0 %v12204_v35 }
 0x22e   : > { %12635 = vst [vmem:[#allocation82_spill] sm:$0xff] %v11087_v9  ;;  %v5170_v51 = vadd.f32 %v5023_v40, %v10660_v15  ;;  %7318 = vmatprep.mubr.msk.f32.mxu1 %vm3354_vm1, %v12636_v8  ;;  %6244 = vmatpush2.msra.mxu1 %v7406_v12  ;;  %v12638_v12 = vld [vmem:[#allocation35_spill] sm:$0xff] }
 0x22f   : > { %v5297_v19 = vpop.f32.mrf.mxu0  ;;  %6011 = vmatmul.mubr.f32.gmra.mxu0 %v9803_v39  ;;  %v5025_v10 = vpop.f32.mrf.mxu1  ;;  %6245 = vmatprep.subr.mxu1 %v12204_v35  ;;  %v7461_v39 = vld [vmem:[%s11801_s2 + $0x650] sm:$0xff] }
 0x230   : > { %v11105_v36 = vadd.f32 %v5297_v19, %v5168_v42  ;;  %7373 = vmatprep.mubr.msk.f32.mxu0 %vm3354_vm1, %v9952_v61  ;;  %6573 = vmatpush2.msra.mxu0 %v7462_v18  ;;  %v1075_v10 = vrot.slane %v7620_v3, %v12634_v28  ;;  %v12639_v42 = vld [vmem:[#allocation48_spill] sm:$0xff]  ;;  %v1098_v3 = vrot.slane %v1076_v27, %v12634_v28 }
 0x231   : > { %v5299_v15 = vpop.f32.mrf.mxu0  ;;  %v5028_v40 = vpop.f32.mrf.mxu1  ;;  %5675 = vmatmul.mubr.f32.gmra.mxu1 %v12638_v12  ;;  %6574 = vmatprep.subr.mxu0 %v12204_v35 }
 0x232   : > { %12637 = vst [vmem:[#allocation83_spill] sm:$0xff] %v11105_v36  ;;  %v5171_v57 = vadd.f32 %v5028_v40, %v10674_v22  ;;  %7319 = vmatprep.mubr.msk.f32.mxu1 %vm3354_vm1, %v12639_v42  ;;  %6246 = vmatpush2.msra.mxu1 %v7405_v55  ;;  %v7404_v15 = vld [vmem:[%s11801_s2 + $0x590] sm:$0xff]  ;;  %v11124_v36 = vrot.slane %v1068_v2, %v12634_v28  ;;  %v12641_v40 = vld [vmem:[#allocation47_spill] sm:$0xff] }
 0x233   : > { %v5302_v19 = vpop.f32.mrf.mxu0  ;;  %6016 = vmatmul.mubr.f32.gmra.mxu0 %v9954_v54  ;;  %v5030_v18 = vpop.f32.mrf.mxu1  ;;  %6247 = vmatprep.subr.mxu1 %v12204_v35  ;;  %v7460_v2 = vld [vmem:[%s11801_s2 + $0x648] sm:$0xff]  ;;  %v1077_v9 = vcombine.high %v1075_v10, %v1075_v10 }
 0x234   : > { %v11127_v22 = vadd.f32 %v5302_v19, %v5169_v31  ;;  %7374 = vmatprep.mubr.msk.f32.mxu0 %vm3354_vm1, %v12641_v40  ;;  %6575 = vmatpush2.msra.mxu0 %v7461_v39  ;;  %v12642_v18 = vld [vmem:[#allocation59_spill] sm:$0xff]  ;;  %v12643_v39 = vld [vmem:[#allocation25_spill] sm:$0xff] }
 0x235   : > { %v5304_v55 = vpop.f32.mrf.mxu0  ;;  %v5033_v17 = vpop.f32.mrf.mxu1  ;;  %5680 = vmatmul.mubr.f32.gmra.mxu1 %v12642_v18  ;;  %6576 = vmatprep.subr.mxu0 %v12204_v35 }
 0x236   : > { %12640 = vst [vmem:[#allocation22_spill] sm:$0xff] %v11127_v22  ;;  %v5172_v27 = vadd.f32 %v5033_v17, %v10684_v14  ;;  %7320 = vmatprep.mubr.msk.f32.mxu1 %vm3354_vm1, %v12636_v8  ;;  %6248 = vmatpush2.msra.mxu1 %v7404_v15  ;;  %v1106_v55 = vcombine.high %v11124_v36, %v11124_v36  ;;  %v7621_v14 = vld [vmem:[%s7935_s23 + $0x30] ss:$8 sps:$4 sm:$0x33]  }
 0x237   : > { %v5307_v31 = vpop.f32.mrf.mxu0  ;;  %6021 = vmatmul.mubr.f32.gmra.mxu0 %v12643_v39  ;;  %v5035_v19 = vpop.f32.mrf.mxu1  ;;  %v1108_v22 = vcombine.high %v1098_v3, %v1098_v3  ;;  %6249 = vmatprep.subr.mxu1 %v12204_v35  ;;  %v11154_v8 = vrot.slane %v1077_v9, %v12634_v28 }
 0x238   : > { %v11146_v41 = vadd.f32 %v5307_v31, %v5170_v51  ;;  %7375 = vmatprep.mubr.msk.f32.mxu0 %vm3354_vm1, %v9952_v61  ;;  %6577 = vmatpush2.msra.mxu0 %v7460_v2  ;;  %v1091_v19 = vrot.slane %v1075_v10, %v12634_v28  ;;  %v7459_v51 = vld [vmem:[%s11801_s2 + $0x640] sm:$0xff]  ;;  %v12645_v61 = vld [vmem:[#allocation3_spill] sm:$0xff] }
 0x239   : > { %v5309_v17 = vpop.f32.mrf.mxu0  ;;  %v5038_v15 = vpop.f32.mrf.mxu1  ;;  %5685 = vmatmul.mubr.f32.gmra.mxu1 %v12638_v12  ;;  %6578 = vmatprep.subr.mxu0 %v12204_v35  ;;  %v1864_v2 = vrot.slane %v1098_v3, %v12645_v61  ;;  %v1872_v35 = vrot.slane %v1106_v55, %v12645_v61  ;;  %v1880_v34 = vrot.slane %v1108_v22, %v12645_v61 }
 0x23a   : > { %12644 = vst [vmem:[#allocation32_spill] sm:$0xff] %v11146_v41  ;;  %v5173_v31 = vadd.f32 %v5038_v15, %v10693_v11  ;;  %7321 = vmatprep.mubr.msk.f32.mxu1 %vm3354_vm1, %v12639_v42  ;;  %v12646_v17 = vld [vmem:[#allocation4_spill] sm:$0xff]  ;;  %6250 = vmatpush2.msra.mxu1 %v7403_v24 }
 0x23b   : > { %v1868_v12 = vrot.slane %v1098_v3, %v12646_v17  ;;  %v5312_v10 = vpop.f32.mrf.mxu0  ;;  %6026 = vmatmul.mubr.f32.gmra.mxu0 %v9954_v54  ;;  %v5040_v9 = vpop.f32.mrf.mxu1  ;;  %v1876_v41 = vrot.slane %v1106_v55, %v12646_v17  ;;  %v1884_v11 = vrot.slane %v1108_v22, %v12646_v17  ;;  %v11175_v3 = vrot.slane %v7621_v14, %v12634_v28  ;;  %v12649_v22 = vld [vmem:[#allocation49_spill] sm:$0xff] }
 0x23c   : > { %v11170_v15 = vadd.f32 %v5312_v10, %v5171_v57  ;;  %7376 = vmatprep.mubr.msk.f32.mxu0 %vm3354_vm1, %v12641_v40  ;;  %6579 = vmatpush2.msra.mxu0 %v7459_v51  ;;  %v1107_v9 = vcombine.high %v1091_v19, %v1091_v19  ;;  %v1109_v55 = vcombine.high %v11154_v8, %v11154_v8 }
 0x23d   : > { %12648 = vst [vmem:[#allocation29_spill] sm:$0xff] %v11175_v3  ;;  %v5314_v24 = vpop.f32.mrf.mxu0  ;;  %v5043_v54 = vpop.f32.mrf.mxu1  ;;  %5690 = vmatmul.mubr.f32.gmra.mxu1 %v12642_v18  ;;  %v1856_v57 = vrot.slane %v11124_v36, %v12645_v61  ;;  %v1860_v40 = vrot.slane %v11124_v36, %v12646_v17  ;;  %v1888_v14 = vrot.slane %v1091_v19, %v12645_v61 }
 0x23e   : > { %12647 = vst [vmem:[#allocation27_spill] sm:$0xff] %v11170_v15  ;;  %v5174_v42 = vadd.f32 %v5043_v54, %v10702_v0  ;;  %7322 = vmatprep.mubr.msk.f32.mxu1 %vm3354_vm1, %v12649_v22  ;;  %v1892_v24 = vrot.slane %v1091_v19, %v12646_v17  ;;  %v2661_v18 = vcombine.low %v1864_v2, %v1868_v12  ;;  %v12651_v19 = vld [vmem:[#allocation41_spill] sm:$0xff] }
 0x23f   : > { %v5317_v51 = vpop.f32.mrf.mxu0  ;;  %6031 = vmatmul.mubr.f32.gmra.mxu0 %v12643_v39  ;;  %v5045_v10 = vpop.f32.mrf.mxu1  ;;  %v2669_v15 = vcombine.low %v1872_v35, %v1876_v41  ;;  %v2677_v0 = vcombine.low %v1880_v34, %v1884_v11  ;;  %v1125_v43 = vrot.slane %v11175_v3, %v12634_v28  ;;  %v1896_v36 = vrot.slane %v11154_v8, %v12645_v61  ;;  %v12652_v35 = vld [vmem:[#allocation63_spill] sm:$0xff] }
 0x240   : > { %v11190_v54 = vadd.f32 %v5317_v51, %v5172_v27  ;;  %7377 = vmatprep.mubr.msk.f32.mxu0 %vm3354_vm1, %v10084_v49  ;;  %v1900_v39 = vrot.slane %v11154_v8, %v12646_v17  ;;  %v1904_v34 = vrot.slane %v1107_v9, %v12645_v61  ;;  %v1908_v41 = vrot.slane %v1107_v9, %v12646_v17 }
 0x241   : > { %v5319_v10 = vpop.f32.mrf.mxu0  ;;  %v5048_v46 = vpop.f32.mrf.mxu1  ;;  %5695 = vmatmul.mubr.f32.gmra.mxu1 %v12651_v19  ;;  %v1912_v12 = vrot.slane %v1109_v55, %v12645_v61  ;;  %v1916_v27 = vrot.slane %v1109_v55, %v12646_v17  ;;  %v2653_v51 = vcombine.low %v1856_v57, %v1860_v40  ;;  %v2685_v3 = vcombine.low %v1888_v14, %v1892_v24  ;;  %v12655_v57 = vld [vmem:[#allocation50_spill] sm:$0xff] }
 0x242   : > { %12650 = vst [vmem:[#allocation52_spill] sm:$0xff] %v11190_v54  ;;  %v5175_v2 = vadd.f32 %v5048_v46, %v10711_v63  ;;  %7323 = vmatprep.mubr.msk.f32.mxu1 %vm3354_vm1, %v12652_v35  ;;  %v12653_v10 = vld [vmem:[#allocation6_spill] sm:$0xff]  ;;  %v1920_v46 = vrot.slane %v1125_v43, %v12645_v61  ;;  %v2693_v40 = vcombine.low %v1896_v36, %v1900_v39 }
 0x243   : > { %v5322_v11 = vpop.f32.mrf.mxu0  ;;  %6036 = vmatmul.mubr.f32.gmra.mxu0 %v10086_v47  ;;  %v5050_v8 = vpop.f32.mrf.mxu1  ;;  %v11210_v28 = vrot.slane %v2661_v18, %v12653_v10  ;;  %v11217_v9 = vrot.slane %v2669_v15, %v12653_v10  ;;  %v11220_v63 = vrot.slane %v2677_v0, %v12653_v10  ;;  %v1924_v18 = vrot.slane %v1125_v43, %v12646_v17 }
 0x244   : > { %v11212_v54 = vadd.f32 %v5322_v11, %v5173_v31  ;;  %7378 = vmatprep.mubr.msk.f32.mxu0 %vm3354_vm1, %v10076_v1  ;;  %v2701_v31 = vcombine.low %v1904_v34, %v1908_v41  ;;  %v2709_v14 = vcombine.low %v1912_v12, %v1916_v27  ;;  %v2660_v11 = vrot.slane %v2653_v51, %v12653_v10 }
 0x245   : > { %12654 = vst [vmem:[#allocation53_spill] sm:$0xff] %v11220_v63  ;;  %v5324_v55 = vpop.f32.mrf.mxu0  ;;  %v5053_v8 = vpop.f32.mrf.mxu1  ;;  %5700 = vmatmul.mubr.f32.gmra.mxu1 %v12655_v57  ;;  %v11236_v43 = vrot.slane %v2685_v3, %v12653_v10  ;;  %v5775_v36 = vrot.slane %v11220_v63, 7  ;;  %v11242_v41 = vrot.slane %v2693_v40, %v12653_v10 }
 0x246   : > { %v5176_v24 = vadd.f32 %v5053_v8, %v10720_v38  ;;  %7324 = vmatprep.mubr.msk.f32.mxu1 %vm3354_vm1, %v12649_v22  ;;  %v5769_v55 = vrot.slane %v11210_v28, 7  ;;  %v5772_v38 = vrot.slane %v11217_v9, 7  ;;  %v11248_v12 = vrot.slane %v2709_v14, %v12653_v10 }
 0x247   : > { %v5327_v15 = vpop.f32.mrf.mxu0  ;;  %6041 = vmatmul.mubr.f32.gmra.mxu0 %v10088_v7  ;;  %v5055_v0 = vpop.f32.mrf.mxu1  ;;  %12656 = vst [vmem:[#allocation17_spill] sm:$0xff] %v11236_v43  ;;  %12657 = vst [vmem:[#allocation20_spill] sm:$0xff] %v11242_v41  ;;  %v7330_v8 = vrot.slane %v2660_v11, 9  ;;  %v5777_v14 = vrot.slane %v5775_v36, 2 }
 0x248   : > { %v11231_v61 = vadd.f32 %v5327_v15, %v5174_v42  ;;  %7379 = vmatprep.mubr.msk.f32.mxu0 %vm3354_vm1, %v10084_v49  ;;  %v11245_v42 = vrot.slane %v2701_v31, %v12653_v10  ;;  %12659 = vst [vmem:[#allocation43_spill] sm:$0xff] %v11248_v12  ;;  %v2717_v49 = vcombine.low %v1920_v46, %v1924_v18  ;;  %v5771_v15 = vrot.slane %v5769_v55, 2 }
 0x249   : > { %v5329_v39 = vpop.f32.mrf.mxu0  ;;  %v5058_v34 = vpop.f32.mrf.mxu1  ;;  %5705 = vmatmul.mubr.f32.gmra.mxu1 %v12651_v19  ;;  %v5774_v31 = vrot.slane %v5772_v38, 2  ;;  %v5778_v46 = vrot.slane %v11236_v43, 7 }
 0x24a   : > { %12658 = vst [vmem:[#allocation34_spill] sm:$0xff] %v11245_v42  ;;  %v5177_v3 = vadd.f32 %v5058_v34, %v10729_v4  ;;  %7325 = vmatprep.mubr.msk.f32.mxu1 %vm3354_vm1, %v12652_v35  ;;  %v11261_v0 = vrot.slane %v2717_v49, %v12653_v10  ;;  %v5784_v11 = vrot.slane %v11245_v42, 7  ;;  %v11274_v49 = vsel %vm8984_vm8, %v5771_v15, %v5772_v38  ;;  %v12664_v42 = vld [vmem:[#allocation76_spill] sm:$0xff] }
 0x24b   : > { %v5332_v27 = vpop.f32.mrf.mxu0  ;;  %6046 = vmatmul.mubr.f32.gmra.mxu0 %v10086_v47  ;;  %v5060_v51 = vpop.f32.mrf.mxu1  ;;  %v5781_v47 = vrot.slane %v11242_v41, 7 }
 0x24c   : > { %v11254_v40 = vadd.f32 %v5332_v27, %v5175_v2  ;;  %7380 = vmatprep.mubr.msk.f32.mxu0 %vm3354_vm1, %v10076_v1  ;;  %v5787_v2 = vrot.slane %v11248_v12, 7  ;;  %v12660_v1 = vld [vmem:[#allocation60_spill] sm:$0xff]  ;;  %v5786_v15 = vrot.slane %v5784_v11, 2 }
 0x24d   : > { %v5334_v18 = vpop.f32.mrf.mxu0  ;;  %v5063_v4 = vpop.f32.mrf.mxu1  ;;  %5710 = vmatmul.mubr.f32.gmra.mxu1 %v12655_v57  ;;  %v5783_v38 = vrot.slane %v5781_v47, 2 }
 0x24e   : > { %v5178_v39 = vadd.f32 %v5063_v4, %v10738_v25  ;;  %7326 = vmatprep.mubr.msk.f32.mxu1 %vm3354_vm1, %v12660_v1  ;;  %v5770_v18 = vsel %vm8984_vm8, %v7330_v8, %v5769_v55  ;;  %v11282_v25 = vsel %vm8984_vm8, %v5774_v31, %v5775_v36  ;;  %v5780_v4 = vrot.slane %v5778_v46, 2  ;;  %v12663_v8 = vld [vmem:[#allocation61_spill] sm:$0xff] }
 0x24f   : > { %v5337_v34 = vpop.f32.mrf.mxu0  ;;  %6051 = vmatmul.mubr.f32.gmra.mxu0 %v10088_v7  ;;  %v5065_v27 = vpop.f32.mrf.mxu1  ;;  %v11286_v7 = vsel %vm8984_vm8, %v5777_v14, %v5778_v46  ;;  %v5816_v14 = vcombine.low %v5770_v18, %v11274_v49  ;;  %v12668_v18 = vrot.slane %v11261_v0, 7 }
 0x250   : > { %v11276_v41 = vadd.f32 %v5337_v34, %v5176_v24  ;;  %7381 = vmatprep.mubr.msk.f32.mxu0 %vm3354_vm1, %v10238_v26  ;;  %12662 = vst [vmem:[#allocation80_spill] sm:$0xff] %v11286_v7  ;;  %v5789_v24 = vrot.slane %v5787_v2, 2  ;;  %v5817_v63 = vcombine.low %v11282_v25, %v11286_v7 }
 0x251   : > { %v5339_v27 = vpop.f32.mrf.mxu0  ;;  %v5068_v55 = vpop.f32.mrf.mxu1  ;;  %5715 = vmatmul.mubr.f32.gmra.mxu1 %v12663_v8 }
 0x252   : > { %v5179_v12 = vadd.f32 %v5068_v55, %v10747_v20  ;;  %7327 = vmatprep.mubr.msk.f32.mxu1 %vm3354_vm1, %v12664_v42  ;;  %v12665_v27 = vld [vmem:[#allocation73_spill] sm:$0xff]  ;;  %v11304_v55 = vsel %vm8984_vm8, %v5780_v4, %v5781_v47  ;;  %v12670_v4 = vld [vmem:[#allocation74_spill] sm:$0xff] }
 0x253   : > { %v5342_v36 = vpop.f32.mrf.mxu0  ;;  %6056 = vmatmul.mubr.f32.gmra.mxu0 %v10240_v37  ;;  %v5070_v31 = vpop.f32.mrf.mxu1  ;;  %v12666_v20 = vld [vmem:[#allocation77_spill] sm:$0xff] }
 0x254   : > { %v11295_v46 = vadd.f32 %v5342_v36, %v5177_v3  ;;  %7382 = vmatprep.mubr.msk.f32.mxu0 %vm3354_vm1, %v12665_v27  ;;  %v11308_v31 = vsel %vm8984_vm8, %v5783_v38, %v5784_v11  ;;  %v11312_v3 = vsel %vm8984_vm8, %v5786_v15, %v5787_v2  ;;  %v5824_v38 = vrot.slane %v5816_v14, %v12653_v10 }
 0x255   : > { %v5344_v34 = vpop.f32.mrf.mxu0  ;;  %v5073_v43 = vpop.f32.mrf.mxu1  ;;  %5720 = vmatmul.mubr.f32.gmra.mxu1 %v12666_v20  ;;  %12667 = vst [vmem:[#allocation62_spill] sm:$0xff] %v11308_v31  ;;  %v5831_v2 = vrot.slane %v5817_v63, %v12653_v10  ;;  %v5834_v15 = vcombine.low %v11304_v55, %v11308_v31 }
 0x256   : > { %v11318_v34 = vsel %vm8984_vm8, %v5789_v24, %v12668_v18  ;;  %v5180_v36 = vadd.f32 %v5073_v43, %v10759_v53  ;;  %7328 = vmatprep.mubr.msk.f32.mxu1 %vm3354_vm1, %v12660_v1 }
 0x257   : > { %12669 = vst [vmem:[#allocation69_spill] sm:$0xff] %v11318_v34  ;;  %v5347_v47 = vpop.f32.mrf.mxu0  ;;  %6061 = vmatmul.mubr.f32.gmra.mxu0 %v12670_v4  ;;  %v5075_v11 = vpop.f32.mrf.mxu1  ;;  %v5835_v53 = vcombine.low %v11312_v3, %v11318_v34  ;;  %v5833_v14 = vcombine.high %v5824_v38, %v5831_v2 }
 0x258   : > { %v11325_v7 = vadd.f32 %v5347_v47, %v5178_v39  ;;  %7383 = vmatprep.mubr.msk.f32.mxu0 %vm3354_vm1, %v10238_v26  ;;  %v5842_v47 = vrot.slane %v5834_v15, %v12653_v10 }
 0x259   : > { %v5349_v43 = vpop.f32.mrf.mxu0  ;;  %v5078_v24 = vpop.f32.mrf.mxu1  ;;  %5725 = vmatmul.mubr.f32.gmra.mxu1 %v12663_v8  ;;  %v5849_v11 = vrot.slane %v5835_v53, %v12653_v10 }
 0x25a   : > { %v5181_v18 = vadd.f32 %v5078_v24, %v10775_v21  ;;  %7329 = vmatprep.mubr.msk.f32.mxu1 %vm3354_vm1, %v12664_v42  ;;  %v12671_v24 = vld [vmem:[#allocation30_spill] sm:$0xff] }
 0x25b   : > { %v5352_v39 = vpop.f32.mrf.mxu0  ;;  %6066 = vmatmul.mubr.f32.gmra.mxu0 %v10240_v37  ;;  %v5080_v26 = vpop.f32.mrf.mxu1  ;;  %v5851_v15 = vcombine.high %v5842_v47, %v5849_v11 }
 0x25c   : > { %v11339_v63 = vadd.f32 %v5352_v39, %v5179_v12  ;;  %7384 = vmatprep.mubr.msk.f32.mxu0 %vm3354_vm1, %v12665_v27  ;;  %v5832_v12 = vcombine.low %v5824_v38, %v5831_v2  ;;  %v12743_v51 = vld [vmem:[#allocation62_spill] sm:$0xff] }
 0x25d   : > { %v5354_v43 = vpop.f32.mrf.mxu0  ;;  %v5083_v34 = vpop.f32.mrf.mxu1  ;;  %5730 = vmatmul.mubr.f32.gmra.mxu1 %v12666_v20 }
 0x25e   : > { %v5182_v21 = vadd.f32 %v5083_v34, %v10792_v33  ;;  %7411 = vmatprep.mubr.msk.f32.mxu1 %vm3354_vm1, %v12671_v24  ;;  %v12672_v43 = vld [vmem:[#allocation31_spill] sm:$0xff]  ;;  %v12673_v33 = vld [vmem:[#allocation44_spill] sm:$0xff]  ;;  %v5850_v24 = vcombine.low %v5842_v47, %v5849_v11  ;;  %v12676_v11 = vld [vmem:[#allocation58_spill] sm:$0xff] }
 0x25f   : > { %v5357_v37 = vpop.f32.mrf.mxu0  ;;  %6071 = vmatmul.mubr.f32.gmra.mxu0 %v12670_v4  ;;  %v5085_v39 = vpop.f32.mrf.mxu1 }
 0x260   : > { %v11350_v27 = vadd.f32 %v5357_v37, %v5180_v36  ;;  %7385 = vmatprep.mubr.msk.f32.mxu0 %vm3354_vm1, %v5833_v14  ;;  %v12674_v14 = vld [vmem:[#allocation45_spill] sm:$0xff] }
 0x261   : > { %v5359_v53 = vpop.f32.mrf.mxu0  ;;  %v5088_v26 = vpop.f32.mrf.mxu1  ;;  %6252 = vmatmul.mubr.f32.vlgmr.msra.gmra.mxu1 %v12672_v43  ;;  %v12675_v39 = vld [vmem:[#allocation57_spill] sm:$0xff] }
 0x262   : > { %v5183_v31 = vadd.f32 %v5088_v26, %v10809_v52  ;;  %7412 = vmatprep.mubr.msk.f32.mxu1 %vm3354_vm1, %v12673_v33 }
 0x263   : > { %v5362_v34 = vpop.f32.mrf.mxu0  ;;  %6076 = vmatmul.mubr.f32.gmra.mxu0 %v5832_v12  ;;  %v5090_v4 = vpop.f32.mrf.mxu1 }
 0x264   : > { %v11357_v38 = vadd.f32 %v5362_v34, %v5181_v18  ;;  %7386 = vmatprep.mubr.msk.f32.mxu0 %vm3354_vm1, %v5851_v15  ;;  %v12677_v15 = vld [vmem:[#allocation71_spill] sm:$0xff]  ;;  %v12678_v34 = vld [vmem:[#allocation72_spill] sm:$0xff] }
 0x265   : > { %v5364_v36 = vpop.f32.mrf.mxu0  ;;  %v5093_v2 = vpop.f32.mrf.mxu1  ;;  %6257 = vmatmul.mubr.f32.gmra.mxu1 %v12674_v14 }
 0x266   : > { %v5184_v37 = vadd.f32 %v5093_v2, %v10826_v29  ;;  %7413 = vmatprep.mubr.msk.f32.mxu1 %vm3354_vm1, %v12675_v39 }
 0x267   : > { %v5367_v52 = vpop.f32.mrf.mxu0  ;;  %6081 = vmatmul.mubr.f32.gmra.mxu0 %v5850_v24  ;;  %v5095_v53 = vpop.f32.mrf.mxu1 }
 0x268   : > { %v11364_v26 = vadd.f32 %v5367_v52, %v5182_v21  ;;  %7467 = vmatprep.mubr.msk.f32.mxu0 %vm3354_vm1, %v12592_v59  ;;  %v12679_v52 = vld [vmem:[#allocation86_spill] sm:$0xff] }
 0x269   : > { %v5369_v18 = vpop.f32.mrf.mxu0  ;;  %v5098_v47 = vpop.f32.mrf.mxu1  ;;  %6262 = vmatmul.mubr.f32.gmra.mxu1 %v12676_v11 }
 0x26a   : > { %v5185_v12 = vadd.f32 %v5098_v47, %v10843_v48  ;;  %7414 = vmatprep.mubr.msk.f32.mxu1 %vm3354_vm1, %v12677_v15 }
 0x26b   : > { %v5372_v29 = vpop.f32.mrf.mxu0  ;;  %6581 = vmatmul.mubr.f32.vlgmr.msra.gmra.mxu0 %v12594_v23  ;;  %v5100_v43 = vpop.f32.mrf.mxu1 }
 0x26c   : > { %v11373_v33 = vadd.f32 %v5372_v29, %v5183_v31  ;;  %7468 = vmatprep.mubr.msk.f32.mxu0 %vm3354_vm1, %v12595_v56  ;;  %v12681_v29 = vld [vmem:[#allocation93_spill] sm:$0xff] }
 0x26d   : > { %v5374_v21 = vpop.f32.mrf.mxu0  ;;  %v5103_v59 = vpop.f32.mrf.mxu1  ;;  %6267 = vmatmul.mubr.f32.gmra.mxu1 %v12678_v34 }
 0x26e   : > { %v5186_v24 = vadd.f32 %v5103_v59, %v10860_v50  ;;  %7415 = vmatprep.mubr.msk.f32.mxu1 %vm3354_vm1, %v12675_v39 }
 0x26f   : > { %v5377_v48 = vpop.f32.mrf.mxu0  ;;  %6586 = vmatmul.mubr.f32.gmra.mxu0 %v12596_v16  ;;  %v5105_v4 = vpop.f32.mrf.mxu1 }
 0x270   : > { %v11382_v23 = vadd.f32 %v5377_v48, %v5184_v37  ;;  %7469 = vmatprep.mubr.msk.f32.mxu0 %vm3354_vm1, %v12599_v30 }
 0x271   : > { %v5379_v31 = vpop.f32.mrf.mxu0  ;;  %v5108_v56 = vpop.f32.mrf.mxu1  ;;  %6272 = vmatmul.mubr.f32.gmra.mxu1 %v12676_v11 }
 0x272   : > { %v5187_v36 = vadd.f32 %v5108_v56, %v10877_v5  ;;  %7416 = vmatprep.mubr.msk.f32.mxu1 %vm3354_vm1, %v12677_v15  ;;  %v12683_v31 = vld [vmem:[#allocation42_spill] sm:$0xff] }
 0x273   : > { %v5382_v50 = vpop.f32.mrf.mxu0  ;;  %6591 = vmatmul.mubr.f32.gmra.mxu0 %v12600_v62  ;;  %v5110_v2 = vpop.f32.mrf.mxu1 }
 0x274   : > { %v11391_v16 = vadd.f32 %v5382_v50, %v5185_v12  ;;  %7470 = vmatprep.mubr.msk.f32.mxu0 %vm3354_vm1, %v12601_v45  ;;  %v12680_v12 = vld [vmem:[#allocation87_spill] sm:$0xff]  ;;  %v12685_v2 = vld [vmem:[#allocation9_spill] sm:$0xff] }
 0x275   : > { %v5384_v14 = vpop.f32.mrf.mxu0  ;;  %v5113_v37 = vpop.f32.mrf.mxu1  ;;  %6277 = vmatmul.mubr.f32.gmra.mxu1 %v12678_v34  ;;  %v12682_v34 = vld [vmem:[#allocation94_spill] sm:$0xff] }
 0x276   : > { %v5188_v39 = vadd.f32 %v5113_v37, %v10894_v44  ;;  %7417 = vmatprep.mubr.msk.f32.mxu1 %vm3354_vm1, %v12679_v52 }
 0x277   : > { %v5387_v5 = vpop.f32.mrf.mxu0  ;;  %6596 = vmatmul.mubr.f32.gmra.mxu0 %v12602_v13  ;;  %v5115_v53 = vpop.f32.mrf.mxu1 }
 0x278   : > { %v11400_v18 = vadd.f32 %v5387_v5, %v5186_v24  ;;  %7471 = vmatprep.mubr.msk.f32.mxu0 %vm3354_vm1, %v12599_v30  ;;  %v12687_v5 = vld [vmem:[#allocation11_spill] sm:$0xff] }
 0x279   : > { %v5389_v47 = vpop.f32.mrf.mxu0  ;;  %v5118_v11 = vpop.f32.mrf.mxu1  ;;  %6282 = vmatmul.mubr.f32.gmra.mxu1 %v12680_v12 }
 0x27a   : > { %v5189_v15 = vadd.f32 %v5118_v11, %v10911_v32  ;;  %7418 = vmatprep.mubr.msk.f32.mxu1 %vm3354_vm1, %v12681_v29  ;;  %v12688_v47 = vld [vmem:[#allocation5_spill] sm:$0xff] }
 0x27b   : > { %v5392_v44 = vpop.f32.mrf.mxu0  ;;  %6601 = vmatmul.mubr.f32.gmra.mxu0 %v12600_v62  ;;  %v5120_v43 = vpop.f32.mrf.mxu1 }
 0x27c   : > { %v11409_v21 = vadd.f32 %v5392_v44, %v5187_v36  ;;  %7472 = vmatprep.mubr.msk.f32.mxu0 %vm3354_vm1, %v12601_v45  ;;  %v12684_v36 = vld [vmem:[#allocation70_spill] sm:$0xff]  ;;  %v12689_v44 = vld [vmem:[#allocation13_spill] sm:$0xff]  ;;  %v12690_v43 = vld [vmem:[#allocation67_spill] sm:$0xff] }
 0x27d   : > { %v5394_v59 = vpop.f32.mrf.mxu0  ;;  %v5123_v30 = vpop.f32.mrf.mxu1  ;;  %6287 = vmatmul.mubr.f32.gmra.mxu1 %v12682_v34 }
 0x27e   : > { %v5190_v24 = vadd.f32 %v5123_v30, %v10928_v58  ;;  %7419 = vmatprep.mubr.msk.f32.mxu1 %vm3354_vm1, %v12679_v52  ;;  %v12691_v30 = vld [vmem:[#allocation18_spill] sm:$0xff] }
 0x27f   : > { %v5397_v32 = vpop.f32.mrf.mxu0  ;;  %6606 = vmatmul.mubr.f32.gmra.mxu0 %v12602_v13  ;;  %v5125_v48 = vpop.f32.mrf.mxu1 }
 0x280   : > { %v11418_v62 = vadd.f32 %v5397_v32, %v5188_v39  ;;  %7473 = vmatprep.mubr.msk.f32.mxu0 %vm3354_vm1, %v12603_v6  ;;  %v12686_v39 = vld [vmem:[#allocation66_spill] sm:$0xff] }
 0x281   : > { %v5399_v4 = vpop.f32.mrf.mxu0  ;;  %v5128_v45 = vpop.f32.mrf.mxu1  ;;  %6292 = vmatmul.mubr.f32.gmra.mxu1 %v12680_v12 }
 0x282   : > { %v5191_v56 = vadd.f32 %v5128_v45, %v12683_v31  ;;  %7420 = vmatprep.mubr.msk.f32.mxu1 %vm3354_vm1, %v12681_v29  ;;  %v12692_v4 = vld [vmem:[#allocation19_spill] sm:$0xff] }
 0x283   : > { %v5402_v58 = vpop.f32.mrf.mxu0  ;;  %6611 = vmatmul.mubr.f32.gmra.mxu0 %v12684_v36  ;;  %v5130_v50 = vpop.f32.mrf.mxu1 }
 0x284   : > { %v11427_v13 = vadd.f32 %v5402_v58, %v5189_v15  ;;  %7474 = vmatprep.mubr.msk.f32.mxu0 %vm3354_vm1, %v12685_v2 }
 0x285   : > { %v5404_v14 = vpop.f32.mrf.mxu0  ;;  %v5133_v37 = vpop.f32.mrf.mxu1  ;;  %6297 = vmatmul.mubr.f32.gmra.mxu1 %v12682_v34 }
 0x286   : > { %v5192_v52 = vadd.f32 %v5133_v37, %v12686_v39  ;;  %7421 = vmatprep.mubr.msk.f32.mxu1 %vm3354_vm1, %v12687_v5  ;;  %v12694_v14 = vld [vmem:[#allocation54_spill] sm:$0xff]  ;;  %v12695_v39 = vld [vmem:[#allocation8_spill] sm:$0xff] }
 0x287   : > { %v5407_v53 = vpop.f32.mrf.mxu0  ;;  %6616 = vmatmul.mubr.f32.gmra.mxu0 %v12688_v47  ;;  %v5135_v11 = vpop.f32.mrf.mxu1 }
 0x288   : > { %v11436_v12 = vadd.f32 %v5407_v53, %v5190_v24  ;;  %7475 = vmatprep.mubr.msk.f32.mxu0 %vm3354_vm1, %v12603_v6 }
 0x289   : > { %v5409_v15 = vpop.f32.mrf.mxu0  ;;  %v5138_v29 = vpop.f32.mrf.mxu1  ;;  %6302 = vmatmul.mubr.f32.gmra.mxu1 %v12689_v44 }
 0x28a   : > { %v5193_v59 = vadd.f32 %v5138_v29, %v12690_v43  ;;  %7422 = vmatprep.mubr.msk.f32.mxu1 %vm3354_vm1, %v12691_v30  ;;  %v12697_v15 = vld [vmem:[#allocation56_spill] sm:$0xff] }
 0x28b   : > { %v5412_v34 = vpop.f32.mrf.mxu0  ;;  %6621 = vmatmul.mubr.f32.gmra.mxu0 %v12684_v36  ;;  %v5140_v32 = vpop.f32.mrf.mxu1 }
 0x28c   : > { %v11445_v48 = vadd.f32 %v5412_v34, %v5191_v56  ;;  %7476 = vmatprep.mubr.msk.f32.mxu0 %vm3354_vm1, %v12685_v2  ;;  %v12693_v56 = vld [vmem:[#allocation85_spill] sm:$0xff] }
 0x28d   : > { %v5414_v24 = vpop.f32.mrf.mxu0  ;;  %v5143_v6 = vpop.f32.mrf.mxu1  ;;  %6307 = vmatmul.mubr.f32.gmra.mxu1 %v12692_v4 }
 0x28e   : > { %v5194_v45 = vadd.f32 %v5143_v6, %v10996_v60  ;;  %7423 = vmatprep.mubr.msk.f32.mxu1 %vm3354_vm1, %v12687_v5  ;;  %v12700_v6 = vld [vmem:[#allocation28_spill] sm:$0xff] }
 0x28f   : > { %v5417_v31 = vpop.f32.mrf.mxu0  ;;  %6626 = vmatmul.mubr.f32.gmra.mxu0 %v12688_v47  ;;  %v5145_v58 = vpop.f32.mrf.mxu1 }
 0x290   : > { %v11454_v36 = vadd.f32 %v5417_v31, %v5192_v52  ;;  %7477 = vmatprep.mubr.msk.f32.mxu0 %vm3354_vm1, %v12693_v56  ;;  %v12696_v52 = vld [vmem:[#allocation23_spill] sm:$0xff]  ;;  %v12702_v58 = vld [vmem:[#allocation37_spill] sm:$0xff] }
 0x291   : > { %v5419_v50 = vpop.f32.mrf.mxu0  ;;  %v5148_v2 = vpop.f32.mrf.mxu1  ;;  %6312 = vmatmul.mubr.f32.gmra.mxu1 %v12689_v44  ;;  %v12698_v44 = vld [vmem:[#allocation26_spill] sm:$0xff]  ;;  %v12701_v31 = vld [vmem:[#allocation75_spill] sm:$0xff] }
 0x292   : > { %v5195_v37 = vadd.f32 %v5148_v2, %v12694_v14  ;;  %7424 = vmatprep.mubr.msk.f32.mxu1 %vm3354_vm1, %v12691_v30  ;;  %v12699_v30 = vld [vmem:[#allocation24_spill] sm:$0xff] }
 0x293   : > { %v5422_v60 = vpop.f32.mrf.mxu0  ;;  %6631 = vmatmul.mubr.f32.gmra.mxu0 %v12695_v39  ;;  %v5150_v5 = vpop.f32.mrf.mxu1 }
 0x294   : > { %v11463_v53 = vadd.f32 %v5422_v60, %v5193_v59  ;;  %7478 = vmatprep.mubr.msk.f32.mxu0 %vm3354_vm1, %v12696_v52  ;;  %v12703_v60 = vld [vmem:[#allocation39_spill] sm:$0xff]  ;;  %v12704_v5 = vld [vmem:[#allocation84_spill] sm:$0xff] }
 0x295   : > { %v5424_v47 = vpop.f32.mrf.mxu0  ;;  %v5153_v11 = vpop.f32.mrf.mxu1  ;;  %6317 = vmatmul.mubr.f32.gmra.mxu1 %v12692_v4 }
 0x296   : > { %v5196_v29 = vadd.f32 %v5153_v11, %v12697_v15  ;;  %7425 = vmatprep.mubr.msk.f32.mxu1 %vm3354_vm1, %v12698_v44 }
 0x297   : > { %v5427_v43 = vpop.f32.mrf.mxu0  ;;  %6636 = vmatmul.mubr.f32.gmra.mxu0 %v12699_v30  ;;  %v5155_v34 = vpop.f32.mrf.mxu1 }
 0x298   : > { %v11472_v32 = vadd.f32 %v5427_v43, %v5194_v45  ;;  %7479 = vmatprep.mubr.msk.f32.mxu0 %vm3354_vm1, %v12693_v56  ;;  %v12706_v34 = vld [vmem:[#allocation82_spill] sm:$0xff] }
 0x299   : > { %v5429_v59 = vpop.f32.mrf.mxu0  ;;  %v5158_v24 = vpop.f32.mrf.mxu1  ;;  %6322 = vmatmul.mubr.f32.gmra.mxu1 %v12700_v6 }
 0x29a   : > { %v5197_v4 = vadd.f32 %v5158_v24, %v12701_v31  ;;  %7426 = vmatprep.mubr.msk.f32.mxu1 %vm3354_vm1, %v12702_v58 }
 0x29b   : > { %v5432_v50 = vpop.f32.mrf.mxu0  ;;  %6641 = vmatmul.mubr.f32.gmra.mxu0 %v12695_v39  ;;  %v5160_v2 = vpop.f32.mrf.mxu1 }
 0x29c   : > { %v11481_v14 = vadd.f32 %v5432_v50, %v5195_v37  ;;  %7480 = vmatprep.mubr.msk.f32.mxu0 %vm3354_vm1, %v12696_v52  ;;  %v12705_v37 = vld [vmem:[#allocation16_spill] sm:$0xff] }
 0x29d   : > { %v5434_v45 = vpop.f32.mrf.mxu0  ;;  %v5163_v56 = vpop.f32.mrf.mxu1  ;;  %6327 = vmatmul.mubr.f32.gmra.mxu1 %v12703_v60 }
 0x29e   : > { %v5198_v47 = vadd.f32 %v5163_v56, %v12704_v5  ;;  %7427 = vmatprep.mubr.msk.f32.mxu1 %vm3354_vm1, %v12698_v44  ;;  %v12707_v44 = vld [vmem:[#allocation12_spill] sm:$0xff]  ;;  %v12709_v45 = vld [vmem:[#allocation83_spill] sm:$0xff] }
 0x29f   : > { %v5437_v11 = vpop.f32.mrf.mxu0  ;;  %6646 = vmatmul.mubr.f32.gmra.mxu0 %v12699_v30  ;;  %v5165_v15 = vpop.f32.mrf.mxu1  ;;  %v12710_v56 = vld [vmem:[#allocation51_spill] sm:$0xff] }
 0x2a0   : > { %v11490_v39 = vadd.f32 %v5437_v11, %v5196_v29  ;;  %7481 = vmatprep.mubr.msk.f32.mxu0 %vm3354_vm1, %v12705_v37  ;;  %v12708_v29 = vld [vmem:[#allocation36_spill] sm:$0xff] }
 0x2a1   : > { %v5439_v43 = vpop.f32.mrf.mxu0  ;;  %v5576_v52 = vpop.f32.mrf.mxu1  ;;  %6332 = vmatmul.mubr.f32.gmra.mxu1 %v12700_v6 }
 0x2a2   : > { %v5735_v59 = vadd.f32 %v5576_v52, %v12706_v34  ;;  %7428 = vmatprep.mubr.msk.f32.mxu1 %vm3354_vm1, %v12702_v58  ;;  %v12711_v58 = vld [vmem:[#allocation46_spill] sm:$0xff]  ;;  %v12712_v52 = vld [vmem:[#allocation55_spill] sm:$0xff] }
 0x2a3   : > { %v5442_v24 = vpop.f32.mrf.mxu0  ;;  %6651 = vmatmul.mubr.f32.gmra.mxu0 %v12707_v44  ;;  %v5578_v31 = vpop.f32.mrf.mxu1  ;;  %v12713_v34 = vld [vmem:[#allocation22_spill] sm:$0xff] }
 0x2a4   : > { %v11499_v30 = vadd.f32 %v5442_v24, %v5197_v4  ;;  %7482 = vmatprep.mubr.msk.f32.mxu0 %vm3354_vm1, %v12708_v29  ;;  %v12714_v24 = vld [vmem:[#allocation64_spill] sm:$0xff] }
 0x2a5   : > { %v5444_v50 = vpop.f32.mrf.mxu0  ;;  %v5581_v2 = vpop.f32.mrf.mxu1  ;;  %6337 = vmatmul.mubr.f32.gmra.mxu1 %v12703_v60 }
 0x2a6   : > { %v5736_v6 = vadd.f32 %v5581_v2, %v12709_v45  ;;  %7429 = vmatprep.mubr.msk.f32.mxu1 %vm3354_vm1, %v12710_v56  ;;  %v12715_v45 = vld [vmem:[#allocation65_spill] sm:$0xff] }
 0x2a7   : > { %v5447_v5 = vpop.f32.mrf.mxu0  ;;  %6656 = vmatmul.mubr.f32.gmra.mxu0 %v12711_v58  ;;  %v5583_v11 = vpop.f32.mrf.mxu1 }
 0x2a8   : > { %v11508_v15 = vadd.f32 %v5447_v5, %v5198_v47  ;;  %7483 = vmatprep.mubr.msk.f32.mxu0 %vm3354_vm1, %v12705_v37  ;;  %v12716_v5 = vld [vmem:[#allocation32_spill] sm:$0xff] }
 0x2a9   : > { %v5449_v4 = vpop.f32.mrf.mxu0  ;;  %v5586_v43 = vpop.f32.mrf.mxu1  ;;  %6342 = vmatmul.mubr.f32.gmra.mxu1 %v12712_v52 }
 0x2aa   : > { %v5737_v60 = vadd.f32 %v5586_v43, %v12713_v34  ;;  %7430 = vmatprep.mubr.msk.f32.mxu1 %vm3354_vm1, %v12714_v24 }
 0x2ab   : > { %v5927_v31 = vpop.f32.mrf.mxu0  ;;  %6661 = vmatmul.mubr.f32.gmra.mxu0 %v12707_v44  ;;  %v5588_v50 = vpop.f32.mrf.mxu1 }
 0x2ac   : > { %v11517_v2 = vadd.f32 %v5927_v31, %v5735_v59  ;;  %7484 = vmatprep.mubr.msk.f32.mxu0 %vm3354_vm1, %v12708_v29  ;;  %v12718_v59 = vld [vmem:[#allocation33_spill] sm:$0xff]  ;;  %v12719_v31 = vld [vmem:[#allocation27_spill] sm:$0xff] }
 0x2ad   : > { %v5929_v47 = vpop.f32.mrf.mxu0  ;;  %v5591_v37 = vpop.f32.mrf.mxu1  ;;  %6347 = vmatmul.mubr.f32.gmra.mxu1 %v12715_v45 }
 0x2ae   : > { %v5738_v11 = vadd.f32 %v5591_v37, %v12716_v5  ;;  %7431 = vmatprep.mubr.msk.f32.mxu1 %vm3354_vm1, %v12710_v56  ;;  %v12720_v56 = vld [vmem:[#allocation35_spill] sm:$0xff] }
 0x2af   : > { %v5932_v4 = vpop.f32.mrf.mxu0  ;;  %6666 = vmatmul.mubr.f32.gmra.mxu0 %v12711_v58  ;;  %v5593_v43 = vpop.f32.mrf.mxu1 }
 0x2b0   : > { %v11526_v44 = vadd.f32 %v5932_v4, %v5736_v6  ;;  %7485 = vmatprep.mubr.msk.f32.mxu0 %vm3354_vm1, %v12718_v59  ;;  %v12722_v6 = vld [vmem:[#allocation48_spill] sm:$0xff] }
 0x2b1   : > { %v5934_v34 = vpop.f32.mrf.mxu0  ;;  %v5596_v29 = vpop.f32.mrf.mxu1  ;;  %6352 = vmatmul.mubr.f32.gmra.mxu1 %v12712_v52  ;;  %v12723_v43 = vld [vmem:[#allocation52_spill] sm:$0xff] }
 0x2b2   : > { %12717 = vst [vmem:[#allocation88_spill] sm:$0xff] %v11526_v44  ;;  %v5739_v50 = vadd.f32 %v5596_v29, %v12719_v31  ;;  %7432 = vmatprep.mubr.msk.f32.mxu1 %vm3354_vm1, %v12714_v24  ;;  %v12724_v34 = vld [vmem:[#allocation78_spill] sm:$0xff]  ;;  %v12725_v24 = vld [vmem:[#allocation59_spill] sm:$0xff] }
 0x2b3   : > { %v5937_v47 = vpop.f32.mrf.mxu0  ;;  %6671 = vmatmul.mubr.f32.gmra.mxu0 %v12720_v56  ;;  %v5598_v37 = vpop.f32.mrf.mxu1 }
 0x2b4   : > { %v11535_v58 = vadd.f32 %v5937_v47, %v5737_v60  ;;  %7486 = vmatprep.mubr.msk.f32.mxu0 %vm3354_vm1, %v12722_v6  ;;  %v12726_v37 = vld [vmem:[#allocation79_spill] sm:$0xff] }
 0x2b5   : > { %v5939_v5 = vpop.f32.mrf.mxu0  ;;  %v5601_v4 = vpop.f32.mrf.mxu1  ;;  %6357 = vmatmul.mubr.f32.gmra.mxu1 %v12715_v45 }
 0x2b6   : > { %12721 = vst [vmem:[#allocation68_spill] sm:$0xff] %v11535_v58  ;;  %v5740_v52 = vadd.f32 %v5601_v4, %v12723_v43  ;;  %7433 = vmatprep.mubr.msk.f32.mxu1 %vm3354_vm1, %v12724_v34  ;;  %v12727_v5 = vld [vmem:[#allocation90_spill] sm:$0xff] }
 0x2b7   : > { %v5942_v29 = vpop.f32.mrf.mxu0  ;;  %6676 = vmatmul.mubr.f32.gmra.mxu0 %v12725_v24  ;;  %v5603_v31 = vpop.f32.mrf.mxu1 }
 0x2b8   : > { %v11544_v44 = vadd.f32 %v5942_v29, %v5738_v11  ;;  %7487 = vmatprep.mubr.msk.f32.mxu0 %vm3354_vm1, %v12718_v59  ;;  %v12728_v29 = vld [vmem:[#allocation91_spill] sm:$0xff]  ;;  %v12729_v31 = vld [vmem:[#allocation29_spill] sm:$0xff] }
 0x2b9   : > { %v5944_v60 = vpop.f32.mrf.mxu0  ;;  %v5606_v47 = vpop.f32.mrf.mxu1  ;;  %6362 = vmatmul.mubr.f32.gmra.mxu1 %v12726_v37 }
 0x2ba   : > { %v5741_v45 = vadd.f32 %v5606_v47, %v11212_v54  ;;  %7434 = vmatprep.mubr.msk.f32.mxu1 %vm3354_vm1, %v12727_v5  ;;  %v1118_v60 = vcombine.high %v12729_v31, %v12729_v31 }
 0x2bb   : > { %v5947_v4 = vpop.f32.mrf.mxu0  ;;  %6681 = vmatmul.mubr.f32.gmra.mxu0 %v12720_v56  ;;  %v5608_v43 = vpop.f32.mrf.mxu1 }
 0x2bc   : > { %v11553_v58 = vadd.f32 %v5947_v4, %v5739_v50  ;;  %7488 = vmatprep.mubr.msk.f32.mxu0 %vm3354_vm1, %v12722_v6  ;;  %v12730_v43 = vld [vmem:[#allocation2_spill] sm:$0xff] }
 0x2bd   : > { %v5949_v11 = vpop.f32.mrf.mxu0  ;;  %v5611_v59 = vpop.f32.mrf.mxu1  ;;  %6367 = vmatmul.mubr.f32.gmra.mxu1 %v12728_v29 }
 0x2be   : > { %v5742_v54 = vadd.f32 %v5611_v59, %v11231_v61  ;;  %7435 = vmatprep.mubr.msk.f32.mxu1 %vm3354_vm1, %v12724_v34  ;;  %v1132_v11 = vrot.slane %v1118_v60, %v12730_v43  ;;  %v12733_v43 = vld [vmem:[#allocation97_spill] sm:$0xff] }
 0x2bf   : > { %v5952_v47 = vpop.f32.mrf.mxu0  ;;  %6686 = vmatmul.mubr.f32.gmra.mxu0 %v12725_v24  ;;  %v5613_v50 = vpop.f32.mrf.mxu1 }
 0x2c0   : > { %v11564_v56 = vadd.f32 %v5952_v47, %v5740_v52  ;;  %7489 = vmatprep.mubr.msk.f32.mxu0 %vm3354_vm1, %v12649_v22 }
 0x2c1   : > { %v5954_v6 = vpop.f32.mrf.mxu0  ;;  %v5616_v4 = vpop.f32.mrf.mxu1  ;;  %6372 = vmatmul.mubr.f32.gmra.mxu1 %v12726_v37  ;;  %v12731_v37 = vld [vmem:[#allocation3_spill] sm:$0xff] }
 0x2c2   : > { %v5743_v61 = vadd.f32 %v5616_v4, %v11254_v40  ;;  %7436 = vmatprep.mubr.msk.f32.mxu1 %vm3354_vm1, %v12727_v5  ;;  %v1928_v60 = vrot.slane %v1132_v11, %v12731_v37  ;;  %v1932_v40 = vrot.slane %v1132_v11, %v12646_v17  ;;  %v12732_v5 = vld [vmem:[#allocation96_spill] sm:$0xff]  ;;  %v6142_v17 = vcombine.low %v11210_v28, %v11217_v9  ;;  %v12737_v9 = vld [vmem:[#allocation99_spill] sm:$0xff] }
 0x2c3   : > { %v5957_v34 = vpop.f32.mrf.mxu0  ;;  %6691 = vmatmul.mubr.f32.gmra.mxu0 %v12651_v19  ;;  %v5618_v24 = vpop.f32.mrf.mxu1 }
 0x2c4   : > { %v11574_v52 = vadd.f32 %v5957_v34, %v5741_v45  ;;  %7490 = vmatprep.mubr.msk.f32.mxu0 %vm3354_vm1, %v12652_v35  ;;  %v12734_v34 = vld [vmem:[#allocation98_spill] sm:$0xff]  ;;  %v12735_v24 = vld [vmem:[#allocation17_spill] sm:$0xff] }
 0x2c5   : > { %v5959_v59 = vpop.f32.mrf.mxu0  ;;  %v5621_v31 = vpop.f32.mrf.mxu1  ;;  %6377 = vmatmul.mubr.f32.gmra.mxu1 %v12728_v29 }
 0x2c6   : > { %v5744_v47 = vadd.f32 %v5621_v31, %v11276_v41  ;;  %7437 = vmatprep.mubr.msk.f32.mxu1 %vm3354_vm1, %v12732_v5  ;;  %v2725_v41 = vcombine.low %v1928_v60, %v1932_v40  ;;  %v12736_v59 = vld [vmem:[#allocation53_spill] sm:$0xff] }
 0x2c7   : > { %v5962_v50 = vpop.f32.mrf.mxu0  ;;  %6696 = vmatmul.mubr.f32.gmra.mxu0 %v12655_v57  ;;  %v5623_v45 = vpop.f32.mrf.mxu1 }
 0x2c8   : > { %v11585_v6 = vadd.f32 %v5962_v50, %v5742_v54  ;;  %7491 = vmatprep.mubr.msk.f32.mxu0 %vm3354_vm1, %v12649_v22  ;;  %v6143_v54 = vcombine.low %v12736_v59, %v12735_v24  ;;  %v2732_v60 = vrot.slane %v2725_v41, %v12653_v10  ;;  %v12739_v45 = vld [vmem:[#allocation20_spill] sm:$0xff] }
 0x2c9   : > { %v5964_v4 = vpop.f32.mrf.mxu0  ;;  %v5626_v29 = vpop.f32.mrf.mxu1  ;;  %6382 = vmatmul.mubr.f32.gmra.mxu1 %v12733_v43 }
 0x2ca   : > { %v5745_v11 = vadd.f32 %v5626_v29, %v11295_v46  ;;  %7438 = vmatprep.mubr.msk.f32.mxu1 %vm3354_vm1, %v12734_v34  ;;  %v6150_v46 = vrot.slane %v6142_v17, %v12653_v10 }
 0x2cb   : > { %v5967_v31 = vpop.f32.mrf.mxu0  ;;  %6701 = vmatmul.mubr.f32.gmra.mxu0 %v12651_v19  ;;  %v5628_v22 = vpop.f32.mrf.mxu1  ;;  %v6157_v19 = vrot.slane %v6143_v54, %v12653_v10 }
 0x2cc   : > { %v11598_v37 = vadd.f32 %v5967_v31, %v5743_v61  ;;  %7492 = vmatprep.mubr.msk.f32.mxu0 %vm3354_vm1, %v12652_v35  ;;  %v12738_v61 = vld [vmem:[#allocation34_spill] sm:$0xff]  ;;  %v12740_v35 = vld [vmem:[#allocation43_spill] sm:$0xff]  ;;  %v6445_v31 = vrot.slane %v2732_v60, 7 }
 0x2cd   : > { %v5969_v50 = vpop.f32.mrf.mxu0  ;;  %v5631_v28 = vpop.f32.mrf.mxu1  ;;  %6387 = vmatmul.mubr.f32.gmra.mxu1 %v12737_v9  ;;  %v6160_v4 = vcombine.low %v12739_v45, %v12738_v61  ;;  %v6161_v29 = vcombine.low %v12740_v35, %v11261_v0 }
 0x2ce   : > { %v5746_v40 = vadd.f32 %v5631_v28, %v11325_v7  ;;  %7439 = vmatprep.mubr.msk.f32.mxu1 %vm3354_vm1, %v12732_v5  ;;  %v12741_v5 = vrot.slane %v11261_v0, 7 }
 0x2cf   : > { %v5972_v24 = vpop.f32.mrf.mxu0  ;;  %6706 = vmatmul.mubr.f32.gmra.mxu0 %v12655_v57  ;;  %v5633_v59 = vpop.f32.mrf.mxu1  ;;  %v6159_v57 = vcombine.high %v6150_v46, %v6157_v19  ;;  %v6175_v50 = vrot.slane %v6161_v29, %v12653_v10 }
 0x2d0   : > { %v11614_v17 = vadd.f32 %v5972_v24, %v5744_v47  ;;  %7493 = vmatprep.mubr.msk.f32.mxu0 %vm3354_vm1, %v12660_v1  ;;  %v6444_v54 = vrot.slane %v12741_v5, 2  ;;  %v6168_v47 = vrot.slane %v6160_v4, %v12653_v10  ;;  %v6158_v4 = vcombine.low %v6150_v46, %v6157_v19 }
 0x2d1   : > { %v5974_v7 = vpop.f32.mrf.mxu0  ;;  %v5636_v41 = vpop.f32.mrf.mxu1  ;;  %6392 = vmatmul.mubr.f32.gmra.mxu1 %v12733_v43  ;;  %v6471_v43 = vcombine.low %v11274_v49, %v11282_v25  ;;  %v6489_v46 = vcombine.low %v12743_v51, %v11312_v3 }
 0x2d2   : > { %v5747_v22 = vadd.f32 %v5636_v41, %v11339_v63  ;;  %7440 = vmatprep.mubr.msk.f32.mxu1 %vm3354_vm1, %v12734_v34  ;;  %v12742_v63 = vld [vmem:[#allocation80_spill] sm:$0xff]  ;;  %v6446_v35 = vsel %vm8984_vm8, %v6444_v54, %v6445_v31  ;;  %v6177_v49 = vcombine.high %v6168_v47, %v6175_v50  ;;  %v6176_v41 = vcombine.low %v6168_v47, %v6175_v50 }
 0x2d3   : > { %v5977_v28 = vpop.f32.mrf.mxu0  ;;  %6711 = vmatmul.mubr.f32.gmra.mxu0 %v12663_v8  ;;  %v5638_v61 = vpop.f32.mrf.mxu1  ;;  %v6472_v34 = vcombine.low %v12742_v63, %v11304_v55  ;;  %v6479_v24 = vrot.slane %v6471_v43, %v12653_v10  ;;  %v6497_v31 = vrot.slane %v6489_v46, %v12653_v10 }
 0x2d4   : > { %v11629_v0 = vadd.f32 %v5977_v28, %v5745_v11  ;;  %7494 = vmatprep.mubr.msk.f32.mxu0 %vm3354_vm1, %v12664_v42 }
 0x2d5   : > { %v5979_v60 = vpop.f32.mrf.mxu0  ;;  %v5641_v45 = vpop.f32.mrf.mxu1  ;;  %6397 = vmatmul.mubr.f32.gmra.mxu1 %v12737_v9  ;;  %v6486_v9 = vrot.slane %v6472_v34, %v12653_v10 }
 0x2d6   : > { %v5748_v29 = vadd.f32 %v5641_v45, %v11350_v27  ;;  %7441 = vmatprep.mubr.msk.f32.mxu1 %vm3354_vm1, %v6159_v57  ;;  %v12744_v27 = vld [vmem:[#allocation69_spill] sm:$0xff] }
 0x2d7   : > { %v5982_v25 = vpop.f32.mrf.mxu0  ;;  %6716 = vmatmul.mubr.f32.gmra.mxu0 %v12666_v20  ;;  %v5643_v11 = vpop.f32.mrf.mxu1  ;;  %v6490_v19 = vcombine.low %v12744_v27, %v6446_v35  ;;  %v6488_v3 = vcombine.high %v6479_v24, %v6486_v9 }
 0x2d8   : > { %v11642_v55 = vadd.f32 %v5982_v25, %v5746_v40  ;;  %7495 = vmatprep.mubr.msk.f32.mxu0 %vm3354_vm1, %v12660_v1 }
 0x2d9   : > { %v5984_v59 = vpop.f32.mrf.mxu0  ;;  %v5646_v7 = vpop.f32.mrf.mxu1  ;;  %6402 = vmatmul.mubr.f32.gmra.mxu1 %v6158_v4  ;;  %v6504_v57 = vrot.slane %v6490_v19, %v12653_v10 }
 0x2da   : > { %v5749_v5 = vadd.f32 %v5646_v7, %v11357_v38  ;;  %7442 = vmatprep.mubr.msk.f32.mxu1 %vm3354_vm1, %v6177_v49 }
 0x2db   : > { %v5987_v40 = vpop.f32.mrf.mxu0  ;;  %6721 = vmatmul.mubr.f32.gmra.mxu0 %v12663_v8  ;;  %v5648_v54 = vpop.f32.mrf.mxu1  ;;  %v6487_v8 = vcombine.low %v6479_v24, %v6486_v9  ;;  %v6505_v60 = vcombine.low %v6497_v31, %v6504_v57 }
 0x2dc   : > { %v11653_v1 = vadd.f32 %v5987_v40, %v5747_v22  ;;  %7496 = vmatprep.mubr.msk.f32.mxu0 %vm3354_vm1, %v12664_v42  ;;  %v6506_v42 = vcombine.high %v6497_v31, %v6504_v57 }
 0x2dd   : > { %v5989_v28 = vpop.f32.mrf.mxu0  ;;  %v5651_v47 = vpop.f32.mrf.mxu1  ;;  %6407 = vmatmul.mubr.f32.gmra.mxu1 %v6176_v41 }
 0x2de   : > { %v5750_v38 = vadd.f32 %v5651_v47, %v11364_v26 }
 0x2df   : > { %v5992_v50 = vpop.f32.mrf.mxu0  ;;  %6726 = vmatmul.mubr.f32.gmra.mxu0 %v12666_v20  ;;  %v5653_v61 = vpop.f32.mrf.mxu1 }
 0x2e0   : > { %v11661_v22 = vadd.f32 %v5992_v50, %v5748_v29  ;;  %7497 = vmatprep.mubr.msk.f32.mxu0 %vm3354_vm1, %v6488_v3 }
 0x2e1   : > { %v5994_v43 = vpop.f32.mrf.mxu0  ;;  %v5656_v63 = vpop.f32.mrf.mxu1 }
 0x2e2   : > { %v5751_v34 = vadd.f32 %v5656_v63, %v11373_v33 }
 0x2e3   : > { %v5997_v10 = vpop.f32.mrf.mxu0  ;;  %6731 = vmatmul.mubr.f32.gmra.mxu0 %v6487_v8  ;;  %v5658_v45 = vpop.f32.mrf.mxu1 }
 0x2e4   : > { %v11665_v4 = vadd.f32 %v5997_v10, %v5749_v5  ;;  %7498 = vmatprep.mubr.msk.f32.mxu0 %vm3354_vm1, %v6506_v42 }
 0x2e5   : > { %v5999_v20 = vpop.f32.mrf.mxu0  ;;  %v5661_v26 = vpop.f32.mrf.mxu1 }
 0x2e6   : > { %v5752_v35 = vadd.f32 %v5661_v26, %v11382_v23 }
 0x2e7   : > { %v6002_v29 = vpop.f32.mrf.mxu0  ;;  %6736 = vmatmul.mubr.f32.gmra.mxu0 %v6505_v60  ;;  %v5663_v49 = vpop.f32.mrf.mxu1 }
 0x2e8   : > { %v11669_v25 = vadd.f32 %v6002_v29, %v5750_v38 }
 0x2e9   : > { %v6004_v11 = vpop.f32.mrf.mxu0  ;;  %v5666_v24 = vpop.f32.mrf.mxu1 }
 0x2ea   : > { %v5753_v33 = vadd.f32 %v5666_v24, %v11391_v16 }
 0x2eb   : > { %v6007_v9 = vpop.f32.mrf.mxu0  ;;  %v5668_v51 = vpop.f32.mrf.mxu1 }
 0x2ec   : > { %v11672_v46 = vadd.f32 %v6007_v9, %v5751_v34 }
 0x2ed   : > { %v6009_v27 = vpop.f32.mrf.mxu0  ;;  %v5671_v19 = vpop.f32.mrf.mxu1 }
 0x2ee   : > { %v5754_v59 = vadd.f32 %v5671_v19, %v11400_v18 }
 0x2ef   : > { %v6012_v7 = vpop.f32.mrf.mxu0  ;;  %v5673_v41 = vpop.f32.mrf.mxu1 }
 0x2f0   : > { %v11675_v23 = vadd.f32 %v6012_v7, %v5752_v35 }
 0x2f1   : > { %v6014_v5 = vpop.f32.mrf.mxu0  ;;  %v5676_v40 = vpop.f32.mrf.mxu1 }
 0x2f2   : > { %v5755_v54 = vadd.f32 %v5676_v40, %v11409_v21 }
 0x2f3   : > { %v6017_v3 = vpop.f32.mrf.mxu0  ;;  %v5678_v31 = vpop.f32.mrf.mxu1 }
 0x2f4   : > { %v11678_v57 = vadd.f32 %v6017_v3, %v5753_v33 }
 0x2f5   : > { %v6019_v16 = vpop.f32.mrf.mxu0  ;;  %v5681_v28 = vpop.f32.mrf.mxu1 }
 0x2f6   : > { %v5756_v47 = vadd.f32 %v5681_v28, %v11418_v62 }
 0x2f7   : > { %v6022_v38 = vpop.f32.mrf.mxu0  ;;  %v5683_v50 = vpop.f32.mrf.mxu1 }
 0x2f8   : > { %v11681_v8 = vadd.f32 %v6022_v38, %v5754_v59 }
 0x2f9   : > { %v6024_v18 = vpop.f32.mrf.mxu0  ;;  %v5686_v61 = vpop.f32.mrf.mxu1 }
 0x2fa   : > { %v5757_v42 = vadd.f32 %v5686_v61, %v11427_v13 }
 0x2fb   : > { %v6027_v43 = vpop.f32.mrf.mxu0  ;;  %v5688_v63 = vpop.f32.mrf.mxu1 }
 0x2fc   : > { %v11684_v34 = vadd.f32 %v6027_v43, %v5755_v54 }
 0x2fd   : > { %v6029_v21 = vpop.f32.mrf.mxu0  ;;  %v5691_v10 = vpop.f32.mrf.mxu1 }
 0x2fe   : > { %v5758_v60 = vadd.f32 %v5691_v10, %v11436_v12 }
 0x2ff   : > { %v6032_v45 = vpop.f32.mrf.mxu0  ;;  %v5693_v20 = vpop.f32.mrf.mxu1 }
 0x300   : > { %v11687_v26 = vadd.f32 %v6032_v45, %v5756_v47 }
 0x301   : > { %v6034_v62 = vpop.f32.mrf.mxu0  ;;  %v5696_v35 = vpop.f32.mrf.mxu1 }
 0x302   : > { %v5759_v29 = vadd.f32 %v5696_v35, %v11445_v48 }
 0x303   : > { %v6037_v49 = vpop.f32.mrf.mxu0  ;;  %v5698_v11 = vpop.f32.mrf.mxu1 }
 0x304   : > { %v11690_v24 = vadd.f32 %v6037_v49, %v5757_v42 }
 0x305   : > { %v6039_v13 = vpop.f32.mrf.mxu0  ;;  %v5701_v33 = vpop.f32.mrf.mxu1 }
 0x306   : > { %v5760_v9 = vadd.f32 %v5701_v33, %v11454_v36 }
 0x307   : > { %v6042_v51 = vpop.f32.mrf.mxu0  ;;  %v5703_v27 = vpop.f32.mrf.mxu1 }
 0x308   : > { %v11693_v19 = vadd.f32 %v6042_v51, %v5758_v60 }
 0x309   : > { %v6044_v12 = vpop.f32.mrf.mxu0  ;;  %v5706_v59 = vpop.f32.mrf.mxu1 }
 0x30a   : > { %v5761_v7 = vadd.f32 %v5706_v59, %v11463_v53 }
 0x30b   : > { %v6047_v41 = vpop.f32.mrf.mxu0  ;;  %v5708_v5 = vpop.f32.mrf.mxu1 }
 0x30c   : > { %v11696_v40 = vadd.f32 %v6047_v41, %v5759_v29 }
 0x30d   : > { %v6049_v48 = vpop.f32.mrf.mxu0  ;;  %v5711_v54 = vpop.f32.mrf.mxu1 }
 0x30e   : > { %v5762_v3 = vadd.f32 %v5711_v54, %v11472_v32 }
 0x30f   : > { %v6052_v31 = vpop.f32.mrf.mxu0  ;;  %v5713_v16 = vpop.f32.mrf.mxu1 }
 0x310   : > { %v11699_v28 = vadd.f32 %v6052_v31, %v5760_v9  ;;  %v11721_v31 = vld [vmem:[%s11802_s3] ss:$0 sm:$0xff] }
 0x311   : > { %v6054_v36 = vpop.f32.mrf.mxu0  ;;  %v5716_v47 = vpop.f32.mrf.mxu1 }
 0x312   : > { %v5763_v38 = vadd.f32 %v5716_v47, %v11481_v14  ;;  %v12745_v47 = vld [vmem:[#allocation88_spill] sm:$0xff] }
 0x313   : > { %v6057_v50 = vpop.f32.mrf.mxu0  ;;  %v5718_v18 = vpop.f32.mrf.mxu1 }
 0x314   : > { %v11702_v61 = vadd.f32 %v6057_v50, %v5761_v7 }
 0x315   : > { %v6059_v53 = vpop.f32.mrf.mxu0  ;;  %v5721_v42 = vpop.f32.mrf.mxu1 }
 0x316   : > { %v5764_v43 = vadd.f32 %v5721_v42, %v11490_v39 }
 0x317   : > { %v6062_v63 = vpop.f32.mrf.mxu0  ;;  %v5723_v21 = vpop.f32.mrf.mxu1 }
 0x318   : > { %v11705_v10 = vadd.f32 %v6062_v63, %v5762_v3 }
 0x319   : > { %v6064_v32 = vpop.f32.mrf.mxu0  ;;  %v5726_v60 = vpop.f32.mrf.mxu1 }
 0x31a   : > { %v5765_v45 = vadd.f32 %v5726_v60, %v11499_v30 }
 0x31b   : > { %v6067_v20 = vpop.f32.mrf.mxu0  ;;  %v5728_v62 = vpop.f32.mrf.mxu1 }
 0x31c   : > { %v11708_v35 = vadd.f32 %v6067_v20, %v5763_v38 }
 0x31d   : > { %v6069_v14 = vpop.f32.mrf.mxu0  ;;  %v5731_v29 = vpop.f32.mrf.mxu1 }
 0x31e   : > { %v5766_v49 = vadd.f32 %v5731_v29, %v11508_v15 }
 0x31f   : > { %v6072_v11 = vpop.f32.mrf.mxu0  ;;  %v5733_v13 = vpop.f32.mrf.mxu1 }
 0x320   : > { %v11711_v33 = vadd.f32 %v6072_v11, %v5764_v43 }
 0x321   : > { %v6074_v39 = vpop.f32.mrf.mxu0  ;;  %v6253_v9 = vpop.f32.mrf.mxu1 }
 0x322   : > { %v6412_v48 = vadd.f32 %v6253_v9, %v11517_v2  ;;  %v12746_v2 = vld [vmem:[#allocation68_spill] sm:$0xff] }
 0x323   : > { %v6077_v51 = vpop.f32.mrf.mxu0  ;;  %v6255_v27 = vpop.f32.mrf.mxu1 }
 0x324   : > { %v11713_v12 = vadd.f32 %v6077_v51, %v5765_v45 }
 0x325   : > { %v6079_v59 = vpop.f32.mrf.mxu0  ;;  %v6258_v30 = vpop.f32.mrf.mxu1 }
 0x326   : > { %v6413_v38 = vadd.f32 %v6258_v30, %v12745_v47 }
 0x327   : > { %v6082_v7 = vpop.f32.mrf.mxu0  ;;  %v6260_v41 = vpop.f32.mrf.mxu1 }
 0x328   : > { %v11715_v5 = vadd.f32 %v6082_v7, %v5766_v49 }
 0x329   : > { %v6084_v54 = vpop.f32.mrf.mxu0  ;;  %v6263_v15 = vpop.f32.mrf.mxu1 }
 0x32a   : > { %v6414_v21 = vadd.f32 %v6263_v15, %v12746_v2 }
 0x32b   : > { %v6582_v3 = vpop.f32.mrf.mxu0  ;;  %v6265_v16 = vpop.f32.mrf.mxu1 }
 0x32c   : > { %v6741_v36 = vadd.f32 %v6582_v3, %v6412_v48 }
 0x32d   : > { %v6584_v50 = vpop.f32.mrf.mxu0  ;;  %v6268_v18 = vpop.f32.mrf.mxu1 }
 0x32e   : > { %v6780_v53 = vadd.f32 %v11721_v31, %v6741_v36  ;;  %v6415_v29 = vadd.f32 %v6268_v18, %v11544_v44 }
 0x32f   : > { %v6587_v42 = vpop.f32.mrf.mxu0  ;;  %v6270_v43 = vpop.f32.mrf.mxu1 }
 0x330   : > { %v6742_v63 = vadd.f32 %v6587_v42, %v6413_v38  ;;  %6812 = vxpose.xlu0.b32.start [1/16] (narrow) %v6780_v53, 8 }
 0x331   : > { %v6589_v32 = vpop.f32.mrf.mxu0  ;;  %v6273_v60 = vpop.f32.mrf.mxu1 }
 0x332   : > { %v6781_v45 = vadd.f32 %v11721_v31, %v6742_v63  ;;  %v6416_v27 = vadd.f32 %v6273_v60, %v11553_v58 }
 0x333   : > { %v6592_v20 = vpop.f32.mrf.mxu0  ;;  %v6275_v62 = vpop.f32.mrf.mxu1 }
 0x334   : > { %v6743_v14 = vadd.f32 %v6592_v20, %v6414_v21  ;;  %6813 = vxpose.xlu0.b32.cont [2/16] (narrow) %v6781_v45, 8 }
 0x335   : > { %v6594_v49 = vpop.f32.mrf.mxu0  ;;  %v6278_v11 = vpop.f32.mrf.mxu1 }
 0x336   : > { %v6782_v13 = vadd.f32 %v11721_v31, %v6743_v14  ;;  %v6417_v44 = vadd.f32 %v6278_v11, %v11564_v56 }
 0x337   : > { %v6597_v39 = vpop.f32.mrf.mxu0  ;;  %v6280_v9 = vpop.f32.mrf.mxu1 }
 0x338   : > { %v6744_v51 = vadd.f32 %v6597_v39, %v6415_v29  ;;  %6814 = vxpose.xlu0.b32.cont [3/16] (narrow) %v6782_v13, 8 }
 0x339   : > { %v6599_v59 = vpop.f32.mrf.mxu0  ;;  %v6283_v30 = vpop.f32.mrf.mxu1 }
 0x33a   : > { %v6783_v7 = vadd.f32 %v11721_v31, %v6744_v51  ;;  %v6418_v58 = vadd.f32 %v6283_v30, %v11574_v52 }
 0x33b   : > { %v6602_v41 = vpop.f32.mrf.mxu0  ;;  %v6285_v48 = vpop.f32.mrf.mxu1 }
 0x33c   : > { %v6745_v54 = vadd.f32 %v6602_v41, %v6416_v27  ;;  %6815 = vxpose.xlu0.b32.cont [4/16] (narrow) %v6783_v7, 8 }
 0x33d   : > { %v6604_v15 = vpop.f32.mrf.mxu0  ;;  %v6288_v3 = vpop.f32.mrf.mxu1 }
 0x33e   : > { %v6784_v16 = vadd.f32 %v11721_v31, %v6745_v54  ;;  %v6419_v56 = vadd.f32 %v6288_v3, %v11585_v6 }
 0x33f   : > { %v6607_v36 = vpop.f32.mrf.mxu0  ;;  %v6290_v47 = vpop.f32.mrf.mxu1 }
 0x340   : > { %v6746_v38 = vadd.f32 %v6607_v36, %v6417_v44  ;;  %6816 = vxpose.xlu0.b32.cont [5/16] (narrow) %v6784_v16, 8 }
 0x341   : > { %v6609_v50 = vpop.f32.mrf.mxu0  ;;  %v6293_v18 = vpop.f32.mrf.mxu1 }
 0x342   : > { %v6785_v53 = vadd.f32 %v11721_v31, %v6746_v38  ;;  %v6420_v52 = vadd.f32 %v6293_v18, %v11598_v37 }
 0x343   : > { %v6612_v42 = vpop.f32.mrf.mxu0  ;;  %v6295_v43 = vpop.f32.mrf.mxu1 }
 0x344   : > { %v6747_v63 = vadd.f32 %v6612_v42, %v6418_v58  ;;  %6817 = vxpose.xlu0.b32.cont [6/16] (narrow) %v6785_v53, 8 }
 0x345   : > { %v6614_v2 = vpop.f32.mrf.mxu0  ;;  %v6298_v21 = vpop.f32.mrf.mxu1 }
 0x346   : > { %v6786_v32 = vadd.f32 %v11721_v31, %v6747_v63  ;;  %v6421_v6 = vadd.f32 %v6298_v21, %v11614_v17 }
 0x347   : > { %v6617_v60 = vpop.f32.mrf.mxu0  ;;  %v6300_v45 = vpop.f32.mrf.mxu1 }
 0x348   : > { %v6748_v20 = vadd.f32 %v6617_v60, %v6419_v56  ;;  %6818 = vxpose.xlu0.b32.cont [7/16] (narrow) %v6786_v32, 8 }
 0x349   : > { %v6619_v62 = vpop.f32.mrf.mxu0  ;;  %v6303_v14 = vpop.f32.mrf.mxu1 }
 0x34a   : > { %v6787_v29 = vadd.f32 %v11721_v31, %v6748_v20  ;;  %v6422_v37 = vadd.f32 %v6303_v14, %v11629_v0 }
 0x34b   : > { %v6622_v49 = vpop.f32.mrf.mxu0  ;;  %v6305_v11 = vpop.f32.mrf.mxu1 }
 0x34c   : > { %v6749_v13 = vadd.f32 %v6622_v49, %v6420_v52  ;;  %6819 = vxpose.xlu0.b32.cont [8/16] (narrow) %v6787_v29, 8 }
 0x34d   : > { %v6624_v39 = vpop.f32.mrf.mxu0  ;;  %v6308_v9 = vpop.f32.mrf.mxu1 }
 0x34e   : > { %v6788_v51 = vadd.f32 %v11721_v31, %v6749_v13  ;;  %v6423_v17 = vadd.f32 %v6308_v9, %v11642_v55 }
 0x34f   : > { %v6627_v27 = vpop.f32.mrf.mxu0  ;;  %v6310_v59 = vpop.f32.mrf.mxu1 }
 0x350   : > { %v6750_v30 = vadd.f32 %v6627_v27, %v6421_v6  ;;  %6820 = vxpose.xlu0.b32.cont [9/16] (narrow) %v6788_v51, 8 }
 0x351   : > { %v6629_v7 = vpop.f32.mrf.mxu0  ;;  %v6313_v41 = vpop.f32.mrf.mxu1 }
 0x352   : > { %v6789_v48 = vadd.f32 %v11721_v31, %v6750_v30  ;;  %v6424_v0 = vadd.f32 %v6313_v41, %v11653_v1 }
 0x353   : > { %v6632_v54 = vpop.f32.mrf.mxu0  ;;  %v6315_v44 = vpop.f32.mrf.mxu1 }
 0x354   : > { %v6751_v15 = vadd.f32 %v6632_v54, %v6422_v37  ;;  %6821 = vxpose.xlu0.b32.cont [10/16] (narrow) %v6789_v48, 8 }
 0x355   : > { %v6634_v3 = vpop.f32.mrf.mxu0  ;;  %v6318_v16 = vpop.f32.mrf.mxu1 }
 0x356   : > { %v6790_v36 = vadd.f32 %v11721_v31, %v6751_v15  ;;  %v6425_v55 = vadd.f32 %v6318_v16, %v11661_v22 }
 0x357   : > { %v6637_v47 = vpop.f32.mrf.mxu0  ;;  %v6320_v38 = vpop.f32.mrf.mxu1 }
 0x358   : > { %v6752_v58 = vadd.f32 %v6637_v47, %v6423_v17  ;;  %6822 = vxpose.xlu0.b32.cont [11/16] (narrow) %v6790_v36, 8 }
 0x359   : > { %v6639_v50 = vpop.f32.mrf.mxu0  ;;  %v6323_v18 = vpop.f32.mrf.mxu1 }
 0x35a   : > { %v6791_v53 = vadd.f32 %v11721_v31, %v6752_v58  ;;  %v6426_v1 = vadd.f32 %v6323_v18, %v11665_v4 }
 0x35b   : > { %v6642_v42 = vpop.f32.mrf.mxu0  ;;  %v6325_v43 = vpop.f32.mrf.mxu1 }
 0x35c   : > { %v6753_v63 = vadd.f32 %v6642_v42, %v6424_v0  ;;  %6823 = vxpose.xlu0.b32.cont [12/16] (narrow) %v6791_v53, 8 }
 0x35d   : > { %v6644_v56 = vpop.f32.mrf.mxu0  ;;  %v6328_v2 = vpop.f32.mrf.mxu1 }
 0x35e   : > { %v6792_v21 = vadd.f32 %v11721_v31, %v6753_v63  ;;  %v6427_v22 = vadd.f32 %v6328_v2, %v11669_v25 }
 0x35f   : > { %v6647_v32 = vpop.f32.mrf.mxu0  ;;  %v6330_v60 = vpop.f32.mrf.mxu1 }
 0x360   : > { %v6754_v45 = vadd.f32 %v6647_v32, %v6425_v55  ;;  %6824 = vxpose.xlu0.b32.cont [13/16] (narrow) %v6792_v21, 8 }
 0x361   : > { %v6649_v20 = vpop.f32.mrf.mxu0  ;;  %v6333_v52 = vpop.f32.mrf.mxu1 }
 0x362   : > { %v6793_v62 = vadd.f32 %v11721_v31, %v6754_v45  ;;  %v6428_v4 = vadd.f32 %v6333_v52, %v11672_v46 }
 0x363   : > { %v6652_v14 = vpop.f32.mrf.mxu0  ;;  %v6335_v29 = vpop.f32.mrf.mxu1 }
 0x364   : > { %v6755_v49 = vadd.f32 %v6652_v14, %v6426_v1  ;;  %6825 = vxpose.xlu0.b32.cont [14/16] (narrow) %v6793_v62, 8 }
 0x365   : > { %v6654_v11 = vpop.f32.mrf.mxu0  ;;  %v6338_v13 = vpop.f32.mrf.mxu1 }
 0x366   : > { %v6794_v6 = vadd.f32 %v11721_v31, %v6755_v49  ;;  %v6429_v25 = vadd.f32 %v6338_v13, %v11675_v23 }
 0x367   : > { %v6657_v39 = vpop.f32.mrf.mxu0  ;;  %v6340_v9 = vpop.f32.mrf.mxu1 }
 0x368   : > { %v6756_v51 = vadd.f32 %v6657_v39, %v6427_v22  ;;  %6826 = vxpose.xlu0.b32.cont [15/16] (narrow) %v6794_v6, 8 }
 0x369   : > { %v6659_v27 = vpop.f32.mrf.mxu0  ;;  %v6343_v59 = vpop.f32.mrf.mxu1 }
 0x36a   : > { %v6795_v30 = vadd.f32 %v11721_v31, %v6756_v51  ;;  %v6430_v46 = vadd.f32 %v6343_v59, %v11678_v57 }
 0x36b   : > { %v6662_v37 = vpop.f32.mrf.mxu0  ;;  %v6345_v7 = vpop.f32.mrf.mxu1 }
 0x36c   : > { %v6757_v41 = vadd.f32 %v6662_v37, %v6428_v4  ;;  %6827 = vxpose.xlu0.b32.end [16/16] (narrow) %v6795_v30, 8 }
 0x36d   : > { %v6664_v48 = vpop.f32.mrf.mxu0  ;;  %v6348_v54 = vpop.f32.mrf.mxu1 }
 0x36e   : > { %v6796_v44 = vadd.f32 %v11721_v31, %v6757_v41  ;;  %v6431_v23 = vadd.f32 %v6348_v54, %v11681_v8 }
 0x36f   : > { %v6667_v15 = vpop.f32.mrf.mxu0  ;;  %v6350_v17 = vpop.f32.mrf.mxu1 }
 0x370   : > { %v6758_v3 = vadd.f32 %v6667_v15, %v6429_v25  ;;  %6844 = vxpose.xlu1.b32.start [1/16] (narrow) %v6796_v44, 8 }
 0x371   : > { %v6669_v16 = vpop.f32.mrf.mxu0  ;;  %v6353_v36 = vpop.f32.mrf.mxu1 }
 0x372   : > { %v6797_v47 = vadd.f32 %v11721_v31, %v6758_v3  ;;  %v6432_v57 = vadd.f32 %v6353_v36, %v11684_v34 }
 0x373   : > { %v6672_v38 = vpop.f32.mrf.mxu0  ;;  %v6355_v58 = vpop.f32.mrf.mxu1 }
 0x374   : > { %v6759_v0 = vadd.f32 %v6672_v38, %v6430_v46  ;;  %6845 = vxpose.xlu1.b32.cont [2/16] (narrow) %v6797_v47, 8 }
 0x375   : > { %v6674_v50 = vpop.f32.mrf.mxu0  ;;  %v6358_v18 = vpop.f32.mrf.mxu1 }
 0x376   : > { %v6798_v53 = vadd.f32 %v11721_v31, %v6759_v0  ;;  %v6433_v8 = vadd.f32 %v6358_v18, %v11687_v26 }
 0x377   : > { %v6677_v42 = vpop.f32.mrf.mxu0  ;;  %v6360_v43 = vpop.f32.mrf.mxu1 }
 0x378   : > { %v6760_v63 = vadd.f32 %v6677_v42, %v6431_v23  ;;  %6846 = vxpose.xlu1.b32.cont [3/16] (narrow) %v6798_v53, 8 }
 0x379   : > { %v6679_v55 = vpop.f32.mrf.mxu0  ;;  %v6363_v56 = vpop.f32.mrf.mxu1 }
 0x37a   : > { %v6799_v2 = vadd.f32 %v11721_v31, %v6760_v63  ;;  %v6434_v34 = vadd.f32 %v6363_v56, %v11690_v24 }
 0x37b   : > { %v6682_v21 = vpop.f32.mrf.mxu0  ;;  %v6365_v32 = vpop.f32.mrf.mxu1 }
 0x37c   : > { %v6761_v60 = vadd.f32 %v6682_v21, %v6432_v57  ;;  %6847 = vxpose.xlu1.b32.cont [4/16] (narrow) %v6799_v2, 8 }
 0x37d   : > { %v6684_v45 = vpop.f32.mrf.mxu0  ;;  %v6368_v1 = vpop.f32.mrf.mxu1 }
 0x37e   : > { %v6800_v20 = vadd.f32 %v11721_v31, %v6761_v60  ;;  %v6435_v26 = vadd.f32 %v6368_v1, %v11693_v19 }
 0x37f   : > { %v6687_v52 = vpop.f32.mrf.mxu0  ;;  %v6370_v62 = vpop.f32.mrf.mxu1 }
 0x380   : > { %v6762_v14 = vadd.f32 %v6687_v52, %v6433_v8  ;;  %6848 = vxpose.xlu1.b32.cont [5/16] (narrow) %v6800_v20, 8 }
 0x381   : > { %v6689_v29 = vpop.f32.mrf.mxu0  ;;  %v6373_v49 = vpop.f32.mrf.mxu1 }
 0x382   : > { %v6801_v22 = vadd.f32 %v11721_v31, %v6762_v14  ;;  %v6436_v24 = vadd.f32 %v6373_v49, %v11696_v40 }
 0x383   : > { %v6692_v11 = vpop.f32.mrf.mxu0  ;;  %v6375_v13 = vpop.f32.mrf.mxu1 }
 0x384   : > { %v6763_v6 = vadd.f32 %v6692_v11, %v6434_v34  ;;  %6849 = vxpose.xlu1.b32.cont [6/16] (narrow) %v6801_v22, 8 }
 0x385   : > { %v6694_v39 = vpop.f32.mrf.mxu0  ;;  %v6378_v9 = vpop.f32.mrf.mxu1 }
 0x386   : > { %v6802_v51 = vadd.f32 %v11721_v31, %v6763_v6  ;;  %v6437_v19 = vadd.f32 %v6378_v9, %v11699_v28 }
 0x387   : > { %v6697_v4 = vpop.f32.mrf.mxu0  ;;  %v6380_v27 = vpop.f32.mrf.mxu1 }
 0x388   : > { %v6764_v59 = vadd.f32 %v6697_v4, %v6435_v26  ;;  %6850 = vxpose.xlu1.b32.cont [7/16] (narrow) %v6802_v51, 8 }
 0x389   : > { %v6699_v30 = vpop.f32.mrf.mxu0  ;;  %v6383_v37 = vpop.f32.mrf.mxu1 }
 0x38a   : > { %v6803_v7 = vadd.f32 %v11721_v31, %v6764_v59  ;;  %v6438_v40 = vadd.f32 %v6383_v37, %v11702_v61 }
 0x38b   : > { %v6702_v41 = vpop.f32.mrf.mxu0  ;;  %v6385_v25 = vpop.f32.mrf.mxu1 }
 0x38c   : > { %v6765_v48 = vadd.f32 %v6702_v41, %v6436_v24  ;;  %6851 = vxpose.xlu1.b32.cont [8/16] (narrow) %v6803_v7, 8 }
 0x38d   : > { %v6704_v54 = vpop.f32.mrf.mxu0  ;;  %v6388_v44 = vpop.f32.mrf.mxu1 }
 0x38e   : > { %v6804_v15 = vadd.f32 %v11721_v31, %v6765_v48  ;;  %v6439_v28 = vadd.f32 %v6388_v44, %v11705_v10 }
 0x38f   : > { %v6707_v17 = vpop.f32.mrf.mxu0  ;;  %v6390_v3 = vpop.f32.mrf.mxu1 }
 0x390   : > { %v6766_v46 = vadd.f32 %v6707_v17, %v6437_v19  ;;  %6852 = vxpose.xlu1.b32.cont [9/16] (narrow) %v6804_v15, 8 }
 0x391   : > { %v6709_v16 = vpop.f32.mrf.mxu0  ;;  %v6393_v36 = vpop.f32.mrf.mxu1 }
 0x392   : > { %v6805_v47 = vadd.f32 %v11721_v31, %v6766_v46  ;;  %v6440_v61 = vadd.f32 %v6393_v36, %v11708_v35 }
 0x393   : > { %v6712_v38 = vpop.f32.mrf.mxu0  ;;  %v6395_v58 = vpop.f32.mrf.mxu1 }
 0x394   : > { %v6767_v0 = vadd.f32 %v6712_v38, %v6438_v40  ;;  %6853 = vxpose.xlu1.b32.cont [10/16] (narrow) %v6805_v47, 8 }
 0x395   : > { %v6714_v23 = vpop.f32.mrf.mxu0  ;;  %v6398_v50 = vpop.f32.mrf.mxu1 }
 0x396   : > { %v6806_v18 = vadd.f32 %v11721_v31, %v6767_v0  ;;  %v6441_v10 = vadd.f32 %v6398_v50, %v11711_v33 }
 0x397   : > { %v6717_v53 = vpop.f32.mrf.mxu0  ;;  %v6400_v42 = vpop.f32.mrf.mxu1 }
 0x398   : > { %v6768_v43 = vadd.f32 %v6717_v53, %v6439_v28  ;;  %6854 = vxpose.xlu1.b32.cont [11/16] (narrow) %v6806_v18, 8 }
 0x399   : > { %v6719_v63 = vpop.f32.mrf.mxu0  ;;  %v6403_v57 = vpop.f32.mrf.mxu1 }
 0x39a   : > { %v6807_v55 = vadd.f32 %v11721_v31, %v6768_v43  ;;  %v6442_v35 = vadd.f32 %v6403_v57, %v11713_v12 }
 0x39b   : > { %v6722_v56 = vpop.f32.mrf.mxu0  ;;  %v6405_v2 = vpop.f32.mrf.mxu1 }
 0x39c   : > { %v6769_v21 = vadd.f32 %v6722_v56, %v6440_v61  ;;  %6855 = vxpose.xlu1.b32.cont [12/16] (narrow) %v6807_v55, 8 }
 0x39d   : > { %v6724_v32 = vpop.f32.mrf.mxu0  ;;  %v6408_v60 = vpop.f32.mrf.mxu1 }
 0x39e   : > { %v6808_v8 = vadd.f32 %v11721_v31, %v6769_v21  ;;  %v6443_v29 = vadd.f32 %v6408_v60, %v11715_v5 }
 0x39f   : > { %v6727_v45 = vpop.f32.mrf.mxu0  ;;  %v6410_v1 = vpop.f32.mrf.mxu1 }
 0x3a0   : > { %v6770_v20 = vadd.f32 %v6727_v45, %v6441_v10  ;;  %6856 = vxpose.xlu1.b32.cont [13/16] (narrow) %v6808_v8, 8 }
 0x3a1   : > { %v6729_v52 = vpop.f32.mrf.mxu0 }
 0x3a2   : > { %v6809_v62 = vadd.f32 %v11721_v31, %v6770_v20 }
 0x3a3   : > { %v6732_v14 = vpop.f32.mrf.mxu0 }
 0x3a4   : > { %v6771_v34 = vadd.f32 %v6732_v14, %v6442_v35  ;;  %6857 = vxpose.xlu1.b32.cont [14/16] (narrow) %v6809_v62, 8 }
 0x3a5   : > { %v6734_v33 = vpop.f32.mrf.mxu0 }
 0x3a6   : > { %v6810_v49 = vadd.f32 %v11721_v31, %v6771_v34 }
 0x3a7   : > { %v6737_v22 = vpop.f32.mrf.mxu0 }
 0x3a8   : > { %v6772_v11 = vadd.f32 %v6737_v22, %v6443_v29  ;;  %6858 = vxpose.xlu1.b32.cont [15/16] (narrow) %v6810_v49, 8 }
 0x3a9   : > { %v6739_v13 = vpop.f32.mrf.mxu0 }
 0x3aa   : > { %v6811_v6 = vadd.f32 %v11721_v31, %v6772_v11 }
 0x3ac   : > { %6859 = vxpose.xlu1.b32.end [16/16] (narrow) %v6811_v6, 8  ;;  %v6828_v12 = vpop.trf.xlu0 }
 0x3ec   : > { %v6860_v26 = vpop.trf.xlu1 }
 0x3ed   : > { %v6878_v39 = vcombine.low %v6828_v12, %v6860_v26 }
 0x3ef   : > { %7500 = vst.sshfl [vmem:[%s321_s29] sm:$0x33 pattern:$0x76325410] %v6878_v39 }
 0x3f0 PF: > { %s14_s17 = sadd.s32 1, %s7644_s17   ;;  %s12747_s15 = smov %s7640_s16 }
 0x3f1   : > { %p11_p5 = scmp.ge.s32.totalorder %s14_s17, 4   ;;  %s12748_s16 = smov %s12750_s18 }
 0x3f3   :  { %13 = sbr.rel (!%p11_p5) target bundleno = 2 (0x2), region = 77 }

</bundles_post_ra>
